<compile_context>
chip_gen: v7x
topology: tpu7x:2x2x1
jax: 0.10.0
libtpu: 0.0.40
codegen_flags: <defaults>
</compile_context>

<pallas_src>
import jax
import jax.numpy as jnp
from jax import lax
from jax.experimental import pallas as pl
from jax.experimental.pallas import tpu as pltpu  # noqa: F401


def _mean_conv1x1_kernel(x_ref, w_ref, b_ref, o_ref):
    # x_ref: (N, HW, C_in)  w_ref: (C_out, C_in)  b_ref: (1, C_out)  o_ref: (N, C_out)
    x = x_ref[...]
    n, hw, _ = x.shape

    # Global average pool on the MXU: (N,1,HW) @ (N,HW,C_in) -> (N,1,C_in).
    # The 1/HW scale is baked into the constant row, so no extra VPU scaling
    # pass and no XLU cross-lane reduce.
    pool_vec = jnp.full((n, 1, hw), 1.0 / hw, dtype=x.dtype)
    pooled = jnp.einsum(
        "nqh,nhc->nqc", pool_vec, x,
        preferred_element_type=jnp.float32,
        precision=lax.Precision.HIGHEST,   # MXU is idle here; full f32 accuracy is free
    )[:, 0, :]                             # (N, C_in), f32

    # 1x1 conv == matmul with the weight in its native (C_out, C_in) layout.
    out = jnp.einsum(
        "nc,oc->no", pooled, w_ref[...],
        preferred_element_type=jnp.float32,
        precision=lax.Precision.HIGHEST,
    )                                      # (N, C_out), f32
    o_ref[...] = out + b_ref[...].astype(jnp.float32)


def mean_conv1x1(x_nchw, weight_oc_ic, bias_oc):
    """x_nchw: (N, C_in, H, W); weight_oc_ic: (C_out, C_in); bias_oc: (C_out,).

    Returns (N, C_out, 1, 1) float32, matching
    Conv2d(C_in, C_out, 1)(x.mean((2, 3), keepdim=True)).
    """
    N, C_in, H, W = x_nchw.shape
    C_out = weight_oc_ic.shape[0]
    HW = H * W

    # Channels-last view so C_in sits on the lane axis inside the kernel.
    # (Layout plumbing; in a fused pipeline the producer would emit this layout.)
    x = jnp.transpose(x_nchw.reshape(N, C_in, HW), (0, 2, 1))   # (N, HW, C_in), dtype preserved
    w = weight_oc_ic                                            # (C_out, C_in), lane-dense
    b = bias_oc.reshape(1, C_out)

    out = pl.pallas_call(
        _mean_conv1x1_kernel,
        out_shape=jax.ShapeDtypeStruct((N, C_out), jnp.float32),
        # No grid: whole problem fits comfortably in VMEM; a grid would only
        # add per-step overhead at this size.  (If N ever grows, add a leading
        # "parallel" grid axis over N for v7x's 2 TensorCores.)
        in_specs=[
            pl.BlockSpec((N, HW, C_in), lambda: (0, 0, 0)),
            pl.BlockSpec((C_out, C_in), lambda: (0, 0)),
            pl.BlockSpec((1, C_out), lambda: (0, 0)),
        ],
        out_specs=pl.BlockSpec((N, C_out), lambda: (0, 0)),
    )(x, w, b)

    return out.reshape(N, C_out, 1, 1)


if __name__ == "__main__":
    # Shapes implied by the module: Conv2d(960, 40, 1x1); input spatial 14x14.
    N, C_in, H, W = 2, 960, 14, 14
    C_out = 40

    key = jax.random.PRNGKey(0)
    kx, kw, kb = jax.random.split(key, 3)

    x = jax.random.normal(kx, (N, C_in, H, W), dtype=jnp.float32)
    # Deterministic synthetic parameters (PyTorch default init scale ~ 1/sqrt(fan_in)).
    fan_in = C_in  # kernel_size = 1x1
    bound = 1.0 / jnp.sqrt(jnp.float32(fan_in))
    weight = jax.random.uniform(kw, (C_out, C_in), jnp.float32, -bound, bound)
    bias = jax.random.uniform(kb, (C_out,), jnp.float32, -bound, bound)

    out = mean_conv1x1(x, weight, bias)
    out = jax.block_until_ready(out)

    # Pure-JAX reference check (mean over H,W then 1x1 conv).
    ref = jnp.einsum("nc,oc->no", x.mean(axis=(2, 3)), weight,
                     precision=lax.Precision.HIGHEST) + bias
    ref = ref.reshape(N, C_out, 1, 1)
    assert out.shape == (N, C_out, 1, 1)
    assert jnp.allclose(out, ref, atol=5e-4, rtol=5e-4)

    print("KERNEL_OK")
</pallas_src>

<mosaic_0001>
module attributes {stable_mosaic.version = 11 : i64} {
  func.func @_mean_conv1x1_kernel(%arg0: memref<2x196x960xf32, #tpu.memory_space<vmem>>, %arg1: memref<40x960xf32, #tpu.memory_space<vmem>>, %arg2: memref<1x40xf32, #tpu.memory_space<vmem>>, %arg3: memref<2x40xf32, #tpu.memory_space<vmem>>) attributes {dimension_semantics = [], scalar_prefetch = 0 : i64, scratch_operands = 0 : i64, tpu.core_type = #tpu.core_type<tc>} {
    %c0 = arith.constant 0 : index
    %c0_0 = arith.constant 0 : index
    %c0_1 = arith.constant 0 : index
    %0 = vector.load %arg0[%c0, %c0_0, %c0_1] : memref<2x196x960xf32, #tpu.memory_space<vmem>>, vector<2x196x960xf32>
    %cst = arith.constant 0.00510204071 : f32
    %1 = vector.broadcast %cst : f32 to vector<2x1x196xf32>
    "tpu.trace_start"() <{level = 10 : i32, message = "nqh,nhc->nqc"}> : () -> ()
    %cst_2 = arith.constant dense<0.000000e+00> : vector<2x1x960xf32>
    %2 = tpu.matmul %1, %0, %cst_2 {dimension_numbers = #tpu.dot_dimension_numbers<[2], [1], [1], [2], [0, 0, 0, 1, 1, 2], [0], [0]>, precision = #tpu.contract_precision<fp32>} : vector<2x1x196xf32>, vector<2x196x960xf32>, vector<2x1x960xf32> -> vector<2x1x960xf32>
    "tpu.trace_stop"() : () -> ()
    %3 = vector.shape_cast %2 : vector<2x1x960xf32> to vector<2x960xf32>
    %c0_3 = arith.constant 0 : index
    %c0_4 = arith.constant 0 : index
    %4 = vector.load %arg1[%c0_3, %c0_4] : memref<40x960xf32, #tpu.memory_space<vmem>>, vector<40x960xf32>
    "tpu.trace_start"() <{level = 10 : i32, message = "nc,oc->no"}> : () -> ()
    %cst_5 = arith.constant dense<0.000000e+00> : vector<2x40xf32>
    %5 = tpu.matmul %3, %4, %cst_5 {dimension_numbers = #tpu.dot_dimension_numbers<[1], [1], [0], [0], [0, 0, 1, 0], [], []>, precision = #tpu.contract_precision<fp32>} : vector<2x960xf32>, vector<40x960xf32>, vector<2x40xf32> -> vector<2x40xf32>
    "tpu.trace_stop"() : () -> ()
    %c0_6 = arith.constant 0 : index
    %c0_7 = arith.constant 0 : index
    %6 = vector.load %arg2[%c0_6, %c0_7] : memref<1x40xf32, #tpu.memory_space<vmem>>, vector<1x40xf32>
    %7 = vector.broadcast %6 : vector<1x40xf32> to vector<2x40xf32>
    %8 = arith.addf %5, %7 : vector<2x40xf32>
    %c0_8 = arith.constant 0 : index
    %c0_9 = arith.constant 0 : index
    %9 = vector.load %arg3[%c0_8, %c0_9] : memref<2x40xf32, #tpu.memory_space<vmem>>, vector<2x40xf32>
    tpu.vector_store %arg3[%c0_8, %c0_9], %8 {strides = array<i32>} : memref<2x40xf32, #tpu.memory_space<vmem>>, vector<2x40xf32>,
    return
  }
}

</mosaic_0001>

<bundles_post_ra>
// kernel: tpu_custom_call.1
= control target key start
LH: loop header
LB: loop body
LE: loop exit
PB: predicated region body
PF: predicated region fallthrough
CT: control target
= control target key end

     0   :  { %vm419_vm0 = vcmask 1043456   ;;  %vm415_vm1 = vcmask 556032   ;;  %s23438_s0 = inlined_call_operand.vmem [shape: f32[2,196,960], index: 0, kind: input, shape index: {}]   ;;  %s23439_s1 = inlined_call_operand.vmem [shape: f32[40,960], index: 1, kind: input, shape index: {}]   ;;  %s23440_s2 = inlined_call_operand.vmem [shape: f32[1,40], index: 2, kind: input, shape index: {}]   ;;  %s23441_s3 = inlined_call_operand.hbm [shape: f32[2,40], index: 3, kind: output, shape index: {}]  }
   0x1   :  { %v16_v0 = vld [vmem:[%s23438_s0 + $0x8] sm:$0xff]  ;;  %v15_v2 = vld [vmem:[%s23438_s0] sm:$0xff] }
   0x2   :  { %v24_v1 = vld [vmem:[%s23438_s0 + $0x48] sm:$0xff]  ;;  %v444_v3 = vand.u32 4294901760, %v16_v0  ;;  %v23_v5 = vld [vmem:[%s23438_s0 + $0x40] sm:$0xff]  ;;  %v446_v6 = vand.u32 4294901760, %v15_v2 }
   0x3   :  { %v448_v4 = vand.u32 4294901760, %v24_v1  ;;  %v32_v7 = vld [vmem:[%s23438_s0 + $0x88] sm:$0xff]  ;;  %v450_v9 = vand.u32 4294901760, %v23_v5  ;;  %v31_v12 = vld [vmem:[%s23438_s0 + $0x80] sm:$0xff] }
   0x4   :  { %v40_v8 = vld [vmem:[%s23438_s0 + $0xc8] sm:$0xff]  ;;  %v452_v10 = vand.u32 4294901760, %v32_v7  ;;  %v39_v13 = vld [vmem:[%s23438_s0 + $0xc0] sm:$0xff]  ;;  %v14314_v16 = vsub.f32 %v16_v0, %v444_v3  ;;  %v14318_v18 = vsub.f32 %v15_v2, %v446_v6  ;;  %v454_v29 = vand.u32 4294901760, %v31_v12 }
   0x5   :  { %v456_v11 = vand.u32 4294901760, %v40_v8  ;;  %v48_v14 = vld [vmem:[%s23438_s0 + $0x108] sm:$0xff]  ;;  %v14312_v15 = vpack.c.bf16 %v448_v4, %v444_v3  ;;  %v14316_v17 = vsub.f32 %v24_v1, %v448_v4  ;;  %v47_v20 = vld [vmem:[%s23438_s0 + $0x100] sm:$0xff]  ;;  %v14329_v22 = vpack.c.bf16 %v450_v9, %v446_v6 }
   0x6   :  { %24627 = vst [vmem:[#allocation6_spill] sm:$0xff] %v14314_v16  ;;  %24629 = vst [vmem:[#allocation8_spill] sm:$0xff] %v14318_v18  ;;  %v56_v19 = vld [vmem:[%s23438_s0 + $0x148] sm:$0xff]  ;;  %v55_v21 = vld [vmem:[%s23438_s0 + $0x140] sm:$0xff]  ;;  %v14331_v23 = vsub.f32 %v23_v5, %v450_v9  ;;  %v14335_v25 = vsub.f32 %v32_v7, %v452_v10  ;;  %v458_v30 = vand.u32 4294901760, %v39_v13  ;;  %v460_v31 = vand.u32 4294901760, %v48_v14 }
   0x7   :  { %24626 = vst [vmem:[#allocation5_spill] sm:$0xff] %v14312_v15  ;;  %24628 = vst [vmem:[#allocation7_spill] sm:$0xff] %v14316_v17  ;;  %v14333_v24 = vpack.c.bf16 %v456_v11, %v452_v10  ;;  %v64_v26 = vld [vmem:[%s23438_s0 + $0x188] sm:$0xff]  ;;  %11607 = vmatprep.subr.bf16.mxu1 %v14312_v15  ;;  %11847 = vmatprep.subr.bf16.mxu0 %v14312_v15  ;;  %v14345_v28 = vsub.f32 %v40_v8, %v456_v11  ;;  %v464_v32 = vand.u32 4294901760, %v56_v19  ;;  %v63_v36 = vld [vmem:[%s23438_s0 + $0x180] sm:$0xff] }
   0x8   :  { %24630 = vst [vmem:[#allocation9_spill] sm:$0xff] %v14329_v22  ;;  %24631 = vst [vmem:[#allocation10_spill] sm:$0xff] %v14331_v23  ;;  %v72_v27 = vld [vmem:[%s23438_s0 + $0x1c8] sm:$0xff]  ;;  %11609 = vmatpush1.bf16.msra.mxu1 %v14329_v22  ;;  %11849 = vmatpush1.bf16.msra.mxu0 %v14329_v22  ;;  %v462_v33 = vand.u32 4294901760, %v47_v20  ;;  %v466_v34 = vand.u32 4294901760, %v55_v21  ;;  %v468_v35 = vand.u32 4294901760, %v64_v26  ;;  %v14354_v37 = vpack.c.bf16 %v458_v30, %v454_v29 }
   0x9   :  { %24632 = vst [vmem:[#allocation11_spill] sm:$0xff] %v14333_v24  ;;  %24633 = vst [vmem:[#allocation12_spill] sm:$0xff] %v14335_v25  ;;  %11611 = vmatprep.subr.bf16.mxu1 %v14333_v24  ;;  %11851 = vmatprep.subr.bf16.mxu0 %v14333_v24  ;;  %v14356_v38 = vsub.f32 %v31_v12, %v454_v29  ;;  %v14358_v39 = vsub.f32 %v39_v13, %v458_v30  ;;  %v472_v40 = vand.u32 4294901760, %v72_v27  ;;  %v71_v41 = vld [vmem:[%s23438_s0 + $0x1c0] sm:$0xff]  ;;  %v80_v42 = vld [vmem:[%s23438_s0 + $0x208] sm:$0xff] }
   0xa   :  { %24634 = vst [vmem:[#allocation13_spill] sm:$0xff] %v14345_v28  ;;  %24635 = vst [vmem:[#allocation14_spill] sm:$0xff] %v14354_v37  ;;  %v88_v43 = vld [vmem:[%s23438_s0 + $0x248] sm:$0xff]  ;;  %v14369_v44 = vpack.c.bf16 %v464_v32, %v460_v31  ;;  %v14371_v45 = vsub.f32 %v48_v14, %v460_v31  ;;  %v14373_v46 = vsub.f32 %v56_v19, %v464_v32  ;;  %v79_v48 = vld [vmem:[%s23438_s0 + $0x200] sm:$0xff]  ;;  %v470_v56 = vand.u32 4294901760, %v63_v36 }
   0xb   :  { %24636 = vst [vmem:[#allocation15_spill] sm:$0xff] %v14356_v38  ;;  %24637 = vst [vmem:[#allocation16_spill] sm:$0xff] %v14358_v39  ;;  %v14375_v47 = vpack.c.bf16 %v466_v34, %v462_v33  ;;  %v87_v49 = vld [vmem:[%s23438_s0 + $0x240] sm:$0xff]  ;;  %v96_v50 = vld [vmem:[%s23438_s0 + $0x288] sm:$0xff]  ;;  %v14386_v51 = vsub.f32 %v47_v20, %v462_v33  ;;  %v14388_v52 = vsub.f32 %v55_v21, %v466_v34  ;;  %v474_v57 = vand.u32 4294901760, %v71_v41 }
   0xc   :  { %24638 = vst [vmem:[#allocation17_spill] sm:$0xff] %v14369_v44  ;;  %24639 = vst [vmem:[#allocation18_spill] sm:$0xff] %v14371_v45  ;;  %v14390_v53 = vpack.c.bf16 %v472_v40, %v468_v35  ;;  %v14392_v54 = vsub.f32 %v64_v26, %v468_v35  ;;  %11613 = vmatpush1.bf16.msra.mxu1 %v14354_v37  ;;  %11853 = vmatpush1.bf16.msra.mxu0 %v14354_v37  ;;  %v476_v58 = vand.u32 4294901760, %v80_v42  ;;  %v104_v59 = vld [vmem:[%s23438_s0 + $0x2c8] sm:$0xff]  ;;  %v95_v0 = vld [vmem:[%s23438_s0 + $0x280] sm:$0xff] }
   0xd   :  { %24640 = vst [vmem:[#allocation19_spill] sm:$0xff] %v14373_v46  ;;  %24641 = vst [vmem:[#allocation20_spill] sm:$0xff] %v14375_v47  ;;  %v14396_v55 = vsub.f32 %v72_v27, %v472_v40  ;;  %11615 = vmatprep.subr.bf16.mxu1 %v14369_v44  ;;  %11855 = vmatprep.subr.bf16.mxu0 %v14369_v44  ;;  %v480_v60 = vand.u32 4294901760, %v88_v43  ;;  %v478_v61 = vand.u32 4294901760, %v79_v48  ;;  %v482_v62 = vand.u32 4294901760, %v87_v49  ;;  %v103_v1 = vld [vmem:[%s23438_s0 + $0x2c0] sm:$0xff] }
   0xe   :  { %24642 = vst [vmem:[#allocation21_spill] sm:$0xff] %v14386_v51  ;;  %24643 = vst [vmem:[#allocation22_spill] sm:$0xff] %v14388_v52  ;;  %v484_v63 = vand.u32 4294901760, %v96_v50  ;;  %v14409_v2 = vpack.c.bf16 %v474_v57, %v470_v56  ;;  %v14411_v3 = vsub.f32 %v63_v36, %v470_v56  ;;  %v14413_v4 = vsub.f32 %v71_v41, %v474_v57  ;;  %v112_v6 = vld [vmem:[%s23438_s0 + $0x308] sm:$0xff]  ;;  %v111_v8 = vld [vmem:[%s23438_s0 + $0x300] sm:$0xff] }
   0xf   :  { %24644 = vst [vmem:[#allocation23_spill] sm:$0xff] %v14390_v53  ;;  %24645 = vst [vmem:[#allocation24_spill] sm:$0xff] %v14392_v54  ;;  %v14415_v5 = vsub.f32 %v80_v42, %v476_v58  ;;  %v120_v7 = vld [vmem:[%s23438_s0 + $0x348] sm:$0xff]  ;;  %v14426_v9 = vpack.c.bf16 %v480_v60, %v476_v58  ;;  %v14428_v10 = vsub.f32 %v88_v43, %v480_v60  ;;  %v119_v13 = vld [vmem:[%s23438_s0 + $0x340] sm:$0xff]  ;;  %v488_v19 = vand.u32 4294901760, %v104_v59 }
  0x10   :  { %24646 = vst [vmem:[#allocation25_spill] sm:$0xff] %v14396_v55  ;;  %24647 = vst [vmem:[#allocation26_spill] sm:$0xff] %v14409_v2  ;;  %v14430_v11 = vpack.c.bf16 %v482_v62, %v478_v61  ;;  %v14432_v12 = vsub.f32 %v79_v48, %v478_v61  ;;  %11617 = vmatpush1.bf16.msra.mxu1 %v14375_v47  ;;  %11857 = vmatpush1.bf16.msra.mxu0 %v14375_v47  ;;  %v486_v21 = vand.u32 4294901760, %v95_v0  ;;  %v128_v31 = vld [vmem:[%s23438_s0 + $0x388] sm:$0xff]  ;;  %v127_v40 = vld [vmem:[%s23438_s0 + $0x380] sm:$0xff] }
  0x11   :  { %24648 = vst [vmem:[#allocation27_spill] sm:$0xff] %v14411_v3  ;;  %24649 = vst [vmem:[#allocation28_spill] sm:$0xff] %v14413_v4  ;;  %v14439_v14 = vsub.f32 %v87_v49, %v482_v62  ;;  %v14441_v20 = vsub.f32 %v96_v50, %v484_v63  ;;  %11619 = vmatprep.subr.bf16.mxu1 %v14390_v53  ;;  %11859 = vmatprep.subr.bf16.mxu0 %v14390_v53  ;;  %v490_v26 = vand.u32 4294901760, %v103_v1  ;;  %v136_v36 = vld [vmem:[%s23438_s0 + $0x3c8] sm:$0xff]  ;;  %v135_v41 = vld [vmem:[%s23438_s0 + $0x3c0] sm:$0xff] }
  0x12   :  { %24650 = vst [vmem:[#allocation29_spill] sm:$0xff] %v14415_v5  ;;  %24651 = vst [vmem:[#allocation30_spill] sm:$0xff] %v14426_v9  ;;  %v492_v27 = vand.u32 4294901760, %v112_v6  ;;  %v496_v29 = vand.u32 4294901760, %v120_v7  ;;  %v494_v30 = vand.u32 4294901760, %v111_v8  ;;  %v14448_v32 = vpack.c.bf16 %v488_v19, %v484_v63  ;;  %v144_v50 = vld [vmem:[%s23438_s0 + $0x408] sm:$0xff] }
  0x13   :  { %24652 = vst [vmem:[#allocation31_spill] sm:$0xff] %v14428_v10  ;;  %24653 = vst [vmem:[#allocation32_spill] sm:$0xff] %v14430_v11  ;;  %v14450_v33 = vsub.f32 %v104_v59, %v488_v19  ;;  %v14452_v34 = vsub.f32 %v95_v0, %v486_v21  ;;  %v498_v35 = vand.u32 4294901760, %v119_v13  ;;  %v14463_v42 = vpack.c.bf16 %v490_v26, %v486_v21  ;;  %v152_v56 = vld [vmem:[%s23438_s0 + $0x448] sm:$0xff]  ;;  %v143_v57 = vld [vmem:[%s23438_s0 + $0x400] sm:$0xff] }
  0x14   :  { %24654 = vst [vmem:[#allocation33_spill] sm:$0xff] %v14432_v12  ;;  %24655 = vst [vmem:[#allocation34_spill] sm:$0xff] %v14439_v14  ;;  %v14465_v43 = vsub.f32 %v103_v1, %v490_v26  ;;  %v14467_v48 = vpack.c.bf16 %v496_v29, %v492_v27  ;;  %v14469_v49 = vsub.f32 %v112_v6, %v492_v27  ;;  %11621 = vmatpush1.bf16.msra.mxu1 %v14409_v2  ;;  %v151_v6 = vld [vmem:[%s23438_s0 + $0x440] sm:$0xff]  ;;  %v160_v26 = vld [vmem:[%s23438_s0 + $0x488] sm:$0xff] }
  0x15   :  { %24656 = vst [vmem:[#allocation35_spill] sm:$0xff] %v14441_v20  ;;  %24657 = vst [vmem:[#allocation36_spill] sm:$0xff] %v14448_v32  ;;  %11861 = vmatpush1.bf16.msra.mxu0 %v14409_v2  ;;  %v14482_v58 = vsub.f32 %v120_v7, %v496_v29  ;;  %v14484_v59 = vpack.c.bf16 %v498_v35, %v494_v30  ;;  %v14486_v60 = vsub.f32 %v111_v8, %v494_v30  ;;  %v200_v37 = vld [vmem:[%s23438_s0 + $0x5c8] sm:$0xff]  ;;  %v191_v24 = vld [vmem:[%s23438_s0 + $0x580] sm:$0xff] }
  0x16   :  { %24658 = vst [vmem:[#allocation37_spill] sm:$0xff] %v14450_v33  ;;  %24659 = vst [vmem:[#allocation38_spill] sm:$0xff] %v14452_v34  ;;  %v500_v61 = vand.u32 4294901760, %v128_v31  ;;  %11623 = vmatprep.subr.bf16.mxu1 %v14426_v9  ;;  %11863 = vmatprep.subr.bf16.mxu0 %v14426_v9  ;;  %v14490_v62 = vsub.f32 %v119_v13, %v498_v35  ;;  %v504_v63 = vand.u32 4294901760, %v136_v36  ;;  %v502_v0 = vand.u32 4294901760, %v127_v40  ;;  %v168_v13 = vld [vmem:[%s23438_s0 + $0x4c8] sm:$0xff] }
  0x17   :  { %24660 = vst [vmem:[#allocation39_spill] sm:$0xff] %v14463_v42  ;;  %24661 = vst [vmem:[#allocation40_spill] sm:$0xff] %v14465_v43  ;;  %v506_v1 = vand.u32 4294901760, %v135_v41  ;;  %v508_v19 = vand.u32 4294901760, %v144_v50  ;;  %v512_v21 = vand.u32 4294901760, %v152_v56  ;;  %v510_v8 = vand.u32 4294901760, %v143_v57 }
  0x18   :  { %24662 = vst [vmem:[#allocation41_spill] sm:$0xff] %v14467_v48  ;;  %24663 = vst [vmem:[#allocation42_spill] sm:$0xff] %v14469_v49  ;;  %v14495_v7 = vsub.f32 %v128_v31, %v500_v61  ;;  %v14503_v27 = vpack.c.bf16 %v504_v63, %v500_v61  ;;  %v14505_v29 = vsub.f32 %v136_v36, %v504_v63  ;;  %v159_v35 = vld [vmem:[%s23438_s0 + $0x480] sm:$0xff]  ;;  %11625 = vmatpush1.bf16.msra.mxu1 %v14430_v11 }
  0x19   :  { %24664 = vst [vmem:[#allocation43_spill] sm:$0xff] %v14482_v58  ;;  %24665 = vst [vmem:[#allocation44_spill] sm:$0xff] %v14484_v59  ;;  %v14507_v30 = vpack.c.bf16 %v506_v1, %v502_v0  ;;  %v14509_v31 = vsub.f32 %v127_v40, %v502_v0  ;;  %v167_v9 = vld [vmem:[%s23438_s0 + $0x4c0] sm:$0xff]  ;;  %11865 = vmatpush1.bf16.msra.mxu0 %v14430_v11  ;;  %v14519_v61 = vsub.f32 %v135_v41, %v506_v1  ;;  %v176_v0 = vld [vmem:[%s23438_s0 + $0x508] sm:$0xff] }
  0x1a   :  { %24666 = vst [vmem:[#allocation45_spill] sm:$0xff] %v14486_v60  ;;  %24667 = vst [vmem:[#allocation46_spill] sm:$0xff] %v14490_v62  ;;  %v14521_v36 = vpack.c.bf16 %v512_v21, %v508_v19  ;;  %v14523_v63 = vsub.f32 %v144_v50, %v508_v19  ;;  %v514_v40 = vand.u32 4294901760, %v151_v6  ;;  %11627 = vmatprep.subr.bf16.mxu1 %v14448_v32  ;;  %11867 = vmatprep.subr.bf16.mxu0 %v14448_v32  ;;  %v184_v50 = vld [vmem:[%s23438_s0 + $0x548] sm:$0xff]  ;;  %v175_v32 = vld [vmem:[%s23438_s0 + $0x500] sm:$0xff] }
  0x1b   :  { %24668 = vst [vmem:[#allocation47_spill] sm:$0xff] %v14495_v7  ;;  %24669 = vst [vmem:[#allocation48_spill] sm:$0xff] %v14503_v27  ;;  %v14530_v2 = vsub.f32 %v152_v56, %v512_v21  ;;  %v14532_v53 = vsub.f32 %v143_v57, %v510_v8  ;;  %v516_v11 = vand.u32 4294901760, %v160_v26  ;;  %v520_v41 = vand.u32 4294901760, %v168_v13  ;;  %v183_v56 = vld [vmem:[%s23438_s0 + $0x540] sm:$0xff]  ;;  %v192_v57 = vld [vmem:[%s23438_s0 + $0x588] sm:$0xff] }
  0x1c   :  { %24670 = vst [vmem:[#allocation49_spill] sm:$0xff] %v14505_v29  ;;  %24671 = vst [vmem:[#allocation50_spill] sm:$0xff] %v14507_v30  ;;  %v14537_v1 = vpack.c.bf16 %v514_v40, %v510_v8  ;;  %v14539_v19 = vsub.f32 %v151_v6, %v514_v40  ;;  %v518_v47 = vand.u32 4294901760, %v159_v35  ;;  %v522_v44 = vand.u32 4294901760, %v167_v9  ;;  %11629 = vmatpush1.bf16.msra.mxu1 %v14463_v42 }
  0x1d   :  { %24672 = vst [vmem:[#allocation51_spill] sm:$0xff] %v14509_v31  ;;  %24673 = vst [vmem:[#allocation52_spill] sm:$0xff] %v14519_v61  ;;  %v14550_v21 = vpack.c.bf16 %v520_v41, %v516_v11  ;;  %v14552_v8 = vsub.f32 %v160_v26, %v516_v11  ;;  %v14554_v6 = vsub.f32 %v168_v13, %v520_v41  ;;  %v524_v40 = vand.u32 4294901760, %v176_v0 }
  0x1e   :  { %24674 = vst [vmem:[#allocation53_spill] sm:$0xff] %v14521_v36  ;;  %24675 = vst [vmem:[#allocation54_spill] sm:$0xff] %v14523_v63  ;;  %11869 = vmatpush1.bf16.msra.mxu0 %v14463_v42  ;;  %v14564_v22 = vpack.c.bf16 %v522_v44, %v518_v47  ;;  %v14566_v15 = vsub.f32 %v159_v35, %v518_v47  ;;  %v14568_v11 = vsub.f32 %v167_v9, %v522_v44  ;;  %v199_v42 = vld [vmem:[%s23438_s0 + $0x5c0] sm:$0xff]  ;;  %v208_v35 = vld [vmem:[%s23438_s0 + $0x608] sm:$0xf] }
  0x1f   :  { %24676 = vst [vmem:[#allocation55_spill] sm:$0xff] %v14530_v2  ;;  %24677 = vst [vmem:[#allocation56_spill] sm:$0xff] %v14532_v53  ;;  %v528_v26 = vand.u32 4294901760, %v184_v50  ;;  %11631 = vmatprep.subr.bf16.mxu1 %v14467_v48  ;;  %11871 = vmatprep.subr.bf16.mxu0 %v14467_v48  ;;  %v14572_v13 = vsub.f32 %v176_v0, %v524_v40  ;;  %v526_v41 = vand.u32 4294901760, %v175_v32  ;;  %v536_v44 = vand.u32 4294901760, %v200_v37 }
  0x20   :  { %24678 = vst [vmem:[#allocation57_spill] sm:$0xff] %v14537_v1  ;;  %24679 = vst [vmem:[#allocation58_spill] sm:$0xff] %v14539_v19  ;;  %v534_v9 = vand.u32 4294901760, %v191_v24  ;;  %v207_v0 = vld [vmem:[%s23438_s0 + $0x600] sm:$0xf]  ;;  %11633 = vmatpush1.bf16.msra.mxu1 %v14484_v59 }
  0x21   :  { %24680 = vst [vmem:[#allocation59_spill] sm:$0xff] %v14550_v21  ;;  %24681 = vst [vmem:[#allocation60_spill] sm:$0xff] %v14552_v8  ;;  %v532_v8 = vand.u32 4294901760, %v192_v57  ;;  %v14577_v19 = vpack.c.bf16 %v528_v26, %v524_v40  ;;  %v14579_v47 = vsub.f32 %v184_v50, %v528_v26  ;;  %v14599_v26 = vsub.f32 %v200_v37, %v536_v44 }
  0x22   :  { %24682 = vst [vmem:[#allocation61_spill] sm:$0xff] %v14554_v6  ;;  %24683 = vst [vmem:[#allocation62_spill] sm:$0xff] %v14564_v22  ;;  %v530_v6 = vand.u32 4294901760, %v183_v56  ;;  %11873 = vmatpush1.bf16.msra.mxu0 %v14484_v59  ;;  %11635 = vmatprep.subr.bf16.mxu1 %v14503_v27 }
  0x23   :  { %24684 = vst [vmem:[#allocation63_spill] sm:$0xff] %v14566_v15  ;;  %24685 = vst [vmem:[#allocation64_spill] sm:$0xff] %v14568_v11  ;;  %v14593_v40 = vsub.f32 %v192_v57, %v532_v8  ;;  %v14597_v50 = vpack.c.bf16 %v536_v44, %v532_v8  ;;  %v14601_v15 = vsub.f32 %v191_v24, %v534_v9  ;;  %11875 = vmatprep.subr.bf16.mxu0 %v14503_v27  ;;  %v14259_v8 = vmov 0   ;;  %v28_v24 = vld [vmem:[%s23438_s0 + $0x68] sm:$0xff] }
  0x24   :  { %24686 = vst [vmem:[#allocation65_spill] sm:$0xff] %v14572_v13  ;;  %24687 = vst [vmem:[#allocation66_spill] sm:$0xff] %v14577_v19  ;;  %v14587_v48 = vpack.c.bf16 %v530_v6, %v526_v41  ;;  %v14589_v13 = vsub.f32 %v175_v32, %v526_v41  ;;  %v14591_v11 = vsub.f32 %v183_v56, %v530_v6  ;;  %v20_v32 = vld [vmem:[%s23438_s0 + $0x28] sm:$0xff]  ;;  %v14609_v56 = vsel %vm419_vm0, %v208_v35, 0 }
  0x25   :  { %24688 = vst [vmem:[#allocation67_spill] sm:$0xff] %v14579_v47  ;;  %24692 = vst [vmem:[#allocation71_spill] sm:$0xff] %v14593_v40  ;;  %v538_v47 = vand.u32 4294901760, %v199_v42  ;;  %v421_v57 = vsel %vm419_vm0, %v207_v0, 0  ;;  %v417_v37 = vsel %vm415_vm1, 0.0051020407, %v14259_v8  ;;  %11637 = vmatpush1.bf16.msra.mxu1 %v14507_v30 }
  0x26   :  { %24689 = vst [vmem:[#allocation68_spill] sm:$0xff] %v14587_v48  ;;  %24690 = vst [vmem:[#allocation69_spill] sm:$0xff] %v14589_v13  ;;  %v23466_v6 = vand.u32 4294901760, %v14314_v16  ;;  %v14622_v27 = vand.u32 4294901760, %v14609_v56  ;;  %v14624_v35 = vand.u32 4294901760, %v421_v57  ;;  %v14626_v59 = vand.u32 4294901760, %v417_v37  ;;  %11877 = vmatpush1.bf16.msra.mxu0 %v14507_v30  ;;  %11639 = vmatprep.subr.bf16.mxu1 %v14521_v36 }
  0x27   :  { %24691 = vst [vmem:[#allocation70_spill] sm:$0xff] %v14591_v11  ;;  %24693 = vst [vmem:[#allocation72_spill] sm:$0xff] %v14597_v50  ;;  %v14617_v41 = vpack.c.bf16 %v538_v47, %v534_v9  ;;  %v14619_v44 = vsub.f32 %v199_v42, %v538_v47  ;;  %v2626_v47 = vand.u32 4294901760, %v28_v24  ;;  %11879 = vmatprep.subr.bf16.mxu0 %v14521_v36  ;;  %v24704_v30 = vand.u32 4294901760, %v14316_v17  ;;  %v27_v9 = vld [vmem:[%s23438_s0 + $0x60] sm:$0xff] }
  0x28   :  { %24694 = vst [vmem:[#allocation73_spill] sm:$0xff] %v14599_v26  ;;  %24695 = vst [vmem:[#allocation74_spill] sm:$0xff] %v14601_v15  ;;  %v573_v0 = vsub.f32 %v14314_v16, %v23466_v6  ;;  %v2622_v15 = vand.u32 4294901760, %v20_v32  ;;  %v14635_v42 = vsub.f32 %v421_v57, %v14624_v35  ;;  %v14644_v6 = vsub.f32 %v417_v37, %v14626_v59 }
  0x29   :  { %24696 = vst [vmem:[#allocation75_spill] sm:$0xff] %v14609_v56  ;;  %24697 = vst [vmem:[#allocation76_spill] sm:$0xff] %v14617_v41  ;;  %v19_v56 = vld [vmem:[%s23438_s0 + $0x20] sm:$0xff]  ;;  %v585_v57 = vsub.f32 %v14316_v17, %v24704_v30 }
  0x2a   :  { %24698 = vst [vmem:[#allocation77_spill] sm:$0xff] %v14619_v44  ;;  %24699 = vst [vmem:[#allocation78_spill] sm:$0xff] %v14622_v27  ;;  %v574_v8 = vand.u32 4294901760, %v573_v0  ;;  %v14649_v16 = vsub.f32 %v20_v32, %v2622_v15 }
  0x2b   :  { %24700 = vst [vmem:[#allocation79_spill] sm:$0xff] %v14624_v35  ;;  %24701 = vst [vmem:[#allocation80_spill] sm:$0xff] %v14626_v59 }
  0x2c   :  { %24702 = vst [vmem:[#allocation81_spill] sm:$0xff] %v14635_v42  ;;  %24703 = vst [vmem:[#allocation82_spill] sm:$0xff] %v14644_v6 }
  0x2d   :  { %24705 = vst [vmem:[#allocation83_spill] sm:$0xff] %v14649_v16 }
  0x2e   :  { %8 = vsyncpa [#allocation3], 0  ;;  %1526 = vmatprep.mubr.f32.mxu0 %v14626_v59  ;;  %v14655_v42 = vpack.c.bf16 %v2626_v47, %v2622_v15  ;;  %v14657_v36 = vsub.f32 %v28_v24, %v2626_v47  ;;  %v24708_v37 = vand.u32 4294901760, %v14318_v18  ;;  %v23477_v44 = vand.u32 4294901760, %v14331_v23  ;;  %11641 = vmatpush1.bf16.msra.mxu1 %v14537_v1  ;;  %s14264_s26 = smov [#allocation2]  }
  0x2f   :  { %v14664_v30 = vand.u32 4294901760, %v14644_v6  ;;  %v586_v32 = vand.u32 4294901760, %v585_v57  ;;  %v2624_v16 = vand.u32 4294901760, %v19_v56  ;;  %11881 = vmatpush1.bf16.msra.mxu0 %v14537_v1  ;;  %v2628_v24 = vand.u32 4294901760, %v27_v9  ;;  %v44_v57 = vld [vmem:[%s23438_s0 + $0xe8] sm:$0xff]  ;;  %11643 = vmatprep.subr.bf16.mxu1 %v14550_v21  ;;  %s11597_s27 = sshll.u32 %s14264_s26, 4  ;;  %s11598_s27 = int_to_ptr.vmem [resolvable:$true] %s11597_s27 }
  0x30   :  { %24706 = vst [vmem:[#allocation84_spill] sm:$0xff] %v14655_v42  ;;  %24707 = vst [vmem:[#allocation85_spill] sm:$0xff] %v14657_v36  ;;  %v579_v0 = vsub.f32 %v14318_v18, %v24708_v37  ;;  %v591_v15 = vsub.f32 %v14331_v23, %v23477_v44  ;;  %v36_v37 = vld [vmem:[%s23438_s0 + $0xa8] sm:$0xff]  ;;  %11883 = vmatprep.subr.bf16.mxu0 %v14550_v21  ;;  %v23486_v47 = vand.u32 4294901760, %v14345_v28  ;;  %v24713_v26 = vand.u32 4294901760, %v14335_v25  ;;  %s14235_s28 = scalar_lea.vmem %s11598_s27, 32  ;;  %p14240_p1 = scmp.lt.s32.totalorder %s11598_s27, %s11598_s27 }
  0x31   :  { %24709 = vst [vmem:[#allocation86_spill] sm:$0xff] %v14664_v30  ;;  %v14682_v1 = vpack.c.bf16 %v586_v32, %v574_v8  ;;  %v14684_v44 = vsub.f32 %v19_v56, %v2624_v16  ;;  %v14687_v18 = vpack.c.bf16 %v2628_v24, %v2624_v16  ;;  %v14689_v36 = vsub.f32 %v27_v9, %v2628_v24  ;;  %v43_v16 = vld [vmem:[%s23438_s0 + $0xe0] sm:$0xff]  ;;  %p14236_p0 = scmp.ne.s32.totalorder %s11598_s27, %s14235_s28  ;;  %p14241_p2 = scmp.lt.s32.totalorder %s14235_s28, %s14235_s28 }
  0x32   :  { %v580_v17 = vand.u32 4294901760, %v579_v0  ;;  %v561_v0 = vsub.f32 %v14644_v6, %v14664_v30  ;;  %v592_v23 = vand.u32 4294901760, %v591_v15  ;;  %v597_v40 = vsub.f32 %v14335_v25, %v24713_v26  ;;  %v35_v15 = vld [vmem:[%s23438_s0 + $0xa0] sm:$0xff]  ;;  %11645 = vmatpush1.bf16.msra.mxu1 %v14564_v22 }
  0x33   :  { %24710 = vst [vmem:[#allocation87_spill] sm:$0xff] %v14684_v44  ;;  %24711 = vst [vmem:[#allocation88_spill] sm:$0xff] %v14687_v18  ;;  %v609_v8 = vsub.f32 %v14345_v28, %v23486_v47  ;;  %v2630_v32 = vand.u32 4294901760, %v36_v37  ;;  %v2634_v56 = vand.u32 4294901760, %v44_v57  ;;  %11885 = vmatpush1.bf16.msra.mxu0 %v14564_v22  ;;  %v23495_v24 = vand.u32 4294901760, %v14356_v38  ;;  %v52_v47 = vld [vmem:[%s23438_s0 + $0x128] sm:$0xff]  ;;  %11647 = vmatprep.subr.bf16.mxu1 %v14577_v19  ;;  %p14242_p3 = por %p14241_p2, %p14240_p1 }
  0x34   :  { %24712 = vst [vmem:[#allocation89_spill] sm:$0xff] %v14689_v36  ;;  %v14694_v11 = vand.u32 4294901760, %v561_v0  ;;  %v14707_v26 = vpack.c.bf16 %v592_v23, %v580_v17  ;;  %v598_v9 = vand.u32 4294901760, %v597_v40  ;;  %v23497_v0 = vand.u32 4294901760, %v14358_v39  ;;  %11887 = vmatprep.subr.bf16.mxu0 %v14577_v19 }
  0x35   :  { %v610_v21 = vand.u32 4294901760, %v609_v8  ;;  %v14716_v30 = vpack.c.bf16 %v2634_v56, %v2630_v32  ;;  %v14718_v6 = vsub.f32 %v36_v37, %v2630_v32  ;;  %v14720_v17 = vsub.f32 %v44_v57, %v2634_v56  ;;  %v60_v8 = vld [vmem:[%s23438_s0 + $0x168] sm:$0xff]  ;;  %p14243_p4 = pnand %p14242_p3, %p14236_p0 }
  0x36   :  { %24714 = vst [vmem:[#allocation90_spill] sm:$0xff] %v14694_v11  ;;  %563 = vmatprep.mubr.f32.mxu1 %v14694_v11  ;;  %v603_v23 = vsub.f32 %v14356_v38, %v23495_v24  ;;  %v615_v40 = vsub.f32 %v14358_v39, %v23497_v0  ;;  %v2632_v22 = vand.u32 4294901760, %v35_v15  ;;  %v2636_v28 = vand.u32 4294901760, %v43_v16  ;;  %11649 = vmatpush1.bf16.msra.mxu1 %v14587_v48 }
  0x37   :  { %24715 = vst [vmem:[#allocation91_spill] sm:$0xff] %v14716_v30  ;;  %v14732_v37 = vpack.c.bf16 %v610_v21, %v598_v9  ;;  %v23501_v57 = vand.u32 4294901760, %v14371_v45  ;;  %v23502_v32 = vand.u32 4294901760, %v14373_v46  ;;  %v2638_v56 = vand.u32 4294901760, %v52_v47  ;;  %11889 = vmatpush1.bf16.msra.mxu0 %v14587_v48  ;;  %11651 = vmatprep.subr.bf16.mxu1 %v14597_v50 }
  0x38   :  { %v604_v24 = vand.u32 4294901760, %v603_v23  ;;  %v616_v19 = vand.u32 4294901760, %v615_v40  ;;  %v14738_v0 = vpack.c.bf16 %v2636_v28, %v2632_v22  ;;  %v14740_v39 = vsub.f32 %v35_v15, %v2632_v22  ;;  %11891 = vmatprep.subr.bf16.mxu0 %v14597_v50  ;;  %v51_v22 = vld [vmem:[%s23438_s0 + $0x120] sm:$0xff] }
  0x39   :  { %v14744_v21 = vsub.f32 %v43_v16, %v2636_v28  ;;  %v621_v9 = vsub.f32 %v14371_v45, %v23501_v57  ;;  %v633_v48 = vsub.f32 %v14373_v46, %v23502_v32  ;;  %v2642_v23 = vand.u32 4294901760, %v60_v8  ;;  %v59_v15 = vld [vmem:[%s23438_s0 + $0x160] sm:$0xff]  ;;  %v68_v32 = vld [vmem:[%s23438_s0 + $0x1a8] sm:$0xff] }
  0x3a   :  { %24716 = vst [vmem:[#allocation92_spill] sm:$0xff] %v14738_v0  ;;  %24717 = vst [vmem:[#allocation93_spill] sm:$0xff] %v14740_v39  ;;  %v14758_v40 = vpack.c.bf16 %v616_v19, %v604_v24  ;;  %v14760_v28 = vsub.f32 %v52_v47, %v2638_v56  ;;  %v23510_v16 = vand.u32 4294901760, %v14386_v51  ;;  %v23512_v57 = vand.u32 4294901760, %v14388_v52  ;;  %11653 = vmatpush1.bf16.msra.mxu1 %v14617_v41 }
  0x3b   :  { %24718 = vst [vmem:[#allocation94_spill] sm:$0xff] %v14744_v21  ;;  %v622_v50 = vand.u32 4294901760, %v621_v9  ;;  %v634_v46 = vand.u32 4294901760, %v633_v48  ;;  %v14767_v45 = vpack.c.bf16 %v2642_v23, %v2638_v56  ;;  %v14769_v21 = vsub.f32 %v60_v8, %v2642_v23  ;;  %11893 = vmatpush1.bf16.msra.mxu0 %v14617_v41  ;;  %v76_v48 = vld [vmem:[%s23438_s0 + $0x1e8] sm:$0xff]  ;;  %541 = vmatprep.subr.mxu1 %v14622_v27 }
  0x3c   :  { %24719 = vst [vmem:[#allocation95_spill] sm:$0xff] %v14760_v28  ;;  %v627_v19 = vsub.f32 %v14386_v51, %v23510_v16  ;;  %v639_v47 = vsub.f32 %v14388_v52, %v23512_v57  ;;  %v2640_v24 = vand.u32 4294901760, %v51_v22  ;;  %v2644_v28 = vand.u32 4294901760, %v59_v15  ;;  %1508 = vmatprep.subr.mxu0 %v14622_v27 }
  0x3d   :  { %24720 = vst [vmem:[#allocation96_spill] sm:$0xff] %v14767_v45  ;;  %24721 = vst [vmem:[#allocation97_spill] sm:$0xff] %v14769_v21  ;;  %v14784_v8 = vpack.c.bf16 %v634_v46, %v622_v50  ;;  %v23519_v56 = vand.u32 4294901760, %v14392_v54  ;;  %v23518_v9 = vand.u32 4294901760, %v14396_v55  ;;  %v2646_v23 = vand.u32 4294901760, %v68_v32 }
  0x3e   :  { %v628_v16 = vand.u32 4294901760, %v627_v19  ;;  %v640_v41 = vand.u32 4294901760, %v639_v47  ;;  %v14788_v57 = vpack.c.bf16 %v2644_v28, %v2640_v24  ;;  %v14790_v52 = vsub.f32 %v51_v22, %v2640_v24  ;;  %v67_v19 = vld [vmem:[%s23438_s0 + $0x1a0] sm:$0xff]  ;;  %543 = vmatpush1.msra.mxu1 %v14624_v35 }
  0x3f   :  { %v14792_v51 = vsub.f32 %v59_v15, %v2644_v28  ;;  %v645_v21 = vsub.f32 %v14392_v54, %v23519_v56  ;;  %v657_v46 = vsub.f32 %v14396_v55, %v23518_v9  ;;  %v2650_v50 = vand.u32 4294901760, %v76_v48  ;;  %v75_v22 = vld [vmem:[%s23438_s0 + $0x1e0] sm:$0xff]  ;;  %1510 = vmatpush1.msra.mxu0 %v14624_v35  ;;  %v84_v9 = vld [vmem:[%s23438_s0 + $0x228] sm:$0xff]  ;;  %11655 = vmatprep.subr.bf16.mxu1 %v14682_v1 }
  0x40   :  { %24722 = vst [vmem:[#allocation98_spill] sm:$0xff] %v14788_v57  ;;  %v14808_v15 = vpack.c.bf16 %v640_v41, %v628_v16  ;;  %v14810_v28 = vsub.f32 %v68_v32, %v2646_v23  ;;  %v23528_v47 = vand.u32 4294901760, %v14411_v3  ;;  %12183 = vmatprep.subr.bf16.mxu0 %v14655_v42  ;;  %v23529_v32 = vmov 2.3283064e-09  }
  0x41   :  { %v646_v56 = vand.u32 4294901760, %v645_v21  ;;  %v658_v55 = vand.u32 4294901760, %v657_v46  ;;  %v14819_v54 = vpack.c.bf16 %v2650_v50, %v2646_v23  ;;  %v14821_v41 = vsub.f32 %v76_v48, %v2650_v50  ;;  %564 = vmatmul.mubr.f32.vlgmr.msra.gmra.mrb[0].mxu1 %v23529_v32  ;;  %v92_v48 = vld [vmem:[%s23438_s0 + $0x268] sm:$0xff] }
  0x42   :  { %v23526_v16 = vmov 0.0050964355   ;;  %v651_v24 = vsub.f32 %v14411_v3, %v23528_v47  ;;  %v24724_v1 = vand.u32 4294901760, %v14413_v4  ;;  %v2648_v21 = vand.u32 4294901760, %v67_v19  ;;  %11657 = vmatpush1.bf16.msra.mxu1 %v14707_v26  ;;  %885 = vmatprep.mubr.f32.mxu1 %v14626_v59 }
  0x43   :  { %24723 = vst [vmem:[#allocation99_spill] sm:$0xff] %v14819_v54  ;;  %1527 = vmatmul.mubr.f32.vlgmr.msra.gmra.mrb[0].mxu0 %v23526_v16  ;;  %v2652_v46 = vand.u32 4294901760, %v75_v22  ;;  %v11666_v23 = vpack.c.bf16 %v658_v55, %v646_v56  ;;  %v23537_v50 = vand.u32 4294901760, %v14415_v5  ;;  %v23536_v16 = vand.u32 4294901760, %v14428_v10  ;;  %11659 = vmatprep.subr.bf16.mxu1 %v14732_v37  ;;  %v83_v37 = vld [vmem:[%s23438_s0 + $0x220] sm:$0xff] }
  0x44   :  { %v663_v42 = vsub.f32 %v14413_v4, %v24724_v1  ;;  %12185 = vmatpush1.bf16.msra.mxu0 %v14687_v18  ;;  %v2654_v47 = vand.u32 4294901760, %v84_v9  ;;  %v652_v1 = vand.u32 4294901760, %v651_v24  ;;  %v14842_v4 = vsub.f32 %v67_v19, %v2648_v21  ;;  %2741 = vmatprep.mubr.f32.mxu0 %v14694_v11 }
  0x45   :  { %12187 = vmatprep.subr.bf16.mxu0 %v14716_v30  ;;  %v14840_v35 = vpack.c.bf16 %v2652_v46, %v2648_v21  ;;  %v14844_v3 = vsub.f32 %v75_v22, %v2652_v46  ;;  %v669_v55 = vsub.f32 %v14415_v5, %v23537_v50  ;;  %v681_v26 = vsub.f32 %v14428_v10, %v23536_v16  ;;  %v100_v46 = vld [vmem:[%s23438_s0 + $0x2a8] sm:$0xff] }
  0x46   :  { %v664_v32 = vand.u32 4294901760, %v663_v42  ;;  %v2658_v56 = vand.u32 4294901760, %v92_v48  ;;  %v91_v42 = vld [vmem:[%s23438_s0 + $0x260] sm:$0xff]  ;;  %v14860_v22 = vsub.f32 %v84_v9, %v2654_v47  ;;  %v23546_v24 = vand.u32 4294901760, %v14432_v12  ;;  %11661 = vmatpush1.bf16.msra.mxu1 %v14758_v40 }
  0x47   :  { %24725 = vst [vmem:[#allocation100_spill] sm:$0xff] %v14840_v35  ;;  %v23547_v21 = vand.u32 4294901760, %v14439_v14  ;;  %v670_v16 = vand.u32 4294901760, %v669_v55  ;;  %v682_v50 = vand.u32 4294901760, %v681_v26  ;;  %11663 = vmatprep.subr.bf16.mxu1 %v14784_v8  ;;  %v23549_v55 = vand.u32 4294901760, %v14441_v20 }
  0x48   :  { %v11668_v19 = vpack.c.bf16 %v664_v32, %v652_v1  ;;  %12189 = vmatpush1.bf16.msra.mxu0 %v14738_v0  ;;  %v14869_v30 = vpack.c.bf16 %v2658_v56, %v2654_v47  ;;  %v14871_v11 = vsub.f32 %v92_v48, %v2658_v56  ;;  %v675_v9 = vsub.f32 %v14432_v12, %v23546_v24  ;;  %v108_v47 = vld [vmem:[%s23438_s0 + $0x2e8] sm:$0xff] }
  0x49   :  { %12191 = vmatprep.subr.bf16.mxu0 %v14767_v45  ;;  %v687_v40 = vsub.f32 %v14439_v14, %v23547_v21  ;;  %v2656_v32 = vand.u32 4294901760, %v83_v37  ;;  %v2660_v1 = vand.u32 4294901760, %v91_v42  ;;  %v11670_v48 = vpack.c.bf16 %v682_v50, %v670_v16 }
  0x4a   :  { %24726 = vst [vmem:[#allocation101_spill] sm:$0xff] %v14869_v30  ;;  %v23548_v8 = vand.u32 4294901760, %v14450_v33  ;;  %v2662_v26 = vand.u32 4294901760, %v100_v46  ;;  %v676_v56 = vand.u32 4294901760, %v675_v9  ;;  %11665 = vmatpush1.bf16.msra.mxu1 %v14808_v15  ;;  %v693_v16 = vsub.f32 %v14441_v20, %v23549_v55  ;;  %v107_v15 = vld [vmem:[%s23438_s0 + $0x2e0] sm:$0xff] }
  0x4b   :  { %v688_v45 = vand.u32 4294901760, %v687_v40  ;;  %v14886_v0 = vpack.c.bf16 %v2660_v1, %v2656_v32  ;;  %v14888_v24 = vsub.f32 %v83_v37, %v2656_v32  ;;  %v14892_v21 = vsub.f32 %v91_v42, %v2660_v1  ;;  %v99_v37 = vld [vmem:[%s23438_s0 + $0x2a0] sm:$0xff]  ;;  %11667 = vmatprep.subr.bf16.mxu1 %v11666_v23 }
  0x4c   :  { %12193 = vmatpush1.bf16.msra.mxu0 %v14788_v57  ;;  %v705_v50 = vsub.f32 %v14450_v33, %v23548_v8  ;;  %v2666_v9 = vand.u32 4294901760, %v108_v47  ;;  %v14907_v40 = vsub.f32 %v100_v46, %v2662_v26  ;;  %v23559_v32 = vand.u32 4294901760, %v14452_v34  ;;  %v116_v8 = vld [vmem:[%s23438_s0 + $0x328] sm:$0xff] }
  0x4d   :  { %24727 = vst [vmem:[#allocation102_spill] sm:$0xff] %v14886_v0  ;;  %12195 = vmatprep.subr.bf16.mxu0 %v14819_v54  ;;  %v11672_v42 = vpack.c.bf16 %v688_v45, %v676_v56  ;;  %v23558_v1 = vand.u32 4294901760, %v14465_v43  ;;  %v694_v55 = vand.u32 4294901760, %v693_v16  ;;  %v2664_v46 = vand.u32 4294901760, %v99_v37  ;;  %v124_v54 = vld [vmem:[%s23438_s0 + $0x368] sm:$0xff] }
  0x4e   :  { %v706_v57 = vand.u32 4294901760, %v705_v50  ;;  %v14914_v18 = vpack.c.bf16 %v2666_v9, %v2662_v26  ;;  %v14916_v33 = vsub.f32 %v108_v47, %v2666_v9  ;;  %v699_v45 = vsub.f32 %v14452_v34, %v23559_v32  ;;  %11669 = vmatpush1.bf16.msra.mxu1 %v11668_v19 }
  0x4f   :  { %v711_v23 = vsub.f32 %v14465_v43, %v23558_v1  ;;  %v2668_v56 = vand.u32 4294901760, %v107_v15  ;;  %v23565_v47 = vand.u32 4294901760, %v14469_v49  ;;  %v23564_v16 = vand.u32 4294901760, %v14482_v58  ;;  %11671 = vmatprep.subr.bf16.mxu1 %v11670_v48  ;;  %v115_v48 = vld [vmem:[%s23438_s0 + $0x320] sm:$0xff] }
  0x50   :  { %24728 = vst [vmem:[#allocation103_spill] sm:$0xff] %v14914_v18  ;;  %12197 = vmatpush1.bf16.msra.mxu0 %v14840_v35  ;;  %v11674_v26 = vpack.c.bf16 %v706_v57, %v694_v55  ;;  %v2670_v50 = vand.u32 4294901760, %v116_v8  ;;  %v700_v9 = vand.u32 4294901760, %v699_v45  ;;  %v14933_v43 = vsub.f32 %v99_v37, %v2664_v46  ;;  %v123_v37 = vld [vmem:[%s23438_s0 + $0x360] sm:$0xff] }
  0x51   :  { %12199 = vmatprep.subr.bf16.mxu0 %v14869_v30  ;;  %v712_v1 = vand.u32 4294901760, %v711_v23  ;;  %v14931_v32 = vpack.c.bf16 %v2668_v56, %v2664_v46  ;;  %v14935_v34 = vsub.f32 %v107_v15, %v2668_v56  ;;  %v717_v57 = vsub.f32 %v14469_v49, %v23565_v47  ;;  %v132_v56 = vld [vmem:[%s23438_s0 + $0x3a8] sm:$0xff] }
  0x52   :  { %v729_v19 = vsub.f32 %v14482_v58, %v23564_v16  ;;  %v2674_v55 = vand.u32 4294901760, %v124_v54  ;;  %v14949_v15 = vsub.f32 %v116_v8, %v2670_v50  ;;  %v23574_v23 = vand.u32 4294901760, %v14486_v60  ;;  %11673 = vmatpush1.bf16.msra.mxu1 %v11672_v42 }
  0x53   :  { %24729 = vst [vmem:[#allocation104_spill] sm:$0xff] %v14931_v32  ;;  %v11676_v45 = vpack.c.bf16 %v712_v1, %v700_v9  ;;  %v23575_v46 = vand.u32 4294901760, %v14490_v62  ;;  %v718_v16 = vand.u32 4294901760, %v717_v57  ;;  %11675 = vmatprep.subr.bf16.mxu1 %v11674_v26  ;;  %v2672_v42 = vand.u32 4294901760, %v115_v48 }
  0x54   :  { %12201 = vmatpush1.bf16.msra.mxu0 %v14886_v0  ;;  %v730_v47 = vand.u32 4294901760, %v729_v19  ;;  %v14957_v30 = vpack.c.bf16 %v2674_v55, %v2670_v50  ;;  %v14959_v35 = vsub.f32 %v124_v54, %v2674_v55  ;;  %v723_v8 = vsub.f32 %v14486_v60, %v23574_v23  ;;  %v140_v50 = vld [vmem:[%s23438_s0 + $0x3e8] sm:$0xff] }
  0x55   :  { %12203 = vmatprep.subr.bf16.mxu0 %v14914_v18  ;;  %v735_v1 = vsub.f32 %v14490_v62, %v23575_v46  ;;  %v2676_v9 = vand.u32 4294901760, %v123_v37  ;;  %v23579_v54 = vand.u32 4294901760, %v14495_v7  ;;  %v23578_v26 = vand.u32 4294901760, %v14505_v29 }
  0x56   :  { %24730 = vst [vmem:[#allocation105_spill] sm:$0xff] %v14957_v30  ;;  %v11678_v57 = vpack.c.bf16 %v730_v47, %v718_v16  ;;  %v2678_v19 = vand.u32 4294901760, %v132_v56  ;;  %v724_v55 = vand.u32 4294901760, %v723_v8  ;;  %v14975_v23 = vsub.f32 %v115_v48, %v2672_v42  ;;  %11677 = vmatpush1.bf16.msra.mxu1 %v11676_v45  ;;  %v131_v8 = vld [vmem:[%s23438_s0 + $0x3a0] sm:$0xff] }
  0x57   :  { %v736_v18 = vand.u32 4294901760, %v735_v1  ;;  %v14973_v0 = vpack.c.bf16 %v2676_v9, %v2672_v42  ;;  %v14978_v46 = vsub.f32 %v123_v37, %v2676_v9  ;;  %v741_v47 = vsub.f32 %v14495_v7, %v23579_v54  ;;  %v139_v48 = vld [vmem:[%s23438_s0 + $0x3e0] sm:$0xff]  ;;  %v148_v9 = vld [vmem:[%s23438_s0 + $0x428] sm:$0xff] }
  0x58   :  { %12205 = vmatpush1.bf16.msra.mxu0 %v14931_v32  ;;  %v753_v16 = vsub.f32 %v14505_v29, %v23578_v26  ;;  %v2682_v62 = vand.u32 4294901760, %v140_v50  ;;  %11679 = vmatprep.subr.bf16.mxu1 %v11678_v57  ;;  %v14993_v45 = vsub.f32 %v132_v56, %v2678_v19  ;;  %v23586_v1 = vand.u32 4294901760, %v14509_v31 }
  0x59   :  { %24731 = vst [vmem:[#allocation106_spill] sm:$0xff] %v14973_v0  ;;  %12207 = vmatprep.subr.bf16.mxu0 %v14957_v30  ;;  %v11680_v37 = vpack.c.bf16 %v736_v18, %v724_v55  ;;  %v23587_v42 = vand.u32 4294901760, %v14519_v61  ;;  %v742_v26 = vand.u32 4294901760, %v741_v47  ;;  %v2680_v57 = vand.u32 4294901760, %v131_v8  ;;  %v156_v30 = vld [vmem:[%s23438_s0 + $0x468] sm:$0xff] }
  0x5a   :  { %v754_v54 = vand.u32 4294901760, %v753_v16  ;;  %v15000_v32 = vpack.c.bf16 %v2682_v62, %v2678_v19  ;;  %v15002_v29 = vsub.f32 %v140_v50, %v2682_v62  ;;  %v747_v18 = vsub.f32 %v14509_v31, %v23586_v1 }
  0x5b   :  { %v759_v56 = vsub.f32 %v14519_v61, %v23587_v42  ;;  %v2684_v55 = vand.u32 4294901760, %v139_v48  ;;  %11681 = vmatpush1.bf16.msra.mxu1 %v11680_v37  ;;  %v23593_v62 = vand.u32 4294901760, %v14523_v63  ;;  %v23592_v50 = vand.u32 4294901760, %v14530_v2 }
  0x5c   :  { %24732 = vst [vmem:[#allocation107_spill] sm:$0xff] %v15000_v32  ;;  %12209 = vmatpush1.bf16.msra.mxu0 %v14973_v0  ;;  %v11682_v19 = vpack.c.bf16 %v754_v54, %v742_v26  ;;  %v2686_v47 = vand.u32 4294901760, %v148_v9  ;;  %v748_v16 = vand.u32 4294901760, %v747_v18  ;;  %v15019_v61 = vsub.f32 %v131_v8, %v2680_v57  ;;  %v147_v18 = vld [vmem:[%s23438_s0 + $0x420] sm:$0xff] }
  0x5d   :  { %12211 = vmatprep.subr.bf16.mxu0 %v15000_v32  ;;  %v760_v1 = vand.u32 4294901760, %v759_v56  ;;  %v15017_v42 = vpack.c.bf16 %v2684_v55, %v2680_v57  ;;  %v15021_v31 = vsub.f32 %v139_v48, %v2684_v55  ;;  %v765_v54 = vsub.f32 %v14523_v63, %v23593_v62  ;;  %v155_v8 = vld [vmem:[%s23438_s0 + $0x460] sm:$0xff]  ;;  %v24735_v55 = vld [vmem:[#allocation58_spill] sm:$0xff] }
  0x5e   :  { %11683 = vmatprep.subr.bf16.mxu1 %v11682_v19  ;;  %v777_v26 = vsub.f32 %v14530_v2, %v23592_v50  ;;  %v2690_v37 = vand.u32 4294901760, %v156_v30  ;;  %v15035_v48 = vsub.f32 %v148_v9, %v2686_v47  ;;  %v23604_v57 = vand.u32 4294901760, %v14532_v53  ;;  %v164_v50 = vld [vmem:[%s23438_s0 + $0x4a8] sm:$0xff] }
  0x5f   :  { %24733 = vst [vmem:[#allocation108_spill] sm:$0xff] %v15017_v42  ;;  %v11684_v56 = vpack.c.bf16 %v760_v1, %v748_v16  ;;  %v23609_v19 = vand.u32 4294901760, %v24735_v55  ;;  %v766_v62 = vand.u32 4294901760, %v765_v54  ;;  %v2688_v16 = vand.u32 4294901760, %v147_v18  ;;  %v172_v54 = vld [vmem:[%s23438_s0 + $0x4e8] sm:$0xff] }
  0x60   :  { %24734 = vst [vmem:[#allocation109_spill] sm:$0xff] %v15035_v48  ;;  %12213 = vmatpush1.bf16.msra.mxu0 %v15017_v42  ;;  %v778_v32 = vand.u32 4294901760, %v777_v26  ;;  %v15043_v0 = vpack.c.bf16 %v2690_v37, %v2686_v47  ;;  %v15045_v2 = vsub.f32 %v156_v30, %v2690_v37  ;;  %v771_v1 = vsub.f32 %v14532_v53, %v23604_v57  ;;  %v24738_v30 = vld [vmem:[#allocation60_spill] sm:$0xff]  ;;  %v24739_v37 = vld [vmem:[#allocation61_spill] sm:$0xff] }
  0x61   :  { %11685 = vmatpush1.bf16.msra.mxu1 %v11684_v56  ;;  %v783_v9 = vsub.f32 %v24735_v55, %v23609_v19  ;;  %v2692_v48 = vand.u32 4294901760, %v155_v8  ;;  %v23612_v47 = vand.u32 4294901760, %v24738_v30  ;;  %v23613_v56 = vand.u32 4294901760, %v24739_v37 }
  0x62   :  { %24736 = vst [vmem:[#allocation110_spill] sm:$0xff] %v15043_v0  ;;  %24737 = vst [vmem:[#allocation111_spill] sm:$0xff] %v15045_v2  ;;  %v11686_v26 = vpack.c.bf16 %v778_v32, %v766_v62  ;;  %12215 = vmatprep.subr.bf16.mxu0 %v15043_v0  ;;  %v2694_v42 = vand.u32 4294901760, %v164_v50  ;;  %v772_v2 = vand.u32 4294901760, %v771_v1  ;;  %v15061_v63 = vsub.f32 %v147_v18, %v2688_v16  ;;  %v163_v1 = vld [vmem:[%s23438_s0 + $0x4a0] sm:$0xff] }
  0x63   :  { %v784_v57 = vand.u32 4294901760, %v783_v9  ;;  %v15059_v53 = vpack.c.bf16 %v2692_v48, %v2688_v16  ;;  %v15063_v19 = vsub.f32 %v155_v8, %v2692_v48  ;;  %v789_v32 = vsub.f32 %v24738_v30, %v23612_v47  ;;  %v171_v18 = vld [vmem:[%s23438_s0 + $0x4e0] sm:$0xff]  ;;  %v24744_v48 = vld [vmem:[#allocation63_spill] sm:$0xff] }
  0x64   :  { %24741 = vst [vmem:[#allocation113_spill] sm:$0xff] %v15061_v63  ;;  %11687 = vmatprep.subr.bf16.mxu1 %v11686_v26  ;;  %v801_v62 = vsub.f32 %v24739_v37, %v23613_v56  ;;  %v2698_v0 = vand.u32 4294901760, %v172_v54  ;;  %v15078_v8 = vsub.f32 %v164_v50, %v2694_v42  ;;  %v23622_v16 = vand.u32 4294901760, %v24744_v48  ;;  %v24745_v26 = vld [vmem:[#allocation64_spill] sm:$0xff]  ;;  %v180_v56 = vld [vmem:[%s23438_s0 + $0x528] sm:$0xff] }
  0x65   :  { %24740 = vst [vmem:[#allocation112_spill] sm:$0xff] %v15059_v53  ;;  %24742 = vst [vmem:[#allocation114_spill] sm:$0xff] %v15063_v19  ;;  %v11688_v9 = vpack.c.bf16 %v784_v57, %v772_v2  ;;  %12217 = vmatpush1.bf16.msra.mxu0 %v15059_v53  ;;  %v23625_v47 = vand.u32 4294901760, %v24745_v26  ;;  %v790_v37 = vand.u32 4294901760, %v789_v32  ;;  %v2696_v57 = vand.u32 4294901760, %v163_v1  ;;  %v188_v32 = vld [vmem:[%s23438_s0 + $0x568] sm:$0xff] }
  0x66   :  { %24743 = vst [vmem:[#allocation115_spill] sm:$0xff] %v15078_v8  ;;  %v802_v30 = vand.u32 4294901760, %v801_v62  ;;  %v15085_v19 = vpack.c.bf16 %v2698_v0, %v2694_v42  ;;  %v15087_v63 = vsub.f32 %v172_v54, %v2698_v0  ;;  %v795_v2 = vsub.f32 %v24744_v48, %v23622_v16  ;;  %v24748_v0 = vld [vmem:[#allocation65_spill] sm:$0xff]  ;;  %v24749_v54 = vld [vmem:[#allocation67_spill] sm:$0xff] }
  0x67   :  { %11689 = vmatpush1.bf16.msra.mxu1 %v11688_v9  ;;  %v807_v50 = vsub.f32 %v24745_v26, %v23625_v47  ;;  %v2700_v53 = vand.u32 4294901760, %v171_v18  ;;  %v23629_v42 = vand.u32 4294901760, %v24748_v0  ;;  %v23628_v9 = vand.u32 4294901760, %v24749_v54 }
  0x68   :  { %24746 = vst [vmem:[#allocation116_spill] sm:$0xff] %v15085_v19  ;;  %24747 = vst [vmem:[#allocation117_spill] sm:$0xff] %v15087_v63  ;;  %v11690_v62 = vpack.c.bf16 %v802_v30, %v790_v37  ;;  %12219 = vmatprep.subr.bf16.mxu0 %v15085_v19  ;;  %v2702_v63 = vand.u32 4294901760, %v180_v56  ;;  %v796_v8 = vand.u32 4294901760, %v795_v2  ;;  %v15103_v55 = vsub.f32 %v163_v1, %v2696_v57  ;;  %v179_v2 = vld [vmem:[%s23438_s0 + $0x520] sm:$0xff] }
  0x69   :  { %v808_v16 = vand.u32 4294901760, %v807_v50  ;;  %v15101_v48 = vpack.c.bf16 %v2700_v53, %v2696_v57  ;;  %v15105_v47 = vsub.f32 %v171_v18, %v2700_v53  ;;  %v813_v30 = vsub.f32 %v24748_v0, %v23629_v42  ;;  %v187_v1 = vld [vmem:[%s23438_s0 + $0x560] sm:$0xff]  ;;  %v24754_v57 = vld [vmem:[#allocation70_spill] sm:$0xff] }
  0x6a   :  { %24751 = vst [vmem:[#allocation119_spill] sm:$0xff] %v15103_v55  ;;  %11691 = vmatprep.subr.bf16.mxu1 %v11690_v62  ;;  %v825_v37 = vsub.f32 %v24749_v54, %v23628_v9  ;;  %v2706_v19 = vand.u32 4294901760, %v188_v32  ;;  %v15120_v53 = vsub.f32 %v180_v56, %v2702_v63  ;;  %v23637_v18 = vand.u32 4294901760, %v14589_v13  ;;  %v196_v9 = vld [vmem:[%s23438_s0 + $0x5a8] sm:$0xff] }
  0x6b   :  { %24750 = vst [vmem:[#allocation118_spill] sm:$0xff] %v15101_v48  ;;  %24752 = vst [vmem:[#allocation120_spill] sm:$0xff] %v15105_v47  ;;  %v11692_v50 = vpack.c.bf16 %v808_v16, %v796_v8  ;;  %12221 = vmatpush1.bf16.msra.mxu0 %v15101_v48  ;;  %v23641_v62 = vand.u32 4294901760, %v24754_v57  ;;  %v814_v42 = vand.u32 4294901760, %v813_v30  ;;  %v2704_v16 = vand.u32 4294901760, %v179_v2  ;;  %v204_v30 = vld [vmem:[%s23438_s0 + $0x5e8] sm:$0xff] }
  0x6c   :  { %24753 = vst [vmem:[#allocation121_spill] sm:$0xff] %v15120_v53  ;;  %v826_v54 = vand.u32 4294901760, %v825_v37  ;;  %v15127_v0 = vpack.c.bf16 %v2706_v19, %v2702_v63  ;;  %v15129_v47 = vsub.f32 %v188_v32, %v2706_v19  ;;  %v819_v56 = vsub.f32 %v14589_v13, %v23637_v18  ;;  %v24757_v63 = vld [vmem:[#allocation71_spill] sm:$0xff]  ;;  %v24758_v32 = vld [vmem:[#allocation73_spill] sm:$0xff] }
  0x6d   :  { %11693 = vmatpush1.bf16.msra.mxu1 %v11692_v50  ;;  %v831_v8 = vsub.f32 %v24754_v57, %v23641_v62  ;;  %v2708_v48 = vand.u32 4294901760, %v187_v1  ;;  %v23644_v19 = vand.u32 4294901760, %v24757_v63  ;;  %v23645_v50 = vand.u32 4294901760, %v24758_v32 }
  0x6e   :  { %24755 = vst [vmem:[#allocation122_spill] sm:$0xff] %v15127_v0  ;;  %24756 = vst [vmem:[#allocation123_spill] sm:$0xff] %v15129_v47  ;;  %v11694_v37 = vpack.c.bf16 %v826_v54, %v814_v42  ;;  %12223 = vmatprep.subr.bf16.mxu0 %v15127_v0  ;;  %v2710_v47 = vand.u32 4294901760, %v196_v9  ;;  %v820_v53 = vand.u32 4294901760, %v819_v56  ;;  %v15145_v55 = vsub.f32 %v179_v2, %v2704_v16  ;;  %v195_v56 = vld [vmem:[%s23438_s0 + $0x5a0] sm:$0xff] }
  0x6f   :  { %v832_v18 = vand.u32 4294901760, %v831_v8  ;;  %v15143_v13 = vpack.c.bf16 %v2708_v48, %v2704_v16  ;;  %v15147_v62 = vsub.f32 %v187_v1, %v2708_v48  ;;  %v837_v42 = vsub.f32 %v24757_v63, %v23644_v19  ;;  %v203_v2 = vld [vmem:[%s23438_s0 + $0x5e0] sm:$0xff]  ;;  %v24763_v1 = vld [vmem:[#allocation74_spill] sm:$0xff] }
  0x70   :  { %24760 = vst [vmem:[#allocation125_spill] sm:$0xff] %v15145_v55  ;;  %11695 = vmatprep.subr.bf16.mxu1 %v11694_v37  ;;  %v849_v54 = vsub.f32 %v24758_v32, %v23645_v50  ;;  %v2714_v0 = vand.u32 4294901760, %v204_v30  ;;  %v15162_v48 = vsub.f32 %v196_v9, %v2710_v47  ;;  %v23653_v16 = vand.u32 4294901760, %v24763_v1  ;;  %v24764_v37 = vld [vmem:[#allocation77_spill] sm:$0xff] }
  0x71   :  { %24759 = vst [vmem:[#allocation124_spill] sm:$0xff] %v15143_v13  ;;  %24761 = vst [vmem:[#allocation126_spill] sm:$0xff] %v15147_v62  ;;  %v11696_v8 = vpack.c.bf16 %v832_v18, %v820_v53  ;;  %12225 = vmatpush1.bf16.msra.mxu0 %v15143_v13  ;;  %v23654_v19 = vand.u32 4294901760, %v24764_v37  ;;  %v212_v50 = vld [vmem:[%s23438_s0 + $0x628] sm:$0xf]  ;;  %v838_v32 = vand.u32 4294901760, %v837_v42 }
  0x72   :  { %24762 = vst [vmem:[#allocation127_spill] sm:$0xff] %v15162_v48  ;;  %v850_v63 = vand.u32 4294901760, %v849_v54  ;;  %v15169_v62 = vpack.c.bf16 %v2714_v0, %v2710_v47  ;;  %v15171_v55 = vsub.f32 %v204_v30, %v2714_v0  ;;  %v843_v9 = vsub.f32 %v24763_v1, %v23653_v16  ;;  %v24766_v42 = vld [vmem:[#allocation75_spill] sm:$0xff]  ;;  %v24769_v30 = vld [vmem:[#allocation81_spill] sm:$0xff] }
  0x73   :  { %11697 = vmatpush1.bf16.msra.mxu1 %v11696_v8  ;;  %v855_v53 = vsub.f32 %v24764_v37, %v23654_v19  ;;  %v2712_v18 = vand.u32 4294901760, %v195_v56  ;;  %v2716_v13 = vand.u32 4294901760, %v203_v2  ;;  %v15182_v47 = vsub.f32 %v24766_v42, %v14622_v27  ;;  %v211_v8 = vld [vmem:[%s23438_s0 + $0x620] sm:$0xf] }
  0x74   :  { %24765 = vst [vmem:[#allocation74_spill] sm:$0xff] %v15169_v62  ;;  %v11698_v48 = vpack.c.bf16 %v850_v63, %v838_v32  ;;  %12227 = vmatprep.subr.bf16.mxu0 %v15169_v62  ;;  %v15185_v0 = vsel %vm419_vm0, %v212_v50, 0  ;;  %v23661_v54 = vand.u32 4294901760, %v24769_v30  ;;  %v844_v16 = vand.u32 4294901760, %v843_v9 }
  0x75   :  { %24767 = vst [vmem:[#allocation75_spill] sm:$0xff] %v15182_v47  ;;  %24768 = vst [vmem:[#allocation128_spill] sm:$0xff] %v15185_v0  ;;  %v856_v19 = vand.u32 4294901760, %v855_v53  ;;  %v15191_v37 = vpack.c.bf16 %v2716_v13, %v2712_v18  ;;  %v15193_v63 = vsub.f32 %v195_v56, %v2712_v18  ;;  %v15195_v32 = vsub.f32 %v203_v2, %v2716_v13  ;;  %v24773_v53 = vld [vmem:[#allocation6_spill] sm:$0xff]  ;;  %v24774_v56 = vld [vmem:[#allocation7_spill] sm:$0xff] }
  0x76   :  { %11699 = vmatprep.subr.bf16.mxu1 %v11698_v48  ;;  %v23665_v42 = vand.u32 4294901760, %v15182_v47  ;;  %v15199_v50 = vand.u32 4294901760, %v15185_v0  ;;  %v867_v62 = vsub.f32 %v24769_v30, %v23661_v54  ;;  %v433_v9 = vsel %vm419_vm0, %v211_v8, 0  ;;  %v24775_v48 = vld [vmem:[#allocation83_spill] sm:$0xff]  ;;  %v24777_v54 = vld [vmem:[#allocation85_spill] sm:$0xff]  ;;  %v24778_v8 = vld [vmem:[#allocation8_spill] sm:$0xff] }
  0x77   :  { %24770 = vst [vmem:[#allocation129_spill] sm:$0xff] %v15191_v37  ;;  %24771 = vst [vmem:[#allocation130_spill] sm:$0xff] %v15195_v32  ;;  %v11700_v27 = vpack.c.bf16 %v856_v19, %v844_v16  ;;  %12229 = vmatpush1.bf16.msra.mxu0 %v15191_v37  ;;  %v11702_v18 = vpack.c.bf16 %v24774_v56, %v24773_v53  ;;  %v23670_v13 = vand.u32 4294901760, %v24775_v48  ;;  %v15213_v32 = vand.u32 4294901760, %v433_v9  ;;  %v24779_v37 = vld [vmem:[#allocation10_spill] sm:$0xff] }
  0x78   :  { %24772 = vst [vmem:[#allocation131_spill] sm:$0xff] %v15199_v50  ;;  %v861_v2 = vsub.f32 %v15182_v47, %v23665_v42  ;;  %2719 = vmatprep.subr.mxu0 %v15199_v50  ;;  %v868_v0 = vand.u32 4294901760, %v867_v62  ;;  %v23672_v19 = vand.u32 4294901760, %v24777_v54  ;;  %v11704_v56 = vpack.c.bf16 %v24779_v37, %v24778_v8 }
  0x79   :  { %24776 = vst [vmem:[#allocation132_spill] sm:$0xff] %v15213_v32  ;;  %11701 = vmatpush1.bf16.msra.mxu1 %v11700_v27  ;;  %v2751_v16 = vsub.f32 %v24775_v48, %v23670_v13  ;;  %v23676_v53 = vand.u32 4294901760, %v14684_v44  ;;  %v23677_v30 = vand.u32 4294901760, %v14689_v36  ;;  %v15224_v47 = vsub.f32 %v433_v9, %v15213_v32  ;;  %v24781_v27 = vld [vmem:[#allocation13_spill] sm:$0xff] }
  0x7a   :  { %v862_v42 = vand.u32 4294901760, %v861_v2  ;;  %v2763_v62 = vsub.f32 %v24777_v54, %v23672_v19  ;;  %v11706_v50 = vpack.c.bf16 %v24781_v27, %v14335_v25  ;;  %v23682_v9 = vand.u32 4294901760, %v14718_v6  ;;  %v24783_v27 = vld [vmem:[#allocation16_spill] sm:$0xff] }
  0x7b   :  { %24780 = vst [vmem:[#allocation85_spill] sm:$0xff] %v15224_v47  ;;  %2721 = vmatpush1.msra.mxu0 %v15213_v32  ;;  %v2752_v13 = vand.u32 4294901760, %v2751_v16  ;;  %v2757_v37 = vsub.f32 %v14684_v44, %v23676_v53  ;;  %v2769_v2 = vsub.f32 %v14689_v36, %v23677_v30  ;;  %v24782_v48 = vmov 2.3283064e-09   ;;  %v24784_v36 = vld [vmem:[#allocation94_spill] sm:$0xff] }
  0x7c   :  { %863 = vmatprep.subr.mxu1 %v862_v42  ;;  %v2764_v8 = vand.u32 4294901760, %v2763_v62  ;;  %2742 = vmatmul.mubr.f32.vlgmr.msra.gmra.mrb[2].mxu0 %v24782_v48  ;;  %v23686_v19 = vand.u32 4294901760, %v14720_v17  ;;  %v11708_v32 = vpack.c.bf16 %v24783_v27, %v14356_v38  ;;  %v23687_v16 = vand.u32 4294901760, %v14740_v39  ;;  %v24789_v38 = vld [vmem:[#allocation82_spill] sm:$0xff] }
  0x7d   :  { %869 = vmatpush1.msra.mxu1 %v868_v0  ;;  %v2758_v25 = vand.u32 4294901760, %v2757_v37  ;;  %v2770_v53 = vand.u32 4294901760, %v2769_v2  ;;  %v2775_v30 = vsub.f32 %v14718_v6, %v23682_v9  ;;  %v23690_v44 = vand.u32 4294901760, %v24784_v36  ;;  %3063 = vmatprep.mubr.f32.mxu0 %v14626_v59  ;;  %v24786_v0 = vld [vmem:[#allocation95_spill] sm:$0xff] }
  0x7e   :  { %11703 = vmatprep.subr.bf16.mxu1 %v11702_v18  ;;  %v12230_v42 = vpack.c.bf16 %v2764_v8, %v2752_v13  ;;  %v24785_v62 = vmov 0.0050964355   ;;  %v2787_v48 = vsub.f32 %v14720_v17, %v23686_v19  ;;  %v2781_v37 = vsub.f32 %v14740_v39, %v23687_v16  ;;  %v24787_v13 = vld [vmem:[#allocation18_spill] sm:$0xff]  ;;  %v24788_v8 = vld [vmem:[#allocation19_spill] sm:$0xff] }
  0x7f   :  { %886 = vmatmul.mubr.f32.vlgmr.msra.gmra.mrb[0].mxu1 %v24785_v62  ;;  %v23692_v2 = vand.u32 4294901760, %v24786_v0  ;;  %v12232_v9 = vpack.c.bf16 %v2770_v53, %v2758_v25  ;;  %v2776_v27 = vand.u32 4294901760, %v2775_v30  ;;  %v2793_v18 = vsub.f32 %v24784_v36, %v23690_v44  ;;  %v24791_v53 = vld [vmem:[#allocation21_spill] sm:$0xff]  ;;  %v24792_v39 = vld [vmem:[#allocation22_spill] sm:$0xff] }
  0x80   :  { %11705 = vmatpush1.bf16.msra.mxu1 %v11704_v56  ;;  %v11710_v59 = vpack.c.bf16 %v24788_v8, %v24787_v13  ;;  %1058 = vmatprep.mubr.f32.mxu1 %v24789_v38  ;;  %v2788_v19 = vand.u32 4294901760, %v2787_v48  ;;  %v2782_v62 = vand.u32 4294901760, %v2781_v37  ;;  %v24790_v56 = vld [vmem:[#allocation97_spill] sm:$0xff]  ;;  %v11712_v44 = vpack.c.bf16 %v24792_v39, %v24791_v53  ;;  %v24793_v48 = vld [vmem:[#allocation24_spill] sm:$0xff] }
  0x81   :  { %12231 = vmatprep.subr.bf16.mxu0 %v12230_v42  ;;  %11707 = vmatprep.subr.bf16.mxu1 %v11706_v50  ;;  %v2799_v16 = vsub.f32 %v24786_v0, %v23692_v2  ;;  %v23693_v25 = vand.u32 4294901760, %v24790_v56  ;;  %v2794_v30 = vand.u32 4294901760, %v2793_v18  ;;  %v23694_v36 = vand.u32 4294901760, %v14790_v52  ;;  %v24794_v37 = vld [vmem:[#allocation25_spill] sm:$0xff]  ;;  %v24796_v39 = vld [vmem:[#allocation28_spill] sm:$0xff] }
  0x82   :  { %12233 = vmatpush1.bf16.msra.mxu0 %v12232_v9  ;;  %v23695_v8 = vand.u32 4294901760, %v14792_v51  ;;  %v12234_v13 = vpack.c.bf16 %v2788_v19, %v2776_v27  ;;  %v11714_v2 = vpack.c.bf16 %v24794_v37, %v24793_v48  ;;  %v23697_v19 = vand.u32 4294901760, %v14810_v28  ;;  %v24823_v53 = vld [vmem:[#allocation69_spill] sm:$0xff] }
  0x83   :  { %v2800_v42 = vand.u32 4294901760, %v2799_v16  ;;  %v2811_v50 = vsub.f32 %v24790_v56, %v23693_v25  ;;  %v12236_v38 = vpack.c.bf16 %v2794_v30, %v2782_v62  ;;  %v2805_v9 = vsub.f32 %v14790_v52, %v23694_v36  ;;  %v24795_v25 = vld [vmem:[#allocation27_spill] sm:$0xff] }
  0x84   :  { %11709 = vmatpush1.bf16.msra.mxu1 %v11708_v32  ;;  %v2817_v18 = vsub.f32 %v14792_v51, %v23695_v8  ;;  %12235 = vmatprep.subr.bf16.mxu0 %v12234_v13  ;;  %v23696_v16 = vand.u32 4294901760, %v14821_v41  ;;  %v11716_v37 = vpack.c.bf16 %v24796_v39, %v24795_v25  ;;  %v23698_v32 = vand.u32 4294901760, %v14842_v4  ;;  %v24822_v39 = vld [vmem:[#allocation123_spill] sm:$0xff] }
  0x85   :  { %11711 = vmatprep.subr.bf16.mxu1 %v11710_v59  ;;  %v2812_v27 = vand.u32 4294901760, %v2811_v50  ;;  %v2806_v62 = vand.u32 4294901760, %v2805_v9  ;;  %v2823_v36 = vsub.f32 %v14810_v28, %v23697_v19  ;;  %v23702_v8 = vand.u32 4294901760, %v14844_v3 }
  0x86   :  { %12237 = vmatpush1.bf16.msra.mxu0 %v12236_v38  ;;  %v2818_v30 = vand.u32 4294901760, %v2817_v18  ;;  %v2835_v59 = vsub.f32 %v14821_v41, %v23696_v16  ;;  %v2829_v13 = vsub.f32 %v14842_v4, %v23698_v32  ;;  %v11718_v38 = vpack.c.bf16 %v14428_v10, %v14415_v5 }
  0x87   :  { %v12238_v48 = vpack.c.bf16 %v2812_v27, %v2800_v42  ;;  %v2824_v9 = vand.u32 4294901760, %v2823_v36  ;;  %v2841_v18 = vsub.f32 %v14844_v3, %v23702_v8  ;;  %v23700_v42 = vand.u32 4294901760, %v14860_v22 }
  0x88   :  { %11713 = vmatpush1.bf16.msra.mxu1 %v11712_v44  ;;  %v12240_v50 = vpack.c.bf16 %v2818_v30, %v2806_v62  ;;  %v2836_v27 = vand.u32 4294901760, %v2835_v59  ;;  %v2830_v16 = vand.u32 4294901760, %v2829_v13  ;;  %v23701_v19 = vand.u32 4294901760, %v14871_v11 }
  0x89   :  { %12239 = vmatprep.subr.bf16.mxu0 %v12238_v48  ;;  %11715 = vmatprep.subr.bf16.mxu1 %v11714_v2  ;;  %v11720_v32 = vpack.c.bf16 %v14439_v14, %v14432_v12  ;;  %v2842_v10 = vand.u32 4294901760, %v2841_v18  ;;  %v2847_v36 = vsub.f32 %v14860_v22, %v23700_v42  ;;  %v23703_v44 = vand.u32 4294901760, %v14888_v24  ;;  %v24797_v48 = vld [vmem:[#allocation37_spill] sm:$0xff] }
  0x8a   :  { %12241 = vmatpush1.bf16.msra.mxu0 %v12240_v50  ;;  %v23705_v62 = vand.u32 4294901760, %v14892_v21  ;;  %v12242_v30 = vpack.c.bf16 %v2836_v27, %v2824_v9  ;;  %v2859_v2 = vsub.f32 %v14871_v11, %v23701_v19  ;;  %v11722_v59 = vpack.c.bf16 %v24797_v48, %v14441_v20 }
  0x8b   :  { %v23706_v13 = vand.u32 4294901760, %v14907_v40  ;;  %v12244_v50 = vpack.c.bf16 %v2842_v10, %v2830_v16  ;;  %v2848_v18 = vand.u32 4294901760, %v2847_v36  ;;  %v2853_v42 = vsub.f32 %v14888_v24, %v23703_v44  ;;  %v24799_v10 = vld [vmem:[#allocation40_spill] sm:$0xff] }
  0x8c   :  { %11717 = vmatpush1.bf16.msra.mxu1 %v11716_v37  ;;  %v2865_v9 = vsub.f32 %v14892_v21, %v23705_v62  ;;  %12243 = vmatprep.subr.bf16.mxu0 %v12242_v30  ;;  %v2860_v27 = vand.u32 4294901760, %v2859_v2  ;;  %v23707_v8 = vand.u32 4294901760, %v14916_v33  ;;  %v24798_v37 = vld [vmem:[#allocation38_spill] sm:$0xff]  ;;  %v23708_v44 = vand.u32 4294901760, %v14933_v43 }
  0x8d   :  { %11719 = vmatprep.subr.bf16.mxu1 %v11718_v38  ;;  %v2871_v19 = vsub.f32 %v14907_v40, %v23706_v13  ;;  %v11724_v16 = vpack.c.bf16 %v24799_v10, %v24798_v37  ;;  %v2854_v36 = vand.u32 4294901760, %v2853_v42  ;;  %v23709_v20 = vand.u32 4294901760, %v14935_v34  ;;  %v24811_v10 = vld [vmem:[#allocation114_spill] sm:$0xff] }
  0x8e   :  { %12245 = vmatpush1.bf16.msra.mxu0 %v12244_v50  ;;  %v2866_v48 = vand.u32 4294901760, %v2865_v9  ;;  %v12246_v62 = vpack.c.bf16 %v2860_v27, %v2848_v18  ;;  %v2883_v38 = vsub.f32 %v14916_v33, %v23707_v8  ;;  %v11726_v2 = vpack.c.bf16 %v14482_v58, %v14469_v49  ;;  %v24800_v27 = vld [vmem:[#allocation46_spill] sm:$0xff] }
  0x8f   :  { %v2872_v30 = vand.u32 4294901760, %v2871_v19  ;;  %v2877_v42 = vsub.f32 %v14933_v43, %v23708_v44  ;;  %v2889_v50 = vsub.f32 %v14935_v34, %v23709_v20  ;;  %v23711_v18 = vand.u32 4294901760, %v14949_v15 }
  0x90   :  { %11721 = vmatpush1.bf16.msra.mxu1 %v11720_v32  ;;  %v12248_v13 = vpack.c.bf16 %v2866_v48, %v2854_v36  ;;  %12247 = vmatprep.subr.bf16.mxu0 %v12246_v62  ;;  %v2884_v19 = vand.u32 4294901760, %v2883_v38  ;;  %v23712_v9 = vand.u32 4294901760, %v14959_v35  ;;  %v11728_v8 = vpack.c.bf16 %v24800_v27, %v14486_v60  ;;  %v24801_v38 = vld [vmem:[#allocation49_spill] sm:$0xff]  ;;  %v24802_v60 = vld [vmem:[#allocation51_spill] sm:$0xff] }
  0x91   :  { %11723 = vmatprep.subr.bf16.mxu1 %v11722_v59  ;;  %v23714_v32 = vand.u32 4294901760, %v14975_v23  ;;  %v2878_v48 = vand.u32 4294901760, %v2877_v42  ;;  %v2890_v36 = vand.u32 4294901760, %v2889_v50  ;;  %v2895_v44 = vsub.f32 %v14949_v15, %v23711_v18 }
  0x92   :  { %12249 = vmatpush1.bf16.msra.mxu0 %v12248_v13  ;;  %v23716_v20 = vand.u32 4294901760, %v14978_v46  ;;  %v12250_v58 = vpack.c.bf16 %v2884_v19, %v2872_v30  ;;  %v2907_v62 = vsub.f32 %v14959_v35, %v23712_v9  ;;  %v11730_v13 = vpack.c.bf16 %v24801_v38, %v14495_v7 }
  0x93   :  { %v2901_v59 = vsub.f32 %v14975_v23, %v23714_v32  ;;  %v12252_v42 = vpack.c.bf16 %v2890_v36, %v2878_v48  ;;  %v2896_v50 = vand.u32 4294901760, %v2895_v44  ;;  %v23717_v30 = vand.u32 4294901760, %v14993_v45  ;;  %v24803_v32 = vld [vmem:[#allocation52_spill] sm:$0xff] }
  0x94   :  { %11725 = vmatpush1.bf16.msra.mxu1 %v11724_v16  ;;  %v2913_v18 = vsub.f32 %v14978_v46, %v23716_v20  ;;  %12251 = vmatprep.subr.bf16.mxu0 %v12250_v58  ;;  %v2908_v19 = vand.u32 4294901760, %v2907_v62  ;;  %v23718_v27 = vand.u32 4294901760, %v15002_v29  ;;  %v11732_v49 = vpack.c.bf16 %v24803_v32, %v24802_v60  ;;  %v24805_v62 = vld [vmem:[#allocation55_spill] sm:$0xff]  ;;  %v24806_v20 = vld [vmem:[#allocation109_spill] sm:$0xff] }
  0x95   :  { %11727 = vmatprep.subr.bf16.mxu1 %v11726_v2  ;;  %v2902_v9 = vand.u32 4294901760, %v2901_v59  ;;  %v2919_v44 = vsub.f32 %v14993_v45, %v23717_v30  ;;  %v23719_v16 = vand.u32 4294901760, %v15019_v61  ;;  %v23721_v48 = vand.u32 4294901760, %v15021_v31  ;;  %v24804_v2 = vld [vmem:[#allocation54_spill] sm:$0xff] }
  0x96   :  { %12253 = vmatpush1.bf16.msra.mxu0 %v12252_v42  ;;  %v2914_v38 = vand.u32 4294901760, %v2913_v18  ;;  %v12254_v36 = vpack.c.bf16 %v2908_v19, %v2896_v50  ;;  %v2931_v58 = vsub.f32 %v15002_v29, %v23718_v27  ;;  %v11734_v59 = vpack.c.bf16 %v24805_v62, %v24804_v2  ;;  %v24807_v62 = vld [vmem:[#allocation111_spill] sm:$0xff] }
  0x97   :  { %v23722_v32 = vand.u32 4294901760, %v24806_v20  ;;  %v2920_v42 = vand.u32 4294901760, %v2919_v44  ;;  %v2925_v30 = vsub.f32 %v15019_v61, %v23719_v16  ;;  %v2937_v50 = vsub.f32 %v15021_v31, %v23721_v48  ;;  %v24810_v16 = vld [vmem:[#allocation113_spill] sm:$0xff] }
  0x98   :  { %11729 = vmatpush1.bf16.msra.mxu1 %v11728_v8  ;;  %v12256_v18 = vpack.c.bf16 %v2914_v38, %v2902_v9  ;;  %12255 = vmatprep.subr.bf16.mxu0 %v12254_v36  ;;  %v2932_v19 = vand.u32 4294901760, %v2931_v58  ;;  %v23725_v2 = vand.u32 4294901760, %v24807_v62  ;;  %v24808_v8 = vld [vmem:[#allocation56_spill] sm:$0xff]  ;;  %v24809_v9 = vld [vmem:[#allocation58_spill] sm:$0xff]  ;;  %v23726_v7 = vand.u32 4294901760, %v24810_v16 }
  0x99   :  { %11731 = vmatprep.subr.bf16.mxu1 %v11730_v13  ;;  %v2943_v27 = vsub.f32 %v24806_v20, %v23722_v32  ;;  %v11736_v38 = vpack.c.bf16 %v24809_v9, %v24808_v8  ;;  %v2926_v44 = vand.u32 4294901760, %v2925_v30  ;;  %v2938_v60 = vand.u32 4294901760, %v2937_v50  ;;  %v24812_v58 = vld [vmem:[#allocation60_spill] sm:$0xff]  ;;  %v24813_v32 = vld [vmem:[#allocation61_spill] sm:$0xff]  ;;  %v24814_v50 = vld [vmem:[#allocation115_spill] sm:$0xff] }
  0x9a   :  { %12257 = vmatpush1.bf16.msra.mxu0 %v12256_v18  ;;  %v23727_v37 = vand.u32 4294901760, %v24811_v10  ;;  %v12258_v48 = vpack.c.bf16 %v2932_v19, %v2920_v42  ;;  %v2955_v13 = vsub.f32 %v24807_v62, %v23725_v2  ;;  %v11738_v14 = vpack.c.bf16 %v24813_v32, %v24812_v58  ;;  %v24815_v19 = vld [vmem:[#allocation117_spill] sm:$0xff]  ;;  %v24816_v9 = vld [vmem:[#allocation63_spill] sm:$0xff] }
  0x9b   :  { %v2944_v36 = vand.u32 4294901760, %v2943_v27  ;;  %v12260_v12 = vpack.c.bf16 %v2938_v60, %v2926_v44  ;;  %v2949_v30 = vsub.f32 %v24810_v16, %v23726_v7  ;;  %v23730_v42 = vand.u32 4294901760, %v24814_v50 }
  0x9c   :  { %11733 = vmatpush1.bf16.msra.mxu1 %v11732_v49  ;;  %v2961_v18 = vsub.f32 %v24811_v10, %v23727_v37  ;;  %12259 = vmatprep.subr.bf16.mxu0 %v12258_v48  ;;  %v2956_v27 = vand.u32 4294901760, %v2955_v13  ;;  %v23731_v2 = vand.u32 4294901760, %v24815_v19  ;;  %v11740_v32 = vpack.c.bf16 %v24745_v26, %v24816_v9  ;;  %v24817_v49 = vld [vmem:[#allocation119_spill] sm:$0xff]  ;;  %v24818_v37 = vld [vmem:[#allocation120_spill] sm:$0xff]  ;;  %v24819_v13 = vld [vmem:[#allocation65_spill] sm:$0xff] }
  0x9d   :  { %11735 = vmatprep.subr.bf16.mxu1 %v11734_v59  ;;  %v23732_v60 = vand.u32 4294901760, %v24817_v49  ;;  %v2950_v44 = vand.u32 4294901760, %v2949_v30  ;;  %v2967_v7 = vsub.f32 %v24814_v50, %v23730_v42  ;;  %v23733_v8 = vand.u32 4294901760, %v24818_v37  ;;  %v24820_v26 = vld [vmem:[#allocation67_spill] sm:$0xff]  ;;  %v24821_v9 = vld [vmem:[#allocation121_spill] sm:$0xff] }
  0x9e   :  { %12261 = vmatpush1.bf16.msra.mxu0 %v12260_v12  ;;  %v2962_v58 = vand.u32 4294901760, %v2961_v18  ;;  %v12262_v5 = vpack.c.bf16 %v2956_v27, %v2944_v36  ;;  %v2979_v48 = vsub.f32 %v24815_v19, %v23731_v2  ;;  %v11742_v12 = vpack.c.bf16 %v24820_v26, %v24819_v13 }
  0x9f   :  { %v2973_v59 = vsub.f32 %v24817_v49, %v23732_v60  ;;  %v2968_v18 = vand.u32 4294901760, %v2967_v7  ;;  %v2985_v42 = vsub.f32 %v24818_v37, %v23733_v8  ;;  %v23736_v36 = vand.u32 4294901760, %v24821_v9  ;;  %v24828_v37 = vld [vmem:[#allocation127_spill] sm:$0xff] }
  0xa0   :  { %11737 = vmatpush1.bf16.msra.mxu1 %v11736_v38  ;;  %v12264_v30 = vpack.c.bf16 %v2962_v58, %v2950_v44  ;;  %12263 = vmatprep.subr.bf16.mxu0 %v12262_v5  ;;  %v2980_v27 = vand.u32 4294901760, %v2979_v48  ;;  %v23737_v25 = vand.u32 4294901760, %v24822_v39  ;;  %v11744_v60 = vpack.c.bf16 %v24754_v57, %v24823_v53  ;;  %v24824_v38 = vld [vmem:[#allocation125_spill] sm:$0xff]  ;;  %v24825_v44 = vld [vmem:[#allocation126_spill] sm:$0xff] }
  0xa1   :  { %11739 = vmatprep.subr.bf16.mxu1 %v11738_v14  ;;  %v2974_v2 = vand.u32 4294901760, %v2973_v59  ;;  %v2986_v26 = vand.u32 4294901760, %v2985_v42  ;;  %v2991_v7 = vsub.f32 %v24821_v9, %v23736_v36  ;;  %v23738_v58 = vand.u32 4294901760, %v24824_v38  ;;  %v24826_v14 = vld [vmem:[#allocation71_spill] sm:$0xff]  ;;  %v24827_v48 = vld [vmem:[#allocation73_spill] sm:$0xff] }
  0xa2   :  { %12265 = vmatpush1.bf16.msra.mxu0 %v12264_v30  ;;  %v23739_v8 = vand.u32 4294901760, %v24825_v44  ;;  %v12266_v13 = vpack.c.bf16 %v2980_v27, %v2968_v18  ;;  %v3003_v5 = vsub.f32 %v24822_v39, %v23737_v25  ;;  %v11746_v59 = vpack.c.bf16 %v24827_v48, %v24826_v14  ;;  %v24830_v14 = vld [vmem:[#allocation130_spill] sm:$0xff] }
  0xa3   :  { %v23740_v57 = vand.u32 4294901760, %v24828_v37  ;;  %v12268_v42 = vpack.c.bf16 %v2986_v26, %v2974_v2  ;;  %v2992_v30 = vand.u32 4294901760, %v2991_v7  ;;  %v2997_v36 = vsub.f32 %v24824_v38, %v23738_v58  ;;  %v24829_v26 = vld [vmem:[#allocation77_spill] sm:$0xff] }
  0xa4   :  { %11741 = vmatpush1.bf16.msra.mxu1 %v11740_v32  ;;  %v3009_v18 = vsub.f32 %v24825_v44, %v23739_v8  ;;  %12267 = vmatprep.subr.bf16.mxu0 %v12266_v13  ;;  %v3004_v27 = vand.u32 4294901760, %v3003_v5  ;;  %v23749_v48 = vand.u32 4294901760, %v15171_v55  ;;  %v11748_v32 = vpack.c.bf16 %v24829_v26, %v24763_v1  ;;  %v24831_v5 = vld [vmem:[#allocation131_spill] sm:$0xff] }
  0xa5   :  { %11743 = vmatprep.subr.bf16.mxu1 %v11742_v12  ;;  %v3015_v25 = vsub.f32 %v24828_v37, %v23740_v57  ;;  %v2998_v2 = vand.u32 4294901760, %v2997_v36  ;;  %v23745_v58 = vand.u32 4294901760, %v15193_v63  ;;  %v23743_v53 = vand.u32 4294901760, %v24830_v14  ;;  %v24832_v57 = vld [vmem:[#allocation128_spill] sm:$0xff] }
  0xa6   :  { %12269 = vmatpush1.bf16.msra.mxu0 %v12268_v42  ;;  %v3010_v7 = vand.u32 4294901760, %v3009_v18  ;;  %v12270_v8 = vpack.c.bf16 %v3004_v27, %v2992_v30  ;;  %v3027_v12 = vsub.f32 %v15171_v55, %v23749_v48  ;;  %v15456_v37 = vsub.f32 %v24832_v57, %v24831_v5 }
  0xa7   :  { %v3016_v13 = vand.u32 4294901760, %v3015_v25  ;;  %v3021_v36 = vsub.f32 %v15193_v63, %v23745_v58  ;;  %v3033_v42 = vsub.f32 %v24830_v14, %v23743_v53  ;;  %v23744_v25 = vand.u32 4294901760, %v15224_v47  ;;  %v24838_v58 = vld [vmem:[#allocation5_spill] sm:$0xff] }
  0xa8   :  { %11745 = vmatpush1.bf16.msra.mxu1 %v11744_v60  ;;  %v12272_v44 = vpack.c.bf16 %v3010_v7, %v2998_v2  ;;  %12271 = vmatprep.subr.bf16.mxu0 %v12270_v8  ;;  %v3028_v30 = vand.u32 4294901760, %v3027_v12  ;;  %v23746_v18 = vand.u32 4294901760, %v15456_v37  ;;  %v24833_v8 = vld [vmem:[#allocation75_spill] sm:$0xff]  ;;  %v24850_v48 = vand.u32 4294901760, %v24777_v54 }
  0xa9   :  { %11747 = vmatprep.subr.bf16.mxu1 %v11746_v59  ;;  %v3022_v57 = vand.u32 4294901760, %v3021_v36  ;;  %v3034_v27 = vand.u32 4294901760, %v3033_v42  ;;  %v3045_v60 = vsub.f32 %v15224_v47, %v23744_v25  ;;  %v24835_v42 = vld [vmem:[#allocation81_spill] sm:$0xff]  ;;  %v24836_v25 = vld [vmem:[#allocation87_spill] sm:$0xff]  ;;  %vm9244_vm2 = vcmask 1041409  }
  0xaa   :  { %12273 = vmatpush1.bf16.msra.mxu0 %v12272_v44  ;;  %v12274_v2 = vpack.c.bf16 %v3028_v30, %v3016_v13  ;;  %v3039_v7 = vsub.f32 %v15456_v37, %v23746_v18  ;;  %v24834_v44 = vld [vmem:[#allocation83_spill] sm:$0xff]  ;;  %v24837_v13 = vld [vmem:[#allocation89_spill] sm:$0xff]  ;;  %v23747_v18 = vmov 5.605165e-06   ;;  %vm9267_vm3 = vcmask 523264  }
  0xab   :  { %v12276_v53 = vpack.c.bf16 %v3034_v27, %v3022_v57  ;;  %v3046_v12 = vand.u32 4294901760, %v3045_v60  ;;  %v12278_v36 = vpack.c.bf16 %v24777_v54, %v24834_v44  ;;  %v12280_v30 = vpack.c.bf16 %v24837_v13, %v24836_v25  ;;  %v24841_v27 = vld [vmem:[#allocation11_spill] sm:$0xff]  ;;  %v24842_v60 = vld [vmem:[#allocation93_spill] sm:$0xff] }
  0xac   :  { %11749 = vmatpush1.bf16.msra.mxu1 %v11748_v32  ;;  %12275 = vmatprep.subr.bf16.mxu0 %v12274_v2  ;;  %v3040_v59 = vand.u32 4294901760, %v3039_v7  ;;  %v12282_v32 = vpack.c.bf16 %v14720_v17, %v14718_v6  ;;  %v24840_v57 = vmov 0.0050964355   ;;  %v24843_v2 = vld [vmem:[#allocation94_spill] sm:$0xff]  ;;  %v12292_v54 = vpack.c.bf16 %v14844_v3, %v14842_v4 }
  0xad   :  { %1038 = vmatprep.subr.mxu1 %v24833_v8  ;;  %v12284_v7 = vpack.c.bf16 %v24843_v2, %v24842_v60  ;;  %vm11589_vm4 = vcmask 320512  }
  0xae   :  { %12277 = vmatpush1.bf16.msra.mxu0 %v12276_v53  ;;  %v24839_v53 = vld [vmem:[#allocation9_spill] sm:$0xff] }
  0xaf   :  { %3041 = vmatprep.subr.mxu0 %v3040_v59  ;;  %v24844_v59 = vld [vmem:[#allocation86_spill] sm:$0xff] }
  0xb0   :  { %1041 = vmatpush1.msra.mxu1 %v24835_v42  ;;  %v24855_v42 = vand.u32 4294901760, %v14720_v17  ;;  %v24859_v17 = vand.u32 4294901760, %v24790_v56 }
  0xb1   :  { %11751 = vmatprep.subr.bf16.mxu1 %v24838_v58  ;;  %1059 = vmatmul.mubr.f32.vlgmr.msra.gmra.mrb[0].mxu1 %v23747_v18  ;;  %v12286_v58 = vpack.c.bf16 %v24790_v56, %v24786_v0  ;;  %v24845_v18 = vld [vmem:[#allocation14_spill] sm:$0xff]  ;;  %v24865_v56 = vand.u32 4294901760, %v14821_v41 }
  0xb2   :  { %3047 = vmatpush1.msra.mxu0 %v3046_v12  ;;  %11753 = vmatpush1.bf16.msra.mxu1 %v24839_v53  ;;  %v24846_v12 = vld [vmem:[#allocation82_spill] sm:$0xff]  ;;  %v24847_v53 = vld [vmem:[#allocation17_spill] sm:$0xff] }
  0xb3   :  { %12279 = vmatprep.subr.bf16.mxu0 %v12278_v36  ;;  %3064 = vmatmul.mubr.f32.vlgmr.msra.gmra.mrb[2].mxu0 %v24840_v57  ;;  %v12288_v36 = vpack.c.bf16 %v14792_v51, %v14790_v52 }
  0xb4   :  { %12281 = vmatpush1.bf16.msra.mxu0 %v12280_v30  ;;  %11755 = vmatprep.subr.bf16.mxu1 %v24841_v27  ;;  %v12290_v30 = vpack.c.bf16 %v14821_v41, %v14810_v28  ;;  %v24849_v27 = vand.u32 4294901760, %v24834_v44  ;;  %v24857_v44 = vand.u32 4294901760, %v24843_v2  ;;  %v24862_v2 = vand.u32 4294901760, %v14790_v52 }
  0xb5   :  { %12283 = vmatprep.subr.bf16.mxu0 %v12282_v32  ;;  %1182 = vmatprep.mubr.f32.mxu1 %v24844_v59  ;;  %v24848_v32 = vld [vmem:[#allocation20_spill] sm:$0xff]  ;;  %v24868_v52 = vand.u32 4294901760, %v14842_v4  ;;  %v24870_v41 = vand.u32 4294901760, %v14860_v22  ;;  %v24874_v4 = vand.u32 4294901760, %v14892_v21 }
  0xb6   :  { %11757 = vmatpush1.bf16.msra.mxu1 %v24845_v18  ;;  %3236 = vmatprep.mubr.f32.mxu0 %v24846_v12  ;;  %v15502_v57 = vpack.c.bf16 %v24850_v48, %v24849_v27  ;;  %v24851_v18 = vld [vmem:[#allocation23_spill] sm:$0xff]  ;;  %v24856_v48 = vand.u32 4294901760, %v24842_v60  ;;  %v12296_v60 = vpack.c.bf16 %v14892_v21, %v14888_v24  ;;  %v24878_v21 = vand.u32 4294901760, %v14933_v43 }
  0xb7   :  { %11759 = vmatprep.subr.bf16.mxu1 %v24847_v53  ;;  %v24852_v53 = vand.u32 4294901760, %v24836_v25  ;;  %v12294_v25 = vpack.c.bf16 %v14871_v11, %v14860_v22  ;;  %v24876_v22 = vand.u32 4294901760, %v14907_v40 }
  0xb8   :  { %12285 = vmatpush1.bf16.msra.mxu0 %v12284_v7  ;;  %v24853_v7 = vand.u32 4294901760, %v24837_v13  ;;  %v24860_v13 = vld [vmem:[#allocation26_spill] sm:$0xff] }
  0xb9   :  { %12287 = vmatprep.subr.bf16.mxu0 %v12286_v58  ;;  %v24854_v58 = vand.u32 4294901760, %v14718_v6  ;;  %v24858_v6 = vand.u32 4294901760, %v24786_v0  ;;  %v24864_v0 = vand.u32 4294901760, %v14810_v28  ;;  %v12300_v28 = vpack.c.bf16 %v14935_v34, %v14933_v43 }
  0xba   :  { %11761 = vmatpush1.bf16.msra.mxu1 %v24848_v32  ;;  %v15509_v12 = vpack.c.bf16 %v24853_v7, %v24852_v53  ;;  %v15523_v32 = vpack.c.bf16 %v24857_v44, %v24856_v48  ;;  %v12298_v53 = vpack.c.bf16 %v14916_v33, %v14907_v40  ;;  %v24866_v7 = vld [vmem:[#allocation32_spill] sm:$0xff]  ;;  %v24871_v48 = vand.u32 4294901760, %v14871_v11 }
  0xbb   :  { %11763 = vmatprep.subr.bf16.mxu1 %v24851_v18  ;;  %v15515_v5 = vpack.c.bf16 %v24855_v42, %v24854_v58  ;;  %v15531_v42 = vpack.c.bf16 %v24859_v17, %v24858_v6  ;;  %v15547_v18 = vpack.c.bf16 %v24865_v56, %v24864_v0  ;;  %v24867_v58 = vld [vmem:[#allocation36_spill] sm:$0xff]  ;;  %v24872_v6 = vld [vmem:[#allocation39_spill] sm:$0xff]  ;;  %v24877_v11 = vand.u32 4294901760, %v14916_v33 }
  0xbc   :  { %12289 = vmatpush1.bf16.msra.mxu0 %v12288_v36  ;;  %v24861_v36 = vld [vmem:[#allocation30_spill] sm:$0xff]  ;;  %v15565_v44 = vpack.c.bf16 %v24871_v48, %v24870_v41  ;;  %v24880_v0 = vld [vmem:[#allocation44_spill] sm:$0xff]  ;;  %v24881_v33 = vand.u32 4294901760, %v14949_v15  ;;  %v24882_v40 = vand.u32 4294901760, %v14959_v35  ;;  %v24884_v43 = vand.u32 4294901760, %v14975_v23  ;;  %v24889_v41 = vld [vmem:[#allocation53_spill] sm:$0xff] }
  0xbd   :  { %12291 = vmatprep.subr.bf16.mxu0 %v12290_v30  ;;  %v24863_v30 = vand.u32 4294901760, %v14792_v51  ;;  %v24869_v51 = vand.u32 4294901760, %v14844_v3  ;;  %v24873_v3 = vand.u32 4294901760, %v14888_v24  ;;  %v12306_v24 = vpack.c.bf16 %v15002_v29, %v14993_v45 }
  0xbe   :  { %11765 = vmatpush1.bf16.msra.mxu1 %v24860_v13  ;;  %v24875_v13 = vld [vmem:[#allocation41_spill] sm:$0xff]  ;;  %v15598_v56 = vpack.c.bf16 %v24882_v40, %v24881_v33  ;;  %v24906_v40 = vld [vmem:[#allocation66_spill] sm:$0xff] }
  0xbf   :  { %11767 = vmatprep.subr.bf16.mxu1 %v24861_v36  ;;  %v15541_v27 = vpack.c.bf16 %v24863_v30, %v24862_v2  ;;  %v15574_v17 = vpack.c.bf16 %v24874_v4, %v24873_v3  ;;  %v15581_v36 = vpack.c.bf16 %v24877_v11, %v24876_v22  ;;  %v24879_v2 = vand.u32 4294901760, %v14935_v34  ;;  %v24894_v4 = vld [vmem:[#allocation57_spill] sm:$0xff]  ;;  %v24897_v22 = vld [vmem:[#allocation59_spill] sm:$0xff] }
  0xc0   :  { %12293 = vmatpush1.bf16.msra.mxu0 %v12292_v54  ;;  %v15557_v54 = vpack.c.bf16 %v24869_v51, %v24868_v52  ;;  %v24885_v34 = vand.u32 4294901760, %v14978_v46  ;;  %v24887_v52 = vand.u32 4294901760, %v15002_v29  ;;  %v24893_v29 = vand.u32 4294901760, %v24807_v62 }
  0xc1   :  { %12295 = vmatprep.subr.bf16.mxu0 %v12294_v25  ;;  %v12302_v25 = vpack.c.bf16 %v14959_v35, %v14949_v15  ;;  %v15591_v30 = vpack.c.bf16 %v24879_v2, %v24878_v21  ;;  %v12310_v15 = vpack.c.bf16 %v24807_v62, %v24806_v20  ;;  %v24886_v35 = vand.u32 4294901760, %v14993_v45 }
  0xc2   :  { %11769 = vmatpush1.bf16.msra.mxu1 %v24866_v7  ;;  %v12308_v7 = vpack.c.bf16 %v15021_v31, %v15019_v61  ;;  %v24892_v45 = vand.u32 4294901760, %v24806_v20  ;;  %v12314_v3 = vpack.c.bf16 %v24815_v19, %v24814_v50  ;;  %v24898_v20 = vand.u32 4294901760, %v24814_v50 }
  0xc3   :  { %11771 = vmatprep.subr.bf16.mxu1 %v24867_v58  ;;  %v15607_v58 = vpack.c.bf16 %v24885_v34, %v24884_v43  ;;  %v15615_v51 = vpack.c.bf16 %v24887_v52, %v24886_v35  ;;  %v24899_v62 = vand.u32 4294901760, %v24815_v19  ;;  %v24904_v50 = vand.u32 4294901760, %v24821_v9 }
  0xc4   :  { %12297 = vmatpush1.bf16.msra.mxu0 %v12296_v60  ;;  %v12304_v60 = vpack.c.bf16 %v14978_v46, %v14975_v23  ;;  %v24890_v23 = vand.u32 4294901760, %v15019_v61  ;;  %v24891_v46 = vand.u32 4294901760, %v15021_v31  ;;  %v24895_v31 = vand.u32 4294901760, %v24810_v16 }
  0xc5   :  { %12299 = vmatprep.subr.bf16.mxu0 %v12298_v53  ;;  %v24883_v53 = vld [vmem:[#allocation48_spill] sm:$0xff]  ;;  %v24896_v61 = vand.u32 4294901760, %v24811_v10  ;;  %v15647_v11 = vpack.c.bf16 %v24899_v62, %v24898_v20  ;;  %v24905_v19 = vand.u32 4294901760, %v24822_v39  ;;  %v24912_v35 = vand.u32 4294901760, %v15171_v55  ;;  %v24925_v62 = vld [vmem:[#allocation10_spill] sm:$0xff] }
  0xc6   :  { %11773 = vmatpush1.bf16.msra.mxu1 %v24872_v6  ;;  %v15623_v48 = vpack.c.bf16 %v24891_v46, %v24890_v23  ;;  %v15631_v6 = vpack.c.bf16 %v24893_v29, %v24892_v45  ;;  %v24916_v23 = vand.u32 4294901760, %v24830_v14  ;;  %v24917_v45 = vld [vmem:[#allocation76_spill] sm:$0xff]  ;;  %v24919_v29 = vld [vmem:[#allocation6_spill] sm:$0xff] }
  0xc7   :  { %11775 = vmatprep.subr.bf16.mxu1 %v24875_v13  ;;  %v15640_v13 = vpack.c.bf16 %v24896_v61, %v24895_v31  ;;  %v15664_v33 = vpack.c.bf16 %v24905_v19, %v24904_v50  ;;  %v23750_v50 = vmov 5.6028366e-06   ;;  %v24932_v19 = vld [vmem:[#allocation15_spill] sm:$0xff] }
  0xc8   :  { %12301 = vmatpush1.bf16.msra.mxu0 %v12300_v28  ;;  %v24888_v28 = vld [vmem:[#allocation50_spill] sm:$0xff] }
  0xc9   :  { %12303 = vmatprep.subr.bf16.mxu0 %v12302_v25  ;;  %v12312_v25 = vpack.c.bf16 %v24811_v10, %v24810_v16  ;;  %v12318_v16 = vpack.c.bf16 %v24822_v39, %v24821_v9  ;;  %v24901_v10 = vand.u32 4294901760, %v24817_v49 }
  0xca   :  { %11777 = vmatpush1.bf16.msra.mxu1 %v24880_v0  ;;  %v24903_v0 = vld [vmem:[#allocation62_spill] sm:$0xff] }
  0xcb   :  { %11779 = vmatprep.subr.bf16.mxu1 %v24883_v53  ;;  %v24907_v53 = vld [vmem:[#allocation126_spill] sm:$0xff] }
  0xcc   :  { %12305 = vmatpush1.bf16.msra.mxu0 %v12304_v60  ;;  %v24900_v60 = vld [vmem:[#allocation120_spill] sm:$0xff]  ;;  %v24909_v43 = vand.u32 4294901760, %v24907_v53 }
  0xcd   :  { %12307 = vmatprep.subr.bf16.mxu0 %v12306_v24  ;;  %v12316_v24 = vpack.c.bf16 %v24900_v60, %v24817_v49  ;;  %v24902_v21 = vand.u32 4294901760, %v24900_v60  ;;  %v24908_v49 = vand.u32 4294901760, %v24824_v38  ;;  %v24926_v60 = vand.u32 4294901760, %v24925_v62 }
  0xce   :  { %11781 = vmatpush1.bf16.msra.mxu1 %v24888_v28  ;;  %v24913_v28 = vld [vmem:[#allocation68_spill] sm:$0xff] }
  0xcf   :  { %11783 = vmatprep.subr.bf16.mxu1 %v24889_v41  ;;  %v15657_v2 = vpack.c.bf16 %v24902_v21, %v24901_v10  ;;  %v15673_v34 = vpack.c.bf16 %v24909_v43, %v24908_v49  ;;  %v24914_v41 = vld [vmem:[#allocation72_spill] sm:$0xff]  ;;  %v24930_v10 = vld [vmem:[#allocation13_spill] sm:$0xff] }
  0xd0   :  { %12309 = vmatpush1.bf16.msra.mxu0 %v12308_v7  ;;  %v12320_v7 = vpack.c.bf16 %v24907_v53, %v24824_v38  ;;  %v24915_v38 = vand.u32 4294901760, %v15193_v63  ;;  %v24931_v21 = vand.u32 4294901760, %v24930_v10  ;;  %v24934_v53 = vld [vmem:[#allocation16_spill] sm:$0xff] }
  0xd1   :  { %12311 = vmatprep.subr.bf16.mxu0 %v12310_v15  ;;  %v24910_v15 = vld [vmem:[#allocation127_spill] sm:$0xff]  ;;  %v24936_v43 = vld [vmem:[#allocation84_spill] sm:$0xff] }
  0xd2   :  { %11785 = vmatpush1.bf16.msra.mxu1 %v24894_v4  ;;  %v12322_v9 = vpack.c.bf16 %v15171_v55, %v24910_v15  ;;  %v24911_v39 = vand.u32 4294901760, %v24910_v15  ;;  %v15689_v46 = vpack.c.bf16 %v24916_v23, %v24915_v38  ;;  %v24918_v55 = vld [vmem:[#allocation78_spill] sm:$0xff]  ;;  %v24921_v4 = vld [vmem:[#allocation7_spill] sm:$0xff]  ;;  %v24937_v15 = vmov 5.605165e-06   ;;  %v24942_v38 = vld [vmem:[#allocation88_spill] sm:$0xff] }
  0xd3   :  { %11787 = vmatprep.subr.bf16.mxu1 %v24897_v22  ;;  %v24922_v31 = vand.u32 4294901760, %v24921_v4  ;;  %v24923_v22 = vld [vmem:[#allocation8_spill] sm:$0xff]  ;;  %v24943_v23 = vld [vmem:[#allocation91_spill] sm:$0xff] }
  0xd4   :  { %12313 = vmatpush1.bf16.msra.mxu0 %v12312_v25  ;;  %v15681_v52 = vpack.c.bf16 %v24912_v35, %v24911_v39  ;;  %v12324_v25 = vpack.c.bf16 %v24830_v14, %v15193_v63  ;;  %v24924_v20 = vand.u32 4294901760, %v24923_v22  ;;  %v24928_v63 = vld [vmem:[#allocation12_spill] sm:$0xff]  ;;  %v24940_v35 = vld [vmem:[#allocation19_spill] sm:$0xff]  ;;  %v24951_v22 = vld [vmem:[#allocation25_spill] sm:$0xff] }
  0xd5   :  { %12315 = vmatprep.subr.bf16.mxu0 %v12314_v3  ;;  %v24920_v3 = vand.u32 4294901760, %v24919_v29  ;;  %v24929_v14 = vand.u32 4294901760, %v24928_v63  ;;  %v24947_v29 = vld [vmem:[#allocation22_spill] sm:$0xff] }
  0xd6   :  { %11789 = vmatpush1.bf16.msra.mxu1 %v24903_v0 }
  0xd7   :  { %11791 = vmatprep.subr.bf16.mxu1 %v24906_v40  ;;  %v11798_v61 = vpack.c.bf16 %v24922_v31, %v24920_v3  ;;  %v11802_v0 = vpack.c.bf16 %v24931_v21, %v24929_v14  ;;  %v24933_v40 = vand.u32 4294901760, %v24932_v19  ;;  %v24948_v3 = vand.u32 4294901760, %v24947_v29  ;;  %v24949_v31 = vld [vmem:[#allocation24_spill] sm:$0xff] }
  0xd8   :  { %12317 = vmatpush1.bf16.msra.mxu0 %v12316_v24  ;;  %v11800_v24 = vpack.c.bf16 %v24926_v60, %v24924_v20  ;;  %v24952_v20 = vand.u32 4294901760, %v24951_v22  ;;  %v24953_v60 = vld [vmem:[#allocation92_spill] sm:$0xff]  ;;  %v24974_v22 = vld [vmem:[#allocation101_spill] sm:$0xff] }
  0xd9   :  { %12319 = vmatprep.subr.bf16.mxu0 %v12318_v16  ;;  %v24927_v16 = vld [vmem:[#allocation79_spill] sm:$0xff]  ;;  %v24957_v14 = vld [vmem:[#allocation28_spill] sm:$0xff] }
  0xda   :  { %11793 = vmatpush1.bf16.msra.mxu1 %v24913_v28  ;;  %v24941_v28 = vand.u32 4294901760, %v24940_v35  ;;  %v24958_v10 = vand.u32 4294901760, %v24957_v14 }
  0xdb   :  { %11795 = vmatprep.subr.bf16.mxu1 %v24914_v41 }
  0xdc   :  { %12321 = vmatpush1.bf16.msra.mxu0 %v12320_v7  ;;  %v24935_v7 = vand.u32 4294901760, %v24934_v53 }
  0xdd   :  { %12323 = vmatprep.subr.bf16.mxu0 %v12322_v9  ;;  %v24938_v9 = vld [vmem:[#allocation18_spill] sm:$0xff] }
  0xde   :  { %11797 = vmatpush1.bf16.msra.mxu1 %v24917_v45  ;;  %v11804_v49 = vpack.c.bf16 %v24935_v7, %v24933_v40  ;;  %v24939_v39 = vand.u32 4294901760, %v24938_v9  ;;  %v24945_v45 = vld [vmem:[#allocation21_spill] sm:$0xff]  ;;  %v24961_v40 = vld [vmem:[#allocation31_spill] sm:$0xff] }
  0xdf   :  { %1162 = vmatprep.subr.mxu1 %v24918_v55  ;;  %v24946_v55 = vand.u32 4294901760, %v24945_v45  ;;  %v24962_v53 = vand.u32 4294901760, %v24961_v40  ;;  %v24964_v9 = vld [vmem:[#allocation99_spill] sm:$0xff] }
  0xe0   :  { %12325 = vmatpush1.bf16.msra.mxu0 %v12324_v25  ;;  %v11806_v41 = vpack.c.bf16 %v24941_v28, %v24939_v39  ;;  %v24944_v25 = vld [vmem:[#allocation80_spill] sm:$0xff]  ;;  %v24965_v39 = vld [vmem:[#allocation33_spill] sm:$0xff]  ;;  %v24967_v28 = vld [vmem:[#allocation34_spill] sm:$0xff] }
  0xe1   :  { %3216 = vmatprep.subr.mxu0 %v15456_v37  ;;  %v11808_v4 = vpack.c.bf16 %v24948_v3, %v24946_v55  ;;  %v24966_v35 = vand.u32 4294901760, %v24965_v39  ;;  %v24969_v55 = vld [vmem:[#allocation35_spill] sm:$0xff]  ;;  %v24971_v3 = vld [vmem:[#allocation37_spill] sm:$0xff] }
  0xe2   :  { %1164 = vmatpush1.msra.mxu1 %v24927_v16  ;;  %v24955_v16 = vld [vmem:[#allocation27_spill] sm:$0xff]  ;;  %v24970_v29 = vand.u32 4294901760, %v24969_v55  ;;  %v24985_v39 = vld [vmem:[#allocation45_spill] sm:$0xff] }
  0xe3   :  { %11799 = vmatprep.subr.bf16.mxu1 %v11798_v61  ;;  %1183 = vmatmul.mubr.f32.vlgmr.msra.gmra.mrb[0].mxu1 %v23750_v50  ;;  %v24950_v61 = vand.u32 4294901760, %v24949_v31  ;;  %v24956_v63 = vand.u32 4294901760, %v24955_v16  ;;  %v24977_v16 = vld [vmem:[#allocation40_spill] sm:$0xff]  ;;  %v24989_v55 = vld [vmem:[#allocation47_spill] sm:$0xff] }
  0xe4   :  { %3219 = vmatpush1.msra.mxu0 %v15224_v47  ;;  %11801 = vmatpush1.bf16.msra.mxu1 %v11800_v24  ;;  %v24954_v24 = vld [vmem:[#allocation96_spill] sm:$0xff] }
  0xe5   :  { %12327 = vmatprep.subr.bf16.mxu0 %v24936_v43  ;;  %3237 = vmatmul.mubr.f32.vlgmr.msra.gmra.mrb[2].mxu0 %v24937_v15  ;;  %v11810_v62 = vpack.c.bf16 %v24952_v20, %v24950_v61  ;;  %v11812_v21 = vpack.c.bf16 %v24958_v10, %v24956_v63  ;;  %v24973_v61 = vld [vmem:[#allocation100_spill] sm:$0xff]  ;;  %v24975_v20 = vld [vmem:[#allocation38_spill] sm:$0xff]  ;;  %v24978_v63 = vand.u32 4294901760, %v24977_v16  ;;  %v24995_v16 = vld [vmem:[#allocation51_spill] sm:$0xff] }
  0xe6   :  { %12329 = vmatpush1.bf16.msra.mxu0 %v24942_v38  ;;  %11803 = vmatprep.subr.bf16.mxu1 %v11802_v0  ;;  %v24959_v0 = vld [vmem:[#allocation29_spill] sm:$0xff]  ;;  %v24979_v10 = vld [vmem:[#allocation42_spill] sm:$0xff]  ;;  %v25017_v50 = vld [vmem:[#allocation64_spill] sm:$0xff] }
  0xe7   :  { %12331 = vmatprep.subr.bf16.mxu0 %v24943_v23  ;;  %1404 = vmatprep.mubr.f32.mxu1 %v24944_v25  ;;  %v24960_v19 = vand.u32 4294901760, %v24959_v0  ;;  %v24981_v0 = vld [vmem:[#allocation43_spill] sm:$0xff]  ;;  %v25027_v15 = vld [vmem:[#allocation70_spill] sm:$0xff] }
  0xe8   :  { %11805 = vmatpush1.bf16.msra.mxu1 %v11804_v49  ;;  %3360 = vmatprep.mubr.f32.mxu0 %v24844_v59  ;;  %v24963_v49 = vld [vmem:[#allocation98_spill] sm:$0xff] }
  0xe9   :  { %11807 = vmatprep.subr.bf16.mxu1 %v11806_v41  ;;  %v11814_v7 = vpack.c.bf16 %v24962_v53, %v24960_v19  ;;  %v24968_v41 = vand.u32 4294901760, %v24967_v28  ;;  %v24982_v19 = vand.u32 4294901760, %v24981_v0  ;;  %v24983_v53 = vld [vmem:[#allocation102_spill] sm:$0xff] }
  0xea   :  { %12333 = vmatpush1.bf16.msra.mxu0 %v24953_v60  ;;  %v24987_v28 = vld [vmem:[#allocation46_spill] sm:$0xff] }
  0xeb   :  { %12335 = vmatprep.subr.bf16.mxu0 %v24954_v24  ;;  %v11816_v45 = vpack.c.bf16 %v24968_v41, %v24966_v35  ;;  %v24986_v35 = vand.u32 4294901760, %v24985_v39  ;;  %v24988_v41 = vand.u32 4294901760, %v24987_v28  ;;  %v24999_v0 = vld [vmem:[#allocation54_spill] sm:$0xff]  ;;  %v25001_v39 = vld [vmem:[#allocation55_spill] sm:$0xff] }
  0xec   :  { %11809 = vmatpush1.bf16.msra.mxu1 %v11808_v4  ;;  %v24972_v4 = vand.u32 4294901760, %v24971_v3  ;;  %v24991_v3 = vld [vmem:[#allocation49_spill] sm:$0xff]  ;;  %v25003_v28 = vld [vmem:[#allocation106_spill] sm:$0xff] }
  0xed   :  { %11811 = vmatprep.subr.bf16.mxu1 %v11810_v62  ;;  %v24976_v62 = vand.u32 4294901760, %v24975_v20  ;;  %v24993_v20 = vld [vmem:[#allocation104_spill] sm:$0xff]  ;;  %v16163_v60 = vld [vmem:[%s23438_s0 + $0x410] sm:$0xff] }
  0xee   :  { %12337 = vmatpush1.bf16.msra.mxu0 %v24963_v49  ;;  %v11818_v31 = vpack.c.bf16 %v24972_v4, %v24970_v29  ;;  %v24990_v29 = vand.u32 4294901760, %v24989_v55  ;;  %v24992_v4 = vand.u32 4294901760, %v24991_v3  ;;  %v25005_v55 = vld [vmem:[#allocation56_spill] sm:$0xff]  ;;  %v25007_v3 = vld [vmem:[#allocation58_spill] sm:$0xff] }
  0xef   :  { %12339 = vmatprep.subr.bf16.mxu0 %v24964_v9  ;;  %v11820_v14 = vpack.c.bf16 %v24978_v63, %v24976_v62  ;;  %v24994_v62 = vld [vmem:[#allocation105_spill] sm:$0xff]  ;;  %v24996_v63 = vand.u32 4294901760, %v24995_v16  ;;  %v25009_v16 = vld [vmem:[#allocation60_spill] sm:$0xff] }
  0xf0   :  { %11813 = vmatpush1.bf16.msra.mxu1 %v11812_v21  ;;  %v24980_v21 = vand.u32 4294901760, %v24979_v10  ;;  %v24997_v10 = vld [vmem:[#allocation52_spill] sm:$0xff] }
  0xf1   :  { %11815 = vmatprep.subr.bf16.mxu1 %v11814_v7  ;;  %v24984_v7 = vld [vmem:[#allocation103_spill] sm:$0xff] }
  0xf2   :  { %12341 = vmatpush1.bf16.msra.mxu0 %v24973_v61  ;;  %v11822_v40 = vpack.c.bf16 %v24982_v19, %v24980_v21  ;;  %v25000_v19 = vand.u32 4294901760, %v24999_v0  ;;  %v25013_v0 = vld [vmem:[#allocation108_spill] sm:$0xff] }
  0xf3   :  { %12343 = vmatprep.subr.bf16.mxu0 %v24974_v22 }
  0xf4   :  { %11817 = vmatpush1.bf16.msra.mxu1 %v11816_v45  ;;  %v11824_v45 = vpack.c.bf16 %v24988_v41, %v24986_v35  ;;  %v25004_v41 = vld [vmem:[#allocation107_spill] sm:$0xff] }
  0xf5   :  { %11819 = vmatprep.subr.bf16.mxu1 %v11818_v31  ;;  %v11826_v31 = vpack.c.bf16 %v24992_v4, %v24990_v29  ;;  %v25006_v29 = vand.u32 4294901760, %v25005_v55  ;;  %v25019_v55 = vld [vmem:[#allocation65_spill] sm:$0xff] }
  0xf6   :  { %12345 = vmatpush1.bf16.msra.mxu0 %v24983_v53 }
  0xf7   :  { %12347 = vmatprep.subr.bf16.mxu0 %v24984_v7 }
  0xf8   :  { %11821 = vmatpush1.bf16.msra.mxu1 %v11820_v14  ;;  %v24998_v14 = vand.u32 4294901760, %v24997_v10  ;;  %v25010_v10 = vand.u32 4294901760, %v25009_v16  ;;  %v25023_v16 = vld [vmem:[#allocation112_spill] sm:$0xff] }
  0xf9   :  { %11823 = vmatprep.subr.bf16.mxu1 %v11822_v40  ;;  %v25002_v40 = vand.u32 4294901760, %v25001_v39  ;;  %v25014_v39 = vld [vmem:[#allocation110_spill] sm:$0xff] }
  0xfa   :  { %12349 = vmatpush1.bf16.msra.mxu0 %v24993_v20  ;;  %v11828_v21 = vpack.c.bf16 %v24998_v14, %v24996_v63  ;;  %v25011_v63 = vld [vmem:[#allocation61_spill] sm:$0xff] }
  0xfb   :  { %12351 = vmatprep.subr.bf16.mxu0 %v24994_v62  ;;  %v11830_v35 = vpack.c.bf16 %v25002_v40, %v25000_v19  ;;  %v25015_v19 = vld [vmem:[#allocation63_spill] sm:$0xff]  ;;  %v25058_v62 = vmov 5.6028366e-06  }
  0xfc   :  { %11825 = vmatpush1.bf16.msra.mxu1 %v11824_v45  ;;  %v25008_v45 = vand.u32 4294901760, %v25007_v3  ;;  %v25016_v40 = vand.u32 4294901760, %v25015_v19  ;;  %v25020_v3 = vand.u32 4294901760, %v25019_v55  ;;  %v25029_v19 = vld [vmem:[#allocation71_spill] sm:$0xff]  ;;  %v25033_v55 = vld [vmem:[#allocation118_spill] sm:$0xff] }
  0xfd   :  { %11827 = vmatprep.subr.bf16.mxu1 %v11826_v31  ;;  %v25012_v31 = vand.u32 4294901760, %v25011_v63  ;;  %v25024_v63 = vld [vmem:[#allocation116_spill] sm:$0xff] }
  0xfe   :  { %12353 = vmatpush1.bf16.msra.mxu0 %v25003_v28  ;;  %v11832_v4 = vpack.c.bf16 %v25008_v45, %v25006_v29  ;;  %v25021_v29 = vld [vmem:[#allocation67_spill] sm:$0xff] }
  0xff   :  { %12355 = vmatprep.subr.bf16.mxu0 %v25004_v41  ;;  %v11834_v14 = vpack.c.bf16 %v25012_v31, %v25010_v10  ;;  %v25025_v10 = vld [vmem:[#allocation69_spill] sm:$0xff] }
 0x100   :  { %11829 = vmatpush1.bf16.msra.mxu1 %v11828_v21  ;;  %v25018_v21 = vand.u32 4294901760, %v25017_v50  ;;  %v25026_v31 = vand.u32 4294901760, %v25025_v10  ;;  %v25030_v50 = vand.u32 4294901760, %v25029_v19  ;;  %v25036_v10 = vand.u32 4294901760, %v24829_v26  ;;  %v15870_v26 = vld [vmem:[%s23438_s0 + $0x118] sm:$0xff]  ;;  %v25043_v19 = vld [vmem:[#allocation129_spill] sm:$0xff] }
 0x101   :  { %11831 = vmatprep.subr.bf16.mxu1 %v11830_v35  ;;  %v25022_v35 = vand.u32 4294901760, %v25021_v29  ;;  %v15828_v29 = vld [vmem:[%s23438_s0 + $0x10] sm:$0xff] }
 0x102   :  { %12357 = vmatpush1.bf16.msra.mxu0 %v25013_v0  ;;  %v11836_v59 = vpack.c.bf16 %v25018_v21, %v25016_v40  ;;  %v25031_v40 = vld [vmem:[#allocation73_spill] sm:$0xff]  ;;  %v15918_v0 = vld [vmem:[%s23438_s0 + $0x198] sm:$0xff] }
 0x103   :  { %12359 = vmatprep.subr.bf16.mxu0 %v25014_v39  ;;  %v11838_v45 = vpack.c.bf16 %v25022_v35, %v25020_v3  ;;  %v15817_v3 = vld [vmem:[%s23438_s0 + $0x18] sm:$0xff]  ;;  %v15833_v35 = vld [vmem:[%s23438_s0 + $0x50] sm:$0xff] }
 0x104   :  { %11833 = vmatpush1.bf16.msra.mxu1 %v11832_v4  ;;  %v25028_v4 = vand.u32 4294901760, %v25027_v15  ;;  %v25034_v15 = vld [vmem:[#allocation122_spill] sm:$0xff] }
 0x105   :  { %11835 = vmatprep.subr.bf16.mxu1 %v11834_v14  ;;  %v25032_v14 = vand.u32 4294901760, %v25031_v40  ;;  %v15849_v40 = vld [vmem:[%s23438_s0 + $0xd8] sm:$0xff] }
 0x106   :  { %12361 = vmatpush1.bf16.msra.mxu0 %v25023_v16  ;;  %v11840_v39 = vpack.c.bf16 %v25028_v4, %v25026_v31  ;;  %v25039_v4 = vand.u32 4294901760, %v24833_v8  ;;  %v25047_v8 = vld [vmem:[#allocation131_spill] sm:$0xff] }
 0x107   :  { %12363 = vmatprep.subr.bf16.mxu0 %v25024_v63  ;;  %v11842_v21 = vpack.c.bf16 %v25032_v14, %v25030_v50  ;;  %v15844_v50 = vld [vmem:[%s23438_s0 + $0x98] sm:$0xff]  ;;  %v25038_v14 = vld [vmem:[#allocation74_spill] sm:$0xff]  ;;  %v25051_v63 = vand.u32 4294901760, %v15849_v40 }
 0x108   :  { %11837 = vmatpush1.bf16.msra.mxu1 %v11836_v59  ;;  %v15822_v59 = vld [vmem:[%s23438_s0 + $0x58] sm:$0xff]  ;;  %v25050_v16 = vand.u32 4294901760, %v15844_v50 }
 0x109   :  { %11839 = vmatprep.subr.bf16.mxu1 %v11838_v45  ;;  %v25035_v45 = vand.u32 4294901760, %v24763_v1  ;;  %v15875_v1 = vld [vmem:[%s23438_s0 + $0x158] sm:$0xff] }
 0x10a   :  { %12365 = vmatpush1.bf16.msra.mxu0 %v25033_v55 }
 0x10b   :  { %12367 = vmatprep.subr.bf16.mxu0 %v25034_v15  ;;  %v11844_v31 = vpack.c.bf16 %v25036_v10, %v25035_v45  ;;  %v15863_v45 = vld [vmem:[%s23438_s0 + $0xd0] sm:$0xff]  ;;  %v25045_v15 = vand.u32 4294901760, %v15833_v35 }
 0x10c   :  { %11841 = vmatpush1.bf16.msra.mxu1 %v11840_v39  ;;  %v25037_v39 = vld [vmem:[#allocation124_spill] sm:$0xff] }
 0x10d   :  { %11843 = vmatprep.subr.bf16.mxu1 %v11842_v21  ;;  %v15858_v21 = vld [vmem:[%s23438_s0 + $0x90] sm:$0xff] }
 0x10e   :  { %12369 = vmatpush1.bf16.msra.mxu0 %v25037_v39  ;;  %v25044_v39 = vand.u32 4294901760, %v15828_v29 }
 0x10f   :  { %12371 = vmatprep.subr.bf16.mxu0 %v25038_v14  ;;  %v25040_v14 = vand.u32 4294901760, %v15817_v3 }
 0x110   :  { %11845 = vmatpush1.bf16.msra.mxu1 %v11844_v31  ;;  %v25041_v31 = vand.u32 4294901760, %v15822_v59  ;;  %v15890_v55 = vpack.c.bf16 %v25045_v15, %v25044_v39  ;;  %v15905_v15 = vld [vmem:[%s23438_s0 + $0x150] sm:$0xff]  ;;  %v25048_v39 = vld [vmem:[#allocation81_spill] sm:$0xff] }
 0x111   :  { %1384 = vmatprep.subr.mxu1 %v25039_v4  ;;  %v15913_v4 = vpack.c.bf16 %v25051_v63, %v25050_v16  ;;  %v25055_v16 = vand.u32 4294901760, %v15858_v21  ;;  %v25056_v63 = vand.u32 4294901760, %v15863_v45  ;;  %v23761_v28 = vand.u32 4294901760, %v15905_v15 }
 0x112   :  { %v15883_v10 = vpack.c.bf16 %v25041_v31, %v25040_v14  ;;  %12373 = vmatpush1.bf16.msra.mxu0 %v25043_v19  ;;  %25046 = vst [vmem:[#allocation97_spill] sm:$0xff] %v15890_v55  ;;  %v15900_v14 = vld [vmem:[%s23438_s0 + $0x110] sm:$0xff]  ;;  %v25049_v31 = vand.u32 4294901760, %v25048_v39  ;;  %v25053_v19 = vmov 0.0050964355   ;;  %v25054_v39 = vld [vmem:[#allocation132_spill] sm:$0xff] }
 0x113   :  { %3340 = vmatprep.subr.mxu0 %v25047_v8  ;;  %25052 = vst [vmem:[#allocation109_spill] sm:$0xff] %v15913_v4  ;;  %v15923_v8 = vld [vmem:[%s23438_s0 + $0x1d8] sm:$0xff]  ;;  %v23762_v41 = vand.u32 4294901760, %v15900_v14 }
 0x114   :  { %25042 = vst [vmem:[#allocation95_spill] sm:$0xff] %v15883_v10  ;;  %1388 = vmatpush1.msra.mxu1 %v25049_v31  ;;  %v15933_v31 = vpack.c.bf16 %v25056_v63, %v25055_v16  ;;  %v15950_v16 = vld [vmem:[%s23438_s0 + $0x190] sm:$0xff] }
 0x115   :  { %1405 = vmatmul.mubr.f32.vlgmr.msra.gmra.mrb[0].mxu1 %v25053_v19  ;;  %11895 = vmatprep.subr.bf16.mxu1 %v15883_v10  ;;  %v25059_v10 = vand.u32 4294901760, %v15870_v26  ;;  %v25062_v63 = vld [vmem:[#allocation90_spill] sm:$0xff]  ;;  %v23768_v7 = vand.u32 4294901760, %v15950_v16 }
 0x116   :  { %3342 = vmatpush1.msra.mxu0 %v25054_v39  ;;  %11897 = vmatpush1.bf16.msra.mxu1 %v15890_v55  ;;  %25057 = vst [vmem:[#allocation111_spill] sm:$0xff] %v15933_v31  ;;  %v25060_v39 = vand.u32 4294901760, %v15875_v1 }
 0x117   :  { %12375 = vmatprep.subr.bf16.mxu0 %v15502_v57  ;;  %3361 = vmatmul.mubr.f32.vlgmr.msra.gmra.mrb[2].mxu0 %v25058_v62  ;;  %v15955_v57 = vld [vmem:[%s23438_s0 + $0x1d0] sm:$0xff]  ;;  %v25065_v62 = vand.u32 4294901760, %v15923_v8 }
 0x118   :  { %v15943_v20 = vpack.c.bf16 %v25060_v39, %v25059_v10  ;;  %12377 = vmatpush1.bf16.msra.mxu0 %v15509_v12  ;;  %11899 = vmatprep.subr.bf16.mxu1 %v15913_v4  ;;  %v15962_v10 = vld [vmem:[%s23438_s0 + $0x218] sm:$0xff]  ;;  %v15976_v12 = vpack.c.bf16 %v23761_v28, %v23762_v41  ;;  %v23767_v55 = vand.u32 4294901760, %v15955_v57  ;;  %v15993_v28 = vld [vmem:[%s23438_s0 + $0x210] sm:$0xff] }
 0x119   :  { %v15967_v39 = vld [vmem:[%s23438_s0 + $0x258] sm:$0xff]  ;;  %12379 = vmatprep.subr.bf16.mxu0 %v15515_v5  ;;  %1652 = vmatprep.mubr.f32.mxu1 %v25062_v63  ;;  %v25064_v5 = vand.u32 4294901760, %v15918_v0  ;;  %v15998_v41 = vld [vmem:[%s23438_s0 + $0x250] sm:$0xff] }
 0x11a   :  { %25061 = vst [vmem:[#allocation113_spill] sm:$0xff] %v15943_v20  ;;  %11901 = vmatpush1.bf16.msra.mxu1 %v15933_v31  ;;  %25063 = vst [vmem:[#allocation114_spill] sm:$0xff] %v15976_v12  ;;  %3582 = vmatprep.mubr.f32.mxu0 %v24944_v25  ;;  %v16017_v63 = vpack.c.bf16 %v23767_v55, %v23768_v7  ;;  %v23773_v31 = vand.u32 4294901760, %v15998_v41  ;;  %v25069_v53 = vand.u32 4294901760, %v15967_v39  ;;  %v16033_v55 = vld [vmem:[%s23438_s0 + $0x290] sm:$0xff]  ;;  %v25082_v25 = vand.u32 4294901760, %v15822_v59 }
 0x11b   :  { %11903 = vmatprep.subr.bf16.mxu1 %v15943_v20  ;;  %v15986_v4 = vpack.c.bf16 %v25065_v62, %v25064_v5  ;;  %v16004_v62 = vld [vmem:[%s23438_s0 + $0x298] sm:$0xff]  ;;  %v25068_v20 = vand.u32 4294901760, %v15962_v10  ;;  %v16038_v7 = vld [vmem:[%s23438_s0 + $0x2d0] sm:$0xff] }
 0x11c   :  { %12381 = vmatpush1.bf16.msra.mxu0 %v15523_v32  ;;  %v16009_v5 = vld [vmem:[%s23438_s0 + $0x2d8] sm:$0xff]  ;;  %25067 = vst [vmem:[#allocation117_spill] sm:$0xff] %v16017_v63  ;;  %v23774_v32 = vand.u32 4294901760, %v15993_v28 }
 0x11d   :  { %25066 = vst [vmem:[#allocation115_spill] sm:$0xff] %v15986_v4  ;;  %12383 = vmatprep.subr.bf16.mxu0 %v15531_v42  ;;  %v16026_v22 = vpack.c.bf16 %v25069_v53, %v25068_v20  ;;  %v16044_v53 = vld [vmem:[%s23438_s0 + $0x318] sm:$0xff]  ;;  %v23779_v42 = vand.u32 4294901760, %v16038_v7  ;;  %v25073_v61 = vand.u32 4294901760, %v16009_v5  ;;  %v25136_v47 = vand.u32 4294901760, %v16009_v5 }
 0x11e   :  { %11905 = vmatpush1.bf16.msra.mxu1 %v15976_v12  ;;  %v16049_v20 = vld [vmem:[%s23438_s0 + $0x358] sm:$0xff]  ;;  %v16057_v12 = vpack.c.bf16 %v23773_v31, %v23774_v32  ;;  %v16073_v31 = vld [vmem:[%s23438_s0 + $0x310] sm:$0xff] }
 0x11f   :  { %11907 = vmatprep.subr.bf16.mxu1 %v15986_v4  ;;  %25070 = vst [vmem:[#allocation119_spill] sm:$0xff] %v16026_v22  ;;  %v25072_v4 = vand.u32 4294901760, %v16004_v62  ;;  %v16078_v32 = vld [vmem:[%s23438_s0 + $0x350] sm:$0xff]  ;;  %v25077_v49 = vand.u32 4294901760, %v16049_v20 }
 0x120   :  { %12385 = vmatpush1.bf16.msra.mxu0 %v15541_v27  ;;  %25071 = vst [vmem:[#allocation121_spill] sm:$0xff] %v16057_v12  ;;  %v23780_v27 = vand.u32 4294901760, %v16033_v55 }
 0x121   :  { %12387 = vmatprep.subr.bf16.mxu0 %v15547_v18  ;;  %v16066_v9 = vpack.c.bf16 %v25073_v61, %v25072_v4  ;;  %v16084_v61 = vld [vmem:[%s23438_s0 + $0x398] sm:$0xff]  ;;  %v23786_v18 = vand.u32 4294901760, %v16078_v32 }
 0x122   :  { %11909 = vmatpush1.bf16.msra.mxu1 %v16017_v63  ;;  %v16089_v4 = vld [vmem:[%s23438_s0 + $0x3d8] sm:$0xff]  ;;  %v16097_v63 = vpack.c.bf16 %v23779_v42, %v23780_v27  ;;  %v16113_v42 = vld [vmem:[%s23438_s0 + $0x390] sm:$0xff] }
 0x123   :  { %11911 = vmatprep.subr.bf16.mxu1 %v16026_v22  ;;  %25074 = vst [vmem:[#allocation123_spill] sm:$0xff] %v16066_v9  ;;  %v25076_v22 = vand.u32 4294901760, %v16044_v53  ;;  %v16118_v27 = vld [vmem:[%s23438_s0 + $0x3d0] sm:$0xff] }
 0x124   :  { %12389 = vmatpush1.bf16.msra.mxu0 %v15557_v54  ;;  %25075 = vst [vmem:[#allocation125_spill] sm:$0xff] %v16097_v63  ;;  %v23787_v54 = vand.u32 4294901760, %v16073_v31 }
 0x125   :  { %12391 = vmatprep.subr.bf16.mxu0 %v15565_v44  ;;  %v16106_v24 = vpack.c.bf16 %v25077_v49, %v25076_v22  ;;  %v16124_v49 = vld [vmem:[%s23438_s0 + $0x418] sm:$0xff] }
 0x126   :  { %11913 = vmatpush1.bf16.msra.mxu1 %v16057_v12  ;;  %v16129_v22 = vld [vmem:[%s23438_s0 + $0x458] sm:$0xff]  ;;  %v25079_v12 = vand.u32 4294901760, %v15817_v3 }
 0x127   :  { %11915 = vmatprep.subr.bf16.mxu1 %v16066_v9  ;;  %25078 = vst [vmem:[#allocation77_spill] sm:$0xff] %v16106_v24 }
 0x128   :  { %12393 = vmatpush1.bf16.msra.mxu0 %v15574_v17  ;;  %v16135_v44 = vsub.f32 %v15817_v3, %v25079_v12  ;;  %v16142_v17 = vpack.c.bf16 %v23786_v18, %v23787_v54  ;;  %v25084_v3 = vand.u32 4294901760, %v16084_v61  ;;  %v25085_v12 = vand.u32 4294901760, %v16089_v4 }
 0x129   :  { %12395 = vmatprep.subr.bf16.mxu0 %v15581_v36  ;;  %v16149_v36 = vsub.f32 %v15822_v59, %v25082_v25  ;;  %v16168_v25 = vld [vmem:[%s23438_s0 + $0x450] sm:$0xff]  ;;  %v25087_v59 = vand.u32 4294901760, %v15828_v29  ;;  %v25091_v54 = vand.u32 4294901760, %v15844_v50 }
 0x12a   :  { %25080 = vst [vmem:[#allocation130_spill] sm:$0xff] %v16135_v44  ;;  %11917 = vmatpush1.bf16.msra.mxu1 %v16097_v63  ;;  %25081 = vst [vmem:[#allocation128_spill] sm:$0xff] %v16142_v17  ;;  %v16156_v63 = vpack.c.bf16 %v25085_v12, %v25084_v3  ;;  %v25089_v3 = vand.u32 4294901760, %v15833_v35 }
 0x12b   :  { %25083 = vst [vmem:[#allocation75_spill] sm:$0xff] %v16149_v36  ;;  %11919 = vmatprep.subr.bf16.mxu1 %v16106_v24  ;;  %v16173_v9 = vsub.f32 %v15828_v29, %v25087_v59  ;;  %v16183_v18 = vsub.f32 %v15844_v50, %v25091_v54  ;;  %v25093_v24 = vand.u32 4294901760, %v15849_v40  ;;  %v16194_v29 = vld [vmem:[%s23438_s0 + $0x498] sm:$0xff]  ;;  %v25095_v50 = vand.u32 4294901760, %v15858_v21 }
 0x12c   :  { %25086 = vst [vmem:[#allocation83_spill] sm:$0xff] %v16156_v63  ;;  %v16178_v12 = vsub.f32 %v15833_v35, %v25089_v3  ;;  %12397 = vmatpush1.bf16.msra.mxu0 %v15591_v30  ;;  %v16199_v35 = vld [vmem:[%s23438_s0 + $0x4d8] sm:$0xff]  ;;  %v25099_v30 = vand.u32 4294901760, %v15870_v26  ;;  %v25101_v3 = vand.u32 4294901760, %v15875_v1 }
 0x12d   :  { %25088 = vst [vmem:[#allocation87_spill] sm:$0xff] %v16173_v9  ;;  %25092 = vst [vmem:[#allocation5_spill] sm:$0xff] %v16183_v18  ;;  %v16188_v23 = vsub.f32 %v15849_v40, %v25093_v24  ;;  %v16204_v54 = vsub.f32 %v15858_v21, %v25095_v50  ;;  %v25097_v24 = vand.u32 4294901760, %v15863_v45  ;;  %12399 = vmatprep.subr.bf16.mxu0 %v15598_v56  ;;  %v25103_v21 = vand.u32 4294901760, %v15900_v14 }
 0x12e   :  { %25090 = vst [vmem:[#allocation89_spill] sm:$0xff] %v16178_v12  ;;  %v16214_v59 = vsub.f32 %v15870_v26, %v25099_v30  ;;  %v16219_v38 = vsub.f32 %v15875_v1, %v25101_v3  ;;  %11921 = vmatpush1.bf16.msra.mxu1 %v16142_v17  ;;  %v25108_v3 = vand.u32 4294901760, %v15905_v15  ;;  %v16253_v1 = vld [vmem:[%s23438_s0 + $0x490] sm:$0xff] }
 0x12f   :  { %25094 = vst [vmem:[#allocation9_spill] sm:$0xff] %v16188_v23  ;;  %25096 = vst [vmem:[#allocation11_spill] sm:$0xff] %v16204_v54  ;;  %v16209_v40 = vsub.f32 %v15863_v45, %v25097_v24  ;;  %v16225_v50 = vsub.f32 %v15900_v14, %v25103_v21  ;;  %v25105_v45 = vand.u32 4294901760, %v16113_v42  ;;  %v25106_v24 = vand.u32 4294901760, %v16118_v27  ;;  %11923 = vmatprep.subr.bf16.mxu1 %v16156_v63 }
 0x130   :  { %25100 = vst [vmem:[#allocation94_spill] sm:$0xff] %v16214_v59  ;;  %25102 = vst [vmem:[#allocation14_spill] sm:$0xff] %v16219_v38  ;;  %v16239_v56 = vsub.f32 %v15905_v15, %v25108_v3  ;;  %v25110_v14 = vand.u32 4294901760, %v16124_v49  ;;  %v25111_v21 = vand.u32 4294901760, %v16129_v22  ;;  %v16258_v15 = vld [vmem:[%s23438_s0 + $0x4d0] sm:$0xff]  ;;  %v25115_v3 = vand.u32 4294901760, %v15918_v0  ;;  %12401 = vmatpush1.bf16.msra.mxu0 %v15607_v58 }
 0x131   :  { %25098 = vst [vmem:[#allocation93_spill] sm:$0xff] %v16209_v40  ;;  %25104 = vst [vmem:[#allocation17_spill] sm:$0xff] %v16225_v50  ;;  %v16232_v26 = vpack.c.bf16 %v25106_v24, %v25105_v45  ;;  %v25119_v24 = vand.u32 4294901760, %v15950_v16  ;;  %v25121_v63 = vand.u32 4294901760, %v15955_v57  ;;  %v25127_v58 = vand.u32 4294901760, %v15993_v28  ;;  %12403 = vmatprep.subr.bf16.mxu0 %v15615_v51 }
 0x132   :  { %25109 = vst [vmem:[#allocation23_spill] sm:$0xff] %v16239_v56  ;;  %v16246_v17 = vpack.c.bf16 %v25111_v21, %v25110_v14  ;;  %25113 = vst [vmem:[#allocation30_spill] sm:$0xff] %v16253_v1  ;;  %v16263_v30 = vsub.f32 %v15918_v0, %v25115_v3  ;;  %v25117_v14 = vand.u32 4294901760, %v15923_v8  ;;  %v16284_v0 = vld [vmem:[%s23438_s0 + $0x518] sm:$0xff]  ;;  %v25134_v51 = vand.u32 4294901760, %v16168_v25 }
 0x133   :  { %25107 = vst [vmem:[#allocation20_spill] sm:$0xff] %v16232_v26  ;;  %25114 = vst [vmem:[#allocation32_spill] sm:$0xff] %v16258_v15  ;;  %v16273_v45 = vsub.f32 %v15950_v16, %v25119_v24  ;;  %v16278_v19 = vsub.f32 %v15955_v57, %v25121_v63  ;;  %v25123_v16 = vand.u32 4294901760, %v15962_v10  ;;  %v25125_v57 = vand.u32 4294901760, %v15967_v39  ;;  %11925 = vmatpush1.bf16.msra.mxu1 %v16232_v26 }
 0x134   :  { %25112 = vst [vmem:[#allocation26_spill] sm:$0xff] %v16246_v17  ;;  %25116 = vst [vmem:[#allocation36_spill] sm:$0xff] %v16263_v30  ;;  %v16268_v21 = vsub.f32 %v15923_v8, %v25117_v14  ;;  %v16289_v8 = vld [vmem:[%s23438_s0 + $0x558] sm:$0xff]  ;;  %v16304_v3 = vsub.f32 %v15993_v28, %v25127_v58  ;;  %v25129_v14 = vand.u32 4294901760, %v15998_v41  ;;  %v25131_v28 = vand.u32 4294901760, %v16004_v62  ;;  %11927 = vmatprep.subr.bf16.mxu1 %v16246_v17 }
 0x135   :  { %25120 = vst [vmem:[#allocation41_spill] sm:$0xff] %v16273_v45  ;;  %25122 = vst [vmem:[#allocation44_spill] sm:$0xff] %v16278_v19  ;;  %v16294_v24 = vsub.f32 %v15962_v10, %v25123_v16  ;;  %v16299_v63 = vsub.f32 %v15967_v39, %v25125_v57  ;;  %v16315_v10 = vld [vmem:[%s23438_s0 + $0x510] sm:$0xff]  ;;  %v25141_v58 = vand.u32 4294901760, %v16033_v55  ;;  %12405 = vmatpush1.bf16.msra.mxu0 %v15623_v48  ;;  %v25147_v48 = vand.u32 4294901760, %v16049_v20 }
 0x136   :  { %25118 = vst [vmem:[#allocation39_spill] sm:$0xff] %v16268_v21  ;;  %25128 = vst [vmem:[#allocation53_spill] sm:$0xff] %v16304_v3  ;;  %v16309_v43 = vsub.f32 %v15998_v41, %v25129_v14  ;;  %v16320_v39 = vld [vmem:[%s23438_s0 + $0x550] sm:$0xff]  ;;  %v16325_v16 = vsub.f32 %v16004_v62, %v25131_v28  ;;  %v25133_v41 = vand.u32 4294901760, %v16163_v60  ;;  %v25138_v62 = vand.u32 4294901760, %v16194_v29  ;;  %12407 = vmatprep.subr.bf16.mxu0 %v15631_v6 }
 0x137   :  { %25124 = vst [vmem:[#allocation48_spill] sm:$0xff] %v16294_v24  ;;  %25126 = vst [vmem:[#allocation50_spill] sm:$0xff] %v16299_v63  ;;  %v25139_v28 = vand.u32 4294901760, %v16199_v35  ;;  %v16353_v14 = vsub.f32 %v16033_v55, %v25141_v58  ;;  %v16371_v55 = vld [vmem:[%s23438_s0 + $0x5d8] sm:$0xff]  ;;  %v25145_v58 = vand.u32 4294901760, %v16044_v53 }
 0x138   :  { %25130 = vst [vmem:[#allocation57_spill] sm:$0xff] %v16309_v43  ;;  %25132 = vst [vmem:[#allocation59_spill] sm:$0xff] %v16325_v16  ;;  %v16332_v57 = vpack.c.bf16 %v25134_v51, %v25133_v41  ;;  %v16339_v43 = vsub.f32 %v16009_v5, %v25136_v47  ;;  %v25143_v47 = vand.u32 4294901760, %v16038_v7  ;;  %v25151_v51 = vand.u32 4294901760, %v16078_v32  ;;  %v210_v6 = vld [vmem:[%s23438_s0 + $0x618] sm:$0xf] }
 0x139   :  { %v16346_v26 = vpack.c.bf16 %v25139_v28, %v25138_v62  ;;  %25142 = vst [vmem:[#allocation126_spill] sm:$0xff] %v16353_v14  ;;  %v16366_v28 = vld [vmem:[%s23438_s0 + $0x598] sm:$0xff]  ;;  %v25149_v62 = vand.u32 4294901760, %v16073_v31  ;;  %12409 = vmatpush1.bf16.msra.mxu0 %v15640_v13  ;;  %v25170_v13 = vand.u32 4294901760, %v16113_v42 }
 0x13a   :  { %25135 = vst [vmem:[#allocation120_spill] sm:$0xff] %v16332_v57  ;;  %25137 = vst [vmem:[#allocation62_spill] sm:$0xff] %v16339_v43  ;;  %v16358_v5 = vsub.f32 %v16038_v7, %v25143_v47  ;;  %v16376_v7 = vsub.f32 %v16044_v53, %v25145_v58  ;;  %v16381_v47 = vsub.f32 %v16049_v20, %v25147_v48  ;;  %v16397_v53 = vld [vmem:[%s23438_s0 + $0x590] sm:$0xff]  ;;  %11929 = vmatpush1.bf16.msra.mxu1 %v16332_v57 }
 0x13b   :  { %25140 = vst [vmem:[#allocation66_spill] sm:$0xff] %v16346_v26  ;;  %v16386_v17 = vsub.f32 %v16073_v31, %v25149_v62  ;;  %v16391_v41 = vsub.f32 %v16078_v32, %v25151_v51  ;;  %v25153_v20 = vand.u32 4294901760, %v16253_v1  ;;  %v25154_v58 = vand.u32 4294901760, %v16258_v15  ;;  %v16409_v32 = vld [vmem:[%s23438_s0 + $0x5d0] sm:$0xff]  ;;  %11931 = vmatprep.subr.bf16.mxu1 %v16346_v26  ;;  %12411 = vmatprep.subr.bf16.mxu0 %v15647_v11 }
 0x13c   :  { %25144 = vst [vmem:[#allocation127_spill] sm:$0xff] %v16358_v5  ;;  %25146 = vst [vmem:[#allocation68_spill] sm:$0xff] %v16376_v7  ;;  %v25159_v51 = vand.u32 4294901760, %v16084_v61  ;;  %v25161_v48 = vand.u32 4294901760, %v16089_v4  ;;  %v25168_v11 = vand.u32 4294901760, %v16149_v36 }
 0x13d   :  { %25148 = vst [vmem:[#allocation72_spill] sm:$0xff] %v16381_v47  ;;  %25150 = vst [vmem:[#allocation76_spill] sm:$0xff] %v16386_v17  ;;  %v16404_v31 = vpack.c.bf16 %v25154_v58, %v25153_v20  ;;  %v25156_v20 = vand.u32 4294901760, %v16284_v0  ;;  %v25157_v58 = vand.u32 4294901760, %v16289_v8  ;;  %12413 = vmatpush1.bf16.msra.mxu0 %v15657_v2  ;;  %v25182_v2 = vand.u32 4294901760, %v16183_v18 }
 0x13e   :  { %25152 = vst [vmem:[#allocation78_spill] sm:$0xff] %v16391_v41  ;;  %v16430_v62 = vsub.f32 %v16084_v61, %v25159_v51  ;;  %v16435_v26 = vsub.f32 %v16089_v4, %v25161_v48  ;;  %v16448_v51 = vsel %vm419_vm0, %v210_v6, 0  ;;  %v209_v4 = vld [vmem:[%s23438_s0 + $0x610] sm:$0xf]  ;;  %v1674_v61 = vsub.f32 %v16149_v36, %v25168_v11  ;;  %12415 = vmatprep.subr.bf16.mxu0 %v15664_v33 }
 0x13f   :  { %25155 = vst [vmem:[#allocation6_spill] sm:$0xff] %v16404_v31  ;;  %v16422_v57 = vpack.c.bf16 %v25157_v58, %v25156_v20  ;;  %v25163_v20 = vand.u32 4294901760, %v16315_v10  ;;  %v25164_v58 = vand.u32 4294901760, %v16320_v39  ;;  %25166 = vst [vmem:[#allocation12_spill] sm:$0xff] %v16448_v51  ;;  %11933 = vmatpush1.bf16.msra.mxu1 %v16404_v31  ;;  %v25169_v6 = vand.u32 4294901760, %v16173_v9 }
 0x140   :  { %25160 = vst [vmem:[#allocation8_spill] sm:$0xff] %v16430_v62  ;;  %25162 = vst [vmem:[#allocation10_spill] sm:$0xff] %v16435_v26  ;;  %v16469_v48 = vsub.f32 %v16113_v42, %v25170_v13  ;;  %v25172_v31 = vand.u32 4294901760, %v16366_v28  ;;  %v25175_v11 = vand.u32 4294901760, %v16178_v12  ;;  %v25176_v41 = vand.u32 4294901760, %v16118_v27 }
 0x141   :  { %25158 = vst [vmem:[#allocation7_spill] sm:$0xff] %v16422_v57  ;;  %v16442_v15 = vpack.c.bf16 %v25164_v58, %v25163_v20  ;;  %v25167_v20 = vand.u32 4294901760, %v16135_v44  ;;  %v1668_v1 = vsub.f32 %v16173_v9, %v25169_v6  ;;  %11935 = vmatprep.subr.bf16.mxu1 %v16422_v57  ;;  %v16489_v42 = vsel %vm419_vm0, %v209_v4, 0  ;;  %12417 = vmatpush1.bf16.msra.mxu0 %v15673_v34 }
 0x142   :  { %25171 = vst [vmem:[#allocation13_spill] sm:$0xff] %v16469_v48  ;;  %v1680_v36 = vsub.f32 %v16178_v12, %v25175_v11  ;;  %v16485_v9 = vsub.f32 %v16118_v27, %v25176_v41  ;;  %v25179_v11 = vand.u32 4294901760, %v16409_v32  ;;  %v16501_v27 = vand.u32 4294901760, %v16448_v51  ;;  %12419 = vmatprep.subr.bf16.mxu0 %v15681_v52 }
 0x143   :  { %25165 = vst [vmem:[#allocation79_spill] sm:$0xff] %v16442_v15  ;;  %v1662_v58 = vsub.f32 %v16135_v44, %v25167_v20  ;;  %v25173_v20 = vand.u32 4294901760, %v16371_v55  ;;  %v1686_v41 = vsub.f32 %v16183_v18, %v25182_v2  ;;  %v25183_v4 = vand.u32 4294901760, %v16188_v23  ;;  %11937 = vmatpush1.bf16.msra.mxu1 %v16442_v15 }
 0x144   :  { %25177 = vst [vmem:[#allocation16_spill] sm:$0xff] %v16485_v9  ;;  %25181 = vst [vmem:[#allocation19_spill] sm:$0xff] %v16501_v27  ;;  %v1669_v57 = vand.u32 4294901760, %v1668_v1  ;;  %v25184_v12 = vand.u32 4294901760, %v16204_v54  ;;  %v25185_v51 = vand.u32 4294901760, %v16209_v40  ;;  %v25186_v15 = vand.u32 4294901760, %v16124_v49 }
 0x145   :  { %v16476_v44 = vpack.c.bf16 %v25173_v20, %v25172_v31  ;;  %v25178_v20 = vand.u32 4294901760, %v16397_v53  ;;  %v1698_v13 = vsub.f32 %v16188_v23, %v25183_v4  ;;  %v1663_v33 = vand.u32 4294901760, %v1662_v58  ;;  %12421 = vmatpush1.bf16.msra.mxu0 %v15689_v46 }
 0x146   :  { %v1675_v31 = vand.u32 4294901760, %v1674_v61  ;;  %v1704_v2 = vsub.f32 %v16209_v40, %v25185_v51  ;;  %v16522_v61 = vsub.f32 %v16124_v49, %v25186_v15  ;;  %v25188_v1 = vand.u32 4294901760, %v16129_v22 }
 0x147   :  { %25174 = vst [vmem:[#allocation15_spill] sm:$0xff] %v16476_v44  ;;  %v16498_v6 = vpack.c.bf16 %v25179_v11, %v25178_v20  ;;  %v1692_v20 = vsub.f32 %v16204_v54, %v25184_v12  ;;  %11939 = vmatprep.subr.bf16.mxu1 %v16476_v44  ;;  %v1681_v11 = vand.u32 4294901760, %v1680_v36  ;;  %v25190_v36 = vand.u32 4294901760, %v16214_v59 }
 0x148   :  { %25187 = vst [vmem:[#allocation21_spill] sm:$0xff] %v16522_v61  ;;  %v16527_v12 = vsub.f32 %v16129_v22, %v25188_v1  ;;  %v25191_v58 = vand.u32 4294901760, %v16219_v38  ;;  %v25192_v18 = vand.u32 4294901760, %v16163_v60  ;;  %v16543_v22 = vand.u32 4294901760, %v16489_v42 }
 0x149   :  { %25180 = vst [vmem:[#allocation18_spill] sm:$0xff] %v16498_v6  ;;  %v1710_v51 = vsub.f32 %v16214_v59, %v25190_v36  ;;  %11941 = vmatpush1.bf16.msra.mxu1 %v16498_v6  ;;  %v11942_v1 = vpack.c.bf16 %v1675_v31, %v1663_v33  ;;  %v1687_v36 = vand.u32 4294901760, %v1686_v41  ;;  %v1699_v44 = vand.u32 4294901760, %v1698_v13  ;;  %v25204_v31 = vld [vmem:[#allocation85_spill] sm:$0xff] }
 0x14a   :  { %25189 = vst [vmem:[#allocation22_spill] sm:$0xff] %v16527_v12  ;;  %v1722_v4 = vsub.f32 %v16219_v38, %v25191_v58  ;;  %v16539_v49 = vsub.f32 %v16163_v60, %v25192_v18  ;;  %25194 = vst [vmem:[#allocation25_spill] sm:$0xff] %v16543_v22  ;;  %v1693_v58 = vand.u32 4294901760, %v1692_v20  ;;  %1630 = vmatprep.subr.mxu1 %v16501_v27  ;;  %v1705_v60 = vand.u32 4294901760, %v1704_v2 }
 0x14b   :  { %v11944_v38 = vpack.c.bf16 %v1681_v11, %v1669_v57  ;;  %v25195_v18 = vand.u32 4294901760, %v16225_v50  ;;  %v25196_v59 = vand.u32 4294901760, %v16239_v56  ;;  %v1711_v15 = vand.u32 4294901760, %v1710_v51  ;;  %v25200_v51 = vld [vmem:[#allocation57_spill] sm:$0xff] }
 0x14c   :  { %25193 = vst [vmem:[#allocation24_spill] sm:$0xff] %v16539_v49  ;;  %v1723_v6 = vand.u32 4294901760, %v1722_v4  ;;  %v25197_v41 = vand.u32 4294901760, %v15456_v37  ;;  %v25198_v57 = vand.u32 4294901760, %v16263_v30  ;;  %v25199_v20 = vand.u32 4294901760, %v16268_v21 }
 0x14d   :  { %v1716_v52 = vsub.f32 %v16225_v50, %v25195_v18  ;;  %v1728_v34 = vsub.f32 %v16239_v56, %v25196_v59  ;;  %1632 = vmatpush1.msra.mxu1 %v16543_v22  ;;  %v11946_v2 = vpack.c.bf16 %v1699_v44, %v1687_v36  ;;  %v11948_v59 = vpack.c.bf16 %v1705_v60, %v1693_v58 }
 0x14e   :  { %3562 = vmatprep.subr.mxu0 %v25197_v41  ;;  %v1734_v33 = vsub.f32 %v16263_v30, %v25198_v57  ;;  %v1746_v11 = vsub.f32 %v16268_v21, %v25199_v20  ;;  %v25201_v41 = vand.u32 4294901760, %v16168_v25  ;;  %11943 = vmatprep.subr.bf16.mxu1 %v11942_v1  ;;  %v25203_v20 = vmov 2.3283064e-09  }
 0x14f   :  { %1653 = vmatmul.mubr.f32.vlgmr.msra.gmra.mrb[2].mxu1 %v25203_v20  ;;  %v1717_v13 = vand.u32 4294901760, %v1716_v52  ;;  %v25205_v44 = vand.u32 4294901760, %v25204_v31  ;;  %v11950_v36 = vpack.c.bf16 %v1723_v6, %v1711_v15  ;;  %v1729_v37 = vand.u32 4294901760, %v1728_v34  ;;  %v25212_v15 = vld [vmem:[#allocation88_spill] sm:$0xff] }
 0x150   :  { %v16575_v57 = vsub.f32 %v16168_v25, %v25201_v41  ;;  %11945 = vmatpush1.bf16.msra.mxu1 %v11944_v38  ;;  %v25206_v18 = vand.u32 4294901760, %v16273_v45  ;;  %v25207_v25 = vand.u32 4294901760, %v16278_v19  ;;  %v25208_v41 = vld [vmem:[#allocation84_spill] sm:$0xff]  ;;  %v25209_v58 = vmov 0.0050964355  }
 0x151   :  { %3566 = vmatpush1.msra.mxu0 %v25205_v44  ;;  %v1735_v60 = vand.u32 4294901760, %v1734_v33  ;;  %v1747_v52 = vand.u32 4294901760, %v1746_v11  ;;  %v25210_v31 = vand.u32 4294901760, %v16294_v24  ;;  %v25211_v6 = vand.u32 4294901760, %v16299_v63  ;;  %11947 = vmatprep.subr.bf16.mxu1 %v11946_v2  ;;  %v25218_v2 = vld [vmem:[#allocation91_spill] sm:$0xff] }
 0x152   :  { %25202 = vst [vmem:[#allocation27_spill] sm:$0xff] %v16575_v57  ;;  %v1740_v4 = vsub.f32 %v16273_v45, %v25206_v18  ;;  %v1752_v1 = vsub.f32 %v16278_v19, %v25207_v25  ;;  %12423 = vmatprep.subr.bf16.mxu0 %v25208_v41  ;;  %3583 = vmatmul.mubr.f32.vlgmr.msra.gmra.mrb[2].mxu0 %v25209_v58  ;;  %v25213_v18 = vand.u32 4294901760, %v16304_v3  ;;  %v25214_v25 = vand.u32 4294901760, %v25200_v51 }
 0x153   :  { %v1758_v38 = vsub.f32 %v16294_v24, %v25210_v31  ;;  %v1770_v34 = vsub.f32 %v16299_v63, %v25211_v6  ;;  %12425 = vmatpush1.bf16.msra.mxu0 %v25212_v15  ;;  %v25215_v11 = vand.u32 4294901760, %v16325_v16  ;;  %v25216_v46 = vand.u32 4294901760, %v16194_v29 }
 0x154   :  { %v1764_v44 = vsub.f32 %v16304_v3, %v25213_v18  ;;  %v1776_v33 = vsub.f32 %v25200_v51, %v25214_v25  ;;  %12427 = vmatprep.subr.bf16.mxu0 %v25218_v2  ;;  %v25219_v15 = vand.u32 4294901760, %v16339_v43  ;;  %v25220_v51 = vld [vmem:[#allocation80_spill] sm:$0xff]  ;;  %11949 = vmatpush1.bf16.msra.mxu1 %v11948_v59  ;;  %v1741_v31 = vand.u32 4294901760, %v1740_v4 }
 0x155   :  { %v1782_v41 = vsub.f32 %v16325_v16, %v25215_v11  ;;  %v16609_v6 = vsub.f32 %v16194_v29, %v25216_v46  ;;  %1974 = vmatprep.mubr.f32.mxu1 %v25220_v51  ;;  %v11952_v11 = vpack.c.bf16 %v1729_v37, %v1717_v13  ;;  %v1753_v16 = vand.u32 4294901760, %v1752_v1  ;;  %3704 = vmatprep.mubr.f32.mxu0 %v25220_v51  ;;  %v25223_v25 = vld [vmem:[#allocation92_spill] sm:$0xff] }
 0x156   :  { %v1794_v18 = vsub.f32 %v16339_v43, %v25219_v15  ;;  %v25221_v29 = vand.u32 4294901760, %v16199_v35  ;;  %11951 = vmatprep.subr.bf16.mxu1 %v11950_v36  ;;  %v11954_v2 = vpack.c.bf16 %v1747_v52, %v1735_v60  ;;  %v1759_v15 = vand.u32 4294901760, %v1758_v38  ;;  %v25225_v1 = vld [vmem:[#allocation96_spill] sm:$0xff]  ;;  %v25228_v38 = vld [vmem:[#allocation30_spill] sm:$0xff] }
 0x157   :  { %25217 = vst [vmem:[#allocation28_spill] sm:$0xff] %v16609_v6  ;;  %v1771_v20 = vand.u32 4294901760, %v1770_v34  ;;  %12429 = vmatpush1.bf16.msra.mxu0 %v25223_v25  ;;  %v1765_v43 = vand.u32 4294901760, %v1764_v44  ;;  %v1777_v59 = vand.u32 4294901760, %v1776_v33  ;;  %v1783_v13 = vand.u32 4294901760, %v1782_v41  ;;  %v25232_v25 = vld [vmem:[#allocation78_spill] sm:$0xff] }
 0x158   :  { %v16623_v46 = vsub.f32 %v16199_v35, %v25221_v29  ;;  %v25224_v4 = vand.u32 4294901760, %v16353_v14  ;;  %12431 = vmatprep.subr.bf16.mxu0 %v25225_v1  ;;  %v1795_v3 = vand.u32 4294901760, %v1794_v18  ;;  %v25226_v51 = vand.u32 4294901760, %v16358_v5  ;;  %11953 = vmatpush1.bf16.msra.mxu1 %v11952_v11 }
 0x159   :  { %v25227_v36 = vand.u32 4294901760, %v16376_v7  ;;  %v25229_v34 = vand.u32 4294901760, %v25228_v38  ;;  %v11956_v33 = vpack.c.bf16 %v1753_v16, %v1741_v31  ;;  %v25231_v41 = vand.u32 4294901760, %v16381_v47  ;;  %11955 = vmatprep.subr.bf16.mxu1 %v11954_v2  ;;  %v25241_v2 = vld [vmem:[#allocation99_spill] sm:$0xff] }
 0x15a   :  { %25222 = vst [vmem:[#allocation29_spill] sm:$0xff] %v16623_v46  ;;  %v1788_v37 = vsub.f32 %v16353_v14, %v25224_v4  ;;  %v1800_v35 = vsub.f32 %v16358_v5, %v25226_v51  ;;  %v25233_v51 = vld [vmem:[#allocation32_spill] sm:$0xff]  ;;  %v25236_v11 = vand.u32 4294901760, %v16284_v0  ;;  %v25238_v31 = vand.u32 4294901760, %v16289_v8 }
 0x15b   :  { %v1806_v60 = vsub.f32 %v16376_v7, %v25227_v36  ;;  %v16640_v44 = vsub.f32 %v25228_v38, %v25229_v34  ;;  %v1818_v18 = vsub.f32 %v16381_v47, %v25231_v41  ;;  %v25234_v4 = vand.u32 4294901760, %v25233_v51  ;;  %v25240_v41 = vld [vmem:[#allocation98_spill] sm:$0xff] }
 0x15c   :  { %v11958_v36 = vpack.c.bf16 %v1771_v20, %v1759_v15  ;;  %v16656_v16 = vsub.f32 %v16284_v0, %v25236_v11  ;;  %v16661_v34 = vsub.f32 %v16289_v8, %v25238_v31  ;;  %12433 = vmatpush1.bf16.msra.mxu0 %v25240_v41  ;;  %v11962_v20 = vpack.c.bf16 %v1795_v3, %v1783_v13  ;;  %v25250_v41 = vld [vmem:[#allocation100_spill] sm:$0xff] }
 0x15d   :  { %25230 = vst [vmem:[#allocation31_spill] sm:$0xff] %v16640_v44  ;;  %v16649_v1 = vsub.f32 %v25233_v51, %v25234_v4  ;;  %v11960_v51 = vpack.c.bf16 %v1777_v59, %v1765_v43  ;;  %v1789_v4 = vand.u32 4294901760, %v1788_v37  ;;  %12435 = vmatprep.subr.bf16.mxu0 %v25241_v2  ;;  %v1801_v15 = vand.u32 4294901760, %v1800_v35  ;;  %11957 = vmatpush1.bf16.msra.mxu1 %v11956_v33 }
 0x15e   :  { %25237 = vst [vmem:[#allocation34_spill] sm:$0xff] %v16656_v16  ;;  %25239 = vst [vmem:[#allocation35_spill] sm:$0xff] %v16661_v34  ;;  %v1807_v52 = vand.u32 4294901760, %v1806_v60  ;;  %v25242_v38 = vand.u32 4294901760, %v16386_v17  ;;  %v1819_v0 = vand.u32 4294901760, %v1818_v18  ;;  %v25243_v11 = vand.u32 4294901760, %v25232_v25  ;;  %11959 = vmatprep.subr.bf16.mxu1 %v11958_v36 }
 0x15f   :  { %25235 = vst [vmem:[#allocation33_spill] sm:$0xff] %v16649_v1  ;;  %v23843_v31 = vand.u32 4294901760, %v16469_v48  ;;  %v25244_v59 = vand.u32 4294901760, %v16430_v62  ;;  %v25245_v13 = vand.u32 4294901760, %v16435_v26  ;;  %v25246_v33 = vand.u32 4294901760, %v16315_v10 }
 0x160   :  { %v1812_v29 = vsub.f32 %v16386_v17, %v25242_v38  ;;  %v1824_v8 = vsub.f32 %v25232_v25, %v25243_v11  ;;  %v25248_v38 = vand.u32 4294901760, %v16320_v39  ;;  %12437 = vmatpush1.bf16.msra.mxu0 %v25250_v41  ;;  %v23842_v2 = vand.u32 4294901760, %v16539_v49 }
 0x161   :  { %v1830_v3 = vsub.f32 %v16430_v62, %v25244_v59  ;;  %v1842_v37 = vsub.f32 %v16435_v26, %v25245_v13  ;;  %v16684_v18 = vsub.f32 %v16315_v10, %v25246_v33  ;;  %v25251_v59 = vld [vmem:[#allocation101_spill] sm:$0xff]  ;;  %v11964_v13 = vpack.c.bf16 %v1801_v15, %v1789_v4  ;;  %11961 = vmatpush1.bf16.msra.mxu1 %v11960_v51 }
 0x162   :  { %v16689_v36 = vsub.f32 %v16320_v39, %v25248_v38  ;;  %12439 = vmatprep.subr.bf16.mxu0 %v25251_v59  ;;  %v1813_v60 = vand.u32 4294901760, %v1812_v29  ;;  %v23846_v35 = vand.u32 4294901760, %v16609_v6  ;;  %v23851_v10 = vand.u32 4294901760, %v16623_v46  ;;  %11963 = vmatprep.subr.bf16.mxu1 %v11962_v20 }
 0x163   :  { %25247 = vst [vmem:[#allocation37_spill] sm:$0xff] %v16684_v18  ;;  %v11966_v33 = vpack.c.bf16 %v1819_v0, %v1807_v52  ;;  %v1825_v43 = vand.u32 4294901760, %v1824_v8  ;;  %v1836_v39 = vsub.f32 %v16469_v48, %v23843_v31  ;;  %v25252_v38 = vand.u32 4294901760, %v16485_v9  ;;  %v25257_v8 = vld [vmem:[#allocation102_spill] sm:$0xff] }
 0x164   :  { %25249 = vst [vmem:[#allocation38_spill] sm:$0xff] %v16689_v36  ;;  %v1831_v11 = vand.u32 4294901760, %v1830_v3  ;;  %v1843_v59 = vand.u32 4294901760, %v1842_v37  ;;  %v25253_v29 = vand.u32 4294901760, %v16522_v61  ;;  %v25254_v15 = vand.u32 4294901760, %v16527_v12  ;;  %12441 = vmatpush1.bf16.msra.mxu0 %v25257_v8  ;;  %v25264_v8 = vld [vmem:[#allocation104_spill] sm:$0xff] }
 0x165   :  { %v1848_v41 = vsub.f32 %v16485_v9, %v25252_v38  ;;  %v25255_v51 = vand.u32 4294901760, %v16366_v28  ;;  %v1860_v20 = vsub.f32 %v16539_v49, %v23842_v2  ;;  %v25258_v3 = vand.u32 4294901760, %v16575_v57  ;;  %11965 = vmatpush1.bf16.msra.mxu1 %v11964_v13 }
 0x166   :  { %v1854_v4 = vsub.f32 %v16522_v61, %v25253_v29  ;;  %v1866_v52 = vsub.f32 %v16527_v12, %v25254_v15  ;;  %v25259_v29 = vld [vmem:[#allocation103_spill] sm:$0xff]  ;;  %v1878_v15 = vsub.f32 %v16609_v6, %v23846_v35  ;;  %v25260_v2 = vand.u32 4294901760, %v16371_v55  ;;  %11967 = vmatprep.subr.bf16.mxu1 %v11966_v33 }
 0x167   :  { %v16712_v0 = vsub.f32 %v16366_v28, %v25255_v51  ;;  %v1872_v37 = vsub.f32 %v16575_v57, %v25258_v3  ;;  %12443 = vmatprep.subr.bf16.mxu0 %v25259_v29  ;;  %v1890_v28 = vsub.f32 %v16623_v46, %v23851_v10  ;;  %v11968_v31 = vpack.c.bf16 %v1825_v43, %v1813_v60  ;;  %v25266_v60 = vld [vmem:[#allocation105_spill] sm:$0xff] }
 0x168   :  { %v16734_v3 = vsub.f32 %v16371_v55, %v25260_v2  ;;  %v1837_v29 = vand.u32 4294901760, %v1836_v39  ;;  %v1849_v38 = vand.u32 4294901760, %v1848_v41  ;;  %v11970_v57 = vpack.c.bf16 %v1843_v59, %v1831_v11  ;;  %12445 = vmatpush1.bf16.msra.mxu0 %v25264_v8 }
 0x169   :  { %25256 = vst [vmem:[#allocation40_spill] sm:$0xff] %v16712_v0  ;;  %v1855_v35 = vand.u32 4294901760, %v1854_v4  ;;  %v1867_v6 = vand.u32 4294901760, %v1866_v52  ;;  %v23862_v49 = vand.u32 4294901760, %v16661_v34  ;;  %v25262_v10 = vand.u32 4294901760, %v16397_v53  ;;  %12447 = vmatprep.subr.bf16.mxu0 %v25266_v60  ;;  %11969 = vmatpush1.bf16.msra.mxu1 %v11968_v31  ;;  %v25272_v60 = vld [vmem:[#allocation107_spill] sm:$0xff] }
 0x16a   :  { %25261 = vst [vmem:[#allocation42_spill] sm:$0xff] %v16734_v3  ;;  %v1861_v46 = vand.u32 4294901760, %v1860_v20  ;;  %v1873_v55 = vand.u32 4294901760, %v1872_v37  ;;  %v25265_v2 = vand.u32 4294901760, %v16640_v44  ;;  %v1879_v11 = vand.u32 4294901760, %v1878_v15  ;;  %11971 = vmatprep.subr.bf16.mxu1 %v11970_v57 }
 0x16b   :  { %v16740_v51 = vsub.f32 %v16397_v53, %v25262_v10  ;;  %v1891_v13 = vand.u32 4294901760, %v1890_v28  ;;  %v25267_v33 = vand.u32 4294901760, %v16649_v1  ;;  %v25268_v41 = vand.u32 4294901760, %v16656_v16 }
 0x16c   :  { %v1884_v43 = vsub.f32 %v16640_v44, %v25265_v2  ;;  %v25269_v10 = vand.u32 4294901760, %v16409_v32  ;;  %v11972_v4 = vpack.c.bf16 %v1849_v38, %v1837_v29  ;;  %v23861_v52 = vand.u32 4294901760, %v16684_v18  ;;  %v25271_v2 = vld [vmem:[#allocation106_spill] sm:$0xff] }
 0x16d   :  { %25263 = vst [vmem:[#allocation43_spill] sm:$0xff] %v16740_v51  ;;  %v1896_v39 = vsub.f32 %v16649_v1, %v25267_v33  ;;  %v1902_v53 = vsub.f32 %v16656_v16, %v25268_v41  ;;  %v23860_v20 = vand.u32 4294901760, %v16689_v36  ;;  %v11974_v37 = vpack.c.bf16 %v1867_v6, %v1855_v35  ;;  %12449 = vmatpush1.bf16.msra.mxu0 %v25271_v2 }
 0x16e   :  { %v16756_v59 = vsub.f32 %v16409_v32, %v25269_v10  ;;  %v1914_v15 = vsub.f32 %v16661_v34, %v23862_v49  ;;  %v23857_v28 = vand.u32 4294901760, %v16712_v0  ;;  %v23854_v8 = vand.u32 4294901760, %v16734_v3  ;;  %12451 = vmatprep.subr.bf16.mxu0 %v25272_v60  ;;  %11973 = vmatpush1.bf16.msra.mxu1 %v11972_v4  ;;  %v25277_v10 = vld [vmem:[#allocation110_spill] sm:$0xff] }
 0x16f   :  { %v11976_v32 = vpack.c.bf16 %v1873_v55, %v1861_v46  ;;  %v11978_v31 = vpack.c.bf16 %v1891_v13, %v1879_v11  ;;  %v1885_v38 = vand.u32 4294901760, %v1884_v43  ;;  %v1897_v29 = vand.u32 4294901760, %v1896_v39  ;;  %11975 = vmatprep.subr.bf16.mxu1 %v11974_v37  ;;  %v25273_v11 = vld [vmem:[#allocation12_spill] sm:$0xff]  ;;  %v16874_v49 = vld [vmem:[%s23438_s0 + $0x788] sm:$0xff] }
 0x170   :  { %25270 = vst [vmem:[#allocation45_spill] sm:$0xff] %v16756_v59  ;;  %v1903_v33 = vand.u32 4294901760, %v1902_v53  ;;  %v1908_v57 = vsub.f32 %v16684_v18, %v23861_v52  ;;  %v1920_v6 = vsub.f32 %v16689_v36, %v23860_v20  ;;  %v23855_v35 = vand.u32 4294901760, %v16740_v51  ;;  %v25275_v39 = vld [vmem:[#allocation108_spill] sm:$0xff]  ;;  %v16869_v52 = vld [vmem:[%s23438_s0 + $0x748] sm:$0xff] }
 0x171   :  { %v23856_v41 = vand.u32 4294901760, %v16756_v59  ;;  %v1915_v46 = vand.u32 4294901760, %v1914_v15  ;;  %v1926_v55 = vsub.f32 %v16712_v0, %v23857_v28  ;;  %v1938_v43 = vsub.f32 %v16734_v3, %v23854_v8  ;;  %12453 = vmatpush1.bf16.msra.mxu0 %v25275_v39 }
 0x172   :  { %v16783_v13 = vsub.f32 %v25273_v11, %v16501_v27  ;;  %v16788_v53 = vsub.f32 %v16489_v42, %v16543_v22  ;;  %12455 = vmatprep.subr.bf16.mxu0 %v25277_v10  ;;  %v11980_v4 = vpack.c.bf16 %v1897_v29, %v1885_v38  ;;  %11977 = vmatpush1.bf16.msra.mxu1 %v11976_v32  ;;  %v1909_v37 = vand.u32 4294901760, %v1908_v57  ;;  %v16797_v11 = vpop.f32.mrb[0].mxu0  ;;  %v25280_v32 = vld [vmem:[#allocation112_spill] sm:$0xff] }
 0x173   :  { %v1921_v15 = vand.u32 4294901760, %v1920_v6  ;;  %v1932_v2 = vsub.f32 %v16740_v51, %v23855_v35  ;;  %v1944_v60 = vsub.f32 %v16756_v59, %v23856_v41  ;;  %25278 = vst [vmem:[#allocation49_spill] sm:$0xff] %v16797_v11  ;;  %11979 = vmatprep.subr.bf16.mxu1 %v11978_v31  ;;  %v11982_v39 = vpack.c.bf16 %v1915_v46, %v1903_v33  ;;  %v16800_v38 = vpop.f32.mrb[1].mxu0  ;;  %v25281_v29 = vld [vmem:[#allocation116_spill] sm:$0xff]  ;;  %v25282_v33 = vld [vmem:[#allocation118_spill] sm:$0xff] }
 0x174   :  { %25274 = vst [vmem:[#allocation46_spill] sm:$0xff] %v16783_v13  ;;  %25276 = vst [vmem:[#allocation47_spill] sm:$0xff] %v16788_v53  ;;  %v1927_v42 = vand.u32 4294901760, %v1926_v55  ;;  %v1939_v8 = vand.u32 4294901760, %v1938_v43  ;;  %v23859_v10 = vand.u32 4294901760, %v16783_v13  ;;  %v23858_v41 = vand.u32 4294901760, %v16788_v53 }
 0x175   :  { %25279 = vst [vmem:[#allocation51_spill] sm:$0xff] %v16800_v38  ;;  %12457 = vmatpush1.bf16.msra.mxu0 %v25280_v32  ;;  %v11984_v57 = vpack.c.bf16 %v1921_v15, %v1909_v37  ;;  %v1933_v6 = vand.u32 4294901760, %v1932_v2  ;;  %v1945_v35 = vand.u32 4294901760, %v1944_v60  ;;  %v25283_v46 = vld [vmem:[#allocation122_spill] sm:$0xff]  ;;  %v16831_v15 = vld [vmem:[%s23438_s0 + $0x680] sm:$0xff] }
 0x176   :  { %12459 = vmatprep.subr.bf16.mxu0 %v25281_v29  ;;  %11981 = vmatpush1.bf16.msra.mxu1 %v11980_v4  ;;  %v11986_v28 = vpack.c.bf16 %v1939_v8, %v1927_v42  ;;  %v1950_v31 = vsub.f32 %v16783_v13, %v23859_v10  ;;  %v1956_v43 = vsub.f32 %v16788_v53, %v23858_v41  ;;  %v16816_v4 = vld [vmem:[%s23438_s0 + $0x648] sm:$0xff]  ;;  %v25284_v2 = vld [vmem:[#allocation124_spill] sm:$0xff]  ;;  %v25291_v41 = vld [vmem:[#allocation131_spill] sm:$0xff] }
 0x177   :  { %11983 = vmatprep.subr.bf16.mxu1 %v11982_v39  ;;  %v11988_v55 = vpack.c.bf16 %v1945_v35, %v1933_v6  ;;  %v16821_v8 = vld [vmem:[%s23438_s0 + $0x688] sm:$0xff]  ;;  %v16826_v35 = vld [vmem:[%s23438_s0 + $0x640] sm:$0xff]  ;;  %v23866_v42 = vand.u32 4294901760, %v16816_v4  ;;  %v23867_v6 = vand.u32 4294901760, %v16831_v15 }
 0x178   :  { %v1951_v37 = vand.u32 4294901760, %v1950_v31  ;;  %v16837_v60 = vld [vmem:[%s23438_s0 + $0x6c8] sm:$0xff]  ;;  %v23865_v32 = vand.u32 4294901760, %v16821_v8  ;;  %v1957_v29 = vand.u32 4294901760, %v1956_v43 }
 0x179   :  { %12461 = vmatpush1.bf16.msra.mxu0 %v25282_v33  ;;  %v25285_v39 = vld [vmem:[#allocation74_spill] sm:$0xff]  ;;  %v25287_v33 = vld [vmem:[#allocation75_spill] sm:$0xff]  ;;  %v25288_v43 = vld [vmem:[#allocation129_spill] sm:$0xff] }
 0x17a   :  { %12463 = vmatprep.subr.bf16.mxu0 %v25283_v46  ;;  %11985 = vmatpush1.bf16.msra.mxu1 %v11984_v57  ;;  %v23868_v57 = vand.u32 4294901760, %v16826_v35  ;;  %v25286_v31 = vld [vmem:[#allocation130_spill] sm:$0xff]  ;;  %v25290_v10 = vld [vmem:[#allocation89_spill] sm:$0xff] }
 0x17b   :  { %11987 = vmatprep.subr.bf16.mxu1 %v11986_v28  ;;  %v16842_v28 = vld [vmem:[%s23438_s0 + $0x708] sm:$0xff]  ;;  %v11990_v46 = vpack.c.bf16 %v25287_v33, %v25286_v31  ;;  %v12012_v33 = vpack.c.bf16 %v16358_v5, %v16353_v14 }
 0x17c   :  { %v25294_v38 = vld [vmem:[#allocation5_spill] sm:$0xff] }
 0x17d   :  { %12465 = vmatpush1.bf16.msra.mxu0 %v25284_v2  ;;  %v16887_v2 = vpack.c.bf16 %v23867_v6, %v23868_v57  ;;  %v11994_v11 = vpack.c.bf16 %v16188_v23, %v25294_v38  ;;  %v16905_v57 = vld [vmem:[%s23438_s0 + $0x740] sm:$0xff]  ;;  %v16923_v6 = vld [vmem:[%s23438_s0 + $0x808] sm:$0xff]  ;;  %v12002_v23 = vpack.c.bf16 %v16268_v21, %v16263_v30  ;;  %v12006_v21 = vpack.c.bf16 %v16299_v63, %v16294_v24  ;;  %v25321_v63 = vld [vmem:[#allocation59_spill] sm:$0xff] }
 0x17e   :  { %12467 = vmatprep.subr.bf16.mxu0 %v25285_v39  ;;  %11989 = vmatpush1.bf16.msra.mxu1 %v11988_v55  ;;  %v16856_v39 = vld [vmem:[%s23438_s0 + $0x6c0] sm:$0xff]  ;;  %v25306_v38 = vld [vmem:[#allocation82_spill] sm:$0xff] }
 0x17f   :  { %1952 = vmatprep.subr.mxu1 %v1951_v37  ;;  %v16861_v55 = vld [vmem:[%s23438_s0 + $0x700] sm:$0xff]  ;;  %v25289_v37 = vld [vmem:[#allocation87_spill] sm:$0xff]  ;;  %25293 = vst [vmem:[#allocation54_spill] sm:$0xff] %v16887_v2  ;;  %v23877_v22 = vand.u32 4294901760, %v16856_v39 }
 0x180   :  { %v11992_v20 = vpack.c.bf16 %v25290_v10, %v25289_v37  ;;  %v25299_v10 = vld [vmem:[#allocation94_spill] sm:$0xff]  ;;  %v25330_v37 = vand.u32 4294901760, %v16821_v8 }
 0x181   :  { %12469 = vmatpush1.bf16.msra.mxu0 %v25288_v43  ;;  %v16881_v43 = vpack.c.bf16 %v23865_v32, %v23866_v42  ;;  %v25295_v32 = vand.u32 4294901760, %v16837_v60 }
 0x182   :  { %3686 = vmatprep.subr.mxu0 %v25291_v41  ;;  %1958 = vmatpush1.msra.mxu1 %v1957_v29  ;;  %v25296_v29 = vand.u32 4294901760, %v16842_v28  ;;  %v25298_v41 = vld [vmem:[#allocation132_spill] sm:$0xff] }
 0x183   :  { %25292 = vst [vmem:[#allocation52_spill] sm:$0xff] %v16881_v43  ;;  %11991 = vmatprep.subr.bf16.mxu1 %v11990_v46  ;;  %1975 = vmatmul.mubr.f32.vlgmr.msra.gmra.mrb[2].mxu1 %v25209_v58  ;;  %v16910_v46 = vld [vmem:[%s23438_s0 + $0x780] sm:$0xff] }
 0x184   :  { %v16898_v42 = vpack.c.bf16 %v25296_v29, %v25295_v32  ;;  %11993 = vmatpush1.bf16.msra.mxu1 %v11992_v20  ;;  %v11996_v32 = vpack.c.bf16 %v16209_v40, %v16204_v54  ;;  %v16918_v29 = vld [vmem:[%s23438_s0 + $0x7c8] sm:$0xff]  ;;  %v25301_v40 = vand.u32 4294901760, %v16861_v55  ;;  %2147 = vmatprep.mubr.f32.mxu1 %v25306_v38 }
 0x185   :  { %3688 = vmatpush1.msra.mxu0 %v25298_v41  ;;  %v25300_v41 = vld [vmem:[#allocation14_spill] sm:$0xff]  ;;  %11995 = vmatprep.subr.bf16.mxu1 %v11994_v11 }
 0x186   :  { %25297 = vst [vmem:[#allocation55_spill] sm:$0xff] %v16898_v42  ;;  %12759 = vmatprep.subr.bf16.mxu0 %v16881_v43  ;;  %3705 = vmatmul.mubr.f32.vlgmr.msra.gmra.mrb[2].mxu0 %v25209_v58  ;;  %v11998_v20 = vpack.c.bf16 %v25300_v41, %v25299_v10  ;;  %v16934_v54 = vpack.c.bf16 %v25301_v40, %v23877_v22  ;;  %v25303_v43 = vand.u32 4294901760, %v16869_v52  ;;  %v25304_v58 = vand.u32 4294901760, %v16874_v49  ;;  %v16950_v40 = vld [vmem:[%s23438_s0 + $0x7c0] sm:$0xff]  ;;  %v25307_v11 = vld [vmem:[#allocation90_spill] sm:$0xff] }
 0x187   :  { %12761 = vmatpush1.bf16.msra.mxu0 %v16887_v2  ;;  %v16955_v22 = vld [vmem:[%s23438_s0 + $0x800] sm:$0xff]  ;;  %v16968_v2 = vld [vmem:[%s23438_s0 + $0x888] sm:$0xff]  ;;  %4943 = vmatprep.mubr.f32.mxu0 %v25307_v11  ;;  %v25311_v11 = vand.u32 4294901760, %v16918_v29 }
 0x188   :  { %25302 = vst [vmem:[#allocation56_spill] sm:$0xff] %v16934_v54  ;;  %12763 = vmatprep.subr.bf16.mxu0 %v16898_v42  ;;  %v16943_v41 = vpack.c.bf16 %v25304_v58, %v25303_v43  ;;  %11997 = vmatpush1.bf16.msra.mxu1 %v11996_v32  ;;  %v12000_v58 = vpack.c.bf16 %v16239_v56, %v16225_v50  ;;  %v16963_v43 = vld [vmem:[%s23438_s0 + $0x848] sm:$0xff]  ;;  %v25308_v32 = vand.u32 4294901760, %v16905_v57  ;;  %v25309_v42 = vand.u32 4294901760, %v16910_v46 }
 0x189   :  { %11999 = vmatprep.subr.bf16.mxu1 %v11998_v20  ;;  %v23893_v56 = vand.u32 4294901760, %v16950_v40  ;;  %v25312_v20 = vand.u32 4294901760, %v16923_v6  ;;  %v12004_v50 = vpack.c.bf16 %v16278_v19, %v16273_v45  ;;  %v25316_v45 = vand.u32 4294901760, %v16963_v43  ;;  %v25319_v19 = vld [vmem:[#allocation53_spill] sm:$0xff] }
 0x18a   :  { %25305 = vst [vmem:[#allocation58_spill] sm:$0xff] %v16943_v41  ;;  %v16978_v38 = vpack.c.bf16 %v25309_v42, %v25308_v32  ;;  %v16994_v42 = vld [vmem:[%s23438_s0 + $0x840] sm:$0xff] }
 0x18b   :  { %12765 = vmatpush1.bf16.msra.mxu0 %v16934_v54  ;;  %v16987_v10 = vpack.c.bf16 %v25312_v20, %v25311_v11  ;;  %v16999_v32 = vld [vmem:[%s23438_s0 + $0x880] sm:$0xff]  ;;  %v17006_v11 = vld [vmem:[%s23438_s0 + $0x8c8] sm:$0xff] }
 0x18c   :  { %25310 = vst [vmem:[#allocation60_spill] sm:$0xff] %v16978_v38  ;;  %12767 = vmatprep.subr.bf16.mxu0 %v16943_v41  ;;  %12001 = vmatpush1.bf16.msra.mxu1 %v12000_v58  ;;  %v17011_v20 = vld [vmem:[%s23438_s0 + $0x908] sm:$0xff]  ;;  %v25314_v58 = vand.u32 4294901760, %v16955_v22  ;;  %v25326_v31 = vand.u32 4294901760, %v17006_v11 }
 0x18d   :  { %25313 = vst [vmem:[#allocation61_spill] sm:$0xff] %v16987_v10  ;;  %12003 = vmatprep.subr.bf16.mxu1 %v12002_v23  ;;  %v25317_v23 = vand.u32 4294901760, %v16968_v2  ;;  %v25320_v41 = vld [vmem:[#allocation57_spill] sm:$0xff] }
 0x18e   :  { %v17020_v54 = vpack.c.bf16 %v25314_v58, %v23893_v56  ;;  %v17036_v58 = vld [vmem:[%s23438_s0 + $0x8c0] sm:$0xff] }
 0x18f   :  { %12769 = vmatpush1.bf16.msra.mxu0 %v16978_v38  ;;  %v17029_v30 = vpack.c.bf16 %v25317_v23, %v25316_v45  ;;  %v17041_v56 = vld [vmem:[%s23438_s0 + $0x900] sm:$0xff]  ;;  %v17048_v45 = vld [vmem:[%s23438_s0 + $0x948] sm:$0xff]  ;;  %v25332_v5 = vand.u32 4294901760, %v17036_v58 }
 0x190   :  { %25315 = vst [vmem:[#allocation63_spill] sm:$0xff] %v17020_v54  ;;  %12771 = vmatprep.subr.bf16.mxu0 %v16987_v10  ;;  %12005 = vmatpush1.bf16.msra.mxu1 %v12004_v50  ;;  %v12008_v10 = vpack.c.bf16 %v25320_v41, %v25319_v19  ;;  %v17053_v23 = vld [vmem:[%s23438_s0 + $0x988] sm:$0xff]  ;;  %v25323_v50 = vand.u32 4294901760, %v16994_v42  ;;  %v25324_v41 = vand.u32 4294901760, %v16999_v32  ;;  %v25333_v14 = vand.u32 4294901760, %v17041_v56 }
 0x191   :  { %25318 = vst [vmem:[#allocation64_spill] sm:$0xff] %v17029_v30  ;;  %12007 = vmatprep.subr.bf16.mxu1 %v12006_v21  ;;  %v25322_v38 = vld [vmem:[#allocation62_spill] sm:$0xff]  ;;  %v25327_v21 = vand.u32 4294901760, %v17011_v20 }
 0x192   :  { %v12010_v24 = vpack.c.bf16 %v25322_v38, %v25321_v63  ;;  %v17062_v19 = vpack.c.bf16 %v25324_v41, %v25323_v50  ;;  %v17078_v41 = vld [vmem:[%s23438_s0 + $0x940] sm:$0xff]  ;;  %v25329_v38 = vand.u32 4294901760, %v16816_v4  ;;  %v17114_v63 = vpack.c.bf16 %v25333_v14, %v25332_v5 }
 0x193   :  { %12773 = vmatpush1.bf16.msra.mxu0 %v17020_v54  ;;  %v17071_v27 = vpack.c.bf16 %v25327_v21, %v25326_v31  ;;  %v17083_v50 = vld [vmem:[%s23438_s0 + $0x980] sm:$0xff]  ;;  %v17090_v31 = vld [vmem:[%s23438_s0 + $0x9c8] sm:$0xff]  ;;  %v25344_v5 = vand.u32 4294901760, %v16842_v28 }
 0x194   :  { %25325 = vst [vmem:[#allocation65_spill] sm:$0xff] %v17062_v19  ;;  %12775 = vmatprep.subr.bf16.mxu0 %v17029_v30  ;;  %12009 = vmatpush1.bf16.msra.mxu1 %v12008_v10  ;;  %v17095_v21 = vld [vmem:[%s23438_s0 + $0xa08] sm:$0xff]  ;;  %v17100_v54 = vsub.f32 %v16816_v4, %v25329_v38  ;;  %v12014_v10 = vpack.c.bf16 %v16381_v47, %v16376_v7  ;;  %25334 = vst [vmem:[#allocation70_spill] sm:$0xff] %v17114_v63  ;;  %v25335_v4 = vand.u32 4294901760, %v16826_v35 }
 0x195   :  { %25328 = vst [vmem:[#allocation67_spill] sm:$0xff] %v17071_v27  ;;  %12011 = vmatprep.subr.bf16.mxu1 %v12010_v24  ;;  %v17107_v30 = vsub.f32 %v16821_v8, %v25330_v37  ;;  %v25337_v8 = vand.u32 4294901760, %v17048_v45  ;;  %v25338_v37 = vand.u32 4294901760, %v17053_v23  ;;  %v17135_v24 = vld [vmem:[%s23438_s0 + $0x9c0] sm:$0xff]  ;;  %v17155_v14 = vsub.f32 %v16842_v28, %v25344_v5  ;;  %v17162_v7 = vld [vmem:[%s23438_s0 + $0xa48] sm:$0xff] }
 0x196   :  { %v17121_v47 = vsub.f32 %v16826_v35, %v25335_v4  ;;  %v17140_v35 = vld [vmem:[%s23438_s0 + $0xa00] sm:$0xff]  ;;  %v25340_v4 = vand.u32 4294901760, %v16831_v15  ;;  %v25348_v28 = vand.u32 4294901760, %v16861_v55  ;;  %v25350_v5 = vand.u32 4294901760, %v16869_v52 }
 0x197   :  { %25331 = vst [vmem:[#allocation69_spill] sm:$0xff] %v17107_v30  ;;  %12777 = vmatpush1.bf16.msra.mxu0 %v17062_v19  ;;  %v17128_v19 = vpack.c.bf16 %v25338_v37, %v25337_v8  ;;  %v25342_v8 = vand.u32 4294901760, %v16837_v60  ;;  %25345 = vst [vmem:[#allocation84_spill] sm:$0xff] %v17155_v14 }
 0x198   :  { %25336 = vst [vmem:[#allocation71_spill] sm:$0xff] %v17121_v47  ;;  %12779 = vmatprep.subr.bf16.mxu0 %v17071_v27  ;;  %v17145_v38 = vsub.f32 %v16831_v15, %v25340_v4  ;;  %12013 = vmatpush1.bf16.msra.mxu1 %v12012_v33  ;;  %v12016_v27 = vpack.c.bf16 %v25232_v25, %v16386_v17  ;;  %v17167_v15 = vld [vmem:[%s23438_s0 + $0xa88] sm:$0xff]  ;;  %v25352_v17 = vand.u32 4294901760, %v16874_v49 }
 0x199   :  { %25339 = vst [vmem:[#allocation73_spill] sm:$0xff] %v17128_v19  ;;  %v17150_v37 = vsub.f32 %v16837_v60, %v25342_v8  ;;  %v25346_v60 = vand.u32 4294901760, %v16856_v39  ;;  %v17177_v33 = vsub.f32 %v16861_v55, %v25348_v28  ;;  %v17182_v8 = vsub.f32 %v16869_v52, %v25350_v5  ;;  %12015 = vmatprep.subr.bf16.mxu1 %v12014_v10  ;;  %v17217_v10 = vld [vmem:[%s23438_s0 + $0xa40] sm:$0xff] }
 0x19a   :  { %25341 = vst [vmem:[#allocation81_spill] sm:$0xff] %v17145_v38  ;;  %v12018_v25 = vpack.c.bf16 %v16435_v26, %v16430_v62  ;;  %v17189_v53 = vsub.f32 %v16874_v49, %v25352_v17  ;;  %v25355_v55 = vand.u32 4294901760, %v17083_v50  ;;  %v25357_v28 = vand.u32 4294901760, %v16905_v57  ;;  %v17244_v26 = vld [vmem:[%s23438_s0 + $0xac8] sm:$0xff] }
 0x19b   :  { %25343 = vst [vmem:[#allocation85_spill] sm:$0xff] %v17150_v37  ;;  %v17172_v4 = vsub.f32 %v16856_v39, %v25346_v60  ;;  %25349 = vst [vmem:[#allocation91_spill] sm:$0xff] %v17177_v33  ;;  %12781 = vmatpush1.bf16.msra.mxu0 %v17114_v63  ;;  %v25354_v39 = vand.u32 4294901760, %v17078_v41  ;;  %v25359_v17 = vand.u32 4294901760, %v17090_v31  ;;  %v25360_v49 = vand.u32 4294901760, %v17095_v21 }
 0x19c   :  { %25351 = vst [vmem:[#allocation92_spill] sm:$0xff] %v17182_v8  ;;  %25353 = vst [vmem:[#allocation96_spill] sm:$0xff] %v17189_v53  ;;  %v17203_v5 = vsub.f32 %v16905_v57, %v25357_v28  ;;  %12783 = vmatprep.subr.bf16.mxu0 %v17128_v19  ;;  %v17222_v57 = vld [vmem:[%s23438_s0 + $0xa80] sm:$0xff]  ;;  %v25362_v28 = vand.u32 4294901760, %v16910_v46  ;;  %12017 = vmatpush1.bf16.msra.mxu1 %v12016_v27  ;;  %v12020_v19 = vpack.c.bf16 %v16485_v9, %v16469_v48 }
 0x19d   :  { %25347 = vst [vmem:[#allocation88_spill] sm:$0xff] %v17172_v4  ;;  %v17196_v60 = vpack.c.bf16 %v25355_v55, %v25354_v39  ;;  %v17210_v63 = vpack.c.bf16 %v25360_v49, %v25359_v17  ;;  %v25364_v17 = vand.u32 4294901760, %v16918_v29  ;;  %v25366_v55 = vand.u32 4294901760, %v16923_v6  ;;  %12019 = vmatprep.subr.bf16.mxu1 %v12018_v25  ;;  %v17299_v25 = vld [vmem:[%s23438_s0 + $0xac0] sm:$0xff] }
 0x19e   :  { %25358 = vst [vmem:[#allocation32_spill] sm:$0xff] %v17203_v5  ;;  %v17227_v52 = vsub.f32 %v16910_v46, %v25362_v28  ;;  %v17249_v46 = vld [vmem:[%s23438_s0 + $0xb08] sm:$0xff]  ;;  %v25370_v27 = vand.u32 4294901760, %v16955_v22  ;;  %v12022_v9 = vpack.c.bf16 %v16527_v12, %v16522_v61  ;;  %v25373_v48 = vand.u32 4294901760, %v16968_v2  ;;  %v25390_v12 = vld [vmem:[#allocation27_spill] sm:$0xff] }
 0x19f   :  { %25356 = vst [vmem:[#allocation30_spill] sm:$0xff] %v17196_v60  ;;  %25361 = vst [vmem:[#allocation98_spill] sm:$0xff] %v17210_v63  ;;  %v17232_v49 = vsub.f32 %v16918_v29, %v25364_v17  ;;  %v17237_v39 = vsub.f32 %v16923_v6, %v25366_v55  ;;  %v25368_v29 = vand.u32 4294901760, %v16950_v40  ;;  %v25372_v55 = vand.u32 4294901760, %v16963_v43  ;;  %12785 = vmatpush1.bf16.msra.mxu0 %v17196_v60 }
 0x1a0   :  { %25363 = vst [vmem:[#allocation99_spill] sm:$0xff] %v17227_v52  ;;  %v17259_v6 = vsub.f32 %v16955_v22, %v25370_v27  ;;  %v17271_v62 = vsub.f32 %v16968_v2, %v25373_v48  ;;  %v25376_v22 = vand.u32 4294901760, %v17140_v35  ;;  %v25378_v27 = vand.u32 4294901760, %v16994_v42  ;;  %12787 = vmatprep.subr.bf16.mxu0 %v17210_v63  ;;  %12021 = vmatpush1.bf16.msra.mxu1 %v12020_v19  ;;  %v25389_v63 = vld [vmem:[#allocation24_spill] sm:$0xff] }
 0x1a1   :  { %25365 = vst [vmem:[#allocation100_spill] sm:$0xff] %v17232_v49  ;;  %25367 = vst [vmem:[#allocation101_spill] sm:$0xff] %v17237_v39  ;;  %v17254_v28 = vsub.f32 %v16950_v40, %v25368_v29  ;;  %v17264_v17 = vsub.f32 %v16963_v43, %v25372_v55  ;;  %v25375_v40 = vand.u32 4294901760, %v17135_v24  ;;  %v25380_v48 = vand.u32 4294901760, %v17162_v7  ;;  %12023 = vmatprep.subr.bf16.mxu1 %v12022_v9 }
 0x1a2   :  { %25371 = vst [vmem:[#allocation103_spill] sm:$0xff] %v17259_v6  ;;  %25374 = vst [vmem:[#allocation104_spill] sm:$0xff] %v17271_v62  ;;  %v17285_v55 = vsub.f32 %v16994_v42, %v25378_v27  ;;  %v25381_v2 = vand.u32 4294901760, %v17167_v15  ;;  %v17304_v42 = vld [vmem:[%s23438_s0 + $0xb00] sm:$0xff]  ;;  %v25383_v27 = vand.u32 4294901760, %v16999_v32  ;;  %v12024_v61 = vpack.c.bf16 %v25390_v12, %v25389_v63 }
 0x1a3   :  { %25369 = vst [vmem:[#allocation102_spill] sm:$0xff] %v17254_v28  ;;  %v17278_v29 = vpack.c.bf16 %v25376_v22, %v25375_v40  ;;  %v25387_v22 = vand.u32 4294901760, %v17011_v20  ;;  %v25392_v19 = vand.u32 4294901760, %v17041_v56  ;;  %v25394_v12 = vld [vmem:[#allocation28_spill] sm:$0xff]  ;;  %v25395_v63 = vld [vmem:[#allocation29_spill] sm:$0xff] }
 0x1a4   :  { %25379 = vst [vmem:[#allocation106_spill] sm:$0xff] %v17285_v55  ;;  %v17292_v60 = vpack.c.bf16 %v25381_v2, %v25380_v48  ;;  %v17309_v43 = vsub.f32 %v16999_v32, %v25383_v27  ;;  %v25385_v48 = vand.u32 4294901760, %v17006_v11  ;;  %v17326_v55 = vld [vmem:[%s23438_s0 + $0xb48] sm:$0xff]  ;;  %12025 = vmatpush1.bf16.msra.mxu1 %v12024_v61  ;;  %v25408_v61 = vand.u32 4294901760, %v17304_v42 }
 0x1a5   :  { %25377 = vst [vmem:[#allocation105_spill] sm:$0xff] %v17278_v29  ;;  %v17319_v40 = vsub.f32 %v17011_v20, %v25387_v22  ;;  %v17331_v32 = vld [vmem:[%s23438_s0 + $0xb88] sm:$0xff]  ;;  %v17341_v20 = vsub.f32 %v17041_v56, %v25392_v19  ;;  %v25393_v22 = vand.u32 4294901760, %v17048_v45  ;;  %12789 = vmatpush1.bf16.msra.mxu0 %v17278_v29  ;;  %v25398_v56 = vand.u32 4294901760, %v17222_v57  ;;  %v17367_v19 = vld [vmem:[%s23438_s0 + $0xb40] sm:$0xff] }
 0x1a6   :  { %25382 = vst [vmem:[#allocation107_spill] sm:$0xff] %v17292_v60  ;;  %25384 = vst [vmem:[#allocation12_spill] sm:$0xff] %v17309_v43  ;;  %v17314_v2 = vsub.f32 %v17006_v11, %v25385_v48  ;;  %v25391_v11 = vand.u32 4294901760, %v17036_v58  ;;  %12791 = vmatprep.subr.bf16.mxu0 %v17292_v60  ;;  %v12028_v60 = vpack.c.bf16 %v16649_v1, %v16640_v44 }
 0x1a7   :  { %25388 = vst [vmem:[#allocation110_spill] sm:$0xff] %v17319_v40  ;;  %v17346_v48 = vsub.f32 %v17048_v45, %v25393_v22  ;;  %v12026_v40 = vpack.c.bf16 %v25395_v63, %v25394_v12  ;;  %v25404_v63 = vand.u32 4294901760, %v17083_v50  ;;  %v25410_v45 = vand.u32 4294901760, %v17326_v55 }
 0x1a8   :  { %25386 = vst [vmem:[#allocation108_spill] sm:$0xff] %v17314_v2  ;;  %v17336_v27 = vsub.f32 %v17036_v58, %v25391_v11  ;;  %v25396_v2 = vand.u32 4294901760, %v17053_v23  ;;  %v25397_v58 = vand.u32 4294901760, %v17217_v10  ;;  %v12032_v1 = vpack.c.bf16 %v16689_v36, %v16684_v18 }
 0x1a9   :  { %v17391_v12 = vsub.f32 %v17083_v50, %v25404_v63  ;;  %v17410_v63 = vld [vmem:[%s23438_s0 + $0xc08] sm:$0xff]  ;;  %12027 = vmatprep.subr.bf16.mxu1 %v12026_v40  ;;  %v25407_v40 = vand.u32 4294901760, %v17299_v25  ;;  %v12034_v29 = vpack.c.bf16 %v16734_v3, %v16712_v0  ;;  %v25417_v3 = vand.u32 4294901760, %v17107_v30 }
 0x1aa   :  { %v17353_v43 = vsub.f32 %v17053_v23, %v25396_v2  ;;  %v17360_v11 = vpack.c.bf16 %v25398_v56, %v25397_v58  ;;  %v17372_v23 = vld [vmem:[%s23438_s0 + $0xb80] sm:$0xff]  ;;  %v25400_v2 = vand.u32 4294901760, %v17078_v41  ;;  %v25401_v58 = vand.u32 4294901760, %v17244_v26  ;;  %12029 = vmatpush1.bf16.msra.mxu1 %v12028_v60 }
 0x1ab   :  { %v25402_v56 = vand.u32 4294901760, %v17249_v46  ;;  %v17431_v50 = vpack.c.bf16 %v25408_v61, %v25407_v40  ;;  %v25416_v60 = vand.u32 4294901760, %v17100_v54  ;;  %v25422_v36 = vand.u32 4294901760, %v17410_v63 }
 0x1ac   :  { %25399 = vst [vmem:[#allocation112_spill] sm:$0xff] %v17360_v11  ;;  %v17377_v22 = vsub.f32 %v17078_v41, %v25400_v2  ;;  %v25405_v41 = vand.u32 4294901760, %v17090_v31  ;;  %12793 = vmatpush1.bf16.msra.mxu0 %v17360_v11  ;;  %v25411_v11 = vand.u32 4294901760, %v17331_v32 }
 0x1ad   :  { %v17384_v9 = vpack.c.bf16 %v25402_v56, %v25401_v58  ;;  %v12030_v58 = vpack.c.bf16 %v16661_v34, %v16656_v16  ;;  %v17405_v56 = vld [vmem:[%s23438_s0 + $0xbc8] sm:$0xff]  ;;  %25409 = vst [vmem:[#allocation122_spill] sm:$0xff] %v17431_v50  ;;  %v4953_v40 = vsub.f32 %v17100_v54, %v25416_v60  ;;  %v4965_v16 = vsub.f32 %v17107_v30, %v25417_v3 }
 0x1ae   :  { %v17396_v2 = vsub.f32 %v17090_v31, %v25405_v41  ;;  %v17417_v31 = vld [vmem:[%s23438_s0 + $0xbc0] sm:$0xff]  ;;  %v408_v34 = vld [vmem:[%s23438_s0 + $0xc48] sm:$0xf]  ;;  %v17444_v44 = vpack.c.bf16 %v25411_v11, %v25410_v45  ;;  %v25413_v11 = vand.u32 4294901760, %v17367_v19  ;;  %v25414_v45 = vand.u32 4294901760, %v17372_v23 }
 0x1af   :  { %25403 = vst [vmem:[#allocation116_spill] sm:$0xff] %v17384_v9  ;;  %v17422_v41 = vld [vmem:[%s23438_s0 + $0xc00] sm:$0xff]  ;;  %12795 = vmatprep.subr.bf16.mxu0 %v17384_v9  ;;  %12031 = vmatprep.subr.bf16.mxu1 %v12030_v58  ;;  %v25420_v60 = vand.u32 4294901760, %v17150_v37 }
 0x1b0   :  { %25406 = vst [vmem:[#allocation118_spill] sm:$0xff] %v17396_v2  ;;  %25412 = vst [vmem:[#allocation124_spill] sm:$0xff] %v17444_v44  ;;  %v17459_v61 = vpack.c.bf16 %v25414_v45, %v25413_v11  ;;  %v17462_v2 = vsel %vm419_vm0, %v408_v34, 0  ;;  %12797 = vmatpush1.bf16.msra.mxu0 %v17431_v50  ;;  %v407_v58 = vld [vmem:[%s23438_s0 + $0xc40] sm:$0xf]  ;;  %v25418_v11 = vand.u32 4294901760, %v17121_v47  ;;  %12033 = vmatpush1.bf16.msra.mxu1 %v12032_v1 }
 0x1b1   :  { %v25419_v34 = vand.u32 4294901760, %v17145_v38  ;;  %v4977_v0 = vsub.f32 %v17150_v37, %v25420_v60  ;;  %12799 = vmatprep.subr.bf16.mxu0 %v17444_v44  ;;  %v25421_v50 = vand.u32 4294901760, %v17405_v56  ;;  %v25425_v60 = vand.u32 4294901760, %v17095_v21  ;;  %12035 = vmatprep.subr.bf16.mxu1 %v12034_v29 }
 0x1b2   :  { %25415 = vst [vmem:[#allocation74_spill] sm:$0xff] %v17459_v61  ;;  %v4959_v45 = vsub.f32 %v17121_v47, %v25418_v11  ;;  %v25424_v11 = vand.u32 4294901760, %v17155_v14  ;;  %v12036_v44 = vpack.c.bf16 %v16756_v59, %v16740_v51  ;;  %v4966_v1 = vand.u32 4294901760, %v4965_v16 }
 0x1b3   :  { %v4971_v9 = vsub.f32 %v17145_v38, %v25419_v34  ;;  %v17489_v18 = vpack.c.bf16 %v25422_v36, %v25421_v50  ;;  %v17499_v3 = vsub.f32 %v17095_v21, %v25425_v60  ;;  %v25426_v36 = vand.u32 4294901760, %v17417_v31 }
 0x1b4   :  { %v4989_v47 = vsub.f32 %v17155_v14, %v25424_v11  ;;  %v25427_v50 = vand.u32 4294901760, %v17422_v41  ;;  %v17511_v38 = vand.u32 4294901760, %v17462_v2  ;;  %v17514_v34 = vsel %vm419_vm0, %v407_v58, 0  ;;  %12801 = vmatpush1.bf16.msra.mxu0 %v17459_v61  ;;  %12037 = vmatpush1.bf16.msra.mxu1 %v12036_v44  ;;  %v25441_v44 = vld [vmem:[#allocation47_spill] sm:$0xff] }
 0x1b5   :  { %25423 = vst [vmem:[#allocation129_spill] sm:$0xff] %v17489_v18  ;;  %v4954_v21 = vand.u32 4294901760, %v4953_v40  ;;  %v4960_v60 = vand.u32 4294901760, %v4959_v45  ;;  %v4972_v59 = vand.u32 4294901760, %v4971_v9  ;;  %v4978_v51 = vand.u32 4294901760, %v4977_v0  ;;  %12803 = vmatprep.subr.bf16.mxu0 %v17489_v18  ;;  %2127 = vmatprep.subr.mxu1 %v16783_v13 }
 0x1b6   :  { %v17507_v37 = vpack.c.bf16 %v25427_v50, %v25426_v36  ;;  %25429 = vst [vmem:[#allocation132_spill] sm:$0xff] %v17511_v38  ;;  %v25430_v14 = vand.u32 4294901760, %v17172_v4  ;;  %v4990_v29 = vand.u32 4294901760, %v4989_v47  ;;  %v25431_v50 = vand.u32 4294901760, %v17177_v33 }
 0x1b7   :  { %v25432_v58 = vand.u32 4294901760, %v17182_v8  ;;  %v25433_v9 = vand.u32 4294901760, %v17135_v24  ;;  %v25435_v47 = vand.u32 4294901760, %v17189_v53  ;;  %v12808_v18 = vpack.c.bf16 %v4972_v59, %v4960_v60  ;;  %v25448_v59 = vld [vmem:[#allocation97_spill] sm:$0xff] }
 0x1b8   :  { %25428 = vst [vmem:[#allocation131_spill] sm:$0xff] %v17507_v37  ;;  %v4983_v36 = vsub.f32 %v17172_v4, %v25430_v14  ;;  %v4995_v11 = vsub.f32 %v17177_v33, %v25431_v50  ;;  %v25434_v14 = vand.u32 4294901760, %v17140_v35  ;;  %12805 = vmatpush1.bf16.msra.mxu0 %v17507_v37  ;;  %2130 = vmatpush1.msra.mxu1 %v25441_v44  ;;  %v25442_v37 = vand.u32 4294901760, %v17227_v52  ;;  %v25451_v44 = vld [vmem:[#allocation108_spill] sm:$0xff] }
 0x1b9   :  { %v5001_v16 = vsub.f32 %v17182_v8, %v25432_v58  ;;  %v17531_v0 = vsub.f32 %v17135_v24, %v25433_v9  ;;  %v5013_v50 = vsub.f32 %v17189_v53, %v25435_v47  ;;  %v25436_v58 = vand.u32 4294901760, %v17162_v7  ;;  %4921 = vmatprep.subr.mxu0 %v17511_v38 }
 0x1ba   :  { %v17536_v45 = vsub.f32 %v17140_v35, %v25434_v14  ;;  %v25437_v24 = vand.u32 4294901760, %v17167_v15  ;;  %v17557_v14 = vand.u32 4294901760, %v17514_v34  ;;  %v12806_v47 = vpack.c.bf16 %v4966_v1, %v4954_v21  ;;  %v25443_v1 = vld [vmem:[#allocation95_spill] sm:$0xff]  ;;  %v25449_v21 = vld [vmem:[#allocation106_spill] sm:$0xff] }
 0x1bb   :  { %v17545_v40 = vsub.f32 %v17162_v7, %v25436_v58  ;;  %v4984_v7 = vand.u32 4294901760, %v4983_v36  ;;  %v12810_v58 = vpack.c.bf16 %v4990_v29, %v4978_v51  ;;  %v4996_v61 = vand.u32 4294901760, %v4995_v11  ;;  %12039 = vmatprep.subr.bf16.mxu1 %v25443_v1 }
 0x1bc   :  { %v17550_v9 = vsub.f32 %v17167_v15, %v25437_v24  ;;  %25439 = vst [vmem:[#allocation134_spill] sm:$0xff] %v17557_v14  ;;  %v5002_v15 = vand.u32 4294901760, %v5001_v16  ;;  %v25440_v24 = vand.u32 4294901760, %v17203_v5  ;;  %v5014_v35 = vand.u32 4294901760, %v5013_v50  ;;  %4923 = vmatpush1.msra.mxu0 %v17557_v14 }
 0x1bd   :  { %v5019_v53 = vsub.f32 %v17227_v52, %v25442_v37  ;;  %v25444_v51 = vmov 5.605165e-06   ;;  %v25445_v11 = vand.u32 4294901760, %v17232_v49  ;;  %v25446_v36 = vand.u32 4294901760, %v17237_v39  ;;  %12807 = vmatprep.subr.bf16.mxu0 %v12806_v47  ;;  %v25465_v52 = vld [vmem:[#allocation80_spill] sm:$0xff] }
 0x1be   :  { %25438 = vst [vmem:[#allocation133_spill] sm:$0xff] %v17550_v9  ;;  %v5007_v13 = vsub.f32 %v17203_v5, %v25440_v24  ;;  %2148 = vmatmul.mubr.f32.vlgmr.msra.gmra.mrb[2].mxu1 %v25444_v51  ;;  %v25447_v50 = vand.u32 4294901760, %v17217_v10  ;;  %v25453_v37 = vmov 2.3283064e-09   ;;  %v12814_v51 = vpack.c.bf16 %v5014_v35, %v5002_v15 }
 0x1bf   :  { %v5025_v60 = vsub.f32 %v17232_v49, %v25445_v11  ;;  %v5037_v29 = vsub.f32 %v17237_v39, %v25446_v36  ;;  %12041 = vmatpush1.bf16.msra.mxu1 %v25448_v59  ;;  %v25450_v11 = vld [vmem:[#allocation12_spill] sm:$0xff]  ;;  %v25452_v36 = vand.u32 4294901760, %v17222_v57  ;;  %4944 = vmatmul.mubr.f32.vlgmr.msra.gmra.mrb[4].mxu0 %v25453_v37  ;;  %v25454_v39 = vld [vmem:[#allocation110_spill] sm:$0xff]  ;;  %v25455_v59 = vld [vmem:[#allocation109_spill] sm:$0xff]  ;;  %v5020_v5 = vand.u32 4294901760, %v5019_v53 }
 0x1c0   :  { %v17582_v24 = vsub.f32 %v17217_v10, %v25447_v50  ;;  %v12812_v10 = vpack.c.bf16 %v4996_v61, %v4984_v7  ;;  %v5008_v50 = vand.u32 4294901760, %v5007_v13  ;;  %12809 = vmatpush1.bf16.msra.mxu0 %v12808_v18  ;;  %12043 = vmatprep.subr.bf16.mxu1 %v25455_v59  ;;  %v25456_v1 = vand.u32 4294901760, %v17254_v28  ;;  %v25460_v53 = vld [vmem:[#allocation86_spill] sm:$0xff]  ;;  %v25461_v7 = vld [vmem:[#allocation111_spill] sm:$0xff] }
 0x1c1   :  { %v17592_v16 = vsub.f32 %v17222_v57, %v25452_v36  ;;  %v25457_v8 = vand.u32 4294901760, %v17259_v6  ;;  %12811 = vmatprep.subr.bf16.mxu0 %v12810_v58  ;;  %v5026_v47 = vand.u32 4294901760, %v5025_v60  ;;  %v5038_v36 = vand.u32 4294901760, %v5037_v29  ;;  %2271 = vmatprep.mubr.f32.mxu1 %v25460_v53  ;;  %v25467_v53 = vld [vmem:[#allocation113_spill] sm:$0xff] }
 0x1c2   :  { %v5031_v49 = vsub.f32 %v17254_v28, %v25456_v1  ;;  %v25458_v13 = vand.u32 4294901760, %v17264_v17  ;;  %v25459_v18 = vand.u32 4294901760, %v17271_v62  ;;  %v25462_v15 = vand.u32 4294901760, %v25449_v21  ;;  %5265 = vmatprep.mubr.f32.mxu0 %v25465_v52 }
 0x1c3   :  { %v5043_v57 = vsub.f32 %v17259_v6, %v25457_v8  ;;  %12045 = vmatpush1.bf16.msra.mxu1 %v25461_v7  ;;  %v25463_v8 = vand.u32 4294901760, %v25450_v11  ;;  %v25464_v60 = vand.u32 4294901760, %v25451_v44 }
 0x1c4   :  { %v5049_v61 = vsub.f32 %v17264_v17, %v25458_v13  ;;  %v5061_v35 = vsub.f32 %v17271_v62, %v25459_v18  ;;  %v5055_v1 = vsub.f32 %v25449_v21, %v25462_v15  ;;  %v25466_v18 = vand.u32 4294901760, %v17244_v26  ;;  %12047 = vmatprep.subr.bf16.mxu1 %v25467_v53  ;;  %12813 = vmatpush1.bf16.msra.mxu0 %v12812_v10  ;;  %v25473_v10 = vld [vmem:[#allocation115_spill] sm:$0xff] }
 0x1c5   :  { %v5067_v58 = vsub.f32 %v25450_v11, %v25463_v8  ;;  %v5073_v29 = vsub.f32 %v25451_v44, %v25464_v60  ;;  %v25468_v15 = vand.u32 4294901760, %v25454_v39  ;;  %v12816_v60 = vpack.c.bf16 %v5020_v5, %v5008_v50  ;;  %12815 = vmatprep.subr.bf16.mxu0 %v12814_v51 }
 0x1c6   :  { %v17625_v37 = vsub.f32 %v17244_v26, %v25466_v18  ;;  %v5032_v13 = vand.u32 4294901760, %v5031_v49  ;;  %v5044_v44 = vand.u32 4294901760, %v5043_v57  ;;  %v23989_v11 = vand.u32 4294901760, %v17353_v43 }
 0x1c7   :  { %v5085_v7 = vsub.f32 %v25454_v39, %v25468_v15  ;;  %v25469_v21 = vand.u32 4294901760, %v17249_v46  ;;  %v12818_v18 = vpack.c.bf16 %v5038_v36, %v5026_v47  ;;  %v5050_v53 = vand.u32 4294901760, %v5049_v61  ;;  %v25471_v15 = vld [vmem:[#allocation114_spill] sm:$0xff] }
 0x1c8   :  { %v5062_v62 = vand.u32 4294901760, %v5061_v35  ;;  %12049 = vmatpush1.bf16.msra.mxu1 %v25471_v15  ;;  %v5056_v8 = vand.u32 4294901760, %v5055_v1  ;;  %v5068_v39 = vand.u32 4294901760, %v5067_v58  ;;  %v5074_v59 = vand.u32 4294901760, %v5073_v29  ;;  %12817 = vmatpush1.bf16.msra.mxu0 %v12816_v60 }
 0x1c9   :  { %v17637_v26 = vsub.f32 %v17249_v46, %v25469_v21  ;;  %v25472_v5 = vand.u32 4294901760, %v17336_v27  ;;  %12051 = vmatprep.subr.bf16.mxu1 %v25473_v10  ;;  %v5086_v50 = vand.u32 4294901760, %v5085_v7  ;;  %v25474_v57 = vand.u32 4294901760, %v17341_v20  ;;  %12819 = vmatprep.subr.bf16.mxu0 %v12818_v18  ;;  %v25483_v18 = vld [vmem:[#allocation119_spill] sm:$0xff] }
 0x1ca   :  { %v25475_v21 = vand.u32 4294901760, %v17346_v48  ;;  %v23991_v47 = vand.u32 4294901760, %v17377_v22  ;;  %v25476_v36 = vand.u32 4294901760, %v17299_v25  ;;  %v12820_v35 = vpack.c.bf16 %v5044_v44, %v5032_v13 }
 0x1cb   :  { %25470 = vst [vmem:[#allocation135_spill] sm:$0xff] %v17637_v26  ;;  %v5079_v49 = vsub.f32 %v17336_v27, %v25472_v5  ;;  %v5091_v46 = vsub.f32 %v17341_v20, %v25474_v57  ;;  %v5109_v7 = vsub.f32 %v17353_v43, %v23989_v11  ;;  %v23990_v1 = vand.u32 4294901760, %v17391_v12  ;;  %v25478_v57 = vld [vmem:[#allocation118_spill] sm:$0xff]  ;;  %v25482_v11 = vld [vmem:[#allocation117_spill] sm:$0xff] }
 0x1cc   :  { %v5097_v51 = vsub.f32 %v17346_v48, %v25475_v21  ;;  %v17654_v61 = vsub.f32 %v17299_v25, %v25476_v36  ;;  %v25477_v58 = vand.u32 4294901760, %v17304_v42  ;;  %v12822_v5 = vpack.c.bf16 %v5062_v62, %v5050_v53  ;;  %12053 = vmatpush1.bf16.msra.mxu1 %v25482_v11  ;;  %12821 = vmatpush1.bf16.msra.mxu0 %v12820_v35 }
 0x1cd   :  { %v25479_v60 = vand.u32 4294901760, %v17326_v55  ;;  %v25480_v13 = vand.u32 4294901760, %v17331_v32  ;;  %12055 = vmatprep.subr.bf16.mxu1 %v25483_v18  ;;  %v12826_v62 = vpack.c.bf16 %v5086_v50, %v5074_v59  ;;  %v5092_v53 = vand.u32 4294901760, %v5091_v46 }
 0x1ce   :  { %v17663_v29 = vsub.f32 %v17304_v42, %v25477_v58  ;;  %v12824_v42 = vpack.c.bf16 %v5068_v39, %v5056_v8  ;;  %v5080_v58 = vand.u32 4294901760, %v5079_v49  ;;  %v5098_v21 = vand.u32 4294901760, %v5097_v51  ;;  %12823 = vmatprep.subr.bf16.mxu0 %v12822_v5 }
 0x1cf   :  { %v17670_v44 = vsub.f32 %v17326_v55, %v25479_v60  ;;  %v17675_v36 = vsub.f32 %v17331_v32, %v25480_v13  ;;  %v5103_v25 = vsub.f32 %v17377_v22, %v23991_v47  ;;  %v5110_v55 = vand.u32 4294901760, %v5109_v7  ;;  %v25491_v47 = vld [vmem:[#allocation123_spill] sm:$0xff] }
 0x1d0   :  { %v5115_v32 = vsub.f32 %v17391_v12, %v23990_v1  ;;  %v25484_v8 = vand.u32 4294901760, %v25478_v57  ;;  %v25485_v49 = vand.u32 4294901760, %v17499_v3  ;;  %v25486_v35 = vand.u32 4294901760, %v17367_v19  ;;  %v25490_v1 = vld [vmem:[#allocation121_spill] sm:$0xff]  ;;  %12825 = vmatpush1.bf16.msra.mxu0 %v12824_v42 }
 0x1d1   :  { %25481 = vst [vmem:[#allocation118_spill] sm:$0xff] %v17675_v36  ;;  %v25488_v13 = vand.u32 4294901760, %v17372_v23  ;;  %12057 = vmatpush1.bf16.msra.mxu1 %v25490_v1  ;;  %v12828_v46 = vpack.c.bf16 %v5092_v53, %v5080_v58  ;;  %v5104_v51 = vand.u32 4294901760, %v5103_v25  ;;  %v23992_v39 = vand.u32 4294901760, %v17625_v37  ;;  %12827 = vmatprep.subr.bf16.mxu0 %v12826_v62 }
 0x1d2   :  { %v5121_v59 = vsub.f32 %v25478_v57, %v25484_v8  ;;  %v5133_v50 = vsub.f32 %v17499_v3, %v25485_v49  ;;  %v17698_v7 = vsub.f32 %v17367_v19, %v25486_v35  ;;  %12059 = vmatprep.subr.bf16.mxu1 %v25491_v47  ;;  %v23993_v19 = vand.u32 4294901760, %v17637_v26 }
 0x1d3   :  { %v17703_v5 = vsub.f32 %v17372_v23, %v25488_v13  ;;  %v12830_v35 = vpack.c.bf16 %v5110_v55, %v5098_v21  ;;  %v5116_v60 = vand.u32 4294901760, %v5115_v32  ;;  %v25492_v23 = vand.u32 4294901760, %v17531_v0  ;;  %v25498_v32 = vld [vmem:[#allocation125_spill] sm:$0xff] }
 0x1d4   :  { %25487 = vst [vmem:[#allocation136_spill] sm:$0xff] %v17698_v7  ;;  %v25493_v1 = vand.u32 4294901760, %v17536_v45  ;;  %v5122_v49 = vand.u32 4294901760, %v5121_v59  ;;  %v5134_v47 = vand.u32 4294901760, %v5133_v50  ;;  %v25494_v25 = vand.u32 4294901760, %v17545_v40  ;;  %12829 = vmatpush1.bf16.msra.mxu0 %v12828_v46 }
 0x1d5   :  { %25489 = vst [vmem:[#allocation137_spill] sm:$0xff] %v17703_v5  ;;  %v5127_v13 = vsub.f32 %v17531_v0, %v25492_v23  ;;  %v25495_v53 = vand.u32 4294901760, %v17550_v9  ;;  %v25496_v42 = vand.u32 4294901760, %v17405_v56  ;;  %12061 = vmatpush1.bf16.msra.mxu1 %v25498_v32  ;;  %v25500_v59 = vand.u32 4294901760, %v17592_v16  ;;  %12831 = vmatprep.subr.bf16.mxu0 %v12830_v35 }
 0x1d6   :  { %v5139_v8 = vsub.f32 %v17536_v45, %v25493_v1  ;;  %v5145_v58 = vsub.f32 %v17545_v40, %v25494_v25  ;;  %v25499_v1 = vand.u32 4294901760, %v17582_v24  ;;  %v25501_v25 = vld [vmem:[#allocation77_spill] sm:$0xff]  ;;  %v25502_v32 = vand.u32 4294901760, %v17410_v63 }
 0x1d7   :  { %v5157_v21 = vsub.f32 %v17550_v9, %v25495_v53  ;;  %v17726_v55 = vsub.f32 %v17405_v56, %v25496_v42  ;;  %v5163_v50 = vsub.f32 %v17592_v16, %v25500_v59  ;;  %12063 = vmatprep.subr.bf16.mxu1 %v25501_v25  ;;  %v5169_v53 = vsub.f32 %v17625_v37, %v23992_v39 }
 0x1d8   :  { %v5151_v62 = vsub.f32 %v17582_v24, %v25499_v1  ;;  %v5181_v56 = vsub.f32 %v17637_v26, %v23993_v19  ;;  %v17748_v59 = vsub.f32 %v17410_v63, %v25502_v32  ;;  %v12832_v23 = vpack.c.bf16 %v5116_v60, %v5104_v51  ;;  %v25506_v1 = vld [vmem:[#allocation128_spill] sm:$0xff]  ;;  %v25508_v51 = vld [vmem:[#allocation83_spill] sm:$0xff] }
 0x1d9   :  { %25497 = vst [vmem:[#allocation138_spill] sm:$0xff] %v17726_v55  ;;  %v5128_v25 = vand.u32 4294901760, %v5127_v13  ;;  %v5140_v18 = vand.u32 4294901760, %v5139_v8  ;;  %v12834_v11 = vpack.c.bf16 %v5134_v47, %v5122_v49  ;;  %v5146_v39 = vand.u32 4294901760, %v5145_v58  ;;  %12065 = vmatpush1.bf16.msra.mxu1 %v25506_v1 }
 0x1da   :  { %25503 = vst [vmem:[#allocation139_spill] sm:$0xff] %v17748_v59  ;;  %v5158_v10 = vand.u32 4294901760, %v5157_v21  ;;  %v23996_v15 = vand.u32 4294901760, %v17675_v36  ;;  %v25504_v19 = vand.u32 4294901760, %v17417_v31  ;;  %v5152_v26 = vand.u32 4294901760, %v5151_v62  ;;  %12067 = vmatprep.subr.bf16.mxu1 %v25508_v51  ;;  %12833 = vmatpush1.bf16.msra.mxu0 %v12832_v23 }
 0x1db   :  { %v5164_v63 = vand.u32 4294901760, %v5163_v50  ;;  %v25507_v46 = vand.u32 4294901760, %v17654_v61  ;;  %v5170_v47 = vand.u32 4294901760, %v5169_v53  ;;  %v5182_v8 = vand.u32 4294901760, %v5181_v56  ;;  %12835 = vmatprep.subr.bf16.mxu0 %v12834_v11 }
 0x1dc   :  { %v17754_v42 = vsub.f32 %v17417_v31, %v25504_v19  ;;  %v25509_v49 = vand.u32 4294901760, %v17663_v29  ;;  %v25510_v13 = vand.u32 4294901760, %v17670_v44  ;;  %v25511_v19 = vand.u32 4294901760, %v17422_v41 }
 0x1dd   :  { %v5175_v60 = vsub.f32 %v17654_v61, %v25507_v46  ;;  %v12836_v21 = vpack.c.bf16 %v5140_v18, %v5128_v25  ;;  %v24000_v32 = vand.u32 4294901760, %v17698_v7  ;;  %v23999_v62 = vand.u32 4294901760, %v17703_v5 }
 0x1de   :  { %25505 = vst [vmem:[#allocation140_spill] sm:$0xff] %v17754_v42  ;;  %v5187_v35 = vsub.f32 %v17663_v29, %v25509_v49  ;;  %v5193_v31 = vsub.f32 %v17670_v44, %v25510_v13  ;;  %v17770_v58 = vsub.f32 %v17422_v41, %v25511_v19  ;;  %v12838_v50 = vpack.c.bf16 %v5158_v10, %v5146_v39  ;;  %v25513_v49 = vld [vmem:[#allocation20_spill] sm:$0xff]  ;;  %v25514_v13 = vld [vmem:[#allocation26_spill] sm:$0xff] }
 0x1df   :  { %v5205_v53 = vsub.f32 %v17675_v36, %v23996_v15  ;;  %v23998_v56 = vand.u32 4294901760, %v17726_v55  ;;  %v23997_v46 = vand.u32 4294901760, %v17748_v59  ;;  %12069 = vmatpush1.bf16.msra.mxu1 %v25513_v49  ;;  %v12840_v41 = vpack.c.bf16 %v5164_v63, %v5152_v26  ;;  %12837 = vmatpush1.bf16.msra.mxu0 %v12836_v21 }
 0x1e0   :  { %25512 = vst [vmem:[#allocation128_spill] sm:$0xff] %v17770_v58  ;;  %12071 = vmatprep.subr.bf16.mxu1 %v25514_v13  ;;  %v12842_v18 = vpack.c.bf16 %v5182_v8, %v5170_v47  ;;  %v5176_v23 = vand.u32 4294901760, %v5175_v60  ;;  %v5188_v25 = vand.u32 4294901760, %v5187_v35  ;;  %v5194_v19 = vand.u32 4294901760, %v5193_v31  ;;  %12839 = vmatprep.subr.bf16.mxu0 %v12838_v50  ;;  %v25516_v8 = vld [vmem:[#allocation120_spill] sm:$0xff]  ;;  %v25518_v31 = vld [vmem:[#allocation66_spill] sm:$0xff] }
 0x1e1   :  { %v5199_v11 = vsub.f32 %v17698_v7, %v24000_v32  ;;  %v5211_v10 = vsub.f32 %v17703_v5, %v23999_v62  ;;  %v24003_v39 = vand.u32 4294901760, %v17754_v42  ;;  %v24005_v15 = vand.u32 4294901760, %v17770_v58 }
 0x1e2   :  { %v5206_v26 = vand.u32 4294901760, %v5205_v53  ;;  %v5217_v63 = vsub.f32 %v17726_v55, %v23998_v56  ;;  %v5229_v60 = vsub.f32 %v17748_v59, %v23997_v46  ;;  %v17797_v47 = vsub.f32 %v17462_v2, %v17511_v38 }
 0x1e3   :  { %12073 = vmatpush1.bf16.msra.mxu1 %v25516_v8  ;;  %v17802_v35 = vsub.f32 %v17514_v34, %v17557_v14  ;;  %v12844_v21 = vpack.c.bf16 %v5188_v25, %v5176_v23  ;;  %12841 = vmatpush1.bf16.msra.mxu0 %v12840_v41  ;;  %v5200_v50 = vand.u32 4294901760, %v5199_v11  ;;  %v5212_v53 = vand.u32 4294901760, %v5211_v10  ;;  %v25519_v14 = vld [vmem:[#allocation6_spill] sm:$0xff]  ;;  %v25520_v23 = vld [vmem:[#allocation7_spill] sm:$0xff] }
 0x1e4   :  { %25515 = vst [vmem:[#allocation83_spill] sm:$0xff] %v17797_v47  ;;  %12075 = vmatprep.subr.bf16.mxu1 %v25518_v31  ;;  %v5223_v46 = vsub.f32 %v17754_v42, %v24003_v39  ;;  %v5235_v2 = vsub.f32 %v17770_v58, %v24005_v15  ;;  %12843 = vmatprep.subr.bf16.mxu0 %v12842_v18  ;;  %v5218_v62 = vand.u32 4294901760, %v5217_v63  ;;  %v5230_v32 = vand.u32 4294901760, %v5229_v60  ;;  %v25529_v15 = vld [vmem:[#allocation87_spill] sm:$0xff] }
 0x1e5   :  { %25517 = vst [vmem:[#allocation20_spill] sm:$0xff] %v17802_v35  ;;  %v12846_v56 = vpack.c.bf16 %v5206_v26, %v5194_v19  ;;  %v24004_v34 = vand.u32 4294901760, %v17797_v47  ;;  %v12848_v41 = vpack.c.bf16 %v5212_v53, %v5200_v50  ;;  %v24008_v10 = vand.u32 4294901760, %v17802_v35  ;;  %v25521_v19 = vld [vmem:[#allocation79_spill] sm:$0xff] }
 0x1e6   :  { %v5224_v25 = vand.u32 4294901760, %v5223_v46  ;;  %v5236_v11 = vand.u32 4294901760, %v5235_v2  ;;  %v12850_v39 = vpack.c.bf16 %v5230_v32, %v5218_v62  ;;  %v25522_v26 = vld [vmem:[#allocation15_spill] sm:$0xff]  ;;  %v25525_v32 = vld [vmem:[#allocation130_spill] sm:$0xff] }
 0x1e7   :  { %12077 = vmatpush1.bf16.msra.mxu1 %v25519_v14  ;;  %12845 = vmatpush1.bf16.msra.mxu0 %v12844_v21  ;;  %v5241_v18 = vsub.f32 %v17797_v47, %v24004_v34  ;;  %v5247_v60 = vsub.f32 %v17802_v35, %v24008_v10  ;;  %v25523_v21 = vld [vmem:[#allocation18_spill] sm:$0xff]  ;;  %v25526_v62 = vand.u32 4294901760, %v25525_v32  ;;  %v25527_v50 = vld [vmem:[#allocation75_spill] sm:$0xff]  ;;  %v25536_v32 = vld [vmem:[#allocation5_spill] sm:$0xff] }
 0x1e8   :  { %12079 = vmatprep.subr.bf16.mxu1 %v25520_v23  ;;  %12847 = vmatprep.subr.bf16.mxu0 %v12846_v56  ;;  %v12852_v63 = vpack.c.bf16 %v5236_v11, %v5224_v25  ;;  %v25524_v56 = vld [vmem:[#allocation19_spill] sm:$0xff]  ;;  %v25528_v53 = vand.u32 4294901760, %v25527_v50  ;;  %v25531_v25 = vld [vmem:[#allocation89_spill] sm:$0xff] }
 0x1e9   :  { %v5242_v46 = vand.u32 4294901760, %v5241_v18  ;;  %v5248_v34 = vand.u32 4294901760, %v5247_v60  ;;  %v25532_v11 = vand.u32 4294901760, %v25531_v25  ;;  %v25533_v18 = vld [vmem:[#allocation25_spill] sm:$0xff]  ;;  %v25534_v10 = vld [vmem:[#allocation71_spill] sm:$0xff]  ;;  %v25540_v60 = vmov 5.6028366e-06  }
 0x1ea   :  { %v12086_v2 = vpack.c.bf16 %v25528_v53, %v25526_v62  ;;  %v25538_v50 = vld [vmem:[#allocation9_spill] sm:$0xff]  ;;  %v25542_v53 = vld [vmem:[#allocation84_spill] sm:$0xff] }
 0x1eb   :  { %12081 = vmatpush1.bf16.msra.mxu1 %v25521_v19  ;;  %12849 = vmatpush1.bf16.msra.mxu0 %v12848_v41  ;;  %v25530_v41 = vand.u32 4294901760, %v25529_v15  ;;  %v25539_v62 = vand.u32 4294901760, %v25538_v50  ;;  %v25541_v15 = vld [vmem:[#allocation85_spill] sm:$0xff]  ;;  %v25550_v50 = vld [vmem:[#allocation14_spill] sm:$0xff] }
 0x1ec   :  { %12083 = vmatprep.subr.bf16.mxu1 %v25522_v26  ;;  %12851 = vmatprep.subr.bf16.mxu0 %v12850_v39  ;;  %v12854_v39 = vpack.c.bf16 %v17107_v30, %v17100_v54  ;;  %v25537_v26 = vand.u32 4294901760, %v25536_v32  ;;  %v25548_v32 = vld [vmem:[#allocation94_spill] sm:$0xff] }
 0x1ed   :  { %v12088_v38 = vpack.c.bf16 %v25532_v11, %v25530_v41  ;;  %v12858_v41 = vpack.c.bf16 %v25542_v53, %v25541_v15  ;;  %v25545_v11 = vld [vmem:[#allocation93_spill] sm:$0xff]  ;;  %v25573_v53 = vld [vmem:[#allocation50_spill] sm:$0xff] }
 0x1ef   :  { %12085 = vmatpush1.bf16.msra.mxu1 %v25523_v21  ;;  %12853 = vmatpush1.bf16.msra.mxu0 %v12852_v63  ;;  %v12090_v63 = vpack.c.bf16 %v25539_v62, %v25537_v26  ;;  %v25551_v26 = vand.u32 4294901760, %v25550_v50  ;;  %v12860_v62 = vpack.c.bf16 %v17177_v33, %v17172_v4  ;;  %v25564_v33 = vld [vmem:[#allocation99_spill] sm:$0xff] }
 0x1f0   :  { %2251 = vmatprep.subr.mxu1 %v25524_v56  ;;  %5243 = vmatprep.subr.mxu0 %v5242_v46  ;;  %v25535_v56 = vld [vmem:[#allocation81_spill] sm:$0xff]  ;;  %v25543_v46 = vld [vmem:[#allocation11_spill] sm:$0xff] }
 0x1f1   :  { %v12856_v21 = vpack.c.bf16 %v25535_v56, %v25534_v10  ;;  %v25544_v25 = vand.u32 4294901760, %v25543_v46  ;;  %v25547_v56 = vmov 0.0050964355   ;;  %v25549_v10 = vand.u32 4294901760, %v25548_v32 }
 0x1f3   :  { %2253 = vmatpush1.msra.mxu1 %v25533_v18  ;;  %5249 = vmatpush1.msra.mxu0 %v5248_v34  ;;  %v25546_v18 = vand.u32 4294901760, %v25545_v11  ;;  %v25553_v34 = vld [vmem:[#allocation96_spill] sm:$0xff] }
 0x1f4   :  { %12087 = vmatprep.subr.bf16.mxu1 %v12086_v2  ;;  %2272 = vmatmul.mubr.f32.vlgmr.msra.gmra.mrb[2].mxu1 %v25540_v60  ;;  %v12094_v2 = vpack.c.bf16 %v25551_v26, %v25549_v10  ;;  %v25558_v60 = vld [vmem:[#allocation82_spill] sm:$0xff]  ;;  %v25559_v10 = vld [vmem:[#allocation36_spill] sm:$0xff] }
 0x1f5   :  { %12089 = vmatpush1.bf16.msra.mxu1 %v12088_v38  ;;  %v12092_v30 = vpack.c.bf16 %v25546_v18, %v25544_v25  ;;  %12855 = vmatprep.subr.bf16.mxu0 %v12854_v39  ;;  %v25552_v38 = vld [vmem:[#allocation92_spill] sm:$0xff]  ;;  %v25554_v39 = vld [vmem:[#allocation17_spill] sm:$0xff]  ;;  %v25556_v25 = vld [vmem:[#allocation23_spill] sm:$0xff] }
 0x1f6   :  { %5266 = vmatmul.mubr.f32.vlgmr.msra.gmra.mrb[4].mxu0 %v25547_v56  ;;  %12091 = vmatprep.subr.bf16.mxu1 %v12090_v63  ;;  %v12862_v46 = vpack.c.bf16 %v25553_v34, %v25552_v38  ;;  %v25555_v18 = vand.u32 4294901760, %v25554_v39  ;;  %v25557_v11 = vand.u32 4294901760, %v25556_v25  ;;  %v25561_v63 = vld [vmem:[#allocation39_spill] sm:$0xff]  ;;  %v25565_v38 = vld [vmem:[#allocation100_spill] sm:$0xff]  ;;  %v25567_v39 = vld [vmem:[#allocation41_spill] sm:$0xff] }
 0x1f7   :  { %12857 = vmatpush1.bf16.msra.mxu0 %v12856_v21  ;;  %2493 = vmatprep.mubr.f32.mxu1 %v25465_v52  ;;  %v25560_v21 = vand.u32 4294901760, %v25559_v10  ;;  %v25562_v50 = vand.u32 4294901760, %v25561_v63  ;;  %v25568_v25 = vand.u32 4294901760, %v25567_v39  ;;  %v25574_v63 = vand.u32 4294901760, %v25573_v53  ;;  %v25577_v39 = vld [vmem:[#allocation104_spill] sm:$0xff] }
 0x1f8   :  { %12859 = vmatprep.subr.bf16.mxu0 %v12858_v41  ;;  %v12096_v32 = vpack.c.bf16 %v25557_v11, %v25555_v18  ;;  %5438 = vmatprep.mubr.f32.mxu0 %v25558_v60  ;;  %v25563_v41 = vld [vmem:[#allocation32_spill] sm:$0xff] }
 0x1f9   :  { %12093 = vmatpush1.bf16.msra.mxu1 %v12092_v30  ;;  %v12098_v26 = vpack.c.bf16 %v25562_v50, %v25560_v21  ;;  %v12864_v34 = vpack.c.bf16 %v25564_v33, %v25563_v41  ;;  %v25566_v30 = vld [vmem:[#allocation101_spill] sm:$0xff]  ;;  %v25569_v18 = vld [vmem:[#allocation44_spill] sm:$0xff] }
 0x1fa   :  { %12095 = vmatprep.subr.bf16.mxu1 %v12094_v2  ;;  %v12866_v4 = vpack.c.bf16 %v25566_v30, %v25565_v38  ;;  %v25570_v11 = vand.u32 4294901760, %v25569_v18  ;;  %v25571_v2 = vld [vmem:[#allocation48_spill] sm:$0xff]  ;;  %v25575_v50 = vld [vmem:[#allocation49_spill] sm:$0xff]  ;;  %v12870_v18 = vpack.c.bf16 %v25577_v39, %v17264_v17 }
 0x1fb   :  { %12861 = vmatpush1.bf16.msra.mxu0 %v12860_v62  ;;  %v25572_v10 = vand.u32 4294901760, %v25571_v2  ;;  %v1406_v62 = vpop.f32.mrb[0].mxu1  ;;  %v25582_v2 = vld [vmem:[#allocation57_spill] sm:$0xff]  ;;  %v25590_v39 = vld [vmem:[#allocation108_spill] sm:$0xff] }
 0x1fc   :  { %12863 = vmatprep.subr.bf16.mxu0 %v12862_v46  ;;  %v12100_v60 = vpack.c.bf16 %v25570_v11, %v25568_v25  ;;  %v12868_v46 = vpack.c.bf16 %v17259_v6, %v17254_v28  ;;  %v17883_v33 = vadd.f32 %v25575_v50, %v1406_v62  ;;  %v25578_v25 = vld [vmem:[#allocation51_spill] sm:$0xff]  ;;  %v25580_v11 = vld [vmem:[#allocation53_spill] sm:$0xff]  ;;  %v25586_v28 = vld [vmem:[#allocation62_spill] sm:$0xff] }
 0x1fd   :  { %12097 = vmatpush1.bf16.msra.mxu1 %v12096_v32  ;;  %v12102_v21 = vpack.c.bf16 %v25574_v63, %v25572_v10  ;;  %v1408_v32 = vpop.f32.mrb[1].mxu1  ;;  %v25581_v53 = vand.u32 4294901760, %v25580_v11  ;;  %v25584_v63 = vld [vmem:[#allocation59_spill] sm:$0xff]  ;;  %v25587_v62 = vand.u32 4294901760, %v25586_v28 }
 0x1fe   :  { %12099 = vmatprep.subr.bf16.mxu1 %v12098_v26  ;;  %25576 = vst [vmem:[#allocation26_spill] sm:$0xff] %v17883_v33  ;;  %v17888_v26 = vadd.f32 %v25578_v25, %v1408_v32  ;;  %v25585_v6 = vand.u32 4294901760, %v25584_v63  ;;  %v25589_v33 = vld [vmem:[#allocation12_spill] sm:$0xff]  ;;  %v25591_v32 = vld [vmem:[#allocation110_spill] sm:$0xff] }
 0x1ff   :  { %12865 = vmatpush1.bf16.msra.mxu0 %v12864_v34  ;;  %v25583_v34 = vand.u32 4294901760, %v25582_v2  ;;  %v12874_v25 = vpack.c.bf16 %v25591_v32, %v25590_v39  ;;  %v25598_v63 = vld [vmem:[#allocation72_spill] sm:$0xff] }
 0x200   :  { %12867 = vmatprep.subr.bf16.mxu0 %v12866_v4  ;;  %25579 = vst [vmem:[#allocation120_spill] sm:$0xff] %v17888_v26  ;;  %v12106_v50 = vpack.c.bf16 %v25587_v62, %v25585_v6  ;;  %v25588_v4 = vld [vmem:[#allocation106_spill] sm:$0xff]  ;;  %v25594_v26 = vld [vmem:[#allocation127_spill] sm:$0xff]  ;;  %v25599_v28 = vand.u32 4294901760, %v25598_v63 }
 0x201   :  { %12101 = vmatpush1.bf16.msra.mxu1 %v12100_v60  ;;  %v12104_v10 = vpack.c.bf16 %v25583_v34, %v25581_v53  ;;  %v12872_v30 = vpack.c.bf16 %v25589_v33, %v25588_v4  ;;  %v25592_v60 = vld [vmem:[#allocation126_spill] sm:$0xff]  ;;  %v25595_v2 = vand.u32 4294901760, %v25594_v26 }
 0x202   :  { %12103 = vmatprep.subr.bf16.mxu1 %v12102_v21  ;;  %v25593_v11 = vand.u32 4294901760, %v25592_v60  ;;  %v25596_v21 = vld [vmem:[#allocation68_spill] sm:$0xff]  ;;  %v25602_v60 = vld [vmem:[#allocation78_spill] sm:$0xff] }
 0x203   :  { %12869 = vmatpush1.bf16.msra.mxu0 %v12868_v46  ;;  %v25597_v34 = vand.u32 4294901760, %v25596_v21  ;;  %v12876_v46 = vpack.c.bf16 %v17341_v20, %v17336_v27  ;;  %v25603_v26 = vand.u32 4294901760, %v25602_v60  ;;  %v25606_v21 = vld [vmem:[#allocation10_spill] sm:$0xff] }
 0x204   :  { %12871 = vmatprep.subr.bf16.mxu0 %v12870_v18  ;;  %v12108_v53 = vpack.c.bf16 %v25595_v2, %v25593_v11  ;;  %v12878_v18 = vpack.c.bf16 %v17353_v43, %v17346_v48  ;;  %v25607_v63 = vand.u32 4294901760, %v25606_v21 }
 0x205   :  { %12105 = vmatpush1.bf16.msra.mxu1 %v12104_v10  ;;  %v12110_v6 = vpack.c.bf16 %v25599_v28, %v25597_v34  ;;  %v25600_v10 = vld [vmem:[#allocation76_spill] sm:$0xff] }
 0x206   :  { %12107 = vmatprep.subr.bf16.mxu1 %v12106_v50  ;;  %v25601_v62 = vand.u32 4294901760, %v25600_v10  ;;  %v25604_v50 = vld [vmem:[#allocation8_spill] sm:$0xff] }
 0x207   :  { %12873 = vmatpush1.bf16.msra.mxu0 %v12872_v30  ;;  %v25605_v2 = vand.u32 4294901760, %v25604_v50  ;;  %v12880_v30 = vpack.c.bf16 %v17391_v12, %v17377_v22  ;;  %v25610_v10 = vld [vmem:[#allocation16_spill] sm:$0xff]  ;;  %v25614_v50 = vld [vmem:[#allocation22_spill] sm:$0xff] }
 0x208   :  { %12875 = vmatprep.subr.bf16.mxu0 %v12874_v25  ;;  %v12112_v11 = vpack.c.bf16 %v25603_v26, %v25601_v62  ;;  %v12882_v25 = vpack.c.bf16 %v17499_v3, %v25478_v57  ;;  %v25611_v60 = vand.u32 4294901760, %v25610_v10  ;;  %v25615_v21 = vand.u32 4294901760, %v25614_v50 }
 0x209   :  { %12109 = vmatpush1.bf16.msra.mxu1 %v12108_v53  ;;  %v12114_v34 = vpack.c.bf16 %v25607_v63, %v25605_v2  ;;  %v25608_v53 = vld [vmem:[#allocation13_spill] sm:$0xff] }
 0x20a   :  { %12111 = vmatprep.subr.bf16.mxu1 %v12110_v6  ;;  %v25609_v28 = vand.u32 4294901760, %v25608_v53  ;;  %v25612_v6 = vld [vmem:[#allocation21_spill] sm:$0xff]  ;;  %v25618_v53 = vld [vmem:[#allocation27_spill] sm:$0xff] }
 0x20b   :  { %12877 = vmatpush1.bf16.msra.mxu0 %v12876_v46  ;;  %v25613_v26 = vand.u32 4294901760, %v25612_v6  ;;  %v12884_v46 = vpack.c.bf16 %v17536_v45, %v17531_v0  ;;  %v25619_v10 = vand.u32 4294901760, %v25618_v53  ;;  %v25622_v6 = vld [vmem:[#allocation29_spill] sm:$0xff] }
 0x20c   :  { %12879 = vmatprep.subr.bf16.mxu0 %v12878_v18  ;;  %v12116_v62 = vpack.c.bf16 %v25611_v60, %v25609_v28  ;;  %v12886_v18 = vpack.c.bf16 %v17550_v9, %v17545_v40  ;;  %v25623_v50 = vand.u32 4294901760, %v25622_v6  ;;  %v25627_v9 = vld [vmem:[#allocation33_spill] sm:$0xff] }
 0x20d   :  { %12113 = vmatpush1.bf16.msra.mxu1 %v12112_v11  ;;  %v12118_v2 = vpack.c.bf16 %v25615_v21, %v25613_v26  ;;  %v25616_v11 = vld [vmem:[#allocation24_spill] sm:$0xff]  ;;  %v25628_v53 = vand.u32 4294901760, %v25627_v9 }
 0x20e   :  { %12115 = vmatprep.subr.bf16.mxu1 %v12114_v34  ;;  %v25617_v63 = vand.u32 4294901760, %v25616_v11  ;;  %v25620_v34 = vld [vmem:[#allocation28_spill] sm:$0xff] }
 0x20f   :  { %12881 = vmatpush1.bf16.msra.mxu0 %v12880_v30  ;;  %v25621_v60 = vand.u32 4294901760, %v25620_v34  ;;  %v12888_v30 = vpack.c.bf16 %v17592_v16, %v17582_v24  ;;  %v25631_v34 = vld [vmem:[#allocation35_spill] sm:$0xff] }
 0x210   :  { %12883 = vmatprep.subr.bf16.mxu0 %v12882_v25  ;;  %v12120_v28 = vpack.c.bf16 %v25619_v10, %v25617_v63  ;;  %v25624_v25 = vld [vmem:[#allocation135_spill] sm:$0xff]  ;;  %v25632_v6 = vand.u32 4294901760, %v25631_v34 }
 0x211   :  { %12117 = vmatpush1.bf16.msra.mxu1 %v12116_v62  ;;  %v12122_v26 = vpack.c.bf16 %v25623_v50, %v25621_v60  ;;  %v12890_v21 = vpack.c.bf16 %v25624_v25, %v17625_v37  ;;  %v25625_v62 = vld [vmem:[#allocation31_spill] sm:$0xff] }
 0x212   :  { %12119 = vmatprep.subr.bf16.mxu1 %v12118_v2  ;;  %v25626_v11 = vand.u32 4294901760, %v25625_v62  ;;  %v25629_v2 = vld [vmem:[#allocation34_spill] sm:$0xff] }
 0x213   :  { %12885 = vmatpush1.bf16.msra.mxu0 %v12884_v46  ;;  %v25630_v10 = vand.u32 4294901760, %v25629_v2  ;;  %v12892_v46 = vpack.c.bf16 %v17663_v29, %v17654_v61  ;;  %v25635_v62 = vld [vmem:[#allocation38_spill] sm:$0xff] }
 0x214   :  { %12887 = vmatprep.subr.bf16.mxu0 %v12886_v18  ;;  %v12124_v63 = vpack.c.bf16 %v25628_v53, %v25626_v11  ;;  %v12894_v18 = vpack.c.bf16 %v17675_v36, %v17670_v44  ;;  %v25636_v9 = vand.u32 4294901760, %v25635_v62  ;;  %v25639_v2 = vld [vmem:[#allocation42_spill] sm:$0xff] }
 0x215   :  { %12121 = vmatpush1.bf16.msra.mxu1 %v12120_v28  ;;  %v12126_v60 = vpack.c.bf16 %v25632_v6, %v25630_v10  ;;  %v25633_v28 = vld [vmem:[#allocation37_spill] sm:$0xff]  ;;  %v25640_v34 = vand.u32 4294901760, %v25639_v2  ;;  %v25651_v2 = vld [vmem:[#allocation52_spill] sm:$0xff] }
 0x216   :  { %12123 = vmatprep.subr.bf16.mxu1 %v12122_v26  ;;  %v25634_v50 = vand.u32 4294901760, %v25633_v28  ;;  %v25637_v26 = vld [vmem:[#allocation40_spill] sm:$0xff]  ;;  %v25643_v28 = vld [vmem:[#allocation45_spill] sm:$0xff] }
 0x217   :  { %12889 = vmatpush1.bf16.msra.mxu0 %v12888_v30  ;;  %v25638_v53 = vand.u32 4294901760, %v25637_v26  ;;  %v12896_v30 = vpack.c.bf16 %v17703_v5, %v17698_v7  ;;  %v25644_v62 = vand.u32 4294901760, %v25643_v28  ;;  %v25649_v26 = vld [vmem:[#allocation95_spill] sm:$0xff]  ;;  %v25658_v28 = vld [vmem:[#allocation113_spill] sm:$0xff] }
 0x218   :  { %12891 = vmatprep.subr.bf16.mxu0 %v12890_v21  ;;  %v12128_v11 = vpack.c.bf16 %v25636_v9, %v25634_v50  ;;  %v12898_v21 = vpack.c.bf16 %v17748_v59, %v17726_v55  ;;  %v25752_v59 = vld [vmem:[#allocation104_spill] sm:$0xff] }
 0x219   :  { %12125 = vmatpush1.bf16.msra.mxu1 %v12124_v63  ;;  %v12130_v10 = vpack.c.bf16 %v25640_v34, %v25638_v53  ;;  %v25641_v63 = vld [vmem:[#allocation43_spill] sm:$0xff]  ;;  %v25650_v53 = vld [vmem:[#allocation97_spill] sm:$0xff]  ;;  %v25652_v34 = vmov 5.605165e-06  }
 0x21a   :  { %12127 = vmatprep.subr.bf16.mxu1 %v12126_v60  ;;  %v25642_v6 = vand.u32 4294901760, %v25641_v63  ;;  %v12900_v60 = vpack.c.bf16 %v17770_v58, %v17754_v42  ;;  %v25656_v63 = vld [vmem:[#allocation111_spill] sm:$0xff]  ;;  %v25735_v42 = vand.u32 4294901760, %v25563_v41 }
 0x21b   :  { %12893 = vmatpush1.bf16.msra.mxu0 %v12892_v46  ;;  %v25645_v46 = vld [vmem:[#allocation46_spill] sm:$0xff]  ;;  %v25736_v58 = vld [vmem:[#allocation99_spill] sm:$0xff] }
 0x21c   :  { %12895 = vmatprep.subr.bf16.mxu0 %v12894_v18  ;;  %v12132_v50 = vpack.c.bf16 %v25644_v62, %v25642_v6  ;;  %v25646_v9 = vand.u32 4294901760, %v25645_v46  ;;  %v25647_v18 = vld [vmem:[#allocation47_spill] sm:$0xff]  ;;  %v25657_v6 = vld [vmem:[#allocation86_spill] sm:$0xff]  ;;  %v25659_v62 = vld [vmem:[#allocation56_spill] sm:$0xff] }
 0x21d   :  { %12129 = vmatpush1.bf16.msra.mxu1 %v12128_v11  ;;  %v25648_v11 = vand.u32 4294901760, %v25647_v18  ;;  %v25662_v46 = vld [vmem:[#allocation115_spill] sm:$0xff]  ;;  %v25664_v18 = vld [vmem:[#allocation61_spill] sm:$0xff] }
 0x21e   :  { %12131 = vmatprep.subr.bf16.mxu1 %v12130_v10  ;;  %v25653_v10 = vld [vmem:[#allocation54_spill] sm:$0xff] }
 0x21f   :  { %12897 = vmatpush1.bf16.msra.mxu0 %v12896_v30  ;;  %v25654_v30 = vld [vmem:[#allocation109_spill] sm:$0xff] }
 0x220   :  { %12899 = vmatprep.subr.bf16.mxu0 %v12898_v21  ;;  %v25655_v21 = vld [vmem:[#allocation55_spill] sm:$0xff] }
 0x221   :  { %12133 = vmatpush1.bf16.msra.mxu1 %v12132_v50  ;;  %v25660_v50 = vld [vmem:[#allocation58_spill] sm:$0xff] }
 0x222   :  { %2473 = vmatprep.subr.mxu1 %v25646_v9  ;;  %v25663_v9 = vld [vmem:[#allocation60_spill] sm:$0xff] }
 0x223   :  { %12901 = vmatpush1.bf16.msra.mxu0 %v12900_v60  ;;  %v25661_v60 = vld [vmem:[#allocation114_spill] sm:$0xff] }
 0x224   :  { %5418 = vmatprep.subr.mxu0 %v17797_v47 }
 0x225   :  { %2477 = vmatpush1.msra.mxu1 %v25648_v11  ;;  %v25665_v11 = vld [vmem:[#allocation117_spill] sm:$0xff] }
 0x226   :  { %12135 = vmatprep.subr.bf16.mxu1 %v25649_v26  ;;  %2494 = vmatmul.mubr.f32.vlgmr.msra.gmra.mrb[2].mxu1 %v25547_v56  ;;  %v25666_v26 = vld [vmem:[#allocation119_spill] sm:$0xff] }
 0x227   :  { %5421 = vmatpush1.msra.mxu0 %v17802_v35  ;;  %12137 = vmatpush1.bf16.msra.mxu1 %v25650_v53  ;;  %v25667_v53 = vld [vmem:[#allocation63_spill] sm:$0xff] }
 0x228   :  { %12903 = vmatprep.subr.bf16.mxu0 %v25651_v2  ;;  %5439 = vmatmul.mubr.f32.vlgmr.msra.gmra.mrb[4].mxu0 %v25652_v34  ;;  %v25674_v34 = vld [vmem:[#allocation77_spill] sm:$0xff]  ;;  %v18195_v35 = vld [vmem:[%s23438_s0 + $0x278] sm:$0xff] }
 0x229   :  { %12905 = vmatpush1.bf16.msra.mxu0 %v25653_v10  ;;  %12139 = vmatprep.subr.bf16.mxu1 %v25654_v30  ;;  %v25668_v30 = vld [vmem:[#allocation64_spill] sm:$0xff] }
 0x22a   :  { %12907 = vmatprep.subr.bf16.mxu0 %v25655_v21  ;;  %2615 = vmatprep.mubr.f32.mxu1 %v25465_v52  ;;  %v18140_v21 = vld [vmem:[%s23438_s0 + $0x1b8] sm:$0xff] }
 0x22b   :  { %12141 = vmatpush1.bf16.msra.mxu1 %v25656_v63  ;;  %5562 = vmatprep.mubr.f32.mxu0 %v25657_v6  ;;  %v25669_v63 = vld [vmem:[#allocation121_spill] sm:$0xff] }
 0x22c   :  { %12143 = vmatprep.subr.bf16.mxu1 %v25658_v28  ;;  %v25670_v28 = vld [vmem:[#allocation123_spill] sm:$0xff]  ;;  %v25671_v6 = vld [vmem:[#allocation65_spill] sm:$0xff] }
 0x22d   :  { %12909 = vmatpush1.bf16.msra.mxu0 %v25659_v62 }
 0x22e   :  { %12911 = vmatprep.subr.bf16.mxu0 %v25660_v50  ;;  %v25699_v50 = vld [vmem:[#allocation69_spill] sm:$0xff] }
 0x22f   :  { %12145 = vmatpush1.bf16.msra.mxu1 %v25661_v60  ;;  %v25672_v60 = vld [vmem:[#allocation67_spill] sm:$0xff]  ;;  %v25700_v62 = vand.u32 4294901760, %v25699_v50  ;;  %v25704_v50 = vld [vmem:[#allocation81_spill] sm:$0xff] }
 0x230   :  { %12147 = vmatprep.subr.bf16.mxu1 %v25662_v46  ;;  %v25673_v46 = vld [vmem:[#allocation125_spill] sm:$0xff] }
 0x231   :  { %12913 = vmatpush1.bf16.msra.mxu0 %v25663_v9  ;;  %v25697_v9 = vld [vmem:[#allocation132_spill] sm:$0xff] }
 0x232   :  { %12915 = vmatprep.subr.bf16.mxu0 %v25664_v18  ;;  %v25675_v18 = vld [vmem:[#allocation70_spill] sm:$0xff] }
 0x233   :  { %12149 = vmatpush1.bf16.msra.mxu1 %v25665_v11  ;;  %v25676_v11 = vld [vmem:[#allocation73_spill] sm:$0xff] }
 0x234   :  { %12151 = vmatprep.subr.bf16.mxu1 %v25666_v26  ;;  %v25677_v26 = vld [vmem:[#allocation30_spill] sm:$0xff] }
 0x235   :  { %12917 = vmatpush1.bf16.msra.mxu0 %v25667_v53  ;;  %v25701_v53 = vld [vmem:[#allocation25_spill] sm:$0xff] }
 0x236   :  { %12919 = vmatprep.subr.bf16.mxu0 %v25668_v30 }
 0x237   :  { %12153 = vmatpush1.bf16.msra.mxu1 %v25669_v63  ;;  %v25678_v63 = vld [vmem:[#allocation98_spill] sm:$0xff] }
 0x238   :  { %12155 = vmatprep.subr.bf16.mxu1 %v25670_v28  ;;  %v25679_v28 = vld [vmem:[#allocation105_spill] sm:$0xff] }
 0x239   :  { %12921 = vmatpush1.bf16.msra.mxu0 %v25671_v6 }
 0x23a   :  { %12923 = vmatprep.subr.bf16.mxu0 %v25672_v60 }
 0x23b   :  { %12157 = vmatpush1.bf16.msra.mxu1 %v25673_v46  ;;  %v25680_v46 = vld [vmem:[#allocation107_spill] sm:$0xff] }
 0x23c   :  { %12159 = vmatprep.subr.bf16.mxu1 %v25674_v34  ;;  %v25681_v34 = vld [vmem:[#allocation112_spill] sm:$0xff] }
 0x23d   :  { %12925 = vmatpush1.bf16.msra.mxu0 %v25675_v18 }
 0x23e   :  { %12927 = vmatprep.subr.bf16.mxu0 %v25676_v11 }
 0x23f   :  { %12161 = vmatpush1.bf16.msra.mxu1 %v25506_v1  ;;  %v25682_v1 = vld [vmem:[#allocation116_spill] sm:$0xff] }
 0x240   :  { %12163 = vmatprep.subr.bf16.mxu1 %v25508_v51  ;;  %v25683_v51 = vld [vmem:[#allocation122_spill] sm:$0xff] }
 0x241   :  { %12929 = vmatpush1.bf16.msra.mxu0 %v25677_v26  ;;  %v25689_v26 = vld [vmem:[#allocation19_spill] sm:$0xff] }
 0x242   :  { %12931 = vmatprep.subr.bf16.mxu0 %v25678_v63  ;;  %v25688_v63 = vld [vmem:[#allocation18_spill] sm:$0xff] }
 0x243   :  { %12165 = vmatpush1.bf16.msra.mxu1 %v25513_v49  ;;  %v18034_v49 = vld [vmem:[%s23438_s0 + $0x38] sm:$0xff] }
 0x244   :  { %12167 = vmatprep.subr.bf16.mxu1 %v25514_v13  ;;  %v18039_v13 = vld [vmem:[%s23438_s0 + $0x78] sm:$0xff]  ;;  %v25690_v11 = vand.u32 4294901760, %v18034_v49 }
 0x245   :  { %12933 = vmatpush1.bf16.msra.mxu0 %v25679_v28  ;;  %v25687_v28 = vld [vmem:[#allocation129_spill] sm:$0xff] }
 0x246   :  { %12935 = vmatprep.subr.bf16.mxu0 %v25680_v46  ;;  %v25686_v46 = vld [vmem:[#allocation74_spill] sm:$0xff] }
 0x247   :  { %12169 = vmatpush1.bf16.msra.mxu1 %v25516_v8  ;;  %v25684_v8 = vld [vmem:[#allocation124_spill] sm:$0xff] }
 0x248   :  { %12171 = vmatprep.subr.bf16.mxu1 %v25518_v31  ;;  %v18050_v31 = vld [vmem:[%s23438_s0 + $0x70] sm:$0xff] }
 0x249   :  { %12937 = vmatpush1.bf16.msra.mxu0 %v25681_v34  ;;  %v18064_v34 = vld [vmem:[%s23438_s0 + $0xf8] sm:$0xff]  ;;  %v25695_v60 = vand.u32 4294901760, %v18050_v31  ;;  %v25772_v36 = vand.u32 4294901760, %v18050_v31 }
 0x24a   :  { %12939 = vmatprep.subr.bf16.mxu0 %v25682_v1  ;;  %v18073_v1 = vld [vmem:[%s23438_s0 + $0xb0] sm:$0xff] }
 0x24b   :  { %12173 = vmatpush1.bf16.msra.mxu1 %v25519_v14  ;;  %v18045_v14 = vld [vmem:[%s23438_s0 + $0x30] sm:$0xff] }
 0x24c   :  { %12175 = vmatprep.subr.bf16.mxu1 %v25520_v23  ;;  %v25685_v23 = vld [vmem:[#allocation15_spill] sm:$0xff] }
 0x24d   :  { %12941 = vmatpush1.bf16.msra.mxu0 %v25683_v51  ;;  %v18078_v51 = vld [vmem:[%s23438_s0 + $0xf0] sm:$0xff] }
 0x24e   :  { %12943 = vmatprep.subr.bf16.mxu0 %v25684_v8  ;;  %v18059_v8 = vld [vmem:[%s23438_s0 + $0xb8] sm:$0xff]  ;;  %v25714_v10 = vand.u32 4294901760, %v18078_v51 }
 0x24f   :  { %12177 = vmatpush1.bf16.msra.mxu1 %v25521_v19  ;;  %v25694_v19 = vand.u32 4294901760, %v18045_v14 }
 0x250   :  { %12179 = vmatprep.subr.bf16.mxu1 %v25685_v23  ;;  %v18086_v23 = vld [vmem:[%s23438_s0 + $0x138] sm:$0xff] }
 0x251   :  { %12945 = vmatpush1.bf16.msra.mxu0 %v25686_v46  ;;  %v25693_v46 = vld [vmem:[#allocation131_spill] sm:$0xff]  ;;  %v18105_v6 = vpack.c.bf16 %v25695_v60, %v25694_v19 }
 0x252   :  { %12947 = vmatprep.subr.bf16.mxu0 %v25687_v28  ;;  %v18091_v28 = vld [vmem:[%s23438_s0 + $0x178] sm:$0xff]  ;;  %v18119_v60 = vld [vmem:[%s23438_s0 + $0x130] sm:$0xff] }
 0x253   :  { %12181 = vmatpush1.bf16.msra.mxu1 %v25688_v63  ;;  %v25691_v63 = vand.u32 4294901760, %v18039_v13  ;;  %25696 = vst [vmem:[#allocation6_spill] sm:$0xff] %v18105_v6  ;;  %v18124_v19 = vld [vmem:[%s23438_s0 + $0x170] sm:$0xff] }
 0x254   :  { %2597 = vmatprep.subr.mxu1 %v25689_v26  ;;  %v25698_v26 = vand.u32 4294901760, %v17100_v54  ;;  %v25702_v54 = vld [vmem:[#allocation71_spill] sm:$0xff] }
 0x255   :  { %v18098_v18 = vpack.c.bf16 %v25691_v63, %v25690_v11  ;;  %12949 = vmatpush1.bf16.msra.mxu0 %v25693_v46  ;;  %v25703_v30 = vand.u32 4294901760, %v25702_v54  ;;  %v25706_v63 = vand.u32 4294901760, %v18059_v8  ;;  %v25707_v46 = vand.u32 4294901760, %v18064_v34  ;;  %v25710_v54 = vld [vmem:[#allocation84_spill] sm:$0xff] }
 0x256   :  { %5542 = vmatprep.subr.mxu0 %v25697_v9  ;;  %v12950_v11 = vpack.c.bf16 %v25700_v62, %v25698_v26  ;;  %v25705_v62 = vand.u32 4294901760, %v25704_v50  ;;  %v25711_v50 = vand.u32 4294901760, %v25710_v54 }
 0x257   :  { %25692 = vst [vmem:[#allocation66_spill] sm:$0xff] %v18098_v18  ;;  %2599 = vmatpush1.msra.mxu1 %v25701_v53  ;;  %v18135_v9 = vpack.c.bf16 %v25707_v46, %v25706_v63  ;;  %v18145_v53 = vld [vmem:[%s23438_s0 + $0x1f8] sm:$0xff]  ;;  %v25712_v63 = vld [vmem:[#allocation134_spill] sm:$0xff] }
 0x258   :  { %v12952_v26 = vpack.c.bf16 %v25705_v62, %v25703_v30  ;;  %2616 = vmatmul.mubr.f32.vlgmr.msra.gmra.mrb[2].mxu1 %v25547_v56  ;;  %12471 = vmatprep.subr.bf16.mxu1 %v18098_v18  ;;  %v25709_v30 = vand.u32 4294901760, %v25541_v15  ;;  %v25713_v62 = vand.u32 4294901760, %v18073_v1  ;;  %v25716_v18 = vmov 5.6028366e-06  }
 0x259   :  { %25708 = vst [vmem:[#allocation7_spill] sm:$0xff] %v18135_v9  ;;  %5544 = vmatpush1.msra.mxu0 %v25712_v63  ;;  %12473 = vmatpush1.bf16.msra.mxu1 %v18105_v6  ;;  %v25717_v15 = vand.u32 4294901760, %v18086_v23  ;;  %v18190_v6 = vld [vmem:[%s23438_s0 + $0x238] sm:$0xff]  ;;  %v18304_v7 = vpop.f32.mrb[2].mxu0 }
 0x25a   :  { %v12954_v46 = vpack.c.bf16 %v25711_v50, %v25709_v30  ;;  %v18159_v2 = vpack.c.bf16 %v25714_v10, %v25713_v62  ;;  %12951 = vmatprep.subr.bf16.mxu0 %v12950_v11  ;;  %5563 = vmatmul.mubr.f32.vlgmr.msra.gmra.mrb[4].mxu0 %v25716_v18  ;;  %v25718_v30 = vand.u32 4294901760, %v18091_v28  ;;  %v18175_v10 = vld [vmem:[%s23438_s0 + $0x1b0] sm:$0xff]  ;;  %v25720_v62 = vld [vmem:[#allocation88_spill] sm:$0xff]  ;;  %25757 = vst [vmem:[#allocation85_spill] sm:$0xff] %v18304_v7  ;;  %v18325_v5 = vpop.f32.mrb[3].mxu0  ;;  %v25764_v7 = vand.u32 4294901760, %v18034_v49 }
 0x25b   :  { %v18180_v11 = vld [vmem:[%s23438_s0 + $0x1f0] sm:$0xff]  ;;  %12953 = vmatpush1.bf16.msra.mxu0 %v12952_v26  ;;  %12475 = vmatprep.subr.bf16.mxu1 %v18135_v9  ;;  %v25724_v18 = vld [vmem:[#allocation92_spill] sm:$0xff]  ;;  %25761 = vst [vmem:[#allocation93_spill] sm:$0xff] %v18325_v5 }
 0x25c   :  { %25715 = vst [vmem:[#allocation79_spill] sm:$0xff] %v18159_v2  ;;  %v18168_v54 = vpack.c.bf16 %v25718_v30, %v25717_v15  ;;  %v25721_v15 = vand.u32 4294901760, %v25720_v62  ;;  %v25722_v30 = vld [vmem:[#allocation91_spill] sm:$0xff]  ;;  %12955 = vmatprep.subr.bf16.mxu0 %v12954_v46  ;;  %v25725_v26 = vand.u32 4294901760, %v25724_v18  ;;  %v25726_v63 = vld [vmem:[#allocation96_spill] sm:$0xff]  ;;  %v25728_v62 = vld [vmem:[#allocation90_spill] sm:$0xff]  ;;  %5784 = vmatprep.mubr.f32.mxu0 %v25465_v52  ;;  %v18344_v5 = vsub.f32 %v18034_v49, %v25764_v7 }
 0x25d   :  { %v25723_v56 = vand.u32 4294901760, %v25722_v30  ;;  %v25727_v9 = vand.u32 4294901760, %v25726_v63  ;;  %3830 = vmatprep.mubr.f32.mxu1 %v25728_v62  ;;  %12477 = vmatpush1.bf16.msra.mxu1 %v18159_v2  ;;  %v25733_v18 = vand.u32 4294901760, %v18145_v53  ;;  %v18243_v63 = vld [vmem:[%s23438_s0 + $0x2f8] sm:$0xff]  ;;  %v25739_v2 = vld [vmem:[#allocation101_spill] sm:$0xff]  ;;  %v25747_v52 = vld [vmem:[#allocation102_spill] sm:$0xff]  ;;  %v18363_v7 = vsub.f32 %v18050_v31, %v25772_v36 }
 0x25e   :  { %25719 = vst [vmem:[#allocation130_spill] sm:$0xff] %v18168_v54  ;;  %12479 = vmatprep.subr.bf16.mxu1 %v18168_v54  ;;  %v25738_v54 = vand.u32 4294901760, %v25565_v38  ;;  %v25745_v38 = vand.u32 4294901760, %v18195_v35  ;;  %25765 = vst [vmem:[#allocation94_spill] sm:$0xff] %v18344_v5 }
 0x25f   :  { %v12956_v50 = vpack.c.bf16 %v25723_v56, %v25721_v15  ;;  %v12958_v47 = vpack.c.bf16 %v25727_v9, %v25725_v26  ;;  %v25729_v56 = vand.u32 4294901760, %v18119_v60  ;;  %v25730_v15 = vand.u32 4294901760, %v18124_v19  ;;  %v18238_v26 = vld [vmem:[%s23438_s0 + $0x2b8] sm:$0xff]  ;;  %25773 = vst [vmem:[#allocation23_spill] sm:$0xff] %v18363_v7 }
 0x260   :  { %v25732_v9 = vand.u32 4294901760, %v18140_v21 }
 0x261   :  { %v18207_v30 = vpack.c.bf16 %v25730_v15, %v25729_v56  ;;  %v18224_v56 = vld [vmem:[%s23438_s0 + $0x230] sm:$0xff]  ;;  %12957 = vmatpush1.bf16.msra.mxu0 %v12956_v50  ;;  %v25740_v50 = vand.u32 4294901760, %v25739_v2 }
 0x262   :  { %v18217_v46 = vpack.c.bf16 %v25733_v18, %v25732_v9  ;;  %v18229_v15 = vld [vmem:[%s23438_s0 + $0x270] sm:$0xff]  ;;  %v25737_v9 = vand.u32 4294901760, %v25736_v58  ;;  %12959 = vmatprep.subr.bf16.mxu0 %v12958_v47  ;;  %v25742_v58 = vand.u32 4294901760, %v18180_v11  ;;  %v25744_v47 = vand.u32 4294901760, %v18190_v6 }
 0x263   :  { %25731 = vst [vmem:[#allocation75_spill] sm:$0xff] %v18207_v30  ;;  %v12962_v62 = vpack.c.bf16 %v25740_v50, %v25738_v54  ;;  %12481 = vmatpush1.bf16.msra.mxu1 %v18207_v30  ;;  %v18284_v50 = vld [vmem:[%s23438_s0 + $0x338] sm:$0xff]  ;;  %v25751_v30 = vand.u32 4294901760, %v17264_v17  ;;  %v25758_v17 = vand.u32 4294901760, %v18238_v26 }
 0x264   :  { %25734 = vst [vmem:[#allocation87_spill] sm:$0xff] %v18217_v46  ;;  %v12960_v18 = vpack.c.bf16 %v25737_v9, %v25735_v42  ;;  %v25741_v42 = vand.u32 4294901760, %v18175_v10  ;;  %12483 = vmatprep.subr.bf16.mxu1 %v18217_v46  ;;  %v18263_v2 = vpack.c.bf16 %v25745_v38, %v25744_v47  ;;  %v25748_v9 = vand.u32 4294901760, %v25747_v52  ;;  %v25749_v46 = vld [vmem:[#allocation103_spill] sm:$0xff] }
 0x265   :  { %v25750_v47 = vand.u32 4294901760, %v25749_v46  ;;  %v18289_v54 = vld [vmem:[%s23438_s0 + $0x378] sm:$0xff]  ;;  %v25754_v52 = vand.u32 4294901760, %v18224_v56  ;;  %v25755_v46 = vand.u32 4294901760, %v18229_v15  ;;  %v25779_v36 = vand.u32 4294901760, %v18284_v50 }
 0x266   :  { %v18254_v41 = vpack.c.bf16 %v25742_v58, %v25741_v42  ;;  %25746 = vst [vmem:[#allocation5_spill] sm:$0xff] %v18263_v2  ;;  %v18270_v42 = vld [vmem:[%s23438_s0 + $0x2b0] sm:$0xff]  ;;  %12961 = vmatpush1.bf16.msra.mxu0 %v12960_v18  ;;  %v25753_v18 = vand.u32 4294901760, %v25752_v59  ;;  %v25759_v59 = vand.u32 4294901760, %v18243_v63  ;;  %v25780_v31 = vand.u32 4294901760, %v18289_v54 }
 0x267   :  { %v18275_v58 = vld [vmem:[%s23438_s0 + $0x2f0] sm:$0xff]  ;;  %v12964_v38 = vpack.c.bf16 %v25750_v47, %v25748_v9  ;;  %12963 = vmatprep.subr.bf16.mxu0 %v12962_v62  ;;  %v18300_v9 = vpack.c.bf16 %v25755_v46, %v25754_v52  ;;  %v18339_v47 = vld [vmem:[%s23438_s0 + $0x3f8] sm:$0xff]  ;;  %v25774_v49 = vand.u32 4294901760, %v18270_v42 }
 0x268   :  { %25743 = vst [vmem:[#allocation89_spill] sm:$0xff] %v18254_v41  ;;  %v12966_v55 = vpack.c.bf16 %v25753_v18, %v25751_v30  ;;  %12485 = vmatpush1.bf16.msra.mxu1 %v18254_v41  ;;  %v18311_v62 = vpack.c.bf16 %v25759_v59, %v25758_v17  ;;  %v18318_v52 = vld [vmem:[%s23438_s0 + $0x330] sm:$0xff]  ;;  %v25762_v17 = vand.u32 4294901760, %v25588_v4  ;;  %v25763_v59 = vand.u32 4294901760, %v25589_v33  ;;  %v18334_v18 = vld [vmem:[%s23438_s0 + $0x3b8] sm:$0xff] }
 0x269   :  { %25756 = vst [vmem:[#allocation9_spill] sm:$0xff] %v18300_v9  ;;  %12487 = vmatprep.subr.bf16.mxu1 %v18263_v2  ;;  %v18323_v46 = vld [vmem:[%s23438_s0 + $0x370] sm:$0xff]  ;;  %v25766_v4 = vand.u32 4294901760, %v18039_v13  ;;  %v25771_v2 = vand.u32 4294901760, %v25591_v32  ;;  %v25777_v32 = vand.u32 4294901760, %v18059_v8 }
 0x26a   :  { %25760 = vst [vmem:[#allocation11_spill] sm:$0xff] %v18311_v62  ;;  %12965 = vmatpush1.bf16.msra.mxu0 %v12964_v38  ;;  %v12968_v30 = vpack.c.bf16 %v25763_v59, %v25762_v17  ;;  %v25768_v38 = vand.u32 4294901760, %v18045_v14  ;;  %v25770_v59 = vand.u32 4294901760, %v25590_v39  ;;  %v25788_v39 = vand.u32 4294901760, %v17336_v27 }
 0x26b   :  { %v18349_v33 = vsub.f32 %v18039_v13, %v25766_v4  ;;  %12967 = vmatprep.subr.bf16.mxu0 %v12966_v55  ;;  %v25775_v13 = vand.u32 4294901760, %v18275_v58  ;;  %v25789_v55 = vand.u32 4294901760, %v17341_v20  ;;  %v25792_v27 = vand.u32 4294901760, %v18091_v28 }
 0x26c   :  { %v18354_v17 = vsub.f32 %v18045_v14, %v25768_v38  ;;  %v12970_v41 = vpack.c.bf16 %v25771_v2, %v25770_v59  ;;  %12489 = vmatpush1.bf16.msra.mxu1 %v18300_v9  ;;  %v18377_v14 = vsub.f32 %v18059_v8, %v25777_v32  ;;  %v18384_v2 = vpack.c.bf16 %v25780_v31, %v25779_v36  ;;  %v18396_v8 = vld [vmem:[%s23438_s0 + $0x3f0] sm:$0xff] }
 0x26d   :  { %25767 = vst [vmem:[#allocation14_spill] sm:$0xff] %v18349_v33  ;;  %v18370_v4 = vpack.c.bf16 %v25775_v13, %v25774_v49  ;;  %12491 = vmatprep.subr.bf16.mxu1 %v18311_v62  ;;  %v18391_v49 = vld [vmem:[%s23438_s0 + $0x3b0] sm:$0xff]  ;;  %v25782_v13 = vand.u32 4294901760, %v18064_v34  ;;  %v25784_v36 = vand.u32 4294901760, %v18073_v1  ;;  %v25786_v59 = vand.u32 4294901760, %v18078_v51 }
 0x26e   :  { %25769 = vst [vmem:[#allocation17_spill] sm:$0xff] %v18354_v17  ;;  %25778 = vst [vmem:[#allocation39_spill] sm:$0xff] %v18377_v14  ;;  %12969 = vmatpush1.bf16.msra.mxu0 %v12968_v30  ;;  %v12972_v62 = vpack.c.bf16 %v25789_v55, %v25788_v39  ;;  %v18435_v20 = vsub.f32 %v18091_v28, %v25792_v27  ;;  %v25794_v30 = vand.u32 4294901760, %v18119_v60  ;;  %v25796_v39 = vand.u32 4294901760, %v17346_v48 }
 0x26f   :  { %25776 = vst [vmem:[#allocation36_spill] sm:$0xff] %v18370_v4  ;;  %25781 = vst [vmem:[#allocation32_spill] sm:$0xff] %v18384_v2  ;;  %v18401_v32 = vsub.f32 %v18064_v34, %v25782_v13  ;;  %v18406_v31 = vsub.f32 %v18073_v1, %v25784_v36  ;;  %v18411_v38 = vsub.f32 %v18078_v51, %v25786_v59  ;;  %v18420_v34 = vld [vmem:[%s23438_s0 + $0x438] sm:$0xff]  ;;  %v25790_v13 = vand.u32 4294901760, %v18086_v23 }
 0x270   :  { %v18425_v1 = vld [vmem:[%s23438_s0 + $0x478] sm:$0xff]  ;;  %25793 = vst [vmem:[#allocation50_spill] sm:$0xff] %v18435_v20  ;;  %v18440_v55 = vsub.f32 %v18119_v60, %v25794_v30  ;;  %12971 = vmatprep.subr.bf16.mxu0 %v12970_v41  ;;  %v25797_v59 = vand.u32 4294901760, %v17353_v43  ;;  %v25798_v9 = vand.u32 4294901760, %v18124_v19  ;;  %12493 = vmatpush1.bf16.msra.mxu1 %v18370_v4  ;;  %v25800_v28 = vand.u32 4294901760, %v18318_v52 }
 0x271   :  { %25783 = vst [vmem:[#allocation100_spill] sm:$0xff] %v18401_v32  ;;  %25785 = vst [vmem:[#allocation41_spill] sm:$0xff] %v18406_v31  ;;  %v18430_v51 = vsub.f32 %v18086_v23, %v25790_v13  ;;  %v25801_v13 = vand.u32 4294901760, %v18323_v46  ;;  %v3769_v60 = vand.u32 4294901760, %v18391_v49  ;;  %v25803_v43 = vand.u32 4294901760, %v18140_v21  ;;  %12495 = vmatprep.subr.bf16.mxu1 %v18384_v2 }
 0x272   :  { %25787 = vst [vmem:[#allocation44_spill] sm:$0xff] %v18411_v38  ;;  %25795 = vst [vmem:[#allocation49_spill] sm:$0xff] %v18440_v55  ;;  %v12974_v36 = vpack.c.bf16 %v25797_v59, %v25796_v39  ;;  %v18449_v23 = vsub.f32 %v18124_v19, %v25798_v9  ;;  %v25805_v19 = vand.u32 4294901760, %v18334_v18  ;;  %v25806_v9 = vand.u32 4294901760, %v18339_v47  ;;  %12973 = vmatpush1.bf16.msra.mxu0 %v12972_v62 }
 0x273   :  { %25791 = vst [vmem:[#allocation48_spill] sm:$0xff] %v18430_v51  ;;  %v18456_v27 = vpack.c.bf16 %v25801_v13, %v25800_v28  ;;  %v18463_v41 = vsub.f32 %v18140_v21, %v25803_v43  ;;  %v18477_v28 = vld [vmem:[%s23438_s0 + $0x430] sm:$0xff]  ;;  %v25808_v13 = vand.u32 4294901760, %v18145_v53  ;;  %v25812_v59 = vand.u32 4294901760, %v18180_v11 }
 0x274   :  { %25799 = vst [vmem:[#allocation51_spill] sm:$0xff] %v18449_v23  ;;  %v18470_v30 = vpack.c.bf16 %v25806_v9, %v25805_v19  ;;  %v18482_v21 = vld [vmem:[%s23438_s0 + $0x470] sm:$0xff]  ;;  %v25810_v19 = vand.u32 4294901760, %v18175_v10  ;;  %v25814_v48 = vand.u32 4294901760, %v17377_v22  ;;  %v25815_v2 = vand.u32 4294901760, %v17391_v12  ;;  %12975 = vmatprep.subr.bf16.mxu0 %v12974_v36 }
 0x275   :  { %25802 = vst [vmem:[#allocation53_spill] sm:$0xff] %v18456_v27  ;;  %25804 = vst [vmem:[#allocation57_spill] sm:$0xff] %v18463_v41  ;;  %v18487_v43 = vsub.f32 %v18145_v53, %v25808_v13  ;;  %v18497_v39 = vsub.f32 %v18180_v11, %v25812_v59  ;;  %v18506_v53 = vld [vmem:[%s23438_s0 + $0x4b8] sm:$0xff]  ;;  %v25816_v13 = vand.u32 4294901760, %v18190_v6  ;;  %v25818_v22 = vand.u32 4294901760, %v18195_v35  ;;  %12497 = vmatpush1.bf16.msra.mxu1 %v18456_v27 }
 0x276   :  { %25807 = vst [vmem:[#allocation59_spill] sm:$0xff] %v18470_v30  ;;  %v18492_v9 = vsub.f32 %v18175_v10, %v25810_v19  ;;  %v12976_v4 = vpack.c.bf16 %v25815_v2, %v25814_v48  ;;  %v18511_v10 = vld [vmem:[%s23438_s0 + $0x4f8] sm:$0xff]  ;;  %v25820_v62 = vand.u32 4294901760, %v18224_v56  ;;  %v25822_v48 = vand.u32 4294901760, %v25478_v57  ;;  %12499 = vmatprep.subr.bf16.mxu1 %v18470_v30 }
 0x277   :  { %25809 = vst [vmem:[#allocation62_spill] sm:$0xff] %v18487_v43  ;;  %25813 = vst [vmem:[#allocation12_spill] sm:$0xff] %v18497_v39  ;;  %v18516_v11 = vsub.f32 %v18190_v6, %v25816_v13  ;;  %v18521_v12 = vsub.f32 %v18195_v35, %v25818_v22  ;;  %v25823_v59 = vand.u32 4294901760, %v17499_v3  ;;  %v25824_v39 = vand.u32 4294901760, %v18229_v15 }
 0x278   :  { %25811 = vst [vmem:[#allocation106_spill] sm:$0xff] %v18492_v9  ;;  %v18526_v2 = vsub.f32 %v18224_v56, %v25820_v62  ;;  %v25826_v35 = vand.u32 4294901760, %v18396_v8  ;;  %v25828_v57 = vand.u32 4294901760, %v18238_v26  ;;  %12977 = vmatpush1.bf16.msra.mxu0 %v12976_v4  ;;  %v25839_v36 = vand.u32 4294901760, %v17531_v0 }
 0x279   :  { %25817 = vst [vmem:[#allocation108_spill] sm:$0xff] %v18516_v11  ;;  %25819 = vst [vmem:[#allocation110_spill] sm:$0xff] %v18521_v12  ;;  %v12978_v19 = vpack.c.bf16 %v25823_v59, %v25822_v48  ;;  %v18535_v6 = vsub.f32 %v18229_v15, %v25824_v39  ;;  %v25830_v15 = vand.u32 4294901760, %v18420_v34  ;;  %v25831_v39 = vand.u32 4294901760, %v18425_v1  ;;  %v18561_v59 = vld [vmem:[%s23438_s0 + $0x4b0] sm:$0xff] }
 0x27a   :  { %25821 = vst [vmem:[#allocation126_spill] sm:$0xff] %v18526_v2  ;;  %v18540_v13 = vpack.c.bf16 %v25826_v35, %v3769_v60  ;;  %v18547_v3 = vsub.f32 %v18238_v26, %v25828_v57  ;;  %v18566_v26 = vld [vmem:[%s23438_s0 + $0x4f0] sm:$0xff]  ;;  %v25833_v35 = vand.u32 4294901760, %v18243_v63  ;;  %v25837_v48 = vand.u32 4294901760, %v18275_v58 }
 0x27b   :  { %25825 = vst [vmem:[#allocation127_spill] sm:$0xff] %v18535_v6  ;;  %v18554_v22 = vpack.c.bf16 %v25831_v39, %v25830_v15  ;;  %v25835_v15 = vand.u32 4294901760, %v18270_v42  ;;  %v25840_v56 = vand.u32 4294901760, %v17536_v45  ;;  %v25843_v0 = vand.u32 4294901760, %v18289_v54  ;;  %12979 = vmatprep.subr.bf16.mxu0 %v12978_v19  ;;  %v18633_v19 = vld [vmem:[%s23438_s0 + $0x530] sm:$0xff] }
 0x27c   :  { %25827 = vst [vmem:[#allocation68_spill] sm:$0xff] %v18540_v13  ;;  %25829 = vst [vmem:[#allocation72_spill] sm:$0xff] %v18547_v3  ;;  %v18571_v57 = vsub.f32 %v18243_v63, %v25833_v35  ;;  %v18581_v62 = vsub.f32 %v18275_v58, %v25837_v48  ;;  %v18590_v63 = vld [vmem:[%s23438_s0 + $0x538] sm:$0xff]  ;;  %v25841_v35 = vand.u32 4294901760, %v18284_v50  ;;  %v25845_v4 = vand.u32 4294901760, %v18318_v52  ;;  %v25848_v48 = vld [vmem:[#allocation133_spill] sm:$0xff]  ;;  %12501 = vmatpush1.bf16.msra.mxu1 %v18540_v13 }
 0x27d   :  { %25832 = vst [vmem:[#allocation76_spill] sm:$0xff] %v18554_v22  ;;  %v18576_v39 = vsub.f32 %v18270_v42, %v25835_v15  ;;  %v12980_v30 = vpack.c.bf16 %v25840_v56, %v25839_v36  ;;  %v18595_v42 = vld [vmem:[%s23438_s0 + $0x578] sm:$0xff]  ;;  %v18605_v45 = vsub.f32 %v18289_v54, %v25843_v0  ;;  %v25847_v36 = vand.u32 4294901760, %v17545_v40  ;;  %12503 = vmatprep.subr.bf16.mxu1 %v18554_v22 }
 0x27e   :  { %25834 = vst [vmem:[#allocation78_spill] sm:$0xff] %v18571_v57  ;;  %25838 = vst [vmem:[#allocation10_spill] sm:$0xff] %v18581_v62  ;;  %v18600_v58 = vsub.f32 %v18284_v50, %v25841_v35  ;;  %v18610_v56 = vsub.f32 %v18318_v52, %v25845_v4  ;;  %v25849_v15 = vand.u32 4294901760, %v25848_v48  ;;  %v25850_v62 = vand.u32 4294901760, %v18323_v46 }
 0x27f   :  { %25836 = vst [vmem:[#allocation8_spill] sm:$0xff] %v18576_v39  ;;  %25844 = vst [vmem:[#allocation16_spill] sm:$0xff] %v18605_v45  ;;  %v25852_v54 = vand.u32 4294901760, %v18477_v28  ;;  %v25853_v35 = vand.u32 4294901760, %v18482_v21  ;;  %v25858_v48 = vand.u32 4294901760, %v18511_v10  ;;  %v25860_v40 = vand.u32 4294901760, %v18339_v47  ;;  %12981 = vmatpush1.bf16.msra.mxu0 %v12980_v30 }
 0x280   :  { %25842 = vst [vmem:[#allocation13_spill] sm:$0xff] %v18600_v58  ;;  %25846 = vst [vmem:[#allocation21_spill] sm:$0xff] %v18610_v56  ;;  %v12982_v27 = vpack.c.bf16 %v25849_v15, %v25847_v36  ;;  %v18619_v50 = vsub.f32 %v18323_v46, %v25850_v62  ;;  %v18638_v46 = vld [vmem:[%s23438_s0 + $0x570] sm:$0xff]  ;;  %v25855_v62 = vand.u32 4294901760, %v18334_v18  ;;  %v25857_v36 = vand.u32 4294901760, %v18506_v53 }
 0x281   :  { %v18626_v0 = vpack.c.bf16 %v25853_v35, %v25852_v54  ;;  %v18657_v52 = vsub.f32 %v18339_v47, %v25860_v40  ;;  %v25864_v22 = vand.u32 4294901760, %v17592_v16  ;;  %v18673_v35 = vld [vmem:[%s23438_s0 + $0x5b8] sm:$0xff]  ;;  %v25871_v40 = vand.u32 4294901760, %v18566_v26 }
 0x282   :  { %25851 = vst [vmem:[#allocation22_spill] sm:$0xff] %v18619_v50  ;;  %v18643_v4 = vsub.f32 %v18334_v18, %v25855_v62  ;;  %v18650_v15 = vpack.c.bf16 %v25858_v48, %v25857_v36  ;;  %v18660_v18 = vsub.f32 %v18391_v49, %v3769_v60  ;;  %v25863_v62 = vand.u32 4294901760, %v17582_v24  ;;  %25867 = vst [vmem:[#allocation31_spill] sm:$0xff] %v18673_v35  ;;  %v18678_v47 = vld [vmem:[%s23438_s0 + $0x5f8] sm:$0xff] }
 0x283   :  { %25854 = vst [vmem:[#allocation24_spill] sm:$0xff] %v18626_v0  ;;  %25861 = vst [vmem:[#allocation29_spill] sm:$0xff] %v18657_v52  ;;  %v25865_v36 = vand.u32 4294901760, %v17625_v37  ;;  %v25866_v48 = vand.u32 4294901760, %v25624_v25  ;;  %12983 = vmatprep.subr.bf16.mxu0 %v12982_v27  ;;  %v18685_v37 = vld [vmem:[%s23438_s0 + $0x5b0] sm:$0xff]  ;;  %v25868_v27 = vand.u32 4294901760, %v18396_v8  ;;  %12505 = vmatpush1.bf16.msra.mxu1 %v18626_v0 }
 0x284   :  { %25856 = vst [vmem:[#allocation27_spill] sm:$0xff] %v18643_v4  ;;  %25859 = vst [vmem:[#allocation28_spill] sm:$0xff] %v18650_v15  ;;  %v12984_v13 = vpack.c.bf16 %v25864_v22, %v25863_v62  ;;  %v18690_v25 = vld [vmem:[%s23438_s0 + $0x5f0] sm:$0xff]  ;;  %v25870_v22 = vand.u32 4294901760, %v18561_v59  ;;  %v25873_v49 = vand.u32 4294901760, %v18420_v34  ;;  %12507 = vmatprep.subr.bf16.mxu1 %v18650_v15  ;;  %v24082_v16 = vand.u32 4294901760, %v18673_v35 }
 0x285   :  { %25862 = vst [vmem:[#allocation135_spill] sm:$0xff] %v18660_v18  ;;  %v12986_v54 = vpack.c.bf16 %v25866_v48, %v25865_v36  ;;  %v18697_v30 = vsub.f32 %v18396_v8, %v25868_v27  ;;  %v214_v36 = vld [vmem:[%s23438_s0 + $0x638] sm:$0xf]  ;;  %v25875_v27 = vand.u32 4294901760, %v18590_v63  ;;  %v25878_v60 = vand.u32 4294901760, %v17654_v61 }
 0x286   :  { %v18704_v62 = vpack.c.bf16 %v25871_v40, %v25870_v22  ;;  %v18714_v8 = vsub.f32 %v18420_v34, %v25873_v49  ;;  %v25876_v22 = vand.u32 4294901760, %v18595_v42  ;;  %12985 = vmatpush1.bf16.msra.mxu0 %v12984_v13  ;;  %v25879_v48 = vand.u32 4294901760, %v17663_v29  ;;  %v25881_v49 = vld [vmem:[#allocation118_spill] sm:$0xff] }
 0x287   :  { %25869 = vst [vmem:[#allocation33_spill] sm:$0xff] %v18697_v30  ;;  %v25880_v34 = vand.u32 4294901760, %v17670_v44  ;;  %v25882_v15 = vand.u32 4294901760, %v25881_v49  ;;  %12987 = vmatprep.subr.bf16.mxu0 %v12986_v54  ;;  %v25884_v24 = vand.u32 4294901760, %v18638_v46  ;;  %v18742_v61 = vsel %vm419_vm0, %v214_v36, 0  ;;  %v25894_v49 = vld [vmem:[#allocation137_spill] sm:$0xff] }
 0x288   :  { %25872 = vst [vmem:[#allocation34_spill] sm:$0xff] %v18704_v62  ;;  %25874 = vst [vmem:[#allocation35_spill] sm:$0xff] %v18714_v8  ;;  %v18721_v40 = vpack.c.bf16 %v25876_v22, %v25875_v27  ;;  %v12988_v0 = vpack.c.bf16 %v25879_v48, %v25878_v60  ;;  %v25883_v22 = vand.u32 4294901760, %v18633_v19  ;;  %v25886_v29 = vand.u32 4294901760, %v18344_v5  ;;  %12509 = vmatpush1.bf16.msra.mxu1 %v18704_v62  ;;  %v213_v54 = vld [vmem:[%s23438_s0 + $0x630] sm:$0xf] }
 0x289   :  { %v12990_v8 = vpack.c.bf16 %v25882_v15, %v25880_v34  ;;  %v25887_v15 = vand.u32 4294901760, %v18349_v33  ;;  %v25889_v36 = vand.u32 4294901760, %v18363_v7  ;;  %v24091_v30 = vand.u32 4294901760, %v18430_v51 }
 0x28a   :  { %25877 = vst [vmem:[#allocation37_spill] sm:$0xff] %v18721_v40  ;;  %v18739_v13 = vpack.c.bf16 %v25884_v24, %v25883_v22  ;;  %v3840_v44 = vsub.f32 %v18344_v5, %v25886_v29  ;;  %v25888_v24 = vand.u32 4294901760, %v18354_v17  ;;  %12511 = vmatprep.subr.bf16.mxu1 %v18721_v40  ;;  %v25890_v29 = vand.u32 4294901760, %v18678_v47  ;;  %12989 = vmatpush1.bf16.msra.mxu0 %v12988_v0 }
 0x28b   :  { %v3852_v60 = vsub.f32 %v18349_v33, %v25887_v15  ;;  %v3858_v34 = vsub.f32 %v18363_v7, %v25889_v36  ;;  %v25892_v36 = vld [vmem:[#allocation136_spill] sm:$0xff]  ;;  %v25895_v7 = vand.u32 4294901760, %v25894_v49  ;;  %v25898_v33 = vld [vmem:[#allocation139_spill] sm:$0xff]  ;;  %12991 = vmatprep.subr.bf16.mxu0 %v12990_v8  ;;  %v18788_v0 = vand.u32 4294901760, %v18742_v61 }
 0x28c   :  { %25885 = vst [vmem:[#allocation38_spill] sm:$0xff] %v18739_v13  ;;  %v3846_v48 = vsub.f32 %v18354_v17, %v25888_v24  ;;  %v18767_v15 = vpack.c.bf16 %v25890_v29, %v24082_v16  ;;  %v25893_v62 = vand.u32 4294901760, %v25892_v36  ;;  %v25896_v17 = vld [vmem:[#allocation138_spill] sm:$0xff]  ;;  %v25899_v5 = vand.u32 4294901760, %v25898_v33  ;;  %12513 = vmatpush1.bf16.msra.mxu1 %v18739_v13 }
 0x28d   :  { %v25897_v40 = vand.u32 4294901760, %v25896_v17  ;;  %v25900_v29 = vand.u32 4294901760, %v18685_v37  ;;  %v25901_v16 = vand.u32 4294901760, %v18690_v25  ;;  %25903 = vst [vmem:[#allocation43_spill] sm:$0xff] %v18788_v0  ;;  %v18791_v49 = vsel %vm419_vm0, %v213_v54, 0 }
 0x28e   :  { %25891 = vst [vmem:[#allocation40_spill] sm:$0xff] %v18767_v15  ;;  %v12992_v22 = vpack.c.bf16 %v25895_v7, %v25893_v62  ;;  %v3841_v7 = vand.u32 4294901760, %v3840_v44  ;;  %v3853_v17 = vand.u32 4294901760, %v3852_v60  ;;  %v3859_v33 = vand.u32 4294901760, %v3858_v34  ;;  %12515 = vmatprep.subr.bf16.mxu1 %v18767_v15  ;;  %v25912_v15 = vld [vmem:[#allocation128_spill] sm:$0xff] }
 0x28f   :  { %v12994_v35 = vpack.c.bf16 %v25899_v5, %v25897_v40  ;;  %v18784_v27 = vpack.c.bf16 %v25901_v16, %v25900_v29  ;;  %v3847_v5 = vand.u32 4294901760, %v3846_v48  ;;  %v25904_v62 = vand.u32 4294901760, %v18377_v14 }
 0x290   :  { %v25905_v40 = vand.u32 4294901760, %v18401_v32  ;;  %v25906_v36 = vand.u32 4294901760, %v18406_v31  ;;  %v25907_v44 = vand.u32 4294901760, %v18411_v38  ;;  %v3888_v48 = vsub.f32 %v18430_v51, %v24091_v30  ;;  %12993 = vmatpush1.bf16.msra.mxu0 %v12992_v22 }
 0x291   :  { %25902 = vst [vmem:[#allocation42_spill] sm:$0xff] %v18784_v27  ;;  %v3864_v16 = vsub.f32 %v18377_v14, %v25904_v62  ;;  %v25908_v29 = vand.u32 4294901760, %v18425_v1  ;;  %v25915_v30 = vand.u32 4294901760, %v18477_v28  ;;  %12995 = vmatprep.subr.bf16.mxu0 %v12994_v35  ;;  %12517 = vmatpush1.bf16.msra.mxu1 %v18784_v27  ;;  %v25918_v35 = vand.u32 4294901760, %v18440_v55  ;;  %v25928_v27 = vld [vmem:[#allocation20_spill] sm:$0xff] }
 0x292   :  { %v3876_v8 = vsub.f32 %v18401_v32, %v25905_v40  ;;  %v3870_v54 = vsub.f32 %v18406_v31, %v25906_v36  ;;  %v3882_v60 = vsub.f32 %v18411_v38, %v25907_v44  ;;  %v25910_v40 = vld [vmem:[#allocation140_spill] sm:$0xff]  ;;  %v25913_v36 = vand.u32 4294901760, %v25912_v15  ;;  %3808 = vmatprep.subr.mxu1 %v18788_v0 }
 0x293   :  { %v18814_v62 = vsub.f32 %v18425_v1, %v25908_v29  ;;  %v25911_v24 = vand.u32 4294901760, %v25910_v40  ;;  %v25914_v31 = vand.u32 4294901760, %v18435_v20  ;;  %v18827_v34 = vsub.f32 %v18477_v28, %v25915_v30 }
 0x294   :  { %v18830_v1 = vand.u32 4294901760, %v18791_v49  ;;  %v12520_v29 = vpack.c.bf16 %v3859_v33, %v3847_v5  ;;  %v3877_v40 = vand.u32 4294901760, %v3876_v8  ;;  %v3883_v38 = vand.u32 4294901760, %v3882_v60  ;;  %v25921_v33 = vld [vmem:[#allocation83_spill] sm:$0xff] }
 0x295   :  { %25909 = vst [vmem:[#allocation45_spill] sm:$0xff] %v18814_v62  ;;  %v12996_v13 = vpack.c.bf16 %v25913_v36, %v25911_v24  ;;  %v3900_v44 = vsub.f32 %v18435_v20, %v25914_v31  ;;  %25916 = vst [vmem:[#allocation46_spill] sm:$0xff] %v18827_v34  ;;  %v12518_v24 = vpack.c.bf16 %v3853_v17, %v3841_v7  ;;  %v3865_v31 = vand.u32 4294901760, %v3864_v16  ;;  %v25920_v17 = vld [vmem:[#allocation12_spill] sm:$0xff] }
 0x296   :  { %25917 = vst [vmem:[#allocation47_spill] sm:$0xff] %v18830_v1  ;;  %v3871_v36 = vand.u32 4294901760, %v3870_v54  ;;  %v3889_v28 = vand.u32 4294901760, %v3888_v48  ;;  %v3894_v30 = vsub.f32 %v18440_v55, %v25918_v35  ;;  %v25919_v22 = vand.u32 4294901760, %v18449_v23  ;;  %3810 = vmatpush1.msra.mxu1 %v18830_v1 }
 0x297   :  { %12997 = vmatpush1.bf16.msra.mxu0 %v12996_v13  ;;  %v3901_v20 = vand.u32 4294901760, %v3900_v44  ;;  %v25922_v16 = vand.u32 4294901760, %v25921_v33  ;;  %v25923_v8 = vand.u32 4294901760, %v18463_v41  ;;  %v25924_v60 = vand.u32 4294901760, %v18487_v43  ;;  %12519 = vmatprep.subr.bf16.mxu1 %v12518_v24 }
 0x298   :  { %v3906_v15 = vsub.f32 %v18449_v23, %v25919_v22  ;;  %v12522_v22 = vpack.c.bf16 %v3877_v40, %v3865_v31  ;;  %v25925_v5 = vand.u32 4294901760, %v18482_v21  ;;  %v12524_v48 = vpack.c.bf16 %v3883_v38, %v3871_v36 }
 0x299   :  { %5764 = vmatprep.subr.mxu0 %v25922_v16  ;;  %v3912_v54 = vsub.f32 %v18463_v41, %v25923_v8  ;;  %v3924_v13 = vsub.f32 %v18487_v43, %v25924_v60  ;;  %v25927_v60 = vmov 2.3283064e-09   ;;  %v3895_v7 = vand.u32 4294901760, %v3894_v30 }
 0x29a   :  { %v18861_v8 = vsub.f32 %v18482_v21, %v25925_v5  ;;  %3831 = vmatmul.mubr.f32.vlgmr.msra.gmra.mrb[4].mxu1 %v25927_v60  ;;  %v25929_v31 = vand.u32 4294901760, %v25928_v27  ;;  %v12526_v40 = vpack.c.bf16 %v3901_v20, %v3889_v28  ;;  %v3907_v33 = vand.u32 4294901760, %v3906_v15  ;;  %v25932_v5 = vld [vmem:[#allocation52_spill] sm:$0xff]  ;;  %v25936_v28 = vld [vmem:[#allocation54_spill] sm:$0xff] }
 0x29b   :  { %12521 = vmatpush1.bf16.msra.mxu1 %v12520_v29  ;;  %v25930_v16 = vand.u32 4294901760, %v18492_v9  ;;  %v25931_v21 = vand.u32 4294901760, %v25920_v17  ;;  %v25933_v38 = vmov 0.0050964355   ;;  %v3913_v36 = vand.u32 4294901760, %v3912_v54  ;;  %v25944_v60 = vld [vmem:[#allocation10_spill] sm:$0xff] }
 0x29c   :  { %25926 = vst [vmem:[#allocation95_spill] sm:$0xff] %v18861_v8  ;;  %5768 = vmatpush1.msra.mxu0 %v25929_v31  ;;  %v3925_v30 = vand.u32 4294901760, %v3924_v13  ;;  %v25934_v27 = vand.u32 4294901760, %v18516_v11  ;;  %v25935_v20 = vand.u32 4294901760, %v18521_v12  ;;  %12523 = vmatprep.subr.bf16.mxu1 %v12522_v22  ;;  %v25939_v13 = vand.u32 4294901760, %v18547_v3  ;;  %v25942_v22 = vld [vmem:[#allocation55_spill] sm:$0xff] }
 0x29d   :  { %v3918_v35 = vsub.f32 %v18492_v9, %v25930_v16  ;;  %v3930_v24 = vsub.f32 %v25920_v17, %v25931_v21  ;;  %12999 = vmatprep.subr.bf16.mxu0 %v25932_v5  ;;  %5785 = vmatmul.mubr.f32.vlgmr.msra.gmra.mrb[4].mxu0 %v25933_v38  ;;  %v25937_v16 = vand.u32 4294901760, %v18526_v2  ;;  %v25938_v21 = vand.u32 4294901760, %v18535_v6 }
 0x29e   :  { %v3936_v29 = vsub.f32 %v18516_v11, %v25934_v27  ;;  %v3948_v15 = vsub.f32 %v18521_v12, %v25935_v20  ;;  %13001 = vmatpush1.bf16.msra.mxu0 %v25936_v28  ;;  %v3960_v5 = vsub.f32 %v18547_v3, %v25939_v13  ;;  %v25940_v44 = vand.u32 4294901760, %v18506_v53 }
 0x29f   :  { %v3942_v31 = vsub.f32 %v18526_v2, %v25937_v16  ;;  %v3954_v54 = vsub.f32 %v18535_v6, %v25938_v21  ;;  %13003 = vmatprep.subr.bf16.mxu0 %v25942_v22  ;;  %v25943_v28 = vand.u32 4294901760, %v18571_v57  ;;  %v25945_v6 = vld [vmem:[#allocation80_spill] sm:$0xff]  ;;  %12525 = vmatpush1.bf16.msra.mxu1 %v12524_v48  ;;  %v12528_v13 = vpack.c.bf16 %v3907_v33, %v3895_v7 }
 0x2a0   :  { %v18895_v20 = vsub.f32 %v18506_v53, %v25940_v44  ;;  %5906 = vmatprep.mubr.f32.mxu0 %v25945_v6  ;;  %v3919_v27 = vand.u32 4294901760, %v3918_v35  ;;  %v3931_v3 = vand.u32 4294901760, %v3930_v24  ;;  %4152 = vmatprep.mubr.f32.mxu1 %v25945_v6  ;;  %v25946_v53 = vand.u32 4294901760, %v18511_v10  ;;  %v25948_v21 = vld [vmem:[#allocation56_spill] sm:$0xff]  ;;  %v25950_v24 = vld [vmem:[#allocation58_spill] sm:$0xff] }
 0x2a1   :  { %v3972_v16 = vsub.f32 %v18571_v57, %v25943_v28  ;;  %12527 = vmatprep.subr.bf16.mxu1 %v12526_v40  ;;  %v12530_v22 = vpack.c.bf16 %v3925_v30, %v3913_v36  ;;  %v3937_v28 = vand.u32 4294901760, %v3936_v29  ;;  %v3949_v2 = vand.u32 4294901760, %v3948_v15 }
 0x2a2   :  { %25941 = vst [vmem:[#allocation97_spill] sm:$0xff] %v18895_v20  ;;  %v18909_v44 = vsub.f32 %v18511_v10, %v25946_v53  ;;  %13005 = vmatpush1.bf16.msra.mxu0 %v25948_v21  ;;  %v3943_v57 = vand.u32 4294901760, %v3942_v31  ;;  %v3955_v48 = vand.u32 4294901760, %v3954_v54  ;;  %v3961_v7 = vand.u32 4294901760, %v3960_v5 }
 0x2a3   :  { %v25949_v35 = vand.u32 4294901760, %v18576_v39  ;;  %13007 = vmatprep.subr.bf16.mxu0 %v25950_v24  ;;  %v3973_v12 = vand.u32 4294901760, %v3972_v16  ;;  %v25951_v6 = vand.u32 4294901760, %v25944_v60  ;;  %v25952_v40 = vand.u32 4294901760, %v18600_v58  ;;  %12529 = vmatpush1.bf16.msra.mxu1 %v12528_v13 }
 0x2a4   :  { %25947 = vst [vmem:[#allocation109_spill] sm:$0xff] %v18909_v44  ;;  %v24110_v30 = vand.u32 4294901760, %v18610_v56  ;;  %v25953_v29 = vand.u32 4294901760, %v18561_v59  ;;  %v12532_v31 = vpack.c.bf16 %v3931_v3, %v3919_v27  ;;  %v25955_v54 = vand.u32 4294901760, %v18605_v45  ;;  %12531 = vmatprep.subr.bf16.mxu1 %v12530_v22  ;;  %v25963_v22 = vld [vmem:[#allocation61_spill] sm:$0xff] }
 0x2a5   :  { %v3966_v33 = vsub.f32 %v18576_v39, %v25949_v35  ;;  %v3978_v10 = vsub.f32 %v25944_v60, %v25951_v6  ;;  %v3984_v36 = vsub.f32 %v18600_v58, %v25952_v40  ;;  %v24109_v16 = vand.u32 4294901760, %v18619_v50  ;;  %v25962_v40 = vld [vmem:[#allocation60_spill] sm:$0xff] }
 0x2a6   :  { %v18926_v15 = vsub.f32 %v18561_v59, %v25953_v29  ;;  %v3996_v5 = vsub.f32 %v18605_v45, %v25955_v54  ;;  %v25956_v6 = vand.u32 4294901760, %v18566_v26  ;;  %v12534_v53 = vpack.c.bf16 %v3949_v2, %v3937_v28  ;;  %13009 = vmatpush1.bf16.msra.mxu0 %v25962_v40  ;;  %v25970_v40 = vld [vmem:[#allocation63_spill] sm:$0xff] }
 0x2a7   :  { %v24108_v35 = vand.u32 4294901760, %v18643_v4  ;;  %v24107_v59 = vand.u32 4294901760, %v18657_v52  ;;  %v25958_v13 = vand.u32 4294901760, %v18590_v63  ;;  %v25960_v27 = vand.u32 4294901760, %v18595_v42  ;;  %13011 = vmatprep.subr.bf16.mxu0 %v25963_v22  ;;  %12533 = vmatpush1.bf16.msra.mxu1 %v12532_v31 }
 0x2a8   :  { %25954 = vst [vmem:[#allocation111_spill] sm:$0xff] %v18926_v15  ;;  %v18935_v21 = vsub.f32 %v18566_v26, %v25956_v6  ;;  %v12536_v26 = vpack.c.bf16 %v3955_v48, %v3943_v57  ;;  %v3967_v29 = vand.u32 4294901760, %v3966_v33  ;;  %v12538_v2 = vpack.c.bf16 %v3973_v12, %v3961_v7  ;;  %12535 = vmatprep.subr.bf16.mxu1 %v12534_v53  ;;  %v25965_v7 = vld [vmem:[#allocation35_spill] sm:$0xff] }
 0x2a9   :  { %v18942_v3 = vsub.f32 %v18590_v63, %v25958_v13  ;;  %v18947_v24 = vsub.f32 %v18595_v42, %v25960_v27  ;;  %v3979_v28 = vand.u32 4294901760, %v3978_v10  ;;  %v3985_v54 = vand.u32 4294901760, %v3984_v36  ;;  %v25964_v27 = vld [vmem:[#allocation33_spill] sm:$0xff] }
 0x2aa   :  { %25957 = vst [vmem:[#allocation113_spill] sm:$0xff] %v18935_v21  ;;  %v3990_v6 = vsub.f32 %v18610_v56, %v24110_v30  ;;  %v3997_v63 = vand.u32 4294901760, %v3996_v5  ;;  %v4002_v42 = vsub.f32 %v18619_v50, %v24109_v16  ;;  %v24111_v13 = vand.u32 4294901760, %v18660_v18  ;;  %13013 = vmatpush1.bf16.msra.mxu0 %v25970_v40 }
 0x2ab   :  { %25959 = vst [vmem:[#allocation114_spill] sm:$0xff] %v18942_v3  ;;  %25961 = vst [vmem:[#allocation115_spill] sm:$0xff] %v18947_v24  ;;  %v24112_v57 = vand.u32 4294901760, %v25964_v27  ;;  %v4008_v12 = vsub.f32 %v18643_v4, %v24108_v35  ;;  %v4020_v48 = vsub.f32 %v18657_v52, %v24107_v59  ;;  %v25966_v36 = vand.u32 4294901760, %v18633_v19  ;;  %v25971_v35 = vld [vmem:[#allocation64_spill] sm:$0xff]  ;;  %12537 = vmatpush1.bf16.msra.mxu1 %v12536_v26 }
 0x2ac   :  { %v25968_v5 = vand.u32 4294901760, %v18638_v46  ;;  %v24114_v22 = vand.u32 4294901760, %v18827_v34  ;;  %v24113_v59 = vand.u32 4294901760, %v18861_v8  ;;  %13015 = vmatprep.subr.bf16.mxu0 %v25971_v35  ;;  %v12540_v16 = vpack.c.bf16 %v3979_v28, %v3967_v29  ;;  %12539 = vmatprep.subr.bf16.mxu1 %v12538_v2 }
 0x2ad   :  { %v18970_v31 = vsub.f32 %v18633_v19, %v25966_v36  ;;  %v3991_v30 = vand.u32 4294901760, %v3990_v6  ;;  %v24119_v10 = vand.u32 4294901760, %v18895_v20  ;;  %v24122_v19 = vand.u32 4294901760, %v18909_v44 }
 0x2ae   :  { %v18975_v53 = vsub.f32 %v18638_v46, %v25968_v5  ;;  %v12542_v36 = vpack.c.bf16 %v3997_v63, %v3985_v54  ;;  %v4003_v33 = vand.u32 4294901760, %v4002_v42  ;;  %v4014_v46 = vsub.f32 %v18660_v18, %v24111_v13  ;;  %v25974_v54 = vld [vmem:[#allocation31_spill] sm:$0xff]  ;;  %v25977_v13 = vld [vmem:[#allocation65_spill] sm:$0xff] }
 0x2af   :  { %25967 = vst [vmem:[#allocation117_spill] sm:$0xff] %v18970_v31  ;;  %v4026_v5 = vsub.f32 %v25964_v27, %v24112_v57  ;;  %v4009_v40 = vand.u32 4294901760, %v4008_v12  ;;  %v4021_v35 = vand.u32 4294901760, %v4020_v48  ;;  %v25972_v29 = vand.u32 4294901760, %v25965_v7  ;;  %13017 = vmatpush1.bf16.msra.mxu0 %v25977_v13  ;;  %v25980_v57 = vld [vmem:[#allocation67_spill] sm:$0xff]  ;;  %12541 = vmatpush1.bf16.msra.mxu1 %v12540_v16 }
 0x2b0   :  { %25969 = vst [vmem:[#allocation119_spill] sm:$0xff] %v18975_v53  ;;  %v25973_v6 = vand.u32 4294901760, %v18814_v62  ;;  %v25975_v63 = vand.u32 4294901760, %v25974_v54  ;;  %v4038_v2 = vsub.f32 %v18827_v34, %v24114_v22  ;;  %v4050_v12 = vsub.f32 %v18861_v8, %v24113_v59  ;;  %13019 = vmatprep.subr.bf16.mxu0 %v25980_v57  ;;  %12543 = vmatprep.subr.bf16.mxu1 %v12542_v36 }
 0x2b1   :  { %v4032_v28 = vsub.f32 %v25965_v7, %v25972_v29  ;;  %v25978_v29 = vand.u32 4294901760, %v18678_v47  ;;  %v4056_v13 = vsub.f32 %v18895_v20, %v24119_v10  ;;  %v12544_v59 = vpack.c.bf16 %v4003_v33, %v3991_v30 }
 0x2b2   :  { %v4044_v26 = vsub.f32 %v18814_v62, %v25973_v6  ;;  %v18998_v42 = vsub.f32 %v25974_v54, %v25975_v63  ;;  %v4068_v54 = vsub.f32 %v18909_v44, %v24122_v19  ;;  %v4015_v22 = vand.u32 4294901760, %v4014_v46  ;;  %v25983_v19 = vld [vmem:[#allocation70_spill] sm:$0xff]  ;;  %v25985_v46 = vld [vmem:[#allocation73_spill] sm:$0xff] }
 0x2b3   :  { %v19011_v6 = vsub.f32 %v18678_v47, %v25978_v29  ;;  %v4027_v48 = vand.u32 4294901760, %v4026_v5  ;;  %v24132_v8 = vand.u32 4294901760, %v18942_v3  ;;  %v12546_v47 = vpack.c.bf16 %v4021_v35, %v4009_v40  ;;  %13021 = vmatpush1.bf16.msra.mxu0 %v25983_v19  ;;  %12545 = vmatpush1.bf16.msra.mxu1 %v12544_v59 }
 0x2b4   :  { %25976 = vst [vmem:[#allocation121_spill] sm:$0xff] %v18998_v42  ;;  %v4033_v29 = vand.u32 4294901760, %v4032_v28  ;;  %v4045_v57 = vand.u32 4294901760, %v4044_v26  ;;  %v24131_v34 = vand.u32 4294901760, %v18947_v24  ;;  %v25981_v10 = vand.u32 4294901760, %v18685_v37  ;;  %13023 = vmatprep.subr.bf16.mxu0 %v25985_v46 }
 0x2b5   :  { %25979 = vst [vmem:[#allocation123_spill] sm:$0xff] %v19011_v6  ;;  %v4039_v63 = vand.u32 4294901760, %v4038_v2  ;;  %v4051_v16 = vand.u32 4294901760, %v4050_v12  ;;  %v25984_v30 = vand.u32 4294901760, %v18926_v15  ;;  %v4057_v36 = vand.u32 4294901760, %v4056_v13  ;;  %12547 = vmatprep.subr.bf16.mxu1 %v12546_v47 }
 0x2b6   :  { %v19026_v20 = vsub.f32 %v18685_v37, %v25981_v10  ;;  %v4069_v5 = vand.u32 4294901760, %v4068_v54  ;;  %v25986_v40 = vand.u32 4294901760, %v18935_v21  ;;  %v24130_v28 = vand.u32 4294901760, %v18970_v31 }
 0x2b7   :  { %v4062_v33 = vsub.f32 %v18926_v15, %v25984_v30  ;;  %v25987_v37 = vand.u32 4294901760, %v18690_v25  ;;  %v12548_v19 = vpack.c.bf16 %v4027_v48, %v4015_v22  ;;  %v4080_v26 = vsub.f32 %v18942_v3, %v24132_v8  ;;  %v25990_v22 = vld [vmem:[#allocation98_spill] sm:$0xff] }
 0x2b8   :  { %25982 = vst [vmem:[#allocation125_spill] sm:$0xff] %v19026_v20  ;;  %v4074_v35 = vsub.f32 %v18935_v21, %v25986_v40  ;;  %v24125_v2 = vand.u32 4294901760, %v18975_v53  ;;  %v12550_v12 = vpack.c.bf16 %v4045_v57, %v4033_v29  ;;  %v4092_v13 = vsub.f32 %v18947_v24, %v24131_v34  ;;  %v26006_v34 = vld [vmem:[#allocation132_spill] sm:$0xff] }
 0x2b9   :  { %v19040_v10 = vsub.f32 %v18690_v25, %v25987_v37  ;;  %v24124_v54 = vand.u32 4294901760, %v18998_v42  ;;  %v24123_v30 = vand.u32 4294901760, %v19011_v6  ;;  %v25989_v25 = vld [vmem:[#allocation30_spill] sm:$0xff]  ;;  %v12552_v59 = vpack.c.bf16 %v4051_v16, %v4039_v63  ;;  %12549 = vmatpush1.bf16.msra.mxu1 %v12548_v19  ;;  %v25994_v19 = vld [vmem:[#allocation107_spill] sm:$0xff] }
 0x2ba   :  { %13025 = vmatpush1.bf16.msra.mxu0 %v25989_v25  ;;  %v12554_v48 = vpack.c.bf16 %v4069_v5, %v4057_v36  ;;  %v4063_v46 = vand.u32 4294901760, %v4062_v33  ;;  %v4075_v40 = vand.u32 4294901760, %v4074_v35  ;;  %v4086_v47 = vsub.f32 %v18970_v31, %v24130_v28  ;;  %12551 = vmatprep.subr.bf16.mxu1 %v12550_v12  ;;  %v25992_v5 = vld [vmem:[#allocation105_spill] sm:$0xff] }
 0x2bb   :  { %25988 = vst [vmem:[#allocation77_spill] sm:$0xff] %v19040_v10  ;;  %13027 = vmatprep.subr.bf16.mxu0 %v25990_v22  ;;  %v4081_v29 = vand.u32 4294901760, %v4080_v26  ;;  %v4098_v57 = vsub.f32 %v18975_v53, %v24125_v2  ;;  %v24129_v37 = vand.u32 4294901760, %v19026_v20  ;;  %v24128_v25 = vand.u32 4294901760, %v19040_v10  ;;  %v25995_v2 = vld [vmem:[#allocation112_spill] sm:$0xff]  ;;  %v19156_v28 = vld [vmem:[%s23438_s0 + $0x7a8] sm:$0xff] }
 0x2bc   :  { %v4093_v63 = vand.u32 4294901760, %v4092_v13  ;;  %v4104_v16 = vsub.f32 %v18998_v42, %v24124_v54  ;;  %v4116_v33 = vsub.f32 %v19011_v6, %v24123_v30  ;;  %v19069_v36 = vsub.f32 %v18742_v61, %v18788_v0 }
 0x2bd   :  { %v19074_v35 = vsub.f32 %v18791_v49, %v18830_v1  ;;  %v12556_v26 = vpack.c.bf16 %v4075_v40, %v4063_v46  ;;  %12553 = vmatpush1.bf16.msra.mxu1 %v12552_v59  ;;  %v4087_v12 = vand.u32 4294901760, %v4086_v47  ;;  %v4099_v13 = vand.u32 4294901760, %v4098_v57  ;;  %v25996_v46 = vld [vmem:[#allocation116_spill] sm:$0xff]  ;;  %v19205_v1 = vld [vmem:[%s23438_s0 + $0x828] sm:$0xff] }
 0x2be   :  { %25991 = vst [vmem:[#allocation15_spill] sm:$0xff] %v19069_v36  ;;  %13029 = vmatpush1.bf16.msra.mxu0 %v25992_v5  ;;  %v4110_v22 = vsub.f32 %v19026_v20, %v24129_v37  ;;  %v4122_v61 = vsub.f32 %v19040_v10, %v24128_v25  ;;  %12555 = vmatprep.subr.bf16.mxu1 %v12554_v48  ;;  %v4105_v30 = vand.u32 4294901760, %v4104_v16  ;;  %v4117_v54 = vand.u32 4294901760, %v4116_v33  ;;  %v19098_v33 = vld [vmem:[%s23438_s0 + $0x668] sm:$0xff] }
 0x2bf   :  { %25993 = vst [vmem:[#allocation18_spill] sm:$0xff] %v19074_v35  ;;  %13031 = vmatprep.subr.bf16.mxu0 %v25994_v19  ;;  %v12558_v5 = vpack.c.bf16 %v4093_v63, %v4081_v29  ;;  %v24127_v49 = vand.u32 4294901760, %v19069_v36  ;;  %v12560_v59 = vpack.c.bf16 %v4099_v13, %v4087_v12  ;;  %v24126_v57 = vand.u32 4294901760, %v19074_v35  ;;  %v25997_v29 = vld [vmem:[#allocation122_spill] sm:$0xff]  ;;  %v25998_v63 = vld [vmem:[#allocation124_spill] sm:$0xff] }
 0x2c0   :  { %v4111_v40 = vand.u32 4294901760, %v4110_v22  ;;  %v4123_v47 = vand.u32 4294901760, %v4122_v61  ;;  %v12562_v19 = vpack.c.bf16 %v4117_v54, %v4105_v30  ;;  %v19103_v54 = vld [vmem:[%s23438_s0 + $0x6a8] sm:$0xff]  ;;  %v19113_v12 = vld [vmem:[%s23438_s0 + $0x6a0] sm:$0xff] }
 0x2c1   :  { %12557 = vmatpush1.bf16.msra.mxu1 %v12556_v26  ;;  %v4128_v48 = vsub.f32 %v19069_v36, %v24127_v49  ;;  %v4134_v16 = vsub.f32 %v19074_v35, %v24126_v57  ;;  %v19108_v26 = vld [vmem:[%s23438_s0 + $0x660] sm:$0xff]  ;;  %v25999_v13 = vld [vmem:[#allocation74_spill] sm:$0xff]  ;;  %v26005_v49 = vld [vmem:[#allocation23_spill] sm:$0xff]  ;;  %v12570_v57 = vpack.c.bf16 %v18401_v32, %v18377_v14  ;;  %v12578_v14 = vpack.c.bf16 %v18487_v43, %v18463_v41 }
 0x2c2   :  { %13033 = vmatpush1.bf16.msra.mxu0 %v25995_v2  ;;  %12559 = vmatprep.subr.bf16.mxu1 %v12558_v5  ;;  %v12564_v2 = vpack.c.bf16 %v4123_v47, %v4111_v40  ;;  %v19119_v22 = vld [vmem:[%s23438_s0 + $0x6e8] sm:$0xff]  ;;  %v24138_v47 = vand.u32 4294901760, %v19108_v26 }
 0x2c3   :  { %13035 = vmatprep.subr.bf16.mxu0 %v25996_v46  ;;  %v4129_v30 = vand.u32 4294901760, %v4128_v48  ;;  %v19124_v61 = vld [vmem:[%s23438_s0 + $0x728] sm:$0xff]  ;;  %v24134_v46 = vand.u32 4294901760, %v19098_v33  ;;  %v4135_v40 = vand.u32 4294901760, %v4134_v16  ;;  %v26003_v16 = vld [vmem:[#allocation131_spill] sm:$0xff] }
 0x2c4   :  { %v26000_v5 = vld [vmem:[#allocation129_spill] sm:$0xff]  ;;  %v26001_v48 = vld [vmem:[#allocation94_spill] sm:$0xff] }
 0x2c5   :  { %12561 = vmatpush1.bf16.msra.mxu1 %v12560_v59  ;;  %v24133_v59 = vand.u32 4294901760, %v19103_v54  ;;  %v19151_v37 = vld [vmem:[%s23438_s0 + $0x768] sm:$0xff] }
 0x2c6   :  { %13037 = vmatpush1.bf16.msra.mxu0 %v25997_v29  ;;  %12563 = vmatprep.subr.bf16.mxu1 %v12562_v19  ;;  %v24137_v19 = vand.u32 4294901760, %v19113_v12  ;;  %v26002_v29 = vld [vmem:[#allocation14_spill] sm:$0xff] }
 0x2c7   :  { %13039 = vmatprep.subr.bf16.mxu0 %v25998_v63  ;;  %v12566_v63 = vpack.c.bf16 %v26002_v29, %v26001_v48  ;;  %v26030_v43 = vld [vmem:[#allocation110_spill] sm:$0xff]  ;;  %v12588_v48 = vpack.c.bf16 %v25944_v60, %v18576_v39  ;;  %v26047_v29 = vand.u32 4294901760, %v19103_v54 }
 0x2c8   :  { %v19169_v8 = vpack.c.bf16 %v24137_v19, %v24138_v47  ;;  %v19187_v47 = vld [vmem:[%s23438_s0 + $0x760] sm:$0xff]  ;;  %v19200_v19 = vld [vmem:[%s23438_s0 + $0x7e8] sm:$0xff] }
 0x2c9   :  { %12565 = vmatpush1.bf16.msra.mxu1 %v12564_v2  ;;  %v19143_v2 = vld [vmem:[%s23438_s0 + $0x720] sm:$0xff] }
 0x2ca   :  { %13041 = vmatpush1.bf16.msra.mxu0 %v25999_v13  ;;  %4130 = vmatprep.subr.mxu1 %v4129_v30  ;;  %v26004_v30 = vld [vmem:[#allocation17_spill] sm:$0xff]  ;;  %26008 = vst [vmem:[#allocation69_spill] sm:$0xff] %v19169_v8 }
 0x2cb   :  { %13043 = vmatprep.subr.bf16.mxu0 %v26000_v5  ;;  %v19138_v5 = vld [vmem:[%s23438_s0 + $0x6e0] sm:$0xff]  ;;  %v12568_v25 = vpack.c.bf16 %v26005_v49, %v26004_v30  ;;  %v26022_v49 = vld [vmem:[#allocation82_spill] sm:$0xff] }
 0x2cc   :  { %v26013_v13 = vld [vmem:[#allocation41_spill] sm:$0xff] }
 0x2cd   :  { %4136 = vmatpush1.msra.mxu1 %v4135_v40  ;;  %v26010_v40 = vand.u32 4294901760, %v19124_v61 }
 0x2ce   :  { %13045 = vmatpush1.bf16.msra.mxu0 %v26003_v16  ;;  %v19163_v16 = vpack.c.bf16 %v24133_v59, %v24134_v46  ;;  %12567 = vmatprep.subr.bf16.mxu1 %v12566_v63  ;;  %v26009_v59 = vand.u32 4294901760, %v19119_v22  ;;  %v19192_v63 = vld [vmem:[%s23438_s0 + $0x7a0] sm:$0xff] }
 0x2cf   :  { %5888 = vmatprep.subr.mxu0 %v26006_v34  ;;  %4153 = vmatmul.mubr.f32.vlgmr.msra.gmra.mrb[4].mxu1 %v25933_v38  ;;  %v26012_v34 = vld [vmem:[#allocation134_spill] sm:$0xff] }
 0x2d0   :  { %26007 = vst [vmem:[#allocation19_spill] sm:$0xff] %v19163_v16  ;;  %v19180_v46 = vpack.c.bf16 %v26010_v40, %v26009_v59  ;;  %12569 = vmatpush1.bf16.msra.mxu1 %v12568_v25  ;;  %v26014_v59 = vld [vmem:[#allocation44_spill] sm:$0xff]  ;;  %4325 = vmatprep.mubr.f32.mxu1 %v26022_v49 }
 0x2d1   :  { %v12572_v40 = vpack.c.bf16 %v26014_v59, %v26013_v13  ;;  %12571 = vmatprep.subr.bf16.mxu1 %v12570_v57  ;;  %v26016_v59 = vand.u32 4294901760, %v19138_v5  ;;  %v26017_v13 = vand.u32 4294901760, %v19143_v2  ;;  %v26023_v57 = vld [vmem:[#allocation90_spill] sm:$0xff] }
 0x2d2   :  { %26011 = vst [vmem:[#allocation25_spill] sm:$0xff] %v19180_v46  ;;  %5890 = vmatpush1.msra.mxu0 %v26012_v34  ;;  %v26015_v34 = vld [vmem:[#allocation50_spill] sm:$0xff] }
 0x2d3   :  { %5907 = vmatmul.mubr.f32.vlgmr.msra.gmra.mrb[4].mxu0 %v25933_v38  ;;  %13335 = vmatprep.subr.bf16.mxu0 %v19163_v16  ;;  %v12574_v25 = vpack.c.bf16 %v26015_v34, %v18430_v51  ;;  %v19216_v32 = vpack.c.bf16 %v26017_v13, %v26016_v59  ;;  %v26019_v16 = vand.u32 4294901760, %v19151_v37  ;;  %v26020_v38 = vand.u32 4294901760, %v19156_v28  ;;  %v19232_v13 = vld [vmem:[%s23438_s0 + $0x7e0] sm:$0xff] }
 0x2d4   :  { %13337 = vmatpush1.bf16.msra.mxu0 %v19169_v8  ;;  %v19237_v59 = vld [vmem:[%s23438_s0 + $0x820] sm:$0xff]  ;;  %12573 = vmatpush1.bf16.msra.mxu1 %v12572_v40  ;;  %v19250_v8 = vld [vmem:[%s23438_s0 + $0x8a8] sm:$0xff]  ;;  %v26024_v40 = vand.u32 4294901760, %v19187_v47 }
 0x2d5   :  { %26018 = vst [vmem:[#allocation71_spill] sm:$0xff] %v19216_v32  ;;  %13339 = vmatprep.subr.bf16.mxu0 %v19180_v46  ;;  %v19225_v34 = vpack.c.bf16 %v26020_v38, %v26019_v16  ;;  %v12576_v38 = vpack.c.bf16 %v18449_v23, %v18440_v55  ;;  %v19245_v16 = vld [vmem:[%s23438_s0 + $0x868] sm:$0xff]  ;;  %7121 = vmatprep.mubr.f32.mxu0 %v26023_v57  ;;  %v26025_v46 = vand.u32 4294901760, %v19192_v63  ;;  %v24161_v23 = vand.u32 4294901760, %v19232_v13 }
 0x2d6   :  { %12575 = vmatprep.subr.bf16.mxu1 %v12574_v25  ;;  %v26027_v57 = vand.u32 4294901760, %v19200_v19  ;;  %v26028_v25 = vand.u32 4294901760, %v19205_v1  ;;  %v12580_v55 = vpack.c.bf16 %v25920_v17, %v18492_v9  ;;  %v26033_v41 = vand.u32 4294901760, %v19245_v16  ;;  %v26036_v9 = vld [vmem:[#allocation126_spill] sm:$0xff]  ;;  %v26037_v17 = vld [vmem:[#allocation127_spill] sm:$0xff] }
 0x2d7   :  { %26021 = vst [vmem:[#allocation81_spill] sm:$0xff] %v19225_v34  ;;  %v19260_v49 = vpack.c.bf16 %v26025_v46, %v26024_v40  ;;  %v19276_v46 = vld [vmem:[%s23438_s0 + $0x860] sm:$0xff] }
 0x2d8   :  { %13341 = vmatpush1.bf16.msra.mxu0 %v19216_v32  ;;  %v19269_v51 = vpack.c.bf16 %v26028_v25, %v26027_v57  ;;  %v19281_v40 = vld [vmem:[%s23438_s0 + $0x8a0] sm:$0xff]  ;;  %12577 = vmatpush1.bf16.msra.mxu1 %v12576_v38  ;;  %v19288_v57 = vld [vmem:[%s23438_s0 + $0x8e8] sm:$0xff]  ;;  %v12582_v32 = vpack.c.bf16 %v26030_v43, %v18516_v11  ;;  %v26031_v38 = vand.u32 4294901760, %v19237_v59 }
 0x2d9   :  { %26026 = vst [vmem:[#allocation84_spill] sm:$0xff] %v19260_v49  ;;  %13343 = vmatprep.subr.bf16.mxu0 %v19225_v34  ;;  %v19293_v25 = vld [vmem:[%s23438_s0 + $0x928] sm:$0xff]  ;;  %12579 = vmatprep.subr.bf16.mxu1 %v12578_v14  ;;  %v26034_v14 = vand.u32 4294901760, %v19250_v8  ;;  %v26038_v43 = vld [vmem:[#allocation72_spill] sm:$0xff]  ;;  %v26043_v0 = vand.u32 4294901760, %v19288_v57 }
 0x2da   :  { %26029 = vst [vmem:[#allocation88_spill] sm:$0xff] %v19269_v51  ;;  %v19302_v34 = vpack.c.bf16 %v26031_v38, %v24161_v23  ;;  %v19318_v38 = vld [vmem:[%s23438_s0 + $0x8e0] sm:$0xff] }
 0x2db   :  { %v19311_v30 = vpack.c.bf16 %v26034_v14, %v26033_v41  ;;  %v19323_v23 = vld [vmem:[%s23438_s0 + $0x920] sm:$0xff]  ;;  %v19330_v41 = vld [vmem:[%s23438_s0 + $0x968] sm:$0xff]  ;;  %v26049_v60 = vand.u32 4294901760, %v19318_v38 }
 0x2dc   :  { %13345 = vmatpush1.bf16.msra.mxu0 %v19260_v49  ;;  %26032 = vst [vmem:[#allocation91_spill] sm:$0xff] %v19302_v34  ;;  %12581 = vmatpush1.bf16.msra.mxu1 %v12580_v55  ;;  %v19335_v14 = vld [vmem:[%s23438_s0 + $0x9a8] sm:$0xff]  ;;  %v26040_v55 = vand.u32 4294901760, %v19276_v46  ;;  %v26050_v39 = vand.u32 4294901760, %v19323_v23 }
 0x2dd   :  { %13347 = vmatprep.subr.bf16.mxu0 %v19269_v51  ;;  %26035 = vst [vmem:[#allocation92_spill] sm:$0xff] %v19311_v30  ;;  %v12584_v51 = vpack.c.bf16 %v26037_v17, %v26036_v9  ;;  %12583 = vmatprep.subr.bf16.mxu1 %v12582_v32  ;;  %v26039_v49 = vld [vmem:[#allocation78_spill] sm:$0xff]  ;;  %v26041_v17 = vand.u32 4294901760, %v19281_v40  ;;  %v26044_v32 = vand.u32 4294901760, %v19293_v25 }
 0x2de   :  { %v12586_v11 = vpack.c.bf16 %v26039_v49, %v26038_v43  ;;  %v26046_v49 = vand.u32 4294901760, %v19098_v33  ;;  %v19396_v43 = vpack.c.bf16 %v26050_v39, %v26049_v60  ;;  %v26061_v60 = vand.u32 4294901760, %v19124_v61 }
 0x2df   :  { %v19344_v9 = vpack.c.bf16 %v26041_v17, %v26040_v55  ;;  %v19353_v35 = vpack.c.bf16 %v26044_v32, %v26043_v0  ;;  %v19360_v17 = vld [vmem:[%s23438_s0 + $0x960] sm:$0xff]  ;;  %v19372_v0 = vld [vmem:[%s23438_s0 + $0x9e8] sm:$0xff] }
 0x2e0   :  { %13349 = vmatpush1.bf16.msra.mxu0 %v19302_v34  ;;  %v19365_v55 = vld [vmem:[%s23438_s0 + $0x9a0] sm:$0xff]  ;;  %12585 = vmatpush1.bf16.msra.mxu1 %v12584_v51  ;;  %v19377_v32 = vld [vmem:[%s23438_s0 + $0xa28] sm:$0xff]  ;;  %v19382_v34 = vsub.f32 %v19098_v33, %v26046_v49  ;;  %v12590_v51 = vpack.c.bf16 %v18605_v45, %v18600_v58  ;;  %26051 = vst [vmem:[#allocation102_spill] sm:$0xff] %v19396_v43  ;;  %v26052_v33 = vand.u32 4294901760, %v19108_v26 }
 0x2e1   :  { %26042 = vst [vmem:[#allocation96_spill] sm:$0xff] %v19344_v9  ;;  %13351 = vmatprep.subr.bf16.mxu0 %v19311_v30  ;;  %26045 = vst [vmem:[#allocation99_spill] sm:$0xff] %v19353_v35  ;;  %12587 = vmatprep.subr.bf16.mxu1 %v12586_v11  ;;  %v19389_v30 = vsub.f32 %v19103_v54, %v26047_v29  ;;  %v26054_v54 = vand.u32 4294901760, %v19330_v41  ;;  %v26055_v29 = vand.u32 4294901760, %v19335_v14  ;;  %v19417_v11 = vld [vmem:[%s23438_s0 + $0x9e0] sm:$0xff]  ;;  %v19444_v58 = vld [vmem:[%s23438_s0 + $0xa68] sm:$0xff] }
 0x2e2   :  { %v19403_v45 = vsub.f32 %v19108_v26, %v26052_v33  ;;  %v19422_v26 = vld [vmem:[%s23438_s0 + $0xa20] sm:$0xff]  ;;  %v26057_v33 = vand.u32 4294901760, %v19113_v12  ;;  %v19437_v39 = vsub.f32 %v19124_v61, %v26061_v60  ;;  %v26065_v61 = vand.u32 4294901760, %v19143_v2 }
 0x2e3   :  { %26048 = vst [vmem:[#allocation101_spill] sm:$0xff] %v19389_v30  ;;  %v26067_v60 = vand.u32 4294901760, %v19151_v37 }
 0x2e4   :  { %13353 = vmatpush1.bf16.msra.mxu0 %v19344_v9  ;;  %26053 = vst [vmem:[#allocation103_spill] sm:$0xff] %v19403_v45  ;;  %v19410_v9 = vpack.c.bf16 %v26055_v29, %v26054_v54  ;;  %v19427_v49 = vsub.f32 %v19113_v12, %v26057_v33  ;;  %v26059_v54 = vand.u32 4294901760, %v19119_v22  ;;  %26062 = vst [vmem:[#allocation136_spill] sm:$0xff] %v19437_v39  ;;  %12589 = vmatpush1.bf16.msra.mxu1 %v12588_v48  ;;  %v19449_v12 = vld [vmem:[%s23438_s0 + $0xaa8] sm:$0xff] }
 0x2e5   :  { %13355 = vmatprep.subr.bf16.mxu0 %v19353_v35  ;;  %v12592_v35 = vpack.c.bf16 %v18619_v50, %v18610_v56  ;;  %v19459_v48 = vsub.f32 %v19143_v2, %v26065_v61  ;;  %12591 = vmatprep.subr.bf16.mxu1 %v12590_v51  ;;  %v12594_v50 = vpack.c.bf16 %v18657_v52, %v18643_v4  ;;  %v26069_v56 = vand.u32 4294901760, %v19156_v28  ;;  %v19499_v51 = vld [vmem:[%s23438_s0 + $0xa60] sm:$0xff]  ;;  %v19526_v52 = vld [vmem:[%s23438_s0 + $0xae8] sm:$0xff] }
 0x2e6   :  { %26056 = vst [vmem:[#allocation104_spill] sm:$0xff] %v19410_v9  ;;  %26058 = vst [vmem:[#allocation133_spill] sm:$0xff] %v19427_v49  ;;  %v19432_v29 = vsub.f32 %v19119_v22, %v26059_v54  ;;  %v26063_v22 = vand.u32 4294901760, %v19138_v5  ;;  %v19464_v54 = vsub.f32 %v19151_v37, %v26067_v60  ;;  %v26072_v2 = vand.u32 4294901760, %v19365_v55 }
 0x2e7   :  { %26066 = vst [vmem:[#allocation138_spill] sm:$0xff] %v19459_v48  ;;  %v19471_v36 = vsub.f32 %v19156_v28, %v26069_v56  ;;  %v26074_v61 = vand.u32 4294901760, %v19187_v47  ;;  %v26075_v56 = vand.u32 4294901760, %v19372_v0  ;;  %v26076_v28 = vand.u32 4294901760, %v19377_v32 }
 0x2e8   :  { %26060 = vst [vmem:[#allocation118_spill] sm:$0xff] %v19432_v29  ;;  %v19454_v33 = vsub.f32 %v19138_v5, %v26063_v22  ;;  %26068 = vst [vmem:[#allocation139_spill] sm:$0xff] %v19464_v54  ;;  %13357 = vmatpush1.bf16.msra.mxu0 %v19396_v43  ;;  %v26071_v5 = vand.u32 4294901760, %v19360_v17  ;;  %12593 = vmatpush1.bf16.msra.mxu1 %v12592_v35 }
 0x2e9   :  { %26070 = vst [vmem:[#allocation140_spill] sm:$0xff] %v19471_v36  ;;  %v19485_v60 = vsub.f32 %v19187_v47, %v26074_v61  ;;  %13359 = vmatprep.subr.bf16.mxu0 %v19410_v9  ;;  %v19492_v43 = vpack.c.bf16 %v26076_v28, %v26075_v56  ;;  %v19504_v47 = vld [vmem:[%s23438_s0 + $0xaa0] sm:$0xff]  ;;  %v26078_v61 = vand.u32 4294901760, %v19192_v63  ;;  %v26080_v56 = vand.u32 4294901760, %v19200_v19  ;;  %12595 = vmatprep.subr.bf16.mxu1 %v12594_v50 }
 0x2ea   :  { %26064 = vst [vmem:[#allocation137_spill] sm:$0xff] %v19454_v33  ;;  %v19478_v22 = vpack.c.bf16 %v26072_v2, %v26071_v5  ;;  %v26082_v2 = vand.u32 4294901760, %v19205_v1  ;;  %v12596_v9 = vpack.c.bf16 %v25964_v27, %v18660_v18  ;;  %v12598_v27 = vpack.c.bf16 %v18814_v62, %v25965_v7  ;;  %v19581_v50 = vld [vmem:[%s23438_s0 + $0xae0] sm:$0xff]  ;;  %v26107_v62 = vld [vmem:[#allocation95_spill] sm:$0xff] }
 0x2eb   :  { %26077 = vst [vmem:[#allocation83_spill] sm:$0xff] %v19492_v43  ;;  %v19509_v37 = vsub.f32 %v19192_v63, %v26078_v61  ;;  %v19514_v28 = vsub.f32 %v19200_v19, %v26080_v56  ;;  %v19531_v63 = vld [vmem:[%s23438_s0 + $0xb28] sm:$0xff]  ;;  %v26084_v19 = vand.u32 4294901760, %v19232_v13  ;;  %v26090_v18 = vand.u32 4294901760, %v19250_v8 }
 0x2ec   :  { %26073 = vst [vmem:[#allocation128_spill] sm:$0xff] %v19478_v22  ;;  %v19519_v5 = vsub.f32 %v19205_v1, %v26082_v2  ;;  %v26086_v1 = vand.u32 4294901760, %v19237_v59  ;;  %v26088_v2 = vand.u32 4294901760, %v19245_v16  ;;  %13361 = vmatpush1.bf16.msra.mxu0 %v19478_v22  ;;  %12597 = vmatpush1.bf16.msra.mxu1 %v12596_v9  ;;  %v26110_v9 = vand.u32 4294901760, %v19323_v23 }
 0x2ed   :  { %26079 = vst [vmem:[#allocation20_spill] sm:$0xff] %v19509_v37  ;;  %26081 = vst [vmem:[#allocation52_spill] sm:$0xff] %v19514_v28  ;;  %v19536_v61 = vsub.f32 %v19232_v13, %v26084_v19  ;;  %v19553_v4 = vsub.f32 %v19250_v8, %v26090_v18  ;;  %v26092_v13 = vand.u32 4294901760, %v19417_v11  ;;  %13363 = vmatprep.subr.bf16.mxu0 %v19492_v43  ;;  %v26097_v18 = vand.u32 4294901760, %v19444_v58  ;;  %v26106_v43 = vld [vmem:[#allocation46_spill] sm:$0xff] }
 0x2ee   :  { %26083 = vst [vmem:[#allocation54_spill] sm:$0xff] %v19519_v5  ;;  %v19541_v35 = vsub.f32 %v19237_v59, %v26086_v1  ;;  %v19546_v56 = vsub.f32 %v19245_v16, %v26088_v2  ;;  %v26093_v59 = vand.u32 4294901760, %v19422_v26  ;;  %v26095_v1 = vand.u32 4294901760, %v19276_v46  ;;  %12599 = vmatprep.subr.bf16.mxu1 %v12598_v27 }
 0x2ef   :  { %26085 = vst [vmem:[#allocation55_spill] sm:$0xff] %v19536_v61  ;;  %26091 = vst [vmem:[#allocation60_spill] sm:$0xff] %v19553_v4  ;;  %v26098_v8 = vand.u32 4294901760, %v19449_v12  ;;  %v12600_v7 = vpack.c.bf16 %v26107_v62, %v26106_v43  ;;  %v26113_v62 = vld [vmem:[#allocation97_spill] sm:$0xff]  ;;  %v26115_v27 = vand.u32 4294901760, %v19499_v51 }
 0x2f0   :  { %26087 = vst [vmem:[#allocation56_spill] sm:$0xff] %v19541_v35  ;;  %26089 = vst [vmem:[#allocation58_spill] sm:$0xff] %v19546_v56  ;;  %v19560_v19 = vpack.c.bf16 %v26093_v59, %v26092_v13  ;;  %v19567_v2 = vsub.f32 %v19276_v46, %v26095_v1  ;;  %v19586_v46 = vld [vmem:[%s23438_s0 + $0xb20] sm:$0xff]  ;;  %v26100_v1 = vand.u32 4294901760, %v19281_v40  ;;  %v26104_v59 = vand.u32 4294901760, %v19293_v25 }
 0x2f1   :  { %v19574_v22 = vpack.c.bf16 %v26098_v8, %v26097_v18  ;;  %v26102_v18 = vand.u32 4294901760, %v19288_v57  ;;  %v12602_v43 = vpack.c.bf16 %v18909_v44, %v26113_v62  ;;  %v26118_v62 = vand.u32 4294901760, %v19360_v17  ;;  %12601 = vmatpush1.bf16.msra.mxu1 %v12600_v7 }
 0x2f2   :  { %26094 = vst [vmem:[#allocation61_spill] sm:$0xff] %v19560_v19  ;;  %26096 = vst [vmem:[#allocation63_spill] sm:$0xff] %v19567_v2  ;;  %v19591_v16 = vsub.f32 %v19281_v40, %v26100_v1  ;;  %v19601_v13 = vsub.f32 %v19293_v25, %v26104_v59  ;;  %v19608_v2 = vld [vmem:[%s23438_s0 + $0xb68] sm:$0xff]  ;;  %v19623_v25 = vsub.f32 %v19323_v23, %v26110_v9  ;;  %v26111_v59 = vand.u32 4294901760, %v19330_v41 }
 0x2f3   :  { %26099 = vst [vmem:[#allocation64_spill] sm:$0xff] %v19574_v22  ;;  %v19596_v8 = vsub.f32 %v19288_v57, %v26102_v18  ;;  %v19613_v40 = vld [vmem:[%s23438_s0 + $0xba8] sm:$0xff]  ;;  %v26109_v57 = vand.u32 4294901760, %v19318_v38  ;;  %v26114_v23 = vand.u32 4294901760, %v19335_v14  ;;  %13365 = vmatpush1.bf16.msra.mxu0 %v19560_v19  ;;  %12603 = vmatprep.subr.bf16.mxu1 %v12602_v43  ;;  %v26125_v43 = vand.u32 4294901760, %v19581_v50 }
 0x2f4   :  { %26101 = vst [vmem:[#allocation31_spill] sm:$0xff] %v19591_v16  ;;  %26105 = vst [vmem:[#allocation67_spill] sm:$0xff] %v19601_v13  ;;  %v19628_v18 = vsub.f32 %v19330_v41, %v26111_v59  ;;  %v19635_v13 = vld [vmem:[%s23438_s0 + $0xb60] sm:$0xff]  ;;  %v26116_v41 = vand.u32 4294901760, %v19504_v47  ;;  %13367 = vmatprep.subr.bf16.mxu0 %v19574_v22  ;;  %v26122_v59 = vand.u32 4294901760, %v19365_v55 }
 0x2f5   :  { %26103 = vst [vmem:[#allocation65_spill] sm:$0xff] %v19596_v8  ;;  %26108 = vst [vmem:[#allocation70_spill] sm:$0xff] %v19613_v40  ;;  %v19618_v1 = vsub.f32 %v19318_v38, %v26109_v57  ;;  %v19640_v38 = vld [vmem:[%s23438_s0 + $0xba0] sm:$0xff]  ;;  %v19645_v57 = vsub.f32 %v19335_v14, %v26114_v23  ;;  %v26119_v14 = vand.u32 4294901760, %v19526_v52  ;;  %v26120_v23 = vand.u32 4294901760, %v19531_v63 }
 0x2f6   :  { %26112 = vst [vmem:[#allocation73_spill] sm:$0xff] %v19628_v18  ;;  %v19652_v9 = vpack.c.bf16 %v26116_v41, %v26115_v27  ;;  %v19659_v18 = vsub.f32 %v19360_v17, %v26118_v62  ;;  %v19673_v44 = vsub.f32 %v19365_v55, %v26122_v59  ;;  %v12604_v62 = vpack.c.bf16 %v18935_v21, %v18926_v15  ;;  %v19699_v22 = vld [vmem:[%s23438_s0 + $0xbe0] sm:$0xff] }
 0x2f7   :  { %v19666_v19 = vpack.c.bf16 %v26120_v23, %v26119_v14  ;;  %v19682_v14 = vld [vmem:[%s23438_s0 + $0xbe8] sm:$0xff]  ;;  %v26123_v55 = vand.u32 4294901760, %v19372_v0  ;;  %v12606_v59 = vpack.c.bf16 %v18947_v24, %v18942_v3  ;;  %v19704_v17 = vld [vmem:[%s23438_s0 + $0xc20] sm:$0xff]  ;;  %v26128_v27 = vand.u32 4294901760, %v19608_v2 }
 0x2f8   :  { %26117 = vst [vmem:[#allocation30_spill] sm:$0xff] %v19652_v9  ;;  %v19687_v23 = vld [vmem:[%s23438_s0 + $0xc28] sm:$0xff]  ;;  %13369 = vmatpush1.bf16.msra.mxu0 %v19652_v9  ;;  %v26129_v9 = vand.u32 4294901760, %v19613_v40  ;;  %12605 = vmatpush1.bf16.msra.mxu1 %v12604_v62  ;;  %v12608_v21 = vpack.c.bf16 %v18975_v53, %v18970_v31  ;;  %v26131_v41 = vand.u32 4294901760, %v19635_v13  ;;  %v26132_v3 = vand.u32 4294901760, %v19640_v38 }
 0x2f9   :  { %26121 = vst [vmem:[#allocation98_spill] sm:$0xff] %v19666_v19  ;;  %v19692_v7 = vsub.f32 %v19372_v0, %v26123_v55  ;;  %v26126_v0 = vand.u32 4294901760, %v19586_v46  ;;  %v412_v24 = vld [vmem:[%s23438_s0 + $0xc68] sm:$0xf]  ;;  %13371 = vmatprep.subr.bf16.mxu0 %v19666_v19  ;;  %12607 = vmatprep.subr.bf16.mxu1 %v12606_v59  ;;  %v26134_v62 = vand.u32 4294901760, %v19382_v34  ;;  %v26136_v59 = vand.u32 4294901760, %v19403_v45 }
 0x2fa   :  { %v19726_v15 = vpack.c.bf16 %v26129_v9, %v26128_v27  ;;  %v19737_v19 = vpack.c.bf16 %v26132_v3, %v26131_v41  ;;  %v12610_v27 = vpack.c.bf16 %v19011_v6, %v18998_v42  ;;  %v411_v41 = vld [vmem:[%s23438_s0 + $0xc60] sm:$0xf]  ;;  %v26140_v42 = vand.u32 4294901760, %v19687_v23 }
 0x2fb   :  { %26124 = vst [vmem:[#allocation105_spill] sm:$0xff] %v19692_v7  ;;  %v19713_v55 = vpack.c.bf16 %v26126_v0, %v26125_v43  ;;  %v19744_v7 = vsel %vm419_vm0, %v412_v24, 0  ;;  %v7131_v0 = vsub.f32 %v19382_v34, %v26134_v62  ;;  %v26135_v43 = vand.u32 4294901760, %v19389_v30 }
 0x2fc   :  { %26130 = vst [vmem:[#allocation112_spill] sm:$0xff] %v19726_v15  ;;  %26133 = vst [vmem:[#allocation116_spill] sm:$0xff] %v19737_v19  ;;  %v7137_v9 = vsub.f32 %v19403_v45, %v26136_v59  ;;  %v26137_v24 = vand.u32 4294901760, %v19427_v49  ;;  %v26138_v62 = vand.u32 4294901760, %v19432_v29  ;;  %v26142_v59 = vand.u32 4294901760, %v19437_v39  ;;  %12609 = vmatpush1.bf16.msra.mxu1 %v12608_v21 }
 0x2fd   :  { %26127 = vst [vmem:[#allocation107_spill] sm:$0xff] %v19713_v55  ;;  %v7143_v3 = vsub.f32 %v19389_v30, %v26135_v43  ;;  %13373 = vmatpush1.bf16.msra.mxu0 %v19713_v55  ;;  %v26139_v55 = vand.u32 4294901760, %v19682_v14  ;;  %12611 = vmatprep.subr.bf16.mxu1 %v12610_v27 }
 0x2fe   :  { %v7149_v40 = vsub.f32 %v19427_v49, %v26137_v24  ;;  %v7155_v6 = vsub.f32 %v19432_v29, %v26138_v62  ;;  %13375 = vmatprep.subr.bf16.mxu0 %v19726_v15  ;;  %v7167_v31 = vsub.f32 %v19437_v39, %v26142_v59  ;;  %v26143_v62 = vand.u32 4294901760, %v19377_v32 }
 0x2ff   :  { %v19771_v53 = vpack.c.bf16 %v26140_v42, %v26139_v55  ;;  %v12612_v15 = vpack.c.bf16 %v19040_v10, %v19026_v20  ;;  %v26144_v42 = vand.u32 4294901760, %v19699_v22  ;;  %v26145_v55 = vand.u32 4294901760, %v19704_v17 }
 0x300   :  { %v19781_v43 = vsub.f32 %v19377_v32, %v26143_v62  ;;  %v19793_v49 = vand.u32 4294901760, %v19744_v7  ;;  %v19796_v24 = vsel %vm419_vm0, %v411_v41, 0  ;;  %v7132_v32 = vand.u32 4294901760, %v7131_v0 }
 0x301   :  { %26141 = vst [vmem:[#allocation122_spill] sm:$0xff] %v19771_v53  ;;  %v19789_v29 = vpack.c.bf16 %v26145_v55, %v26144_v42  ;;  %v7144_v21 = vand.u32 4294901760, %v7143_v3  ;;  %13377 = vmatpush1.bf16.msra.mxu0 %v19737_v19  ;;  %v7138_v62 = vand.u32 4294901760, %v7137_v9  ;;  %v7150_v10 = vand.u32 4294901760, %v7149_v40  ;;  %12613 = vmatpush1.bf16.msra.mxu1 %v12612_v15  ;;  %v26157_v19 = vld [vmem:[#allocation15_spill] sm:$0xff]  ;;  %v26160_v15 = vld [vmem:[#allocation18_spill] sm:$0xff] }
 0x302   :  { %26147 = vst [vmem:[#allocation74_spill] sm:$0xff] %v19793_v49  ;;  %v7156_v20 = vand.u32 4294901760, %v7155_v6  ;;  %v26148_v39 = vand.u32 4294901760, %v19454_v33  ;;  %13379 = vmatprep.subr.bf16.mxu0 %v19771_v53  ;;  %v7168_v27 = vand.u32 4294901760, %v7167_v31  ;;  %v26149_v55 = vand.u32 4294901760, %v19459_v48  ;;  %4305 = vmatprep.subr.mxu1 %v26157_v19 }
 0x303   :  { %26146 = vst [vmem:[#allocation124_spill] sm:$0xff] %v19789_v29  ;;  %v26150_v41 = vand.u32 4294901760, %v19464_v54  ;;  %v26151_v40 = vand.u32 4294901760, %v19417_v11  ;;  %v26153_v31 = vand.u32 4294901760, %v19471_v36  ;;  %v13384_v53 = vpack.c.bf16 %v7150_v10, %v7138_v62  ;;  %v26167_v10 = vld [vmem:[#allocation6_spill] sm:$0xff] }
 0x304   :  { %v7161_v42 = vsub.f32 %v19454_v33, %v26148_v39  ;;  %v7173_v59 = vsub.f32 %v19459_v48, %v26149_v55  ;;  %v26152_v39 = vand.u32 4294901760, %v19422_v26 }
 0x305   :  { %v7179_v0 = vsub.f32 %v19464_v54, %v26150_v41  ;;  %v19813_v6 = vsub.f32 %v19417_v11, %v26151_v40  ;;  %v7191_v55 = vsub.f32 %v19471_v36, %v26153_v31  ;;  %v26154_v41 = vand.u32 4294901760, %v19444_v58  ;;  %13381 = vmatpush1.bf16.msra.mxu0 %v19789_v29  ;;  %4308 = vmatpush1.msra.mxu1 %v26160_v15  ;;  %v26171_v15 = vld [vmem:[#allocation67_spill] sm:$0xff] }
 0x306   :  { %v19818_v9 = vsub.f32 %v19422_v26, %v26152_v39  ;;  %v26155_v11 = vand.u32 4294901760, %v19449_v12  ;;  %v19839_v39 = vand.u32 4294901760, %v19796_v24  ;;  %v13382_v31 = vpack.c.bf16 %v7144_v21, %v7132_v32  ;;  %7099 = vmatprep.subr.mxu0 %v19793_v49  ;;  %v26162_v21 = vld [vmem:[#allocation66_spill] sm:$0xff]  ;;  %v26168_v32 = vld [vmem:[#allocation63_spill] sm:$0xff] }
 0x307   :  { %v19827_v3 = vsub.f32 %v19444_v58, %v26154_v41  ;;  %v7162_v58 = vand.u32 4294901760, %v7161_v42  ;;  %v13386_v41 = vpack.c.bf16 %v7168_v27, %v7156_v20  ;;  %v7174_v36 = vand.u32 4294901760, %v7173_v59  ;;  %12615 = vmatprep.subr.bf16.mxu1 %v26162_v21 }
 0x308   :  { %v19832_v40 = vsub.f32 %v19449_v12, %v26155_v11  ;;  %26158 = vst [vmem:[#allocation131_spill] sm:$0xff] %v19839_v39  ;;  %v7180_v12 = vand.u32 4294901760, %v7179_v0  ;;  %v26159_v11 = vand.u32 4294901760, %v19485_v60  ;;  %v7192_v26 = vand.u32 4294901760, %v7191_v55 }
 0x309   :  { %v26161_v29 = vand.u32 4294901760, %v19509_v37  ;;  %v26163_v20 = vmov 5.605165e-06   ;;  %v26164_v59 = vand.u32 4294901760, %v19514_v28  ;;  %v26165_v42 = vand.u32 4294901760, %v19519_v5  ;;  %7101 = vmatpush1.msra.mxu0 %v19839_v39 }
 0x30a   :  { %26156 = vst [vmem:[#allocation129_spill] sm:$0xff] %v19832_v40  ;;  %v7185_v19 = vsub.f32 %v19485_v60, %v26159_v11  ;;  %4326 = vmatmul.mubr.f32.vlgmr.msra.gmra.mrb[4].mxu1 %v26163_v20  ;;  %v26166_v55 = vand.u32 4294901760, %v19499_v51  ;;  %13383 = vmatprep.subr.bf16.mxu0 %v13382_v31  ;;  %v13390_v20 = vpack.c.bf16 %v7192_v26, %v7180_v12  ;;  %v26179_v12 = vand.u32 4294901760, %v26168_v32 }
 0x30b   :  { %v7197_v54 = vsub.f32 %v19509_v37, %v26161_v29  ;;  %v7203_v62 = vsub.f32 %v19514_v28, %v26164_v59  ;;  %v7215_v27 = vsub.f32 %v19519_v5, %v26165_v42  ;;  %12617 = vmatpush1.bf16.msra.mxu1 %v26167_v10  ;;  %v26169_v42 = vand.u32 4294901760, %v19504_v47  ;;  %v26172_v10 = vld [vmem:[#allocation7_spill] sm:$0xff]  ;;  %v26182_v5 = vld [vmem:[#allocation80_spill] sm:$0xff] }
 0x30c   :  { %v19864_v11 = vsub.f32 %v19499_v51, %v26166_v55  ;;  %v26170_v29 = vmov 2.3283064e-09   ;;  %v13388_v51 = vpack.c.bf16 %v7174_v36, %v7162_v58  ;;  %v7186_v55 = vand.u32 4294901760, %v7185_v19  ;;  %12619 = vmatprep.subr.bf16.mxu1 %v26172_v10  ;;  %v26178_v58 = vld [vmem:[#allocation79_spill] sm:$0xff]  ;;  %v26187_v10 = vld [vmem:[#allocation73_spill] sm:$0xff] }
 0x30d   :  { %v19874_v0 = vsub.f32 %v19504_v47, %v26169_v42  ;;  %7122 = vmatmul.mubr.f32.vlgmr.msra.gmra.mrb[6].mxu0 %v26170_v29  ;;  %v7198_v28 = vand.u32 4294901760, %v7197_v54  ;;  %v26173_v59 = vand.u32 4294901760, %v19536_v61  ;;  %v26174_v37 = vand.u32 4294901760, %v19541_v35  ;;  %v26177_v54 = vld [vmem:[#allocation86_spill] sm:$0xff] }
 0x30e   :  { %13385 = vmatpush1.bf16.msra.mxu0 %v13384_v53  ;;  %v7204_v31 = vand.u32 4294901760, %v7203_v62  ;;  %v7216_v42 = vand.u32 4294901760, %v7215_v27  ;;  %v26175_v36 = vand.u32 4294901760, %v19546_v56  ;;  %v26176_v53 = vand.u32 4294901760, %v19553_v4  ;;  %4449 = vmatprep.mubr.f32.mxu1 %v26177_v54  ;;  %v26185_v54 = vld [vmem:[#allocation130_spill] sm:$0xff] }
 0x30f   :  { %v7209_v21 = vsub.f32 %v19536_v61, %v26173_v59  ;;  %v7221_v47 = vsub.f32 %v19541_v35, %v26174_v37  ;;  %13387 = vmatprep.subr.bf16.mxu0 %v13386_v41  ;;  %12621 = vmatpush1.bf16.msra.mxu1 %v26178_v58  ;;  %v7233_v59 = vsub.f32 %v26168_v32, %v26179_v12  ;;  %v26180_v37 = vand.u32 4294901760, %v19591_v16 }
 0x310   :  { %v7227_v19 = vsub.f32 %v19546_v56, %v26175_v36  ;;  %v7239_v26 = vsub.f32 %v19553_v4, %v26176_v53  ;;  %v26181_v62 = vand.u32 4294901760, %v19596_v8  ;;  %7443 = vmatprep.mubr.f32.mxu0 %v26182_v5  ;;  %v26183_v53 = vand.u32 4294901760, %v19526_v52  ;;  %12623 = vmatprep.subr.bf16.mxu1 %v26185_v54 }
 0x311   :  { %v7245_v41 = vsub.f32 %v19591_v16, %v26180_v37  ;;  %v26186_v12 = vand.u32 4294901760, %v26171_v15  ;;  %v7210_v36 = vand.u32 4294901760, %v7209_v21  ;;  %v24260_v32 = vand.u32 4294901760, %v19645_v57 }
 0x312   :  { %v7251_v27 = vsub.f32 %v19596_v8, %v26181_v62  ;;  %v19907_v29 = vsub.f32 %v19526_v52, %v26183_v53  ;;  %13389 = vmatpush1.bf16.msra.mxu0 %v13388_v51  ;;  %v13392_v62 = vpack.c.bf16 %v7198_v28, %v7186_v55  ;;  %v7222_v8 = vand.u32 4294901760, %v7221_v47  ;;  %v26191_v51 = vld [vmem:[#allocation87_spill] sm:$0xff] }
 0x313   :  { %v7263_v58 = vsub.f32 %v26171_v15, %v26186_v12  ;;  %v26188_v4 = vand.u32 4294901760, %v19531_v63  ;;  %13391 = vmatprep.subr.bf16.mxu0 %v13390_v20  ;;  %v13394_v53 = vpack.c.bf16 %v7216_v42, %v7204_v31  ;;  %v7228_v54 = vand.u32 4294901760, %v7227_v19  ;;  %v26189_v12 = vld [vmem:[#allocation75_spill] sm:$0xff] }
 0x314   :  { %26184 = vst [vmem:[#allocation132_spill] sm:$0xff] %v19907_v29  ;;  %v7240_v56 = vand.u32 4294901760, %v7239_v26  ;;  %12625 = vmatpush1.bf16.msra.mxu1 %v26189_v12  ;;  %v7234_v37 = vand.u32 4294901760, %v7233_v59  ;;  %v7246_v15 = vand.u32 4294901760, %v7245_v41  ;;  %v7252_v16 = vand.u32 4294901760, %v7251_v27  ;;  %v26203_v59 = vld [vmem:[#allocation89_spill] sm:$0xff] }
 0x315   :  { %v19919_v52 = vsub.f32 %v19531_v63, %v26188_v4  ;;  %v26190_v28 = vand.u32 4294901760, %v19618_v1  ;;  %12627 = vmatprep.subr.bf16.mxu1 %v26191_v51  ;;  %v7264_v55 = vand.u32 4294901760, %v7263_v58  ;;  %v26192_v47 = vand.u32 4294901760, %v19623_v25 }
 0x316   :  { %v26193_v63 = vand.u32 4294901760, %v26187_v10  ;;  %v24261_v31 = vand.u32 4294901760, %v19659_v18  ;;  %v26194_v42 = vand.u32 4294901760, %v19581_v50  ;;  %13393 = vmatpush1.bf16.msra.mxu0 %v13392_v62  ;;  %v13396_v26 = vpack.c.bf16 %v7222_v8, %v7210_v36  ;;  %v26200_v36 = vld [vmem:[#allocation70_spill] sm:$0xff] }
 0x317   :  { %v7257_v21 = vsub.f32 %v19618_v1, %v26190_v28  ;;  %v7269_v4 = vsub.f32 %v19623_v25, %v26192_v47  ;;  %v7287_v58 = vsub.f32 %v19645_v57, %v24260_v32  ;;  %v26195_v41 = vand.u32 4294901760, %v19586_v46  ;;  %13395 = vmatprep.subr.bf16.mxu0 %v13394_v53  ;;  %v26197_v47 = vld [vmem:[#allocation105_spill] sm:$0xff] }
 0x318   :  { %v7275_v20 = vsub.f32 %v26187_v10, %v26193_v63  ;;  %v19936_v19 = vsub.f32 %v19581_v50, %v26194_v42  ;;  %v13398_v28 = vpack.c.bf16 %v7240_v56, %v7228_v54  ;;  %v26198_v62 = vand.u32 4294901760, %v19608_v2  ;;  %12629 = vmatpush1.bf16.msra.mxu1 %v26203_v59  ;;  %v26204_v53 = vld [vmem:[#allocation5_spill] sm:$0xff] }
 0x319   :  { %v19945_v27 = vsub.f32 %v19586_v46, %v26195_v41  ;;  %v26201_v42 = vand.u32 4294901760, %v26200_v36  ;;  %v13400_v46 = vpack.c.bf16 %v7246_v15, %v7234_v37  ;;  %v7258_v41 = vand.u32 4294901760, %v7257_v21  ;;  %12631 = vmatprep.subr.bf16.mxu1 %v26204_v53  ;;  %v26213_v15 = vld [vmem:[#allocation11_spill] sm:$0xff] }
 0x31a   :  { %v19952_v8 = vsub.f32 %v19608_v2, %v26198_v62  ;;  %v13402_v56 = vpack.c.bf16 %v7264_v55, %v7252_v16  ;;  %v7270_v54 = vand.u32 4294901760, %v7269_v4  ;;  %v7276_v63 = vand.u32 4294901760, %v7275_v20  ;;  %13397 = vmatpush1.bf16.msra.mxu0 %v13396_v26 }
 0x31b   :  { %26196 = vst [vmem:[#allocation134_spill] sm:$0xff] %v19945_v27  ;;  %v19957_v32 = vsub.f32 %v26200_v36, %v26201_v42  ;;  %v7281_v50 = vsub.f32 %v19659_v18, %v24261_v31  ;;  %v7288_v2 = vand.u32 4294901760, %v7287_v58  ;;  %v26205_v62 = vand.u32 4294901760, %v19673_v44  ;;  %13399 = vmatprep.subr.bf16.mxu0 %v13398_v28  ;;  %v26212_v31 = vld [vmem:[#allocation9_spill] sm:$0xff] }
 0x31c   :  { %26199 = vst [vmem:[#allocation73_spill] sm:$0xff] %v19952_v8  ;;  %v26206_v37 = vand.u32 4294901760, %v26197_v47  ;;  %v26207_v21 = vand.u32 4294901760, %v19781_v43  ;;  %v26208_v26 = vand.u32 4294901760, %v19635_v13  ;;  %12633 = vmatpush1.bf16.msra.mxu1 %v26212_v31  ;;  %v13404_v4 = vpack.c.bf16 %v7270_v54, %v7258_v41 }
 0x31d   :  { %26202 = vst [vmem:[#allocation105_spill] sm:$0xff] %v19957_v32  ;;  %v7293_v36 = vsub.f32 %v19673_v44, %v26205_v62  ;;  %v26210_v62 = vand.u32 4294901760, %v19640_v38  ;;  %12635 = vmatprep.subr.bf16.mxu1 %v26213_v15  ;;  %v7282_v20 = vand.u32 4294901760, %v7281_v50  ;;  %v24262_v42 = vand.u32 4294901760, %v19907_v29 }
 0x31e   :  { %v7299_v16 = vsub.f32 %v26197_v47, %v26206_v37  ;;  %v7311_v55 = vsub.f32 %v19781_v43, %v26207_v21  ;;  %v19980_v58 = vsub.f32 %v19635_v13, %v26208_v26  ;;  %13401 = vmatpush1.bf16.msra.mxu0 %v13400_v46  ;;  %v13406_v26 = vpack.c.bf16 %v7288_v2, %v7276_v63  ;;  %v26225_v13 = vld [vmem:[#allocation32_spill] sm:$0xff] }
 0x31f   :  { %v19985_v28 = vsub.f32 %v19640_v38, %v26210_v62  ;;  %v7294_v53 = vand.u32 4294901760, %v7293_v36  ;;  %v26214_v38 = vand.u32 4294901760, %v19813_v6  ;;  %v26215_v31 = vand.u32 4294901760, %v19818_v9  ;;  %13403 = vmatprep.subr.bf16.mxu0 %v13402_v56  ;;  %v26220_v36 = vld [vmem:[#allocation36_spill] sm:$0xff] }
 0x320   :  { %26209 = vst [vmem:[#allocation70_spill] sm:$0xff] %v19980_v58  ;;  %v7300_v21 = vand.u32 4294901760, %v7299_v16  ;;  %v7312_v15 = vand.u32 4294901760, %v7311_v55  ;;  %v26216_v50 = vand.u32 4294901760, %v19827_v3  ;;  %v26217_v54 = vand.u32 4294901760, %v19832_v40  ;;  %12637 = vmatpush1.bf16.msra.mxu1 %v26220_v36 }
 0x321   :  { %26211 = vst [vmem:[#allocation141_spill] sm:$0xff] %v19985_v28  ;;  %v7305_v62 = vsub.f32 %v19813_v6, %v26214_v38  ;;  %v7317_v37 = vsub.f32 %v19818_v9, %v26215_v31  ;;  %v26218_v46 = vand.u32 4294901760, %v19682_v14  ;;  %v26221_v31 = vand.u32 4294901760, %v19864_v11  ;;  %12639 = vmatprep.subr.bf16.mxu1 %v26225_v13 }
 0x322   :  { %v7323_v41 = vsub.f32 %v19827_v3, %v26216_v50  ;;  %v7335_v63 = vsub.f32 %v19832_v40, %v26217_v54  ;;  %v26222_v16 = vand.u32 4294901760, %v19874_v0  ;;  %v26223_v50 = vand.u32 4294901760, %v19687_v23  ;;  %13405 = vmatpush1.bf16.msra.mxu0 %v13404_v4 }
 0x323   :  { %v20008_v2 = vsub.f32 %v19682_v14, %v26218_v46  ;;  %v7329_v56 = vsub.f32 %v19864_v11, %v26221_v31  ;;  %v7347_v14 = vsub.f32 %v19907_v29, %v24262_v42  ;;  %v26226_v46 = vand.u32 4294901760, %v19919_v52  ;;  %13407 = vmatprep.subr.bf16.mxu0 %v13406_v26 }
 0x324   :  { %v7341_v55 = vsub.f32 %v19874_v0, %v26222_v16  ;;  %v20021_v54 = vsub.f32 %v19687_v23, %v26223_v50  ;;  %v13408_v16 = vpack.c.bf16 %v7294_v53, %v7282_v20  ;;  %v7306_v38 = vand.u32 4294901760, %v7305_v62 }
 0x325   :  { %26219 = vst [vmem:[#allocation142_spill] sm:$0xff] %v20008_v2  ;;  %v7359_v31 = vsub.f32 %v19919_v52, %v26226_v46  ;;  %v7318_v59 = vand.u32 4294901760, %v7317_v37  ;;  %v24265_v51 = vand.u32 4294901760, %v19952_v8  ;;  %v13410_v23 = vpack.c.bf16 %v7312_v15, %v7300_v21  ;;  %v26229_v46 = vld [vmem:[#allocation53_spill] sm:$0xff]  ;;  %v26231_v37 = vld [vmem:[#allocation59_spill] sm:$0xff] }
 0x326   :  { %26224 = vst [vmem:[#allocation143_spill] sm:$0xff] %v20021_v54  ;;  %v7324_v50 = vand.u32 4294901760, %v7323_v41  ;;  %v7336_v13 = vand.u32 4294901760, %v7335_v63  ;;  %v24266_v12 = vand.u32 4294901760, %v19957_v32  ;;  %v26227_v42 = vand.u32 4294901760, %v19699_v22  ;;  %12641 = vmatpush1.bf16.msra.mxu1 %v26229_v46  ;;  %13409 = vmatpush1.bf16.msra.mxu0 %v13408_v16 }
 0x327   :  { %v7330_v36 = vand.u32 4294901760, %v7329_v56  ;;  %v7342_v4 = vand.u32 4294901760, %v7341_v55  ;;  %v26230_v53 = vand.u32 4294901760, %v19936_v19  ;;  %12643 = vmatprep.subr.bf16.mxu1 %v26231_v37  ;;  %v7348_v15 = vand.u32 4294901760, %v7347_v14  ;;  %13411 = vmatprep.subr.bf16.mxu0 %v13410_v23 }
 0x328   :  { %v20036_v29 = vsub.f32 %v19699_v22, %v26227_v42  ;;  %v7360_v21 = vand.u32 4294901760, %v7359_v31  ;;  %v26232_v26 = vand.u32 4294901760, %v19945_v27  ;;  %v24269_v41 = vand.u32 4294901760, %v19980_v58 }
 0x329   :  { %v7353_v20 = vsub.f32 %v19936_v19, %v26230_v53  ;;  %v26233_v22 = vand.u32 4294901760, %v19704_v17  ;;  %v13412_v63 = vpack.c.bf16 %v7318_v59, %v7306_v38  ;;  %v7371_v56 = vsub.f32 %v19952_v8, %v24265_v51  ;;  %v26236_v59 = vld [vmem:[#allocation76_spill] sm:$0xff] }
 0x32a   :  { %26228 = vst [vmem:[#allocation144_spill] sm:$0xff] %v20036_v29  ;;  %v7365_v62 = vsub.f32 %v19945_v27, %v26232_v26  ;;  %v24268_v55 = vand.u32 4294901760, %v19985_v28  ;;  %v13414_v14 = vpack.c.bf16 %v7336_v13, %v7324_v50  ;;  %v7383_v31 = vsub.f32 %v19957_v32, %v24266_v12 }
 0x32b   :  { %v20050_v42 = vsub.f32 %v19704_v17, %v26233_v22  ;;  %v24267_v53 = vand.u32 4294901760, %v20008_v2  ;;  %v26235_v17 = vld [vmem:[#allocation68_spill] sm:$0xff]  ;;  %v13416_v16 = vpack.c.bf16 %v7342_v4, %v7330_v36  ;;  %v13418_v38 = vpack.c.bf16 %v7360_v21, %v7348_v15  ;;  %13413 = vmatpush1.bf16.msra.mxu0 %v13412_v63 }
 0x32c   :  { %12645 = vmatpush1.bf16.msra.mxu1 %v26235_v17  ;;  %v7354_v22 = vand.u32 4294901760, %v7353_v20  ;;  %v7366_v51 = vand.u32 4294901760, %v7365_v62  ;;  %v7377_v13 = vsub.f32 %v19980_v58, %v24269_v41  ;;  %v7372_v23 = vand.u32 4294901760, %v7371_v56  ;;  %13415 = vmatprep.subr.bf16.mxu0 %v13414_v14  ;;  %v26239_v62 = vld [vmem:[#allocation24_spill] sm:$0xff] }
 0x32d   :  { %26234 = vst [vmem:[#allocation53_spill] sm:$0xff] %v20050_v42  ;;  %12647 = vmatprep.subr.bf16.mxu1 %v26236_v59  ;;  %v7389_v50 = vsub.f32 %v19985_v28, %v24268_v55  ;;  %v24274_v12 = vand.u32 4294901760, %v20036_v29  ;;  %v24276_v26 = vand.u32 4294901760, %v20050_v42  ;;  %v7384_v36 = vand.u32 4294901760, %v7383_v31  ;;  %v26241_v56 = vld [vmem:[#allocation28_spill] sm:$0xff] }
 0x32e   :  { %v7395_v4 = vsub.f32 %v20008_v2, %v24267_v53  ;;  %v26237_v20 = vand.u32 4294901760, %v20021_v54  ;;  %v20079_v21 = vsub.f32 %v19744_v7, %v19793_v49  ;;  %v20084_v63 = vsub.f32 %v19796_v24, %v19839_v39  ;;  %v26242_v39 = vld [vmem:[#allocation34_spill] sm:$0xff] }
 0x32f   :  { %v13420_v14 = vpack.c.bf16 %v7366_v51, %v7354_v22  ;;  %13417 = vmatpush1.bf16.msra.mxu0 %v13416_v16  ;;  %v7378_v31 = vand.u32 4294901760, %v7377_v13  ;;  %v7390_v53 = vand.u32 4294901760, %v7389_v50  ;;  %v7413_v7 = vsub.f32 %v20050_v42, %v24276_v26  ;;  %v26243_v51 = vld [vmem:[#allocation37_spill] sm:$0xff] }
 0x330   :  { %v7407_v15 = vsub.f32 %v20021_v54, %v26237_v20  ;;  %26238 = vst [vmem:[#allocation59_spill] sm:$0xff] %v20079_v21  ;;  %12649 = vmatpush1.bf16.msra.mxu1 %v26239_v62  ;;  %26240 = vst [vmem:[#allocation68_spill] sm:$0xff] %v20084_v63  ;;  %v7401_v20 = vsub.f32 %v20036_v29, %v24274_v12  ;;  %13419 = vmatprep.subr.bf16.mxu0 %v13418_v38  ;;  %v7396_v41 = vand.u32 4294901760, %v7395_v4  ;;  %v26252_v26 = vld [vmem:[#allocation17_spill] sm:$0xff] }
 0x331   :  { %12651 = vmatprep.subr.bf16.mxu1 %v26241_v56  ;;  %v13422_v55 = vpack.c.bf16 %v7384_v36, %v7372_v23  ;;  %v24275_v24 = vand.u32 4294901760, %v20079_v21  ;;  %v13424_v16 = vpack.c.bf16 %v7390_v53, %v7378_v31  ;;  %v7414_v13 = vand.u32 4294901760, %v7413_v7  ;;  %v26244_v23 = vld [vmem:[#allocation38_spill] sm:$0xff]  ;;  %v26245_v36 = vld [vmem:[#allocation40_spill] sm:$0xff] }
 0x332   :  { %v7408_v49 = vand.u32 4294901760, %v7407_v15  ;;  %v7402_v22 = vand.u32 4294901760, %v7401_v20  ;;  %v24277_v50 = vand.u32 4294901760, %v20084_v63  ;;  %v26250_v31 = vld [vmem:[#allocation14_spill] sm:$0xff] }
 0x333   :  { %13421 = vmatpush1.bf16.msra.mxu0 %v13420_v14  ;;  %v7419_v38 = vsub.f32 %v20079_v21, %v24275_v24  ;;  %v26246_v14 = vld [vmem:[#allocation42_spill] sm:$0xff]  ;;  %v26251_v20 = vand.u32 4294901760, %v26250_v31  ;;  %v26260_v31 = vld [vmem:[#allocation100_spill] sm:$0xff] }
 0x334   :  { %12653 = vmatpush1.bf16.msra.mxu1 %v26242_v39  ;;  %13423 = vmatprep.subr.bf16.mxu0 %v13422_v55  ;;  %v13426_v12 = vpack.c.bf16 %v7408_v49, %v7396_v41  ;;  %v13428_v4 = vpack.c.bf16 %v7414_v13, %v7402_v22  ;;  %v7425_v53 = vsub.f32 %v20084_v63, %v24277_v50  ;;  %v26247_v55 = vld [vmem:[#allocation43_spill] sm:$0xff]  ;;  %v26248_v49 = vld [vmem:[#allocation94_spill] sm:$0xff]  ;;  %v26257_v50 = vld [vmem:[#allocation133_spill] sm:$0xff] }
 0x335   :  { %12655 = vmatprep.subr.bf16.mxu1 %v26243_v51  ;;  %v7420_v15 = vand.u32 4294901760, %v7419_v38  ;;  %v26249_v41 = vand.u32 4294901760, %v26248_v49  ;;  %v26254_v22 = vld [vmem:[#allocation23_spill] sm:$0xff] }
 0x336   :  { %v7426_v24 = vand.u32 4294901760, %v7425_v53  ;;  %v26255_v13 = vand.u32 4294901760, %v26254_v22  ;;  %v26256_v38 = vld [vmem:[#allocation47_spill] sm:$0xff]  ;;  %v26262_v53 = vmov 5.6028366e-06  }
 0x337   :  { %13425 = vmatpush1.bf16.msra.mxu0 %v13424_v16  ;;  %v12662_v7 = vpack.c.bf16 %v26251_v20, %v26249_v41  ;;  %v26253_v16 = vand.u32 4294901760, %v26252_v26  ;;  %v26258_v49 = vld [vmem:[#allocation39_spill] sm:$0xff]  ;;  %v26261_v41 = vand.u32 4294901760, %v26260_v31  ;;  %v26263_v26 = vld [vmem:[#allocation118_spill] sm:$0xff]  ;;  %v26264_v20 = vld [vmem:[#allocation136_spill] sm:$0xff] }
 0x338   :  { %12657 = vmatpush1.bf16.msra.mxu1 %v26244_v23  ;;  %13427 = vmatprep.subr.bf16.mxu0 %v13426_v12  ;;  %v13430_v12 = vpack.c.bf16 %v19389_v30, %v19382_v34  ;;  %v26272_v31 = vld [vmem:[#allocation50_spill] sm:$0xff] }
 0x339   :  { %12659 = vmatprep.subr.bf16.mxu1 %v26245_v36  ;;  %v12664_v36 = vpack.c.bf16 %v26255_v13, %v26253_v16  ;;  %v13434_v16 = vpack.c.bf16 %v26264_v20, %v26263_v26  ;;  %v26267_v13 = vld [vmem:[#allocation44_spill] sm:$0xff] }
 0x33b   :  { %13429 = vmatpush1.bf16.msra.mxu0 %v13428_v4 }
 0x33c   :  { %12661 = vmatpush1.bf16.msra.mxu1 %v26246_v14  ;;  %7421 = vmatprep.subr.mxu0 %v7420_v15  ;;  %v26259_v14 = vand.u32 4294901760, %v26258_v49  ;;  %v26265_v15 = vld [vmem:[#allocation41_spill] sm:$0xff]  ;;  %v26270_v49 = vld [vmem:[#allocation48_spill] sm:$0xff] }
 0x33d   :  { %4429 = vmatprep.subr.mxu1 %v26247_v55  ;;  %v13432_v55 = vpack.c.bf16 %v26257_v50, %v19403_v45  ;;  %v26266_v22 = vand.u32 4294901760, %v26265_v15  ;;  %v26269_v50 = vmov 0.0050964355   ;;  %v26271_v45 = vand.u32 4294901760, %v26270_v49 }
 0x33e   :  { %v12666_v4 = vpack.c.bf16 %v26261_v41, %v26259_v14  ;;  %v26273_v14 = vand.u32 4294901760, %v26272_v31  ;;  %v13436_v41 = vpack.c.bf16 %v19459_v48, %v19454_v33  ;;  %v26294_v33 = vld [vmem:[#allocation110_spill] sm:$0xff] }
 0x33f   :  { %7427 = vmatpush1.msra.mxu0 %v7426_v24  ;;  %v26274_v24 = vld [vmem:[#allocation139_spill] sm:$0xff] }
 0x340   :  { %4431 = vmatpush1.msra.mxu1 %v26256_v38  ;;  %v26268_v38 = vand.u32 4294901760, %v26267_v13  ;;  %13431 = vmatprep.subr.bf16.mxu0 %v13430_v12  ;;  %v26276_v12 = vld [vmem:[#allocation49_spill] sm:$0xff] }
 0x341   :  { %12663 = vmatprep.subr.bf16.mxu1 %v12662_v7  ;;  %4450 = vmatmul.mubr.f32.vlgmr.msra.gmra.mrb[4].mxu1 %v26262_v53  ;;  %v12670_v7 = vpack.c.bf16 %v26273_v14, %v26271_v45  ;;  %v26280_v53 = vld [vmem:[#allocation82_spill] sm:$0xff]  ;;  %v26281_v45 = vld [vmem:[#allocation57_spill] sm:$0xff] }
 0x342   :  { %12665 = vmatpush1.bf16.msra.mxu1 %v12664_v36  ;;  %v12668_v30 = vpack.c.bf16 %v26268_v38, %v26266_v22  ;;  %7444 = vmatmul.mubr.f32.vlgmr.msra.gmra.mrb[6].mxu0 %v26269_v50  ;;  %v26275_v36 = vld [vmem:[#allocation140_spill] sm:$0xff]  ;;  %v26277_v38 = vand.u32 4294901760, %v26276_v12  ;;  %v26278_v22 = vld [vmem:[#allocation51_spill] sm:$0xff]  ;;  %v26288_v12 = vld [vmem:[#allocation106_spill] sm:$0xff] }
 0x343   :  { %13433 = vmatpush1.bf16.msra.mxu0 %v13432_v55  ;;  %12667 = vmatprep.subr.bf16.mxu1 %v12666_v4  ;;  %v13438_v15 = vpack.c.bf16 %v26275_v36, %v26274_v24  ;;  %v26279_v13 = vand.u32 4294901760, %v26278_v22  ;;  %v26282_v55 = vand.u32 4294901760, %v26281_v45  ;;  %v26283_v4 = vld [vmem:[#allocation62_spill] sm:$0xff]  ;;  %v26286_v24 = vld [vmem:[#allocation52_spill] sm:$0xff]  ;;  %v26289_v22 = vand.u32 4294901760, %v26288_v12 }
 0x344   :  { %13435 = vmatprep.subr.bf16.mxu0 %v13434_v16  ;;  %4671 = vmatprep.mubr.f32.mxu1 %v26182_v5  ;;  %v26284_v31 = vand.u32 4294901760, %v26283_v4  ;;  %v26285_v16 = vld [vmem:[#allocation20_spill] sm:$0xff]  ;;  %v26295_v4 = vand.u32 4294901760, %v26294_v33 }
 0x345   :  { %v12672_v49 = vpack.c.bf16 %v26279_v13, %v26277_v38  ;;  %7616 = vmatprep.mubr.f32.mxu0 %v26280_v53  ;;  %v13440_v36 = vpack.c.bf16 %v26285_v16, %v19485_v60  ;;  %v26290_v38 = vld [vmem:[#allocation12_spill] sm:$0xff] }
 0x346   :  { %12669 = vmatpush1.bf16.msra.mxu1 %v12668_v30  ;;  %v12674_v14 = vpack.c.bf16 %v26284_v31, %v26282_v55  ;;  %v26287_v30 = vld [vmem:[#allocation54_spill] sm:$0xff]  ;;  %v26291_v13 = vand.u32 4294901760, %v26290_v38  ;;  %v26299_v12 = vld [vmem:[#allocation60_spill] sm:$0xff]  ;;  %v26302_v38 = vld [vmem:[#allocation127_spill] sm:$0xff] }
 0x347   :  { %12671 = vmatprep.subr.bf16.mxu1 %v12670_v7  ;;  %13437 = vmatpush1.bf16.msra.mxu0 %v13436_v41  ;;  %v13442_v48 = vpack.c.bf16 %v26287_v30, %v26286_v24  ;;  %v26292_v7 = vld [vmem:[#allocation108_spill] sm:$0xff]  ;;  %v20162_v41 = vpop.f32.mrb[2].mxu1  ;;  %v26311_v24 = vld [vmem:[#allocation67_spill] sm:$0xff] }
 0x348   :  { %13439 = vmatprep.subr.bf16.mxu0 %v13438_v15  ;;  %v12676_v53 = vpack.c.bf16 %v26291_v13, %v26289_v22  ;;  %v26293_v45 = vand.u32 4294901760, %v26292_v7  ;;  %26296 = vst [vmem:[#allocation76_spill] sm:$0xff] %v20162_v41  ;;  %v13444_v15 = vpack.c.bf16 %v19541_v35, %v19536_v61  ;;  %v20166_v31 = vpop.f32.mrb[3].mxu1  ;;  %v26300_v22 = vld [vmem:[#allocation126_spill] sm:$0xff]  ;;  %v26303_v13 = vand.u32 4294901760, %v26302_v38  ;;  %v26304_v33 = vld [vmem:[#allocation72_spill] sm:$0xff] }
 0x349   :  { %26297 = vst [vmem:[#allocation24_spill] sm:$0xff] %v20166_v31  ;;  %v26308_v35 = vld [vmem:[#allocation63_spill] sm:$0xff] }
 0x34a   :  { %12673 = vmatpush1.bf16.msra.mxu1 %v12672_v49  ;;  %v12678_v55 = vpack.c.bf16 %v26295_v4, %v26293_v45  ;;  %v26298_v49 = vld [vmem:[#allocation58_spill] sm:$0xff]  ;;  %v26309_v61 = vld [vmem:[#allocation31_spill] sm:$0xff] }
 0x34b   :  { %12675 = vmatprep.subr.bf16.mxu1 %v12674_v14  ;;  %13441 = vmatpush1.bf16.msra.mxu0 %v13440_v36  ;;  %v13446_v30 = vpack.c.bf16 %v26299_v12, %v26298_v49  ;;  %v26301_v14 = vand.u32 4294901760, %v26300_v22  ;;  %v26305_v36 = vand.u32 4294901760, %v26304_v33  ;;  %v26306_v45 = vld [vmem:[#allocation78_spill] sm:$0xff]  ;;  %v13448_v31 = vpack.c.bf16 %v26309_v61, %v26308_v35  ;;  %v26318_v33 = vld [vmem:[#allocation16_spill] sm:$0xff] }
 0x34c   :  { %13443 = vmatprep.subr.bf16.mxu0 %v13442_v48  ;;  %v26307_v4 = vand.u32 4294901760, %v26306_v45  ;;  %v26310_v48 = vld [vmem:[#allocation65_spill] sm:$0xff]  ;;  %v26314_v49 = vld [vmem:[#allocation10_spill] sm:$0xff]  ;;  %v26319_v45 = vand.u32 4294901760, %v26318_v33 }
 0x34d   :  { %v12680_v7 = vpack.c.bf16 %v26303_v13, %v26301_v14  ;;  %v13450_v12 = vpack.c.bf16 %v26311_v24, %v26310_v48  ;;  %v26315_v38 = vand.u32 4294901760, %v26314_v49 }
 0x34e   :  { %12677 = vmatpush1.bf16.msra.mxu1 %v12676_v53  ;;  %v12682_v41 = vpack.c.bf16 %v26307_v4, %v26305_v36  ;;  %v26312_v53 = vld [vmem:[#allocation8_spill] sm:$0xff] }
 0x34f   :  { %12679 = vmatprep.subr.bf16.mxu1 %v12678_v55  ;;  %13445 = vmatpush1.bf16.msra.mxu0 %v13444_v15  ;;  %v26313_v22 = vand.u32 4294901760, %v26312_v53  ;;  %v26316_v55 = vld [vmem:[#allocation13_spill] sm:$0xff]  ;;  %v13452_v15 = vpack.c.bf16 %v19623_v25, %v19618_v1  ;;  %v26322_v53 = vld [vmem:[#allocation22_spill] sm:$0xff] }
 0x350   :  { %13447 = vmatprep.subr.bf16.mxu0 %v13446_v30  ;;  %v26317_v13 = vand.u32 4294901760, %v26316_v55  ;;  %v13454_v30 = vpack.c.bf16 %v19645_v57, %v26187_v10  ;;  %v26323_v49 = vand.u32 4294901760, %v26322_v53  ;;  %v26326_v55 = vld [vmem:[#allocation29_spill] sm:$0xff] }
 0x351   :  { %v12684_v14 = vpack.c.bf16 %v26315_v38, %v26313_v22  ;;  %v26327_v33 = vand.u32 4294901760, %v26326_v55 }
 0x352   :  { %12681 = vmatpush1.bf16.msra.mxu1 %v12680_v7  ;;  %v12686_v36 = vpack.c.bf16 %v26319_v45, %v26317_v13  ;;  %v26320_v7 = vld [vmem:[#allocation21_spill] sm:$0xff] }
 0x353   :  { %12683 = vmatprep.subr.bf16.mxu1 %v12682_v41  ;;  %13449 = vmatpush1.bf16.msra.mxu0 %v13448_v31  ;;  %v26321_v4 = vand.u32 4294901760, %v26320_v7  ;;  %v26324_v41 = vld [vmem:[#allocation27_spill] sm:$0xff]  ;;  %v13456_v31 = vpack.c.bf16 %v19673_v44, %v19659_v18  ;;  %v26330_v7 = vld [vmem:[#allocation33_spill] sm:$0xff] }
 0x354   :  { %13451 = vmatprep.subr.bf16.mxu0 %v13450_v12  ;;  %v26325_v38 = vand.u32 4294901760, %v26324_v41  ;;  %v13458_v12 = vpack.c.bf16 %v19781_v43, %v26197_v47  ;;  %v26331_v53 = vand.u32 4294901760, %v26330_v7  ;;  %v26334_v41 = vld [vmem:[#allocation45_spill] sm:$0xff] }
 0x355   :  { %v12688_v22 = vpack.c.bf16 %v26323_v49, %v26321_v4  ;;  %v26335_v55 = vand.u32 4294901760, %v26334_v41 }
 0x356   :  { %12685 = vmatpush1.bf16.msra.mxu1 %v12684_v14  ;;  %v12690_v13 = vpack.c.bf16 %v26327_v33, %v26325_v38  ;;  %v26328_v14 = vld [vmem:[#allocation135_spill] sm:$0xff] }
 0x357   :  { %12687 = vmatprep.subr.bf16.mxu1 %v12686_v36  ;;  %13453 = vmatpush1.bf16.msra.mxu0 %v13452_v15  ;;  %v26329_v45 = vand.u32 4294901760, %v26328_v14  ;;  %v26332_v36 = vld [vmem:[#allocation35_spill] sm:$0xff]  ;;  %v13460_v15 = vpack.c.bf16 %v19818_v9, %v19813_v6 }
 0x358   :  { %13455 = vmatprep.subr.bf16.mxu0 %v13454_v30  ;;  %v26333_v49 = vand.u32 4294901760, %v26332_v36  ;;  %v13462_v30 = vpack.c.bf16 %v19832_v40, %v19827_v3  ;;  %v26338_v14 = vld [vmem:[#allocation95_spill] sm:$0xff]  ;;  %v26342_v36 = vld [vmem:[#allocation109_spill] sm:$0xff] }
 0x359   :  { %v12692_v4 = vpack.c.bf16 %v26331_v53, %v26329_v45  ;;  %v26339_v7 = vand.u32 4294901760, %v26338_v14  ;;  %v26343_v41 = vand.u32 4294901760, %v26342_v36  ;;  %v26347_v40 = vld [vmem:[#allocation113_spill] sm:$0xff] }
 0x35a   :  { %12689 = vmatpush1.bf16.msra.mxu1 %v12688_v22  ;;  %v12694_v38 = vpack.c.bf16 %v26335_v55, %v26333_v49  ;;  %v26336_v22 = vld [vmem:[#allocation46_spill] sm:$0xff]  ;;  %v26348_v14 = vand.u32 4294901760, %v26347_v40 }
 0x35b   :  { %12691 = vmatprep.subr.bf16.mxu1 %v12690_v13  ;;  %13457 = vmatpush1.bf16.msra.mxu0 %v13456_v31  ;;  %v26337_v33 = vand.u32 4294901760, %v26336_v22  ;;  %v26340_v13 = vld [vmem:[#allocation97_spill] sm:$0xff]  ;;  %v13464_v31 = vpack.c.bf16 %v19874_v0, %v19864_v11 }
 0x35c   :  { %13459 = vmatprep.subr.bf16.mxu0 %v13458_v12  ;;  %v26341_v53 = vand.u32 4294901760, %v26340_v13  ;;  %v26344_v12 = vld [vmem:[#allocation132_spill] sm:$0xff]  ;;  %v26351_v13 = vld [vmem:[#allocation115_spill] sm:$0xff] }
 0x35d   :  { %v12696_v45 = vpack.c.bf16 %v26339_v7, %v26337_v33  ;;  %v13466_v55 = vpack.c.bf16 %v19919_v52, %v26344_v12  ;;  %v26352_v36 = vand.u32 4294901760, %v26351_v13 }
 0x35e   :  { %12693 = vmatpush1.bf16.msra.mxu1 %v12692_v4  ;;  %v12698_v49 = vpack.c.bf16 %v26343_v41, %v26341_v53  ;;  %v26345_v4 = vld [vmem:[#allocation111_spill] sm:$0xff] }
 0x35f   :  { %12695 = vmatprep.subr.bf16.mxu1 %v12694_v38  ;;  %13461 = vmatpush1.bf16.msra.mxu0 %v13460_v15  ;;  %v26346_v22 = vand.u32 4294901760, %v26345_v4  ;;  %v26349_v38 = vld [vmem:[#allocation114_spill] sm:$0xff]  ;;  %v13468_v15 = vpack.c.bf16 %v19945_v27, %v19936_v19  ;;  %v26355_v4 = vld [vmem:[#allocation119_spill] sm:$0xff] }
 0x360   :  { %13463 = vmatprep.subr.bf16.mxu0 %v13462_v30  ;;  %v26350_v7 = vand.u32 4294901760, %v26349_v38  ;;  %v13470_v30 = vpack.c.bf16 %v19957_v32, %v19952_v8  ;;  %v26356_v40 = vand.u32 4294901760, %v26355_v4  ;;  %v26359_v38 = vld [vmem:[#allocation123_spill] sm:$0xff]  ;;  %v26443_v8 = vld [vmem:[#allocation140_spill] sm:$0xff] }
 0x361   :  { %v12700_v33 = vpack.c.bf16 %v26348_v14, %v26346_v22  ;;  %v26360_v13 = vand.u32 4294901760, %v26359_v38  ;;  %v26371_v38 = vld [vmem:[#allocation19_spill] sm:$0xff] }
 0x362   :  { %12697 = vmatpush1.bf16.msra.mxu1 %v12696_v45  ;;  %v12702_v53 = vpack.c.bf16 %v26352_v36, %v26350_v7  ;;  %v26353_v45 = vld [vmem:[#allocation117_spill] sm:$0xff] }
 0x363   :  { %12699 = vmatprep.subr.bf16.mxu1 %v12698_v49  ;;  %13465 = vmatpush1.bf16.msra.mxu0 %v13464_v31  ;;  %v26354_v41 = vand.u32 4294901760, %v26353_v45  ;;  %v26357_v49 = vld [vmem:[#allocation121_spill] sm:$0xff]  ;;  %v13472_v31 = vpack.c.bf16 %v19985_v28, %v19980_v58  ;;  %v20381_v58 = vld [vmem:[%s23438_s0 + $0x7d8] sm:$0xff] }
 0x364   :  { %13467 = vmatprep.subr.bf16.mxu0 %v13466_v55  ;;  %v26358_v14 = vand.u32 4294901760, %v26357_v49  ;;  %v13474_v55 = vpack.c.bf16 %v20021_v54, %v20008_v2  ;;  %v26363_v45 = vld [vmem:[#allocation77_spill] sm:$0xff]  ;;  %v26369_v49 = vld [vmem:[#allocation66_spill] sm:$0xff] }
 0x365   :  { %v12704_v22 = vpack.c.bf16 %v26356_v40, %v26354_v41  ;;  %v26364_v4 = vand.u32 4294901760, %v26363_v45  ;;  %v26378_v45 = vld [vmem:[#allocation130_spill] sm:$0xff] }
 0x366   :  { %12701 = vmatpush1.bf16.msra.mxu1 %v12700_v33  ;;  %v12706_v7 = vpack.c.bf16 %v26360_v13, %v26358_v14  ;;  %v26361_v33 = vld [vmem:[#allocation125_spill] sm:$0xff]  ;;  %v26370_v14 = vld [vmem:[#allocation6_spill] sm:$0xff]  ;;  %v26372_v13 = vmov 5.605165e-06  }
 0x367   :  { %12703 = vmatprep.subr.bf16.mxu1 %v12702_v53  ;;  %13469 = vmatpush1.bf16.msra.mxu0 %v13468_v15  ;;  %v26362_v36 = vand.u32 4294901760, %v26361_v33  ;;  %v13476_v53 = vpack.c.bf16 %v20050_v42, %v20036_v29  ;;  %v26365_v15 = vld [vmem:[#allocation15_spill] sm:$0xff] }
 0x368   :  { %13471 = vmatprep.subr.bf16.mxu0 %v13470_v30  ;;  %v26366_v40 = vand.u32 4294901760, %v26365_v15  ;;  %v26367_v30 = vld [vmem:[#allocation18_spill] sm:$0xff]  ;;  %v26376_v33 = vld [vmem:[#allocation79_spill] sm:$0xff] }
 0x369   :  { %v12708_v41 = vpack.c.bf16 %v26364_v4, %v26362_v36  ;;  %v26377_v36 = vld [vmem:[#allocation86_spill] sm:$0xff]  ;;  %v26379_v4 = vld [vmem:[#allocation71_spill] sm:$0xff] }
 0x36a   :  { %12705 = vmatpush1.bf16.msra.mxu1 %v12704_v22  ;;  %v26368_v22 = vand.u32 4294901760, %v26367_v30  ;;  %v26382_v15 = vld [vmem:[#allocation87_spill] sm:$0xff]  ;;  %v26384_v30 = vld [vmem:[#allocation88_spill] sm:$0xff] }
 0x36b   :  { %12707 = vmatprep.subr.bf16.mxu1 %v12706_v7  ;;  %13473 = vmatpush1.bf16.msra.mxu0 %v13472_v31  ;;  %v26373_v7 = vld [vmem:[#allocation69_spill] sm:$0xff]  ;;  %v26374_v31 = vld [vmem:[#allocation7_spill] sm:$0xff] }
 0x36c   :  { %13475 = vmatprep.subr.bf16.mxu0 %v13474_v55  ;;  %v26375_v55 = vld [vmem:[#allocation25_spill] sm:$0xff]  ;;  %v26417_v29 = vld [vmem:[#allocation47_spill] sm:$0xff] }
 0x36e   :  { %12709 = vmatpush1.bf16.msra.mxu1 %v12708_v41  ;;  %v26380_v41 = vld [vmem:[#allocation81_spill] sm:$0xff] }
 0x36f   :  { %4651 = vmatprep.subr.mxu1 %v26366_v40  ;;  %13477 = vmatpush1.bf16.msra.mxu0 %v13476_v53  ;;  %v26381_v53 = vld [vmem:[#allocation75_spill] sm:$0xff]  ;;  %v26383_v40 = vld [vmem:[#allocation84_spill] sm:$0xff] }
 0x370   :  { %7596 = vmatprep.subr.mxu0 %v20079_v21 }
 0x372   :  { %4655 = vmatpush1.msra.mxu1 %v26368_v22  ;;  %v26385_v22 = vld [vmem:[#allocation89_spill] sm:$0xff] }
 0x373   :  { %12711 = vmatprep.subr.bf16.mxu1 %v26369_v49  ;;  %4672 = vmatmul.mubr.f32.vlgmr.msra.gmra.mrb[4].mxu1 %v26269_v50  ;;  %v26386_v49 = vld [vmem:[#allocation5_spill] sm:$0xff] }
 0x374   :  { %7599 = vmatpush1.msra.mxu0 %v20084_v63  ;;  %12713 = vmatpush1.bf16.msra.mxu1 %v26370_v14  ;;  %v26387_v14 = vld [vmem:[#allocation91_spill] sm:$0xff] }
 0x375   :  { %13479 = vmatprep.subr.bf16.mxu0 %v26371_v38  ;;  %7617 = vmatmul.mubr.f32.vlgmr.msra.gmra.mrb[6].mxu0 %v26372_v13  ;;  %v26394_v13 = vld [vmem:[#allocation32_spill] sm:$0xff] }
 0x376   :  { %13481 = vmatpush1.bf16.msra.mxu0 %v26373_v7  ;;  %12715 = vmatprep.subr.bf16.mxu1 %v26374_v31  ;;  %v26388_v31 = vld [vmem:[#allocation92_spill] sm:$0xff]  ;;  %v26415_v7 = vld [vmem:[#allocation101_spill] sm:$0xff] }
 0x377   :  { %13483 = vmatprep.subr.bf16.mxu0 %v26375_v55  ;;  %4793 = vmatprep.mubr.f32.mxu1 %v26182_v5  ;;  %v26414_v55 = vand.u32 4294901760, %v19382_v34  ;;  %v26416_v38 = vand.u32 4294901760, %v26415_v7  ;;  %v26420_v34 = vld [vmem:[#allocation103_spill] sm:$0xff] }
 0x378   :  { %12717 = vmatpush1.bf16.msra.mxu1 %v26376_v33  ;;  %7740 = vmatprep.mubr.f32.mxu0 %v26377_v36  ;;  %v26389_v33 = vld [vmem:[#allocation9_spill] sm:$0xff]  ;;  %v26391_v36 = vld [vmem:[#allocation96_spill] sm:$0xff]  ;;  %v26421_v7 = vand.u32 4294901760, %v26420_v34 }
 0x379   :  { %12719 = vmatprep.subr.bf16.mxu1 %v26378_v45  ;;  %v26390_v45 = vld [vmem:[#allocation11_spill] sm:$0xff]  ;;  %v13526_v63 = vpack.c.bf16 %v26416_v38, %v26414_v55  ;;  %v26422_v38 = vld [vmem:[#allocation133_spill] sm:$0xff] }
 0x37a   :  { %13485 = vmatpush1.bf16.msra.mxu0 %v26379_v4  ;;  %v26413_v4 = vld [vmem:[#allocation74_spill] sm:$0xff]  ;;  %v26423_v55 = vand.u32 4294901760, %v26422_v38 }
 0x37b   :  { %13487 = vmatprep.subr.bf16.mxu0 %v26380_v41  ;;  %v20406_v38 = vld [vmem:[%s23438_s0 + $0x810] sm:$0xff] }
 0x37c   :  { %12721 = vmatpush1.bf16.msra.mxu1 %v26381_v53  ;;  %v26392_v53 = vld [vmem:[#allocation99_spill] sm:$0xff]  ;;  %v13528_v2 = vpack.c.bf16 %v26423_v55, %v26421_v7 }
 0x37d   :  { %12723 = vmatprep.subr.bf16.mxu1 %v26382_v15  ;;  %v26393_v15 = vld [vmem:[#allocation36_spill] sm:$0xff]  ;;  %v20401_v7 = vld [vmem:[%s23438_s0 + $0x7d0] sm:$0xff] }
 0x37e   :  { %13489 = vmatpush1.bf16.msra.mxu0 %v26383_v40  ;;  %v26429_v55 = vld [vmem:[#allocation131_spill] sm:$0xff] }
 0x37f   :  { %13491 = vmatprep.subr.bf16.mxu0 %v26384_v30  ;;  %v26395_v30 = vld [vmem:[#allocation102_spill] sm:$0xff] }
 0x380   :  { %12725 = vmatpush1.bf16.msra.mxu1 %v26385_v22  ;;  %v26396_v22 = vld [vmem:[#allocation104_spill] sm:$0xff] }
 0x381   :  { %12727 = vmatprep.subr.bf16.mxu1 %v26386_v49  ;;  %v26397_v49 = vld [vmem:[#allocation128_spill] sm:$0xff] }
 0x382   :  { %13493 = vmatpush1.bf16.msra.mxu0 %v26387_v14  ;;  %v26411_v14 = vld [vmem:[#allocation124_spill] sm:$0xff] }
 0x383   :  { %13495 = vmatprep.subr.bf16.mxu0 %v26388_v31 }
 0x384   :  { %12729 = vmatpush1.bf16.msra.mxu1 %v26389_v33  ;;  %v26398_v33 = vld [vmem:[#allocation83_spill] sm:$0xff] }
 0x385   :  { %12731 = vmatprep.subr.bf16.mxu1 %v26390_v45  ;;  %v26399_v45 = vld [vmem:[#allocation61_spill] sm:$0xff] }
 0x386   :  { %13497 = vmatpush1.bf16.msra.mxu0 %v26391_v36  ;;  %v26409_v36 = vld [vmem:[#allocation43_spill] sm:$0xff] }
 0x387   :  { %13499 = vmatprep.subr.bf16.mxu0 %v26392_v53 }
 0x388   :  { %12733 = vmatpush1.bf16.msra.mxu1 %v26393_v15  ;;  %v26400_v15 = vld [vmem:[#allocation64_spill] sm:$0xff] }
 0x389   :  { %12735 = vmatprep.subr.bf16.mxu1 %v26394_v13  ;;  %v26401_v13 = vld [vmem:[#allocation30_spill] sm:$0xff] }
 0x38a   :  { %13501 = vmatpush1.bf16.msra.mxu0 %v26395_v30 }
 0x38b   :  { %13503 = vmatprep.subr.bf16.mxu0 %v26396_v22  ;;  %v26408_v22 = vld [vmem:[#allocation42_spill] sm:$0xff] }
 0x38c   :  { %12737 = vmatpush1.bf16.msra.mxu1 %v26229_v46  ;;  %v26402_v46 = vld [vmem:[#allocation98_spill] sm:$0xff] }
 0x38d   :  { %12739 = vmatprep.subr.bf16.mxu1 %v26231_v37  ;;  %v26403_v37 = vld [vmem:[#allocation107_spill] sm:$0xff] }
 0x38e   :  { %13505 = vmatpush1.bf16.msra.mxu0 %v26397_v49  ;;  %v26407_v49 = vld [vmem:[#allocation122_spill] sm:$0xff] }
 0x38f   :  { %13507 = vmatprep.subr.bf16.mxu0 %v26398_v33 }
 0x390   :  { %12741 = vmatpush1.bf16.msra.mxu1 %v26235_v17  ;;  %v218_v17 = vld [vmem:[%s23438_s0 + $0x658] sm:$0xff] }
 0x391   :  { %12743 = vmatprep.subr.bf16.mxu1 %v26236_v59  ;;  %v226_v59 = vld [vmem:[%s23438_s0 + $0x698] sm:$0xff] }
 0x392   :  { %13509 = vmatpush1.bf16.msra.mxu0 %v26399_v45 }
 0x393   :  { %13511 = vmatprep.subr.bf16.mxu0 %v26400_v15  ;;  %v26406_v15 = vld [vmem:[#allocation116_spill] sm:$0xff] }
 0x394   :  { %12745 = vmatpush1.bf16.msra.mxu1 %v26239_v62  ;;  %v26404_v62 = vld [vmem:[#allocation112_spill] sm:$0xff] }
 0x395   :  { %12747 = vmatprep.subr.bf16.mxu1 %v26241_v56  ;;  %v217_v56 = vld [vmem:[%s23438_s0 + $0x650] sm:$0xff] }
 0x396   :  { %13513 = vmatpush1.bf16.msra.mxu0 %v26401_v13  ;;  %v234_v13 = vld [vmem:[%s23438_s0 + $0x6d8] sm:$0xff]  ;;  %v5915_v45 = vand.u32 4294901760, %v217_v56 }
 0x397   :  { %13515 = vmatprep.subr.bf16.mxu0 %v26402_v46  ;;  %v5917_v46 = vand.u32 4294901760, %v226_v59  ;;  %v5921_v30 = vand.u32 4294901760, %v234_v13 }
 0x398   :  { %12749 = vmatpush1.bf16.msra.mxu1 %v26242_v39  ;;  %v225_v39 = vld [vmem:[%s23438_s0 + $0x690] sm:$0xff] }
 0x399   :  { %12751 = vmatprep.subr.bf16.mxu1 %v26243_v51  ;;  %v26405_v51 = vld [vmem:[#allocation40_spill] sm:$0xff]  ;;  %v5919_v33 = vand.u32 4294901760, %v225_v39 }
 0x39a   :  { %13517 = vmatpush1.bf16.msra.mxu0 %v26403_v37  ;;  %v5913_v37 = vand.u32 4294901760, %v218_v17 }
 0x39b   :  { %13519 = vmatprep.subr.bf16.mxu0 %v26404_v62  ;;  %v242_v62 = vld [vmem:[%s23438_s0 + $0x718] sm:$0xff]  ;;  %v20353_v40 = vpack.c.bf16 %v5919_v33, %v5915_v45 }
 0x39c   :  { %12753 = vmatpush1.bf16.msra.mxu1 %v26244_v23  ;;  %v233_v23 = vld [vmem:[%s23438_s0 + $0x6d0] sm:$0xff]  ;;  %v5925_v53 = vand.u32 4294901760, %v242_v62  ;;  %v20350_v31 = vpack.c.bf16 %v5917_v46, %v5913_v37  ;;  %v20368_v54 = vsub.f32 %v218_v17, %v5913_v37  ;;  %v20392_v37 = vsub.f32 %v225_v39, %v5919_v33  ;;  %v290_v39 = vld [vmem:[%s23438_s0 + $0x898] sm:$0xff] }
 0x39d   :  { %12755 = vmatprep.subr.bf16.mxu1 %v26405_v51  ;;  %v241_v51 = vld [vmem:[%s23438_s0 + $0x710] sm:$0xff]  ;;  %26412 = vst [vmem:[#allocation34_spill] sm:$0xff] %v20353_v40  ;;  %v26427_v17 = vand.u32 4294901760, %v26263_v26  ;;  %v20410_v33 = vsub.f32 %v234_v13, %v5921_v30 }
 0x39e   :  { %13521 = vmatpush1.bf16.msra.mxu0 %v26406_v15  ;;  %v250_v15 = vld [vmem:[%s23438_s0 + $0x758] sm:$0xff]  ;;  %26410 = vst [vmem:[#allocation28_spill] sm:$0xff] %v20350_v31  ;;  %v5927_v41 = vand.u32 4294901760, %v241_v51  ;;  %26418 = vst [vmem:[#allocation37_spill] sm:$0xff] %v20368_v54  ;;  %v20376_v28 = vpack.c.bf16 %v5925_v53, %v5921_v30  ;;  %v5937_v30 = vand.u32 4294901760, %v20381_v58 }
 0x39f   :  { %13523 = vmatprep.subr.bf16.mxu0 %v26407_v49  ;;  %v20347_v49 = vld [vmem:[%s23438_s0 + $0x798] sm:$0xff]  ;;  %v5929_v21 = vand.u32 4294901760, %v250_v15  ;;  %26426 = vst [vmem:[#allocation17_spill] sm:$0xff] %v20392_v37  ;;  %26430 = vst [vmem:[#allocation23_spill] sm:$0xff] %v20410_v33  ;;  %v5939_v33 = vand.u32 4294901760, %v20401_v7  ;;  %v5943_v37 = vand.u32 4294901760, %v20406_v38 }
 0x3a0   :  { %12757 = vmatpush1.bf16.msra.mxu1 %v26408_v22  ;;  %v5923_v22 = vand.u32 4294901760, %v233_v23  ;;  %v5933_v42 = vand.u32 4294901760, %v20347_v49  ;;  %26424 = vst [vmem:[#allocation94_spill] sm:$0xff] %v20376_v28 }
 0x3a1   :  { %4775 = vmatprep.subr.mxu1 %v26409_v36  ;;  %v249_v36 = vld [vmem:[%s23438_s0 + $0x750] sm:$0xff] }
 0x3a2   :  { %13525 = vmatpush1.bf16.msra.mxu0 %v26411_v14  ;;  %v257_v14 = vld [vmem:[%s23438_s0 + $0x790] sm:$0xff]  ;;  %v20412_v26 = vpack.c.bf16 %v5927_v41, %v5923_v22 }
 0x3a3   :  { %7720 = vmatprep.subr.mxu0 %v26413_v4  ;;  %v20370_v4 = vsub.f32 %v226_v59, %v5917_v46  ;;  %v20390_v46 = vsub.f32 %v217_v56, %v5915_v45  ;;  %v26428_v59 = vand.u32 4294901760, %v26264_v20  ;;  %v5931_v20 = vand.u32 4294901760, %v249_v36  ;;  %v282_v56 = vld [vmem:[%s23438_s0 + $0x858] sm:$0xff] }
 0x3a4   :  { %4777 = vmatpush1.msra.mxu1 %v26417_v29  ;;  %v20386_v29 = vld [vmem:[%s23438_s0 + $0x818] sm:$0xff]  ;;  %26431 = vst [vmem:[#allocation39_spill] sm:$0xff] %v20412_v26  ;;  %v5935_v45 = vand.u32 4294901760, %v257_v14 }
 0x3a5   :  { %26419 = vst [vmem:[#allocation38_spill] sm:$0xff] %v20370_v4  ;;  %4794 = vmatmul.mubr.f32.vlgmr.msra.gmra.mrb[4].mxu1 %v26269_v50  ;;  %13047 = vmatprep.subr.bf16.mxu1 %v20350_v31  ;;  %26425 = vst [vmem:[#allocation14_spill] sm:$0xff] %v20390_v46  ;;  %v13530_v34 = vpack.c.bf16 %v26428_v59, %v26427_v17  ;;  %v26432_v17 = vmov 5.6028366e-06   ;;  %v20421_v59 = vsub.f32 %v242_v62, %v5925_v53  ;;  %v5941_v13 = vand.u32 4294901760, %v20386_v29  ;;  %v281_v31 = vld [vmem:[%s23438_s0 + $0x850] sm:$0xff]  ;;  %v26436_v53 = vld [vmem:[#allocation137_spill] sm:$0xff] }
 0x3a6   :  { %7722 = vmatpush1.msra.mxu0 %v26429_v55  ;;  %13049 = vmatpush1.bf16.msra.mxu1 %v20353_v40  ;;  %v20423_v40 = vpack.c.bf16 %v5933_v42, %v5929_v21  ;;  %v289_v55 = vld [vmem:[%s23438_s0 + $0x890] sm:$0xff]  ;;  %v26437_v62 = vand.u32 4294901760, %v26436_v53  ;;  %v20442_v46 = vsub.f32 %v241_v51, %v5927_v41  ;;  %v5947_v53 = vand.u32 4294901760, %v281_v31  ;;  %v298_v41 = vld [vmem:[%s23438_s0 + $0x8d8] sm:$0xff] }
 0x3a7   :  { %13527 = vmatprep.subr.bf16.mxu0 %v13526_v63  ;;  %7741 = vmatmul.mubr.f32.vlgmr.msra.gmra.mrb[6].mxu0 %v26432_v17  ;;  %26433 = vst [vmem:[#allocation100_spill] sm:$0xff] %v20421_v59  ;;  %v20434_v63 = vsub.f32 %v233_v23, %v5923_v22  ;;  %v26438_v17 = vld [vmem:[#allocation138_spill] sm:$0xff]  ;;  %v26441_v4 = vld [vmem:[#allocation139_spill] sm:$0xff]  ;;  %v5949_v23 = vand.u32 4294901760, %v290_v39 }
 0x3a8   :  { %26434 = vst [vmem:[#allocation118_spill] sm:$0xff] %v20423_v40  ;;  %13529 = vmatpush1.bf16.msra.mxu0 %v13528_v2  ;;  %13051 = vmatprep.subr.bf16.mxu1 %v20376_v28  ;;  %v26439_v50 = vand.u32 4294901760, %v26438_v17  ;;  %26440 = vst [vmem:[#allocation41_spill] sm:$0xff] %v20442_v46  ;;  %v26442_v32 = vand.u32 4294901760, %v26441_v4  ;;  %v26444_v2 = vand.u32 4294901760, %v26443_v8  ;;  %v5945_v28 = vand.u32 4294901760, %v282_v56 }
 0x3a9   :  { %26435 = vst [vmem:[#allocation136_spill] sm:$0xff] %v20434_v63  ;;  %13531 = vmatprep.subr.bf16.mxu0 %v13530_v34  ;;  %v26445_v22 = vld [vmem:[#allocation90_spill] sm:$0xff]  ;;  %v20450_v17 = vsub.f32 %v250_v15, %v5929_v21  ;;  %7962 = vmatprep.mubr.f32.mxu0 %v26182_v5  ;;  %v20463_v8 = vsub.f32 %v20347_v49, %v5933_v42  ;;  %v26453_v42 = vand.u32 4294901760, %v26285_v16 }
 0x3aa   :  { %v13532_v59 = vpack.c.bf16 %v26439_v50, %v26437_v62  ;;  %v13534_v27 = vpack.c.bf16 %v26444_v2, %v26442_v32  ;;  %6032 = vmatprep.mubr.f32.mxu1 %v26445_v22  ;;  %13053 = vmatpush1.bf16.msra.mxu1 %v20412_v26  ;;  %v20452_v50 = vpack.c.bf16 %v5935_v45, %v5931_v20  ;;  %v5951_v62 = vand.u32 4294901760, %v289_v55  ;;  %v306_v32 = vld [vmem:[%s23438_s0 + $0x918] sm:$0xff]  ;;  %v297_v51 = vld [vmem:[%s23438_s0 + $0x8d0] sm:$0xff] }
 0x3ab   :  { %26446 = vst [vmem:[#allocation44_spill] sm:$0xff] %v20450_v17  ;;  %13055 = vmatprep.subr.bf16.mxu1 %v20423_v40  ;;  %26448 = vst [vmem:[#allocation50_spill] sm:$0xff] %v20463_v8  ;;  %v20465_v21 = vsub.f32 %v249_v36, %v5931_v20  ;;  %v20467_v4 = vsub.f32 %v257_v14, %v5935_v45  ;;  %v20469_v15 = vpack.c.bf16 %v5941_v13, %v5937_v30  ;;  %v305_v34 = vld [vmem:[%s23438_s0 + $0x910] sm:$0xff]  ;;  %v26454_v36 = vld [vmem:[#allocation52_spill] sm:$0xff] }
 0x3ac   :  { %26447 = vst [vmem:[#allocation48_spill] sm:$0xff] %v20452_v50  ;;  %13533 = vmatpush1.bf16.msra.mxu0 %v13532_v59  ;;  %v26452_v2 = vand.u32 4294901760, %v19485_v60  ;;  %v26455_v20 = vand.u32 4294901760, %v26454_v36  ;;  %v26456_v14 = vld [vmem:[#allocation54_spill] sm:$0xff]  ;;  %v20485_v40 = vpack.c.bf16 %v5943_v37, %v5939_v33  ;;  %v26459_v26 = vld [vmem:[#allocation55_spill] sm:$0xff]  ;;  %v20491_v59 = vpack.c.bf16 %v5949_v23, %v5945_v28 }
 0x3ad   :  { %26449 = vst [vmem:[#allocation49_spill] sm:$0xff] %v20465_v21  ;;  %26450 = vst [vmem:[#allocation51_spill] sm:$0xff] %v20467_v4  ;;  %v26457_v45 = vand.u32 4294901760, %v26456_v14  ;;  %v26460_v5 = vand.u32 4294901760, %v26459_v26  ;;  %v26461_v4 = vld [vmem:[#allocation56_spill] sm:$0xff]  ;;  %13535 = vmatprep.subr.bf16.mxu0 %v13534_v27  ;;  %v5953_v60 = vand.u32 4294901760, %v298_v41  ;;  %v20498_v14 = vpack.c.bf16 %v5951_v62, %v5947_v53 }
 0x3ae   :  { %26451 = vst [vmem:[#allocation57_spill] sm:$0xff] %v20469_v15  ;;  %v13536_v49 = vpack.c.bf16 %v26453_v42, %v26452_v2  ;;  %26458 = vst [vmem:[#allocation62_spill] sm:$0xff] %v20485_v40  ;;  %v26462_v21 = vand.u32 4294901760, %v26461_v4  ;;  %v5957_v17 = vand.u32 4294901760, %v306_v32  ;;  %13057 = vmatpush1.bf16.msra.mxu1 %v20452_v50  ;;  %v26464_v16 = vld [vmem:[#allocation58_spill] sm:$0xff]  ;;  %v26466_v42 = vld [vmem:[#allocation60_spill] sm:$0xff]  ;;  %v20505_v27 = vsub.f32 %v20386_v29, %v5941_v13 }
 0x3af   :  { %v13538_v22 = vpack.c.bf16 %v26457_v45, %v26455_v20  ;;  %26463 = vst [vmem:[#allocation20_spill] sm:$0xff] %v20491_v59  ;;  %v26465_v2 = vand.u32 4294901760, %v26464_v16  ;;  %v26467_v36 = vand.u32 4294901760, %v26466_v42  ;;  %26468 = vst [vmem:[#allocation106_spill] sm:$0xff] %v20498_v14  ;;  %v5955_v45 = vand.u32 4294901760, %v297_v51  ;;  %13059 = vmatprep.subr.bf16.mxu1 %v20469_v15  ;;  %v314_v42 = vld [vmem:[%s23438_s0 + $0x958] sm:$0xff] }
 0x3b0   :  { %v13540_v8 = vpack.c.bf16 %v26462_v21, %v26460_v5  ;;  %v5959_v26 = vand.u32 4294901760, %v305_v34  ;;  %v20502_v5 = vsub.f32 %v20381_v58, %v5937_v30  ;;  %26470 = vst [vmem:[#allocation108_spill] sm:$0xff] %v20505_v27  ;;  %v20508_v21 = vsub.f32 %v20401_v7, %v5939_v33  ;;  %v322_v58 = vld [vmem:[%s23438_s0 + $0x998] sm:$0xff]  ;;  %13537 = vmatpush1.bf16.msra.mxu0 %v13536_v49  ;;  %v321_v33 = vld [vmem:[%s23438_s0 + $0x990] sm:$0xff] }
 0x3b1   :  { %v13542_v20 = vpack.c.bf16 %v26467_v36, %v26465_v2  ;;  %v26472_v4 = vand.u32 4294901760, %v26308_v35  ;;  %v26473_v16 = vand.u32 4294901760, %v26309_v61  ;;  %v20521_v29 = vsub.f32 %v20406_v38, %v5943_v37  ;;  %v313_v61 = vld [vmem:[%s23438_s0 + $0x950] sm:$0xff]  ;;  %13539 = vmatprep.subr.bf16.mxu0 %v13538_v22  ;;  %v5908_v38 = vpop.f32.mrb[4].mxu0 }
 0x3b2   :  { %26469 = vst [vmem:[#allocation12_spill] sm:$0xff] %v20502_v5  ;;  %26471 = vst [vmem:[#allocation110_spill] sm:$0xff] %v20508_v21  ;;  %v20523_v30 = vsub.f32 %v282_v56, %v5945_v28  ;;  %v20525_v7 = vsub.f32 %v290_v39, %v5949_v23  ;;  %v20527_v35 = vsub.f32 %v281_v31, %v5947_v53  ;;  %13061 = vmatpush1.bf16.msra.mxu1 %v20485_v40  ;;  %v337_v36 = vld [vmem:[%s23438_s0 + $0xa10] sm:$0xff] }
 0x3b3   :  { %v13544_v2 = vpack.c.bf16 %v26473_v16, %v26472_v4  ;;  %26474 = vst [vmem:[#allocation126_spill] sm:$0xff] %v20521_v29  ;;  %v20535_v13 = vsub.f32 %v289_v55, %v5951_v62  ;;  %v20537_v49 = vpack.c.bf16 %v5957_v17, %v5953_v60  ;;  %v20539_v37 = vsub.f32 %v298_v41, %v5953_v60  ;;  %v330_v55 = vld [vmem:[%s23438_s0 + $0x9d8] sm:$0xff]  ;;  %v5910_v41 = vpop.f32.mrb[5].mxu0  ;;  %v329_v60 = vld [vmem:[%s23438_s0 + $0x9d0] sm:$0xff] }
 0x3b4   :  { %26475 = vst [vmem:[#allocation127_spill] sm:$0xff] %v20523_v30  ;;  %26476 = vst [vmem:[#allocation72_spill] sm:$0xff] %v20525_v7  ;;  %v20541_v28 = vsub.f32 %v306_v32, %v5957_v17  ;;  %v26482_v31 = vand.u32 4294901760, %v26310_v48  ;;  %v26483_v56 = vand.u32 4294901760, %v26311_v24  ;;  %v20548_v23 = vpack.c.bf16 %v5959_v26, %v5955_v45  ;;  %v338_v17 = vld [vmem:[%s23438_s0 + $0xa18] sm:$0xff]  ;;  %13063 = vmatprep.subr.bf16.mxu1 %v20491_v59  ;;  %v26491_v40 = vld [vmem:[#allocation26_spill] sm:$0xff] }
 0x3b5   :  { %26477 = vst [vmem:[#allocation78_spill] sm:$0xff] %v20527_v35  ;;  %26478 = vst [vmem:[#allocation63_spill] sm:$0xff] %v20535_v13  ;;  %v5961_v53 = vand.u32 4294901760, %v314_v42  ;;  %v5965_v22 = vand.u32 4294901760, %v322_v58  ;;  %v9243_v62 = vrot.slane %v5908_v38, 7  ;;  %v20557_v48 = vsub.f32 %v297_v51, %v5955_v45  ;;  %13541 = vmatpush1.bf16.msra.mxu0 %v13540_v8 }
 0x3b6   :  { %26479 = vst [vmem:[#allocation31_spill] sm:$0xff] %v20537_v49  ;;  %26480 = vst [vmem:[#allocation65_spill] sm:$0xff] %v20539_v37  ;;  %v13546_v39 = vpack.c.bf16 %v26483_v56, %v26482_v31  ;;  %v5963_v24 = vand.u32 4294901760, %v313_v61  ;;  %v5967_v32 = vand.u32 4294901760, %v321_v33  ;;  %v9246_v4 = vrot.slane %v5910_v41, 7  ;;  %13543 = vmatprep.subr.bf16.mxu0 %v13542_v20  ;;  %13065 = vmatpush1.bf16.msra.mxu1 %v20498_v14 }
 0x3b7   :  { %26481 = vst [vmem:[#allocation67_spill] sm:$0xff] %v20541_v28  ;;  %26484 = vst [vmem:[#allocation8_spill] sm:$0xff] %v20548_v23  ;;  %v20565_v16 = vsub.f32 %v305_v34, %v5959_v26  ;;  %v26487_v38 = vand.u32 4294901760, %v19618_v1  ;;  %v26488_v31 = vand.u32 4294901760, %v19623_v25  ;;  %v26489_v45 = vand.u32 4294901760, %v26187_v10  ;;  %v346_v25 = vld [vmem:[%s23438_s0 + $0xa58] sm:$0xff]  ;;  %13067 = vmatprep.subr.bf16.mxu1 %v20537_v49 }
 0x3b8   :  { %26485 = vst [vmem:[#allocation10_spill] sm:$0xff] %v20557_v48  ;;  %v26490_v56 = vand.u32 4294901760, %v19645_v57  ;;  %v20577_v15 = vsel %vm9244_vm2, %v9243_v62, %v26491_v40  ;;  %v26493_v41 = vand.u32 4294901760, %v19659_v18  ;;  %v26494_v8 = vand.u32 4294901760, %v19673_v44  ;;  %v354_v57 = vld [vmem:[%s23438_s0 + $0xa98] sm:$0xff]  ;;  %v345_v62 = vld [vmem:[%s23438_s0 + $0xa50] sm:$0xff] }
 0x3b9   :  { %26486 = vst [vmem:[#allocation13_spill] sm:$0xff] %v20565_v16  ;;  %v13548_v51 = vpack.c.bf16 %v26488_v31, %v26487_v38  ;;  %26492 = vst [vmem:[#allocation16_spill] sm:$0xff] %v20577_v15  ;;  %v5969_v1 = vand.u32 4294901760, %v330_v55  ;;  %v5973_v26 = vand.u32 4294901760, %v338_v17  ;;  %v26495_v10 = vld [vmem:[#allocation120_spill] sm:$0xff]  ;;  %v20596_v18 = vpack.c.bf16 %v5965_v22, %v5961_v53  ;;  %v353_v38 = vld [vmem:[%s23438_s0 + $0xa90] sm:$0xff]  ;;  %13545 = vmatpush1.bf16.msra.mxu0 %v13544_v2 }
 0x3ba   :  { %v13550_v59 = vpack.c.bf16 %v26490_v56, %v26489_v45  ;;  %v20583_v34 = vpack.c.bf16 %v26494_v8, %v26493_v41  ;;  %v20593_v40 = vsel %vm9244_vm2, %v9246_v4, %v26495_v10  ;;  %v5971_v44 = vand.u32 4294901760, %v329_v60  ;;  %13547 = vmatprep.subr.bf16.mxu0 %v13546_v39  ;;  %13069 = vmatpush1.bf16.msra.mxu1 %v20548_v23  ;;  %v361_v39 = vld [vmem:[%s23438_s0 + $0xad0] sm:$0xff] }
 0x3bb   :  { %26496 = vst [vmem:[#allocation21_spill] sm:$0xff] %v20593_v40  ;;  %26497 = vst [vmem:[#allocation22_spill] sm:$0xff] %v20596_v18  ;;  %v5975_v20 = vand.u32 4294901760, %v337_v36  ;;  %v20605_v31 = vsub.f32 %v314_v42, %v5961_v53  ;;  %v20607_v4 = vsub.f32 %v322_v58, %v5965_v22  ;;  %v20609_v45 = vpack.c.bf16 %v5967_v32, %v5963_v24  ;;  %v362_v42 = vld [vmem:[%s23438_s0 + $0xad8] sm:$0xff] }
 0x3bc   :  { %v20611_v56 = vsub.f32 %v313_v61, %v5963_v24  ;;  %v20613_v41 = vsub.f32 %v321_v33, %v5967_v32  ;;  %v26503_v8 = vand.u32 4294901760, %v26197_v47  ;;  %v26504_v10 = vand.u32 4294901760, %v19781_v43  ;;  %v370_v58 = vld [vmem:[%s23438_s0 + $0xb18] sm:$0xff]  ;;  %13071 = vmatprep.subr.bf16.mxu1 %v20596_v18 }
 0x3bd   :  { %26498 = vst [vmem:[#allocation27_spill] sm:$0xff] %v20605_v31  ;;  %26499 = vst [vmem:[#allocation29_spill] sm:$0xff] %v20607_v4  ;;  %v5977_v50 = vand.u32 4294901760, %v346_v25  ;;  %v5981_v15 = vand.u32 4294901760, %v354_v57  ;;  %v20625_v61 = vpack.c.bf16 %v5973_v26, %v5969_v1  ;;  %v20627_v2 = vsub.f32 %v330_v55, %v5969_v1  ;;  %v369_v55 = vld [vmem:[%s23438_s0 + $0xb10] sm:$0xff]  ;;  %v386_v18 = vld [vmem:[%s23438_s0 + $0xb98] sm:$0xff]  ;;  %13549 = vmatpush1.bf16.msra.mxu0 %v13548_v51 }
 0x3be   :  { %26500 = vst [vmem:[#allocation135_spill] sm:$0xff] %v20609_v45  ;;  %26501 = vst [vmem:[#allocation33_spill] sm:$0xff] %v20611_v56  ;;  %v13554_v14 = vpack.c.bf16 %v26504_v10, %v26503_v8  ;;  %v5979_v33 = vand.u32 4294901760, %v345_v62  ;;  %v5983_v47 = vand.u32 4294901760, %v353_v38  ;;  %v20630_v43 = vsub.f32 %v338_v17, %v5973_v26  ;;  %v26514_v26 = vld [vmem:[#allocation129_spill] sm:$0xff]  ;;  %v378_v10 = vld [vmem:[%s23438_s0 + $0xb58] sm:$0xff]  ;;  %13551 = vmatprep.subr.bf16.mxu0 %v13550_v59 }
 0x3bf   :  { %26502 = vst [vmem:[#allocation35_spill] sm:$0xff] %v20613_v41  ;;  %26505 = vst [vmem:[#allocation45_spill] sm:$0xff] %v20625_v61  ;;  %v20632_v53 = vpack.c.bf16 %v5975_v20, %v5971_v44  ;;  %v20634_v22 = vsub.f32 %v329_v60, %v5971_v44  ;;  %v20636_v24 = vsub.f32 %v337_v36, %v5975_v20  ;;  %v26511_v32 = vand.u32 4294901760, %v19813_v6 }
 0x3c0   :  { %26506 = vst [vmem:[#allocation46_spill] sm:$0xff] %v20627_v2  ;;  %26507 = vst [vmem:[#allocation95_spill] sm:$0xff] %v20630_v43  ;;  %v26512_v17 = vand.u32 4294901760, %v19818_v9  ;;  %v26513_v60 = vand.u32 4294901760, %v19827_v3  ;;  %v26515_v36 = vand.u32 4294901760, %v26514_v26  ;;  %v5985_v20 = vand.u32 4294901760, %v362_v42  ;;  %13073 = vmatpush1.bf16.msra.mxu1 %v20609_v45 }
 0x3c1   :  { %26508 = vst [vmem:[#allocation97_spill] sm:$0xff] %v20632_v53  ;;  %26509 = vst [vmem:[#allocation109_spill] sm:$0xff] %v20634_v22  ;;  %v5989_v8 = vand.u32 4294901760, %v370_v58  ;;  %v20659_v6 = vpack.c.bf16 %v5981_v15, %v5977_v50  ;;  %v20661_v9 = vsub.f32 %v346_v25, %v5977_v50  ;;  %v20665_v3 = vsub.f32 %v345_v62, %v5979_v33  ;;  %v20684_v25 = vld [vmem:[%s23438_s0 + $0xbd8] sm:$0xff] }
 0x3c2   :  { %26510 = vst [vmem:[#allocation132_spill] sm:$0xff] %v20636_v24  ;;  %v13556_v1 = vpack.c.bf16 %v26512_v17, %v26511_v32  ;;  %v13558_v44 = vpack.c.bf16 %v26515_v36, %v26513_v60  ;;  %v20663_v32 = vsub.f32 %v354_v57, %v5981_v15  ;;  %v20670_v17 = vld [vmem:[%s23438_s0 + $0xb50] sm:$0xff]  ;;  %v20677_v51 = vpack.c.bf16 %v5983_v47, %v5979_v33  ;;  %v20689_v57 = vld [vmem:[%s23438_s0 + $0xc18] sm:$0xff] }
 0x3c3   :  { %26516 = vst [vmem:[#allocation111_spill] sm:$0xff] %v20659_v6  ;;  %26517 = vst [vmem:[#allocation113_spill] sm:$0xff] %v20661_v9  ;;  %v20675_v60 = vld [vmem:[%s23438_s0 + $0xb90] sm:$0xff]  ;;  %v20679_v26 = vsub.f32 %v353_v38, %v5983_v47  ;;  %v5987_v50 = vand.u32 4294901760, %v361_v39  ;;  %v5991_v15 = vand.u32 4294901760, %v369_v55  ;;  %v26524_v59 = vand.u32 4294901760, %v19864_v11  ;;  %13075 = vmatprep.subr.bf16.mxu1 %v20625_v61  ;;  %13553 = vmatpush1.bf16.msra.mxu0 %v20583_v34 }
 0x3c4   :  { %26518 = vst [vmem:[#allocation114_spill] sm:$0xff] %v20663_v32  ;;  %26519 = vst [vmem:[#allocation115_spill] sm:$0xff] %v20665_v3  ;;  %v26525_v62 = vand.u32 4294901760, %v19874_v0  ;;  %v26526_v33 = vand.u32 4294901760, %v26344_v12  ;;  %v26527_v47 = vand.u32 4294901760, %v19919_v52  ;;  %v5993_v23 = vand.u32 4294901760, %v378_v10  ;;  %13555 = vmatprep.subr.bf16.mxu0 %v13554_v14  ;;  %13077 = vmatpush1.bf16.msra.mxu1 %v20632_v53 }
 0x3c5   :  { %26520 = vst [vmem:[#allocation117_spill] sm:$0xff] %v20677_v51  ;;  %26521 = vst [vmem:[#allocation119_spill] sm:$0xff] %v20679_v26  ;;  %v5997_v49 = vand.u32 4294901760, %v386_v18  ;;  %v20701_v40 = vpack.c.bf16 %v5989_v8, %v5985_v20  ;;  %v20703_v26 = vsub.f32 %v362_v42, %v5985_v20  ;;  %v20708_v0 = vsub.f32 %v370_v58, %v5989_v8  ;;  %v20720_v42 = vld [vmem:[%s23438_s0 + $0xc10] sm:$0xff]  ;;  %v26541_v14 = vld [vmem:[#allocation73_spill] sm:$0xff] }
 0x3c6   :  { %26522 = vst [vmem:[#allocation121_spill] sm:$0xff] %v20684_v25  ;;  %26523 = vst [vmem:[#allocation123_spill] sm:$0xff] %v20689_v57  ;;  %v13560_v38 = vpack.c.bf16 %v26525_v62, %v26524_v59  ;;  %v13562_v36 = vpack.c.bf16 %v26527_v47, %v26526_v33  ;;  %v20715_v59 = vld [vmem:[%s23438_s0 + $0xbd0] sm:$0xff]  ;;  %v20723_v34 = vpack.c.bf16 %v5991_v15, %v5987_v50  ;;  %v26535_v62 = vand.u32 4294901760, %v19936_v19  ;;  %v26543_v61 = vld [vmem:[#allocation105_spill] sm:$0xff] }
 0x3c7   :  { %26528 = vst [vmem:[#allocation125_spill] sm:$0xff] %v20701_v40  ;;  %26529 = vst [vmem:[#allocation77_spill] sm:$0xff] %v20703_v26  ;;  %v20725_v58 = vsub.f32 %v361_v39, %v5987_v50  ;;  %v20727_v8 = vsub.f32 %v369_v55, %v5991_v15  ;;  %v26536_v33 = vld [vmem:[#allocation134_spill] sm:$0xff]  ;;  %v20734_v12 = vpack.c.bf16 %v5997_v49, %v5993_v23  ;;  %v26542_v20 = vand.u32 4294901760, %v26541_v14  ;;  %v410_v19 = vld [vmem:[%s23438_s0 + $0xc58] sm:$0xf] }
 0x3c8   :  { %26530 = vst [vmem:[#allocation15_spill] sm:$0xff] %v20708_v0  ;;  %26531 = vst [vmem:[#allocation18_spill] sm:$0xff] %v20715_v59  ;;  %v26537_v47 = vand.u32 4294901760, %v26536_v33  ;;  %v20736_v11 = vsub.f32 %v378_v10, %v5993_v23  ;;  %v20738_v45 = vsub.f32 %v386_v18, %v5997_v49  ;;  %v26544_v39 = vand.u32 4294901760, %v26543_v61  ;;  %13079 = vmatprep.subr.bf16.mxu1 %v20659_v6  ;;  %v26548_v23 = vld [vmem:[#allocation70_spill] sm:$0xff]  ;;  %v26550_v18 = vld [vmem:[#allocation141_spill] sm:$0xff] }
 0x3c9   :  { %26532 = vst [vmem:[#allocation66_spill] sm:$0xff] %v20723_v34  ;;  %26533 = vst [vmem:[#allocation6_spill] sm:$0xff] %v20725_v58  ;;  %v26545_v55 = vand.u32 4294901760, %v20670_v17  ;;  %v26546_v15 = vand.u32 4294901760, %v20675_v60  ;;  %v26549_v49 = vand.u32 4294901760, %v26548_v23  ;;  %v26551_v10 = vand.u32 4294901760, %v26550_v18  ;;  %13557 = vmatpush1.bf16.msra.mxu0 %v13556_v1  ;;  %13081 = vmatpush1.bf16.msra.mxu1 %v20677_v51 }
 0x3ca   :  { %26534 = vst [vmem:[#allocation7_spill] sm:$0xff] %v20727_v8  ;;  %v13564_v52 = vpack.c.bf16 %v26537_v47, %v26535_v62  ;;  %26538 = vst [vmem:[#allocation79_spill] sm:$0xff] %v20734_v12  ;;  %v13566_v50 = vpack.c.bf16 %v26544_v39, %v26542_v20  ;;  %v26552_v47 = vand.u32 4294901760, %v20684_v25  ;;  %v26553_v14 = vand.u32 4294901760, %v20689_v57  ;;  %v26555_v6 = vld [vmem:[#allocation142_spill] sm:$0xff]  ;;  %13559 = vmatprep.subr.bf16.mxu0 %v13558_v44  ;;  %v26570_v57 = vld [vmem:[#allocation49_spill] sm:$0xff] }
 0x3cb   :  { %26539 = vst [vmem:[#allocation130_spill] sm:$0xff] %v20736_v11  ;;  %26540 = vst [vmem:[#allocation75_spill] sm:$0xff] %v20738_v45  ;;  %v20752_v62 = vpack.c.bf16 %v26546_v15, %v26545_v55  ;;  %v20758_v33 = vpack.c.bf16 %v26551_v10, %v26549_v49  ;;  %v26556_v55 = vand.u32 4294901760, %v26555_v6  ;;  %v26557_v15 = vld [vmem:[#allocation143_spill] sm:$0xff]  ;;  %v26559_v49 = vand.u32 4294901760, %v20368_v54  ;;  %v26560_v10 = vld [vmem:[#allocation38_spill] sm:$0xff]  ;;  %13083 = vmatprep.subr.bf16.mxu1 %v20701_v40 }
 0x3cc   :  { %v20766_v39 = vpack.c.bf16 %v26553_v14, %v26552_v47  ;;  %v26558_v53 = vand.u32 4294901760, %v26557_v15  ;;  %v20781_v1 = vsel %vm419_vm0, %v410_v19, 0  ;;  %v409_v47 = vld [vmem:[%s23438_s0 + $0xc50] sm:$0xf]  ;;  %v26562_v15 = vld [vmem:[#allocation17_spill] sm:$0xff]  ;;  %v26565_v19 = vld [vmem:[#allocation44_spill] sm:$0xff] }
 0x3cd   :  { %26547 = vst [vmem:[#allocation87_spill] sm:$0xff] %v20752_v62  ;;  %v20777_v18 = vsub.f32 %v20368_v54, %v26559_v49  ;;  %v26561_v6 = vld [vmem:[#allocation14_spill] sm:$0xff]  ;;  %v26564_v49 = vld [vmem:[#allocation100_spill] sm:$0xff]  ;;  %v26566_v11 = vand.u32 4294901760, %v20715_v59  ;;  %v26567_v14 = vand.u32 4294901760, %v20720_v42  ;;  %v26571_v58 = vld [vmem:[#allocation51_spill] sm:$0xff]  ;;  %13561 = vmatpush1.bf16.msra.mxu0 %v13560_v38  ;;  %13085 = vmatpush1.bf16.msra.mxu1 %v20723_v34 }
 0x3ce   :  { %26554 = vst [vmem:[#allocation89_spill] sm:$0xff] %v20766_v39  ;;  %v20772_v23 = vpack.c.bf16 %v26558_v53, %v26556_v55  ;;  %v26563_v55 = vld [vmem:[#allocation23_spill] sm:$0xff]  ;;  %v26569_v53 = vld [vmem:[#allocation50_spill] sm:$0xff]  ;;  %v26572_v20 = vld [vmem:[#allocation144_spill] sm:$0xff]  ;;  %v20809_v40 = vand.u32 4294901760, %v20781_v1  ;;  %v20812_v59 = vsel %vm419_vm0, %v409_v47, 0  ;;  %13563 = vmatprep.subr.bf16.mxu0 %v13562_v36  ;;  %13087 = vmatprep.subr.bf16.mxu1 %v20734_v12 }
 0x3cf   :  { %v20799_v8 = vpack.c.bf16 %v26567_v14, %v26566_v11  ;;  %v26573_v25 = vand.u32 4294901760, %v26572_v20  ;;  %v26574_v44 = vld [vmem:[#allocation53_spill] sm:$0xff]  ;;  %v6043_v11 = vand.u32 4294901760, %v20777_v18  ;;  %v26576_v14 = vand.u32 4294901760, %v26560_v10 }
 0x3d0   :  { %v26575_v0 = vand.u32 4294901760, %v26574_v44  ;;  %v26577_v38 = vand.u32 4294901760, %v26561_v6  ;;  %v26578_v44 = vand.u32 4294901760, %v26562_v15  ;;  %v26580_v36 = vand.u32 4294901760, %v26564_v49 }
 0x3d1   :  { %26568 = vst [vmem:[#allocation5_spill] sm:$0xff] %v20799_v8  ;;  %v6054_v51 = vsub.f32 %v26560_v10, %v26576_v14  ;;  %v26581_v14 = vand.u32 4294901760, %v20434_v63  ;;  %13565 = vmatpush1.bf16.msra.mxu0 %v13564_v52  ;;  %13089 = vmatpush1.bf16.msra.mxu1 %v20752_v62  ;;  %v26587_v12 = vand.u32 4294901760, %v20502_v5  ;;  %v21001_v62 = vld [vmem:[%s23439_s1 + $0x80] sm:$0xff] }
 0x3d2   :  { %v13572_v45 = vpack.c.bf16 %v26575_v0, %v26573_v25  ;;  %v6048_v20 = vsub.f32 %v26561_v6, %v26577_v38  ;;  %v6060_v25 = vsub.f32 %v26562_v15, %v26578_v44  ;;  %v26579_v0 = vand.u32 4294901760, %v26563_v55  ;;  %13567 = vmatprep.subr.bf16.mxu0 %v13566_v50  ;;  %13091 = vmatprep.subr.bf16.mxu1 %v20766_v39 }
 0x3d3   :  { %v6078_v18 = vsub.f32 %v26564_v49, %v26580_v36  ;;  %v6072_v54 = vsub.f32 %v20434_v63, %v26581_v14  ;;  %v26582_v38 = vand.u32 4294901760, %v20442_v46  ;;  %v26583_v44 = vand.u32 4294901760, %v26565_v19 }
 0x3d4   :  { %v6066_v47 = vsub.f32 %v26563_v55, %v26579_v0  ;;  %v26584_v0 = vand.u32 4294901760, %v26569_v53  ;;  %v26585_v36 = vand.u32 4294901760, %v26570_v57  ;;  %v26586_v14 = vand.u32 4294901760, %v26571_v58 }
 0x3d5   :  { %v6084_v61 = vsub.f32 %v20442_v46, %v26582_v38  ;;  %v6090_v15 = vsub.f32 %v26565_v19, %v26583_v44  ;;  %v20852_v46 = vand.u32 4294901760, %v20812_v59  ;;  %v6049_v19 = vand.u32 4294901760, %v6048_v20  ;;  %13569 = vmatpush1.bf16.msra.mxu0 %v20758_v33  ;;  %13093 = vmatpush1.bf16.msra.mxu1 %v20799_v8 }
 0x3d6   :  { %v6102_v34 = vsub.f32 %v26569_v53, %v26584_v0  ;;  %v6096_v49 = vsub.f32 %v26570_v57, %v26585_v36  ;;  %v6108_v63 = vsub.f32 %v26571_v58, %v26586_v14  ;;  %v6055_v53 = vand.u32 4294901760, %v6054_v51  ;;  %13571 = vmatprep.subr.bf16.mxu0 %v20772_v23  ;;  %6010 = vmatprep.subr.mxu1 %v20809_v40 }
 0x3d7   :  { %v6061_v36 = vand.u32 4294901760, %v6060_v25  ;;  %v6067_v57 = vand.u32 4294901760, %v6066_v47  ;;  %v6079_v14 = vand.u32 4294901760, %v6078_v18  ;;  %v6073_v58 = vand.u32 4294901760, %v6072_v54 }
 0x3d8   :  { %v6085_v38 = vand.u32 4294901760, %v6084_v61  ;;  %v6091_v52 = vand.u32 4294901760, %v6090_v15  ;;  %v6103_v55 = vand.u32 4294901760, %v6102_v34  ;;  %v6097_v6 = vand.u32 4294901760, %v6096_v49 }
 0x3d9   :  { %v6109_v44 = vand.u32 4294901760, %v6108_v63  ;;  %v6114_v0 = vsub.f32 %v20502_v5, %v26587_v12  ;;  %v26588_v51 = vand.u32 4294901760, %v20505_v27  ;;  %v26589_v20 = vand.u32 4294901760, %v20508_v21  ;;  %13573 = vmatpush1.bf16.msra.mxu0 %v13572_v45  ;;  %v26591_v45 = vld [vmem:[#allocation59_spill] sm:$0xff]  ;;  %6012 = vmatpush1.msra.mxu1 %v20852_v46 }
 0x3da   :  { %v26590_v61 = vand.u32 4294901760, %v20521_v29  ;;  %v24379_v63 = vand.u32 4294901760, %v20523_v30  ;;  %v13094_v12 = vpack.c.bf16 %v6055_v53, %v6043_v11  ;;  %v24377_v33 = vand.u32 4294901760, %v20525_v7  ;;  %v20890_v11 = vld [vmem:[%s23439_s1 + $0x8] sm:$0xff] }
 0x3db   :  { %v6126_v50 = vsub.f32 %v20505_v27, %v26588_v51  ;;  %v20869_v54 = vsub.f32 %v20508_v21, %v26589_v20  ;;  %v24378_v15 = vand.u32 4294901760, %v20527_v35  ;;  %v24380_v49 = vand.u32 4294901760, %v20535_v13 }
 0x3dc   :  { %v20874_v34 = vsub.f32 %v20521_v29, %v26590_v61  ;;  %v13096_v25 = vpack.c.bf16 %v6061_v36, %v6049_v19  ;;  %v13098_v47 = vpack.c.bf16 %v6079_v14, %v6067_v57  ;;  %v13100_v18 = vpack.c.bf16 %v6085_v38, %v6073_v58  ;;  %v20895_v57 = vld [vmem:[%s23439_s1 + $0x48] sm:$0xff]  ;;  %v20907_v38 = vld [vmem:[%s23439_s1] sm:$0xff]  ;;  %13095 = vmatprep.subr.bf16.mxu1 %v13094_v12  ;;  %v26599_v19 = vld [vmem:[#allocation19_spill] sm:$0xff] }
 0x3dd   :  { %v24381_v51 = vand.u32 4294901760, %v20539_v37  ;;  %v13102_v20 = vpack.c.bf16 %v6103_v55, %v6091_v52  ;;  %v20884_v61 = vpack.c.bf16 %v6109_v44, %v6097_v6  ;;  %v6115_v23 = vand.u32 4294901760, %v6114_v0  ;;  %v20912_v44 = vld [vmem:[%s23439_s1 + $0x40] sm:$0xff] }
 0x3de   :  { %v24384_v53 = vand.u32 4294901760, %v20541_v28  ;;  %v6127_v58 = vand.u32 4294901760, %v6126_v50  ;;  %v20902_v55 = vsub.f32 %v20523_v30, %v24379_v63  ;;  %v26592_v0 = vand.u32 4294901760, %v26591_v45  ;;  %v26594_v50 = vld [vmem:[#allocation68_spill] sm:$0xff] }
 0x3df   :  { %v20919_v36 = vsub.f32 %v20525_v7, %v24377_v33  ;;  %v20924_v14 = vsub.f32 %v20527_v35, %v24378_v15  ;;  %v20929_v52 = vsub.f32 %v20535_v13, %v24380_v49  ;;  %v20936_v45 = vsub.f32 %v20539_v37, %v24381_v51 }
 0x3e0   :  { %7942 = vmatprep.subr.mxu0 %v26592_v0  ;;  %v24385_v33 = vand.u32 4294901760, %v20890_v11  ;;  %v26593_v63 = vmov 2.3283064e-09   ;;  %v6174_v49 = vsub.f32 %v20541_v28, %v24384_v53  ;;  %v26595_v8 = vand.u32 4294901760, %v26594_v50 }
 0x3e1   :  { %6033 = vmatmul.mubr.f32.vlgmr.msra.gmra.mrb[6].mxu1 %v26593_v63  ;;  %v13106_v0 = vpack.c.bf16 %v6127_v58, %v6115_v23  ;;  %v6139_v15 = vand.u32 4294901760, %v20902_v55  ;;  %v26597_v53 = vand.u32 4294901760, %v20895_v57  ;;  %v26600_v51 = vmov 0.0050964355  }
 0x3e2   :  { %7946 = vmatpush1.msra.mxu0 %v26595_v8  ;;  %13097 = vmatpush1.bf16.msra.mxu1 %v13096_v25  ;;  %v20954_v12 = vsub.f32 %v20890_v11, %v24385_v33  ;;  %v6151_v8 = vand.u32 4294901760, %v20919_v36  ;;  %v6145_v25 = vand.u32 4294901760, %v20924_v14  ;;  %v26601_v23 = vand.u32 4294901760, %v20907_v38  ;;  %v26604_v36 = vld [vmem:[#allocation69_spill] sm:$0xff] }
 0x3e3   :  { %v20959_v6 = vsub.f32 %v20895_v57, %v26597_v53  ;;  %13575 = vmatprep.subr.bf16.mxu0 %v26599_v19  ;;  %7963 = vmatmul.mubr.f32.vlgmr.msra.gmra.mrb[6].mxu0 %v26600_v51  ;;  %v26603_v55 = vand.u32 4294901760, %v20912_v44  ;;  %v20978_v53 = vld [vmem:[%s23439_s1 + $0x88] sm:$0xff]  ;;  %v6157_v14 = vand.u32 4294901760, %v20929_v52  ;;  %v26606_v63 = vand.u32 4294901760, %v20565_v16 }
 0x3e4   :  { %26596 = vst [vmem:[#allocation9_spill] sm:$0xff] %v20954_v12  ;;  %v20968_v58 = vsub.f32 %v20907_v38, %v26601_v23  ;;  %v20983_v19 = vld [vmem:[%s23439_s1 + $0xc8] sm:$0xff]  ;;  %13577 = vmatpush1.bf16.msra.mxu0 %v26604_v36  ;;  %13099 = vmatprep.subr.bf16.mxu1 %v13098_v47  ;;  %v6163_v23 = vand.u32 4294901760, %v20936_v45  ;;  %v21006_v47 = vld [vmem:[%s23439_s1 + $0xc0] sm:$0xff]  ;;  %v6175_v45 = vand.u32 4294901760, %v6174_v49  ;;  %v26608_v36 = vand.u32 4294901760, %v20605_v31 }
 0x3e5   :  { %26598 = vst [vmem:[#allocation11_spill] sm:$0xff] %v20959_v6  ;;  %v20973_v50 = vsub.f32 %v20912_v44, %v26603_v55  ;;  %v26605_v55 = vand.u32 4294901760, %v20557_v48  ;;  %v20996_v39 = vsub.f32 %v20565_v16, %v26606_v63  ;;  %v26607_v52 = vld [vmem:[#allocation25_spill] sm:$0xff]  ;;  %v24401_v28 = vand.u32 4294901760, %v20978_v53 }
 0x3e6   :  { %26602 = vst [vmem:[#allocation36_spill] sm:$0xff] %v20968_v58  ;;  %13579 = vmatprep.subr.bf16.mxu0 %v26607_v52  ;;  %13101 = vmatpush1.bf16.msra.mxu1 %v13100_v18  ;;  %v24406_v49 = vand.u32 4294901760, %v20954_v12  ;;  %v26610_v18 = vld [vmem:[#allocation71_spill] sm:$0xff]  ;;  %v26611_v52 = vand.u32 4294901760, %v20983_v19  ;;  %v26612_v16 = vand.u32 4294901760, %v20959_v6  ;;  %v26619_v35 = vand.u32 4294901760, %v20968_v58 }
 0x3e7   :  { %v20991_v33 = vsub.f32 %v20557_v48, %v26605_v55  ;;  %v21012_v55 = vsub.f32 %v20605_v31, %v26608_v36  ;;  %v26609_v48 = vld [vmem:[#allocation80_spill] sm:$0xff]  ;;  %13103 = vmatprep.subr.bf16.mxu1 %v13102_v20  ;;  %v24407_v36 = vand.u32 4294901760, %v21001_v62  ;;  %v21031_v37 = vsub.f32 %v20978_v53, %v24401_v28  ;;  %v26614_v31 = vld [vmem:[#allocation81_spill] sm:$0xff] }
 0x3e8   :  { %8084 = vmatprep.mubr.f32.mxu0 %v26609_v48  ;;  %6354 = vmatprep.mubr.f32.mxu1 %v26609_v48  ;;  %v21036_v20 = vsub.f32 %v20983_v19, %v26611_v52  ;;  %v21042_v63 = vpack.c.bf16 %v26612_v16, %v24406_v49  ;;  %v26617_v52 = vand.u32 4294901760, %v21006_v47  ;;  %v26620_v16 = vand.u32 4294901760, %v20973_v50 }
 0x3e9   :  { %13581 = vmatpush1.bf16.msra.mxu0 %v26610_v18  ;;  %v26615_v18 = vand.u32 4294901760, %v20607_v4  ;;  %v21051_v28 = vsub.f32 %v21001_v62, %v24407_v36  ;;  %v13110_v36 = vpack.c.bf16 %v6151_v8, %v6139_v15  ;;  %v24416_v6 = vand.u32 4294901760, %v20627_v2 }
 0x3ea   :  { %26613 = vst [vmem:[#allocation32_spill] sm:$0xff] %v21042_v63  ;;  %13583 = vmatprep.subr.bf16.mxu0 %v26614_v31  ;;  %v21056_v13 = vsub.f32 %v21006_v47, %v26617_v52  ;;  %v21062_v49 = vpack.c.bf16 %v26620_v16, %v26619_v35  ;;  %13105 = vmatpush1.bf16.msra.mxu1 %v20884_v61  ;;  %v26622_v31 = vand.u32 4294901760, %v20869_v54  ;;  %v6169_v12 = vand.u32 4294901760, %v20991_v33  ;;  %v26624_v16 = vld [vmem:[#allocation84_spill] sm:$0xff] }
 0x3eb   :  { %v6198_v48 = vsub.f32 %v20607_v4, %v26615_v18  ;;  %26616 = vst [vmem:[#allocation40_spill] sm:$0xff] %v21051_v28  ;;  %v26623_v18 = vand.u32 4294901760, %v20874_v34  ;;  %v13112_v4 = vpack.c.bf16 %v6157_v14, %v6145_v25  ;;  %13107 = vmatprep.subr.bf16.mxu1 %v13106_v0  ;;  %v13114_v52 = vpack.c.bf16 %v6175_v45, %v6163_v23  ;;  %v26626_v0 = vld [vmem:[#allocation88_spill] sm:$0xff] }
 0x3ec   :  { %26618 = vst [vmem:[#allocation42_spill] sm:$0xff] %v21056_v13  ;;  %26621 = vst [vmem:[#allocation43_spill] sm:$0xff] %v21062_v49  ;;  %v6181_v58 = vand.u32 4294901760, %v20996_v39  ;;  %v24417_v35 = vand.u32 4294901760, %v20630_v43  ;;  %v6187_v61 = vand.u32 4294901760, %v21012_v55  ;;  %v26625_v54 = vand.u32 4294901760, %v20611_v56 }
 0x3ed   :  { %v13108_v63 = vpack.c.bf16 %v26623_v18, %v26622_v31  ;;  %13585 = vmatpush1.bf16.msra.mxu0 %v26624_v16  ;;  %v24419_v15 = vand.u32 4294901760, %v21031_v37  ;;  %v24418_v8 = vand.u32 4294901760, %v21036_v20  ;;  %v6199_v25 = vand.u32 4294901760, %v6198_v48  ;;  %v26635_v55 = vld [vmem:[#allocation15_spill] sm:$0xff] }
 0x3ee   :  { %v6192_v34 = vsub.f32 %v20611_v56, %v26625_v54  ;;  %13587 = vmatprep.subr.bf16.mxu0 %v26626_v0  ;;  %v26627_v33 = vand.u32 4294901760, %v20613_v41  ;;  %v24421_v14 = vand.u32 4294901760, %v21051_v28  ;;  %v24420_v23 = vand.u32 4294901760, %v21056_v13  ;;  %v26646_v31 = vld [vmem:[#allocation123_spill] sm:$0xff]  ;;  %v26654_v28 = vld [vmem:[#allocation18_spill] sm:$0xff] }
 0x3ef   :  { %13109 = vmatpush1.bf16.msra.mxu1 %v13108_v63  ;;  %v6210_v45 = vsub.f32 %v20627_v2, %v24416_v6  ;;  %v21095_v48 = vpack.c.bf16 %v24418_v8, %v24419_v15  ;;  %v6222_v18 = vsub.f32 %v20630_v43, %v24417_v35  ;;  %v26630_v0 = vand.u32 4294901760, %v20670_v17  ;;  %v26632_v35 = vld [vmem:[#allocation91_spill] sm:$0xff]  ;;  %v26634_v63 = vld [vmem:[#allocation92_spill] sm:$0xff] }
 0x3f0   :  { %v6204_v39 = vsub.f32 %v20613_v41, %v26627_v33  ;;  %13111 = vmatprep.subr.bf16.mxu1 %v13110_v36  ;;  %v21106_v54 = vpack.c.bf16 %v24420_v23, %v24421_v14  ;;  %v26631_v36 = vand.u32 4294901760, %v20675_v60  ;;  %v26633_v15 = vld [vmem:[#allocation119_spill] sm:$0xff]  ;;  %v13116_v23 = vpack.c.bf16 %v6181_v58, %v6169_v12 }
 0x3f1   :  { %26628 = vst [vmem:[#allocation101_spill] sm:$0xff] %v21095_v48  ;;  %v21111_v33 = vsub.f32 %v20670_v17, %v26630_v0  ;;  %13589 = vmatpush1.bf16.msra.mxu0 %v26632_v35  ;;  %v6193_v14 = vand.u32 4294901760, %v6192_v34  ;;  %v13118_v0 = vpack.c.bf16 %v6199_v25, %v6187_v61  ;;  %v26637_v35 = vand.u32 4294901760, %v20636_v24  ;;  %v26640_v61 = vld [vmem:[#allocation121_spill] sm:$0xff]  ;;  %v26648_v49 = vld [vmem:[#allocation99_spill] sm:$0xff] }
 0x3f2   :  { %26629 = vst [vmem:[#allocation47_spill] sm:$0xff] %v21106_v54  ;;  %v21116_v6 = vsub.f32 %v20675_v60, %v26631_v36  ;;  %13591 = vmatprep.subr.bf16.mxu0 %v26634_v63  ;;  %v6205_v54 = vand.u32 4294901760, %v6204_v39  ;;  %v26636_v60 = vand.u32 4294901760, %v20634_v22  ;;  %v6211_v16 = vand.u32 4294901760, %v6210_v45 }
 0x3f3   :  { %13113 = vmatpush1.bf16.msra.mxu1 %v13112_v4  ;;  %v6228_v8 = vsub.f32 %v20636_v24, %v26637_v35  ;;  %v6223_v63 = vand.u32 4294901760, %v6222_v18  ;;  %v26638_v12 = vand.u32 4294901760, %v20661_v9  ;;  %v26639_v34 = vand.u32 4294901760, %v20663_v32 }
 0x3f4   :  { %v6216_v36 = vsub.f32 %v20634_v22, %v26636_v60  ;;  %13115 = vmatprep.subr.bf16.mxu1 %v13114_v52  ;;  %v26641_v25 = vand.u32 4294901760, %v26640_v61  ;;  %v26642_v60 = vld [vmem:[#allocation96_spill] sm:$0xff]  ;;  %v26643_v35 = vand.u32 4294901760, %v20665_v3  ;;  %v26644_v45 = vand.u32 4294901760, %v26633_v15  ;;  %v26653_v22 = vld [vmem:[#allocation75_spill] sm:$0xff] }
 0x3f5   :  { %v6234_v58 = vsub.f32 %v20661_v9, %v26638_v12  ;;  %v6246_v4 = vsub.f32 %v20663_v32, %v26639_v34  ;;  %13593 = vmatpush1.bf16.msra.mxu0 %v26642_v60  ;;  %v26645_v12 = vld [vmem:[#allocation6_spill] sm:$0xff]  ;;  %v26647_v48 = vand.u32 4294901760, %v26646_v31  ;;  %v26650_v60 = vand.u32 4294901760, %v26635_v55 }
 0x3f6   :  { %v21139_v39 = vsub.f32 %v26640_v61, %v26641_v25  ;;  %v6240_v52 = vsub.f32 %v20665_v3, %v26643_v35  ;;  %v6252_v18 = vsub.f32 %v26633_v15, %v26644_v45  ;;  %13595 = vmatprep.subr.bf16.mxu0 %v26648_v49  ;;  %v26649_v61 = vand.u32 4294901760, %v20703_v26  ;;  %v26651_v3 = vld [vmem:[#allocation7_spill] sm:$0xff]  ;;  %v26652_v9 = vld [vmem:[#allocation130_spill] sm:$0xff] }
 0x3f7   :  { %v21152_v34 = vsub.f32 %v26646_v31, %v26647_v48  ;;  %v6270_v35 = vsub.f32 %v26635_v55, %v26650_v60  ;;  %13117 = vmatpush1.bf16.msra.mxu1 %v13116_v23  ;;  %v13120_v45 = vpack.c.bf16 %v6205_v54, %v6193_v14  ;;  %v6217_v17 = vand.u32 4294901760, %v6216_v36  ;;  %v26656_v60 = vld [vmem:[#allocation102_spill] sm:$0xff]  ;;  %v26658_v54 = vld [vmem:[#allocation104_spill] sm:$0xff] }
 0x3f8   :  { %v6258_v25 = vsub.f32 %v20703_v26, %v26649_v61  ;;  %v6229_v15 = vand.u32 4294901760, %v6228_v8  ;;  %v24448_v24 = vand.u32 4294901760, %v26652_v9  ;;  %13119 = vmatprep.subr.bf16.mxu1 %v13118_v0  ;;  %v13122_v31 = vpack.c.bf16 %v6223_v63, %v6211_v16 }
 0x3f9   :  { %v6235_v48 = vand.u32 4294901760, %v6234_v58  ;;  %v6247_v49 = vand.u32 4294901760, %v6246_v4  ;;  %v24447_v13 = vand.u32 4294901760, %v26653_v22  ;;  %v26655_v61 = vand.u32 4294901760, %v26654_v28  ;;  %13597 = vmatpush1.bf16.msra.mxu0 %v26656_v60 }
 0x3fa   :  { %v6241_v32 = vand.u32 4294901760, %v6240_v52  ;;  %v6253_v23 = vand.u32 4294901760, %v6252_v18  ;;  %v26657_v14 = vand.u32 4294901760, %v26645_v12  ;;  %13599 = vmatprep.subr.bf16.mxu0 %v26658_v54  ;;  %v6259_v16 = vand.u32 4294901760, %v6258_v25 }
 0x3fb   :  { %v21167_v26 = vsub.f32 %v26654_v28, %v26655_v61  ;;  %v6271_v0 = vand.u32 4294901760, %v6270_v35  ;;  %v26659_v36 = vand.u32 4294901760, %v26651_v3  ;;  %v24446_v58 = vand.u32 4294901760, %v21111_v33  ;;  %13121 = vmatpush1.bf16.msra.mxu1 %v13120_v45 }
 0x3fc   :  { %v6264_v8 = vsub.f32 %v26645_v12, %v26657_v14  ;;  %v26660_v28 = vand.u32 4294901760, %v20720_v42  ;;  %v13124_v52 = vpack.c.bf16 %v6229_v15, %v6217_v17  ;;  %v6282_v18 = vsub.f32 %v26652_v9, %v24448_v24  ;;  %13123 = vmatprep.subr.bf16.mxu1 %v13122_v31  ;;  %v26662_v15 = vld [vmem:[#allocation83_spill] sm:$0xff] }
 0x3fd   :  { %v6276_v63 = vsub.f32 %v26651_v3, %v26659_v36  ;;  %v24441_v25 = vand.u32 4294901760, %v21116_v6  ;;  %v13126_v35 = vpack.c.bf16 %v6247_v49, %v6235_v48  ;;  %v6294_v61 = vsub.f32 %v26653_v22, %v24447_v13  ;;  %v26698_v13 = vld [vmem:[#allocation11_spill] sm:$0xff] }
 0x3fe   :  { %v21181_v4 = vsub.f32 %v20720_v42, %v26660_v28  ;;  %v24440_v60 = vand.u32 4294901760, %v21139_v39  ;;  %v24439_v14 = vand.u32 4294901760, %v21152_v34  ;;  %v26661_v42 = vld [vmem:[#allocation128_spill] sm:$0xff]  ;;  %v13128_v45 = vpack.c.bf16 %v6253_v23, %v6241_v32 }
 0x3ff   :  { %13601 = vmatpush1.bf16.msra.mxu0 %v26661_v42  ;;  %v13130_v17 = vpack.c.bf16 %v6271_v0, %v6259_v16  ;;  %v6265_v54 = vand.u32 4294901760, %v6264_v8  ;;  %v6277_v36 = vand.u32 4294901760, %v6276_v63  ;;  %v6288_v31 = vsub.f32 %v21111_v33, %v24446_v58  ;;  %13125 = vmatpush1.bf16.msra.mxu1 %v13124_v52  ;;  %v26663_v0 = vld [vmem:[#allocation61_spill] sm:$0xff]  ;;  %v26664_v52 = vld [vmem:[#allocation64_spill] sm:$0xff] }
 0x400   :  { %13603 = vmatprep.subr.bf16.mxu0 %v26662_v15  ;;  %v6283_v48 = vand.u32 4294901760, %v6282_v18  ;;  %v6300_v49 = vsub.f32 %v21116_v6, %v24441_v25  ;;  %v24442_v28 = vand.u32 4294901760, %v21167_v26  ;;  %v24445_v42 = vand.u32 4294901760, %v21181_v4  ;;  %13127 = vmatprep.subr.bf16.mxu1 %v13126_v35  ;;  %v26665_v25 = vld [vmem:[#allocation21_spill] sm:$0xff] }
 0x401   :  { %v6295_v32 = vand.u32 4294901760, %v6294_v61  ;;  %v6306_v23 = vsub.f32 %v21139_v39, %v24440_v60  ;;  %v6318_v8 = vsub.f32 %v21152_v34, %v24439_v14  ;;  %v21210_v16 = vsub.f32 %v20781_v1, %v20809_v40 }
 0x402   :  { %v21215_v63 = vsub.f32 %v20812_v59, %v20852_v46  ;;  %v13132_v18 = vpack.c.bf16 %v6277_v36, %v6265_v54  ;;  %v6289_v35 = vand.u32 4294901760, %v6288_v31  ;;  %v6301_v61 = vand.u32 4294901760, %v6300_v49  ;;  %v26667_v54 = vld [vmem:[#allocation98_spill] sm:$0xff] }
 0x403   :  { %13605 = vmatpush1.bf16.msra.mxu0 %v26663_v0  ;;  %13129 = vmatpush1.bf16.msra.mxu1 %v13128_v45  ;;  %v6312_v15 = vsub.f32 %v21167_v26, %v24442_v28  ;;  %v6324_v1 = vsub.f32 %v21181_v4, %v24445_v42  ;;  %v13134_v0 = vpack.c.bf16 %v6295_v32, %v6283_v48  ;;  %v6307_v14 = vand.u32 4294901760, %v6306_v23  ;;  %v26666_v45 = vld [vmem:[#allocation30_spill] sm:$0xff]  ;;  %v26668_v23 = vld [vmem:[#allocation107_spill] sm:$0xff] }
 0x404   :  { %13607 = vmatprep.subr.bf16.mxu0 %v26664_v52  ;;  %13131 = vmatprep.subr.bf16.mxu1 %v13130_v17  ;;  %v6319_v60 = vand.u32 4294901760, %v6318_v8  ;;  %v24444_v59 = vand.u32 4294901760, %v21210_v16  ;;  %v21226_v52 = vand.u32 4294901760, %v26665_v25  ;;  %v13136_v36 = vpack.c.bf16 %v6301_v61, %v6289_v35  ;;  %v26669_v8 = vld [vmem:[#allocation112_spill] sm:$0xff] }
 0x405   :  { %v6313_v31 = vand.u32 4294901760, %v6312_v15  ;;  %v6325_v49 = vand.u32 4294901760, %v6324_v1  ;;  %v24443_v28 = vand.u32 4294901760, %v21215_v63  ;;  %v26671_v15 = vld [vmem:[#allocation122_spill] sm:$0xff]  ;;  %v26672_v1 = vld [vmem:[#allocation37_spill] sm:$0xff]  ;;  %v26692_v42 = vand.u32 4294901760, %v20983_v19 }
 0x406   :  { %v13138_v17 = vpack.c.bf16 %v6319_v60, %v6307_v14  ;;  %v6330_v48 = vsub.f32 %v21210_v16, %v24444_v59  ;;  %v21236_v32 = vsub.f32 %v26665_v25, %v21226_v52  ;;  %v26670_v14 = vld [vmem:[#allocation116_spill] sm:$0xff]  ;;  %v26685_v59 = vld [vmem:[#allocation50_spill] sm:$0xff]  ;;  %v26699_v24 = vand.u32 4294901760, %v26698_v13 }
 0x407   :  { %13609 = vmatpush1.bf16.msra.mxu0 %v26666_v45  ;;  %13133 = vmatpush1.bf16.msra.mxu1 %v13132_v18  ;;  %v13140_v18 = vpack.c.bf16 %v6325_v49, %v6313_v31  ;;  %v6336_v35 = vsub.f32 %v21215_v63, %v24443_v28  ;;  %v26673_v45 = vld [vmem:[#allocation124_spill] sm:$0xff]  ;;  %v26683_v28 = vld [vmem:[#allocation41_spill] sm:$0xff] }
 0x408   :  { %13611 = vmatprep.subr.bf16.mxu0 %v26667_v54  ;;  %13135 = vmatprep.subr.bf16.mxu1 %v13134_v0  ;;  %v6331_v60 = vand.u32 4294901760, %v6330_v48  ;;  %v24449_v61 = vand.u32 4294901760, %v21236_v32  ;;  %v13142_v0 = vpack.c.bf16 %v26560_v10, %v26672_v1  ;;  %v26674_v54 = vld [vmem:[#allocation14_spill] sm:$0xff]  ;;  %v26677_v48 = vld [vmem:[#allocation23_spill] sm:$0xff] }
 0x409   :  { %v6337_v25 = vand.u32 4294901760, %v6336_v35  ;;  %v26680_v35 = vand.u32 4294901760, %v20895_v57  ;;  %v26686_v57 = vand.u32 4294901760, %v20907_v38  ;;  %v13154_v38 = vpack.c.bf16 %v20505_v27, %v20502_v5  ;;  %v9213_v19 = vld [vmem:[%s23439_s1 + $0x108] sm:$0xff]  ;;  %v26711_v5 = vld [vmem:[#allocation27_spill] sm:$0xff] }
 0x40a   :  { %v9362_v49 = vsub.f32 %v21236_v32, %v24449_v61  ;;  %v26709_v27 = vand.u32 4294901760, %v21031_v37 }
 0x40b   :  { %13613 = vmatpush1.bf16.msra.mxu0 %v26668_v23  ;;  %13137 = vmatpush1.bf16.msra.mxu1 %v13136_v36  ;;  %v26675_v36 = vld [vmem:[#allocation17_spill] sm:$0xff]  ;;  %v26678_v23 = vld [vmem:[#allocation100_spill] sm:$0xff] }
 0x40c   :  { %13615 = vmatprep.subr.bf16.mxu0 %v26669_v8  ;;  %13139 = vmatprep.subr.bf16.mxu1 %v13138_v17  ;;  %v13144_v31 = vpack.c.bf16 %v26675_v36, %v26674_v54  ;;  %v26676_v17 = vld [vmem:[#allocation74_spill] sm:$0xff]  ;;  %v13146_v8 = vpack.c.bf16 %v26678_v23, %v26677_v48 }
 0x40f   :  { %13617 = vmatpush1.bf16.msra.mxu0 %v26670_v14  ;;  %13141 = vmatpush1.bf16.msra.mxu1 %v13140_v18  ;;  %v26679_v18 = vand.u32 4294901760, %v20890_v11  ;;  %v26681_v14 = vld [vmem:[#allocation131_spill] sm:$0xff] }
 0x410   :  { %13619 = vmatprep.subr.bf16.mxu0 %v26671_v15  ;;  %6332 = vmatprep.subr.mxu1 %v6331_v60  ;;  %v9363_v15 = vand.u32 4294901760, %v9362_v49  ;;  %v26689_v49 = vld [vmem:[#allocation49_spill] sm:$0xff] }
 0x411   :  { %v21261_v60 = vpack.c.bf16 %v26680_v35, %v26679_v18  ;;  %v26690_v35 = vld [vmem:[#allocation51_spill] sm:$0xff] }
 0x413   :  { %13621 = vmatpush1.bf16.msra.mxu0 %v26673_v45  ;;  %6338 = vmatpush1.msra.mxu1 %v6337_v25  ;;  %v26682_v45 = vld [vmem:[#allocation136_spill] sm:$0xff] }
 0x414   :  { %8066 = vmatprep.subr.mxu0 %v26676_v17  ;;  %13143 = vmatprep.subr.bf16.mxu1 %v13142_v0  ;;  %v13148_v17 = vpack.c.bf16 %v26683_v28, %v26682_v45  ;;  %v26684_v25 = vld [vmem:[#allocation44_spill] sm:$0xff]  ;;  %v26687_v0 = vand.u32 4294901760, %v20912_v44 }
 0x415   :  { %6355 = vmatmul.mubr.f32.vlgmr.msra.gmra.mrb[6].mxu1 %v26600_v51  ;;  %v13150_v11 = vpack.c.bf16 %v26685_v59, %v26684_v25  ;;  %v26693_v44 = vld [vmem:[#allocation16_spill] sm:$0xff] }
 0x416   :  { %13145 = vmatpush1.bf16.msra.mxu1 %v13144_v31  ;;  %v21275_v18 = vpack.c.bf16 %v26687_v0, %v26686_v57  ;;  %v26688_v31 = vld [vmem:[#allocation82_spill] sm:$0xff]  ;;  %v26696_v0 = vld [vmem:[#allocation9_spill] sm:$0xff] }
 0x417   :  { %8068 = vmatpush1.msra.mxu0 %v26681_v14  ;;  %13147 = vmatprep.subr.bf16.mxu1 %v13146_v8  ;;  %v13152_v14 = vpack.c.bf16 %v26690_v35, %v26689_v49  ;;  %v26691_v8 = vand.u32 4294901760, %v20978_v53  ;;  %v13158_v53 = vpack.c.bf16 %v20525_v7, %v20523_v30  ;;  %v21318_v7 = vand.u32 4294901760, %v9213_v19  ;;  %v26712_v35 = vld [vmem:[#allocation29_spill] sm:$0xff] }
 0x418   :  { %8085 = vmatmul.mubr.f32.vlgmr.msra.gmra.mrb[6].mxu0 %v26600_v51  ;;  %13911 = vmatprep.subr.bf16.mxu0 %v21261_v60  ;;  %v26701_v51 = vld [vmem:[#allocation63_spill] sm:$0xff] }
 0x419   :  { %9364 = vmatprep.mubr.f32.mxu0 %v9363_v15  ;;  %6527 = vmatprep.mubr.f32.mxu1 %v26688_v31  ;;  %v21284_v58 = vpack.c.bf16 %v26692_v42, %v26691_v8  ;;  %v21290_v15 = vand.u32 4294901760, %v26693_v44  ;;  %v26694_v42 = vand.u32 4294901760, %v21001_v62  ;;  %v26700_v31 = vld [vmem:[#allocation78_spill] sm:$0xff] }
 0x41a   :  { %13149 = vmatpush1.bf16.msra.mxu1 %v13148_v17  ;;  %v13156_v17 = vpack.c.bf16 %v20521_v29, %v20508_v21  ;;  %v13160_v62 = vpack.c.bf16 %v26701_v51, %v26700_v31  ;;  %v26706_v51 = vand.u32 4294901760, %v20973_v50  ;;  %v26708_v21 = vld [vmem:[#allocation13_spill] sm:$0xff] }
 0x41b   :  { %13151 = vmatprep.subr.bf16.mxu1 %v13150_v11  ;;  %v26695_v11 = vand.u32 4294901760, %v21006_v47  ;;  %v21314_v61 = vsub.f32 %v26693_v44, %v21290_v15  ;;  %v26702_v47 = vld [vmem:[#allocation65_spill] sm:$0xff]  ;;  %v26704_v44 = vld [vmem:[#allocation36_spill] sm:$0xff] }
 0x41c   :  { %v26705_v29 = vand.u32 4294901760, %v26704_v44  ;;  %v9396_v31 = vsub.f32 %v20973_v50, %v26706_v51  ;;  %v13166_v51 = vpack.c.bf16 %v26712_v35, %v26711_v5 }
 0x41d   :  { %v21304_v57 = vpack.c.bf16 %v26695_v11, %v26694_v42  ;;  %v26703_v42 = vld [vmem:[#allocation67_spill] sm:$0xff]  ;;  %v26713_v59 = vand.u32 4294901760, %v21314_v61 }
 0x41e   :  { %13913 = vmatpush1.bf16.xpose.msra.mxu0 %v21275_v18  ;;  %13153 = vmatpush1.bf16.msra.mxu1 %v13152_v14  ;;  %v26697_v14 = vand.u32 4294901760, %v26696_v0  ;;  %v13162_v11 = vpack.c.bf16 %v26703_v42, %v26702_v47  ;;  %v9397_v47 = vand.u32 4294901760, %v9396_v31 }
 0x41f   :  { %13915 = vmatprep.subr.bf16.mxu0 %v21284_v58  ;;  %13155 = vmatprep.subr.bf16.mxu1 %v13154_v38  ;;  %v9390_v38 = vsub.f32 %v26698_v13, %v26699_v24  ;;  %v9212_v24 = vld [vmem:[%s23439_s1 + $0x100] sm:$0xff] }
 0x420   :  { %v9378_v8 = vsub.f32 %v26696_v0, %v26697_v14 }
 0x421   :  { %v9391_v30 = vand.u32 4294901760, %v9390_v38  ;;  %v26710_v38 = vand.u32 4294901760, %v21036_v20 }
 0x422   :  { %13157 = vmatpush1.bf16.msra.mxu1 %v13156_v17  ;;  %v9379_v14 = vand.u32 4294901760, %v9378_v8  ;;  %v9384_v17 = vsub.f32 %v26704_v44, %v26705_v29  ;;  %v9402_v8 = vsub.f32 %v21031_v37, %v26709_v27  ;;  %v9368_v27 = vsub.f32 %v21314_v61, %v26713_v59 }
 0x423   :  { %13159 = vmatprep.subr.bf16.mxu1 %v13158_v53  ;;  %v26707_v53 = vld [vmem:[#allocation10_spill] sm:$0xff]  ;;  %v9414_v29 = vsub.f32 %v21036_v20, %v26710_v38  ;;  %v13170_v38 = vpack.c.bf16 %v20630_v43, %v20627_v2  ;;  %v26720_v2 = vld [vmem:[#allocation113_spill] sm:$0xff] }
 0x424   :  { %v13164_v42 = vpack.c.bf16 %v26708_v21, %v26707_v53  ;;  %v13168_v21 = vpack.c.bf16 %v20613_v41, %v20611_v56  ;;  %v13918_v53 = vpack.c.bf16 %v9391_v30, %v9379_v14  ;;  %v9385_v49 = vand.u32 4294901760, %v9384_v17  ;;  %v26714_v30 = vld [vmem:[#allocation40_spill] sm:$0xff] }
 0x425   :  { %v9403_v25 = vand.u32 4294901760, %v9402_v8  ;;  %v9415_v28 = vand.u32 4294901760, %v9414_v29  ;;  %v26715_v14 = vand.u32 4294901760, %v26714_v30  ;;  %v9369_v8 = vand.u32 4294901760, %v9368_v27  ;;  %v26719_v29 = vld [vmem:[#allocation132_spill] sm:$0xff] }
 0x426   :  { %13917 = vmatpush1.bf16.xpose.msra.mxu0 %v21304_v57  ;;  %13161 = vmatpush1.bf16.msra.mxu1 %v13160_v62  ;;  %v21344_v62 = vand.u32 4294901760, %v9212_v24  ;;  %v13920_v41 = vpack.c.bf16 %v9397_v47, %v9385_v49  ;;  %v26721_v49 = vld [vmem:[#allocation114_spill] sm:$0xff] }
 0x427   :  { %9302 = vmatprep.subr.mxu0 %v21318_v7  ;;  %13163 = vmatprep.subr.bf16.mxu1 %v13162_v11  ;;  %v21352_v11 = vsub.f32 %v9213_v19, %v21318_v7  ;;  %v9408_v31 = vsub.f32 %v26714_v30, %v26715_v14  ;;  %v26718_v19 = vld [vmem:[#allocation109_spill] sm:$0xff]  ;;  %v13922_v56 = vpack.c.bf16 %v9415_v28, %v9403_v25 }
 0x428   :  { %v13174_v47 = vpack.c.bf16 %v26721_v49, %v26720_v2  ;;  %v21369_v14 = vsub.f32 %v9212_v24, %v21344_v62  ;;  %v26724_v25 = vld [vmem:[#allocation77_spill] sm:$0xff] }
 0x429   :  { %v24462_v43 = vand.u32 4294901760, %v21352_v11 }
 0x42a   :  { %13165 = vmatpush1.bf16.msra.mxu1 %v13164_v42  ;;  %v26716_v42 = vld [vmem:[#allocation42_spill] sm:$0xff] }
 0x42b   :  { %13167 = vmatprep.subr.bf16.mxu1 %v13166_v51  ;;  %v26717_v17 = vand.u32 4294901760, %v26716_v42  ;;  %v13172_v51 = vpack.c.bf16 %v26719_v29, %v26718_v19  ;;  %v9426_v28 = vsub.f32 %v21352_v11, %v24462_v43  ;;  %v26748_v43 = vand.u32 4294901760, %v21314_v61 }
 0x42d   :  { %v9420_v59 = vsub.f32 %v26716_v42, %v26717_v17  ;;  %v26723_v17 = vld [vmem:[#allocation119_spill] sm:$0xff] }
 0x42e   :  { %9304 = vmatpush1.xpose.msra.mxu0 %v21344_v62  ;;  %13169 = vmatpush1.bf16.msra.mxu1 %v13168_v21  ;;  %v9409_v21 = vand.u32 4294901760, %v9408_v31  ;;  %v13180_v31 = vpack.c.bf16 %v26651_v3, %v26645_v12 }
 0x42f   :  { %13919 = vmatprep.subr.bf16.mxu0 %v13918_v53  ;;  %13171 = vmatprep.subr.bf16.mxu1 %v13170_v38  ;;  %v9421_v27 = vand.u32 4294901760, %v9420_v59  ;;  %v26722_v53 = vld [vmem:[#allocation115_spill] sm:$0xff]  ;;  %v13178_v38 = vpack.c.bf16 %v26635_v55, %v26724_v25  ;;  %v9427_v59 = vand.u32 4294901760, %v9426_v28  ;;  %v13928_v28 = vpack.c.bf16 %v20973_v50, %v26704_v44  ;;  %v26727_v50 = vld [vmem:[#allocation34_spill] sm:$0xff] }
 0x430   :  { %v13176_v29 = vpack.c.bf16 %v26723_v17, %v26722_v53  ;;  %v26728_v44 = vld [vmem:[#allocation86_spill] sm:$0xff] }
 0x431   :  { %9370 = vmatmul.mubr.f32.vlgmr.msra.gmra.mrb[8].mxu0 %v9369_v8  ;;  %v13924_v24 = vpack.c.bf16 %v9421_v27, %v9409_v21  ;;  %v13188_v21 = vpack.c.bf16 %v21181_v4, %v21167_v26  ;;  %v13926_v27 = vpack.c.bf16 %v26698_v13, %v26696_v0  ;;  %v26725_v13 = vld [vmem:[#allocation28_spill] sm:$0xff]  ;;  %v26726_v0 = vmov 5.605165e-06  }
 0x432   :  { %13921 = vmatpush1.bf16.xpose.msra.mxu0 %v13920_v41  ;;  %9490 = vmatprep.mubr.f32.mxu0 %v21226_v52  ;;  %v24461_v41 = vand.u32 4294901760, %v21369_v14 }
 0x433   :  { %13173 = vmatpush1.bf16.msra.mxu1 %v13172_v51  ;;  %13923 = vmatprep.subr.bf16.mxu0 %v13922_v56  ;;  %v13182_v56 = vpack.c.bf16 %v26653_v22, %v26652_v9  ;;  %v13184_v51 = vpack.c.bf16 %v21116_v6, %v21111_v33 }
 0x434   :  { %13175 = vmatprep.subr.bf16.mxu1 %v13174_v47  ;;  %v9432_v8 = vsub.f32 %v21369_v14, %v24461_v41  ;;  %v26747_v41 = vld [vmem:[#allocation32_spill] sm:$0xff] }
 0x436   :  { %v9433_v47 = vand.u32 4294901760, %v9432_v8  ;;  %v26734_v8 = vld [vmem:[#allocation62_spill] sm:$0xff] }
 0x437   :  { %13177 = vmatpush1.bf16.msra.mxu1 %v13176_v29  ;;  %v13186_v29 = vpack.c.bf16 %v21152_v34, %v21139_v39 }
 0x438   :  { %13179 = vmatprep.subr.bf16.mxu1 %v13178_v38  ;;  %v13930_v38 = vpack.c.bf16 %v21036_v20, %v21031_v37  ;;  %v13932_v37 = vpack.c.bf16 %v26716_v42, %v26714_v30  ;;  %v26730_v20 = vld [vmem:[#allocation39_spill] sm:$0xff]  ;;  %v26736_v30 = vld [vmem:[#allocation106_spill] sm:$0xff]  ;;  %v26737_v42 = vand.u32 4294901760, %v21236_v32 }
 0x43a   :  { %13925 = vmatpush1.bf16.xpose.msra.mxu0 %v13924_v24  ;;  %v26729_v24 = vld [vmem:[#allocation94_spill] sm:$0xff] }
 0x43b   :  { %13181 = vmatpush1.bf16.msra.mxu1 %v13180_v31  ;;  %9428 = vmatprep.subr.mxu0 %v9427_v59  ;;  %v26731_v31 = vld [vmem:[#allocation118_spill] sm:$0xff]  ;;  %v26732_v59 = vld [vmem:[#allocation48_spill] sm:$0xff] }
 0x43c   :  { %13183 = vmatprep.subr.bf16.mxu1 %v13182_v56  ;;  %v26733_v56 = vld [vmem:[#allocation57_spill] sm:$0xff] }
 0x43f   :  { %13185 = vmatpush1.bf16.msra.mxu1 %v13184_v51  ;;  %v26735_v51 = vld [vmem:[#allocation20_spill] sm:$0xff] }
 0x440   :  { %13187 = vmatprep.subr.bf16.mxu1 %v13186_v29  ;;  %v26738_v29 = vld [vmem:[#allocation31_spill] sm:$0xff] }
 0x442   :  { %9434 = vmatpush1.xpose.msra.mxu0 %v9433_v47  ;;  %v26739_v47 = vld [vmem:[#allocation8_spill] sm:$0xff] }
 0x443   :  { %13189 = vmatpush1.bf16.msra.mxu1 %v13188_v21  ;;  %13927 = vmatprep.subr.bf16.mxu0 %v13926_v27  ;;  %v26740_v21 = vld [vmem:[#allocation22_spill] sm:$0xff]  ;;  %v26741_v27 = vld [vmem:[#allocation135_spill] sm:$0xff] }
 0x444   :  { %6507 = vmatprep.subr.mxu1 %v21210_v16 }
 0x445   :  { %9492 = vmatmul.mubr.f32.vlgmr.msra.gmra.mrb[8].mxu0 %v21290_v15 }
 0x446   :  { %13929 = vmatpush1.bf16.xpose.msra.mxu0 %v13928_v28  ;;  %9583 = vmatprep.mubr.f32.mxu0 %v21236_v32  ;;  %v26742_v28 = vld [vmem:[#allocation45_spill] sm:$0xff]  ;;  %v26744_v32 = vld [vmem:[#allocation111_spill] sm:$0xff] }
 0x447   :  { %6510 = vmatpush1.msra.mxu1 %v21215_v63  ;;  %13931 = vmatprep.subr.bf16.mxu0 %v13930_v38  ;;  %v26743_v38 = vld [vmem:[#allocation97_spill] sm:$0xff] }
 0x448   :  { %13191 = vmatprep.subr.bf16.mxu1 %v26725_v13  ;;  %6528 = vmatmul.mubr.f32.vlgmr.msra.gmra.mrb[6].mxu1 %v26726_v0  ;;  %v26750_v0 = vld [vmem:[#allocation43_spill] sm:$0xff] }
 0x449   :  { %13193 = vmatpush1.bf16.msra.mxu1 %v26727_v50  ;;  %6651 = vmatprep.mubr.f32.mxu1 %v26728_v44  ;;  %v26749_v44 = vld [vmem:[#allocation66_spill] sm:$0xff] }
 0x44a   :  { %13195 = vmatprep.subr.bf16.mxu1 %v26729_v24 }
 0x44d   :  { %13197 = vmatpush1.bf16.msra.mxu1 %v26730_v20 }
 0x44e   :  { %13933 = vmatpush1.bf16.xpose.msra.mxu0 %v13932_v37  ;;  %13199 = vmatprep.subr.bf16.mxu1 %v26731_v31  ;;  %v26745_v37 = vld [vmem:[#allocation117_spill] sm:$0xff] }
 0x44f   :  { %9523 = vmatprep.subr.mxu0 %v21352_v11 }
 0x451   :  { %13201 = vmatpush1.bf16.msra.mxu1 %v26732_v59 }
 0x452   :  { %13203 = vmatprep.subr.bf16.mxu1 %v26733_v56 }
 0x455   :  { %13205 = vmatpush1.bf16.msra.mxu1 %v26734_v8 }
 0x456   :  { %9526 = vmatpush1.xpose.msra.mxu0 %v21369_v14  ;;  %13207 = vmatprep.subr.bf16.mxu1 %v26735_v51 }
 0x457   :  { %13935 = vmatprep.subr.bf16.mxu0 %v21261_v60 }
 0x459   :  { %9586 = vmatmul.mubr.f32.vlgmr.msra.gmra.mrb[8].mxu0 %v21314_v61  ;;  %13209 = vmatpush1.bf16.msra.mxu1 %v26736_v30  ;;  %v26758_v61 = vand.u32 4294901760, %v26560_v10  ;;  %v26765_v10 = vand.u32 4294901760, %v26682_v45  ;;  %v26776_v45 = vld [vmem:[#allocation51_spill] sm:$0xff] }
 0x45a   :  { %13937 = vmatpush1.bf16.xpose.msra.mxu0 %v21275_v18  ;;  %9668 = vmatprep.mubr.f32.mxu0 %v26737_v42  ;;  %v26746_v42 = vld [vmem:[#allocation125_spill] sm:$0xff] }
 0x45b   :  { %13211 = vmatprep.subr.bf16.mxu1 %v26738_v29  ;;  %13939 = vmatprep.subr.bf16.mxu0 %v21284_v58 }
 0x45d   :  { %13213 = vmatpush1.bf16.msra.mxu1 %v26739_v47 }
 0x45e   :  { %13215 = vmatprep.subr.bf16.mxu1 %v26740_v21 }
 0x461   :  { %13217 = vmatpush1.bf16.msra.mxu1 %v26741_v27 }
 0x462   :  { %13941 = vmatpush1.bf16.xpose.msra.mxu0 %v21304_v57  ;;  %13219 = vmatprep.subr.bf16.mxu1 %v26742_v28  ;;  %v26754_v28 = vld [vmem:[#allocation89_spill] sm:$0xff] }
 0x463   :  { %9608 = vmatprep.subr.mxu0 %v21318_v7 }
 0x465   :  { %13221 = vmatpush1.bf16.msra.mxu1 %v26743_v38  ;;  %v26751_v38 = vld [vmem:[#allocation79_spill] sm:$0xff] }
 0x466   :  { %13223 = vmatprep.subr.bf16.mxu1 %v26744_v32  ;;  %v26752_v32 = vld [vmem:[#allocation101_spill] sm:$0xff] }
 0x469   :  { %13225 = vmatpush1.bf16.msra.mxu1 %v26745_v37  ;;  %v26753_v37 = vld [vmem:[#allocation87_spill] sm:$0xff] }
 0x46a   :  { %9610 = vmatpush1.xpose.msra.mxu0 %v21344_v62  ;;  %13227 = vmatprep.subr.bf16.mxu1 %v26746_v42  ;;  %v26755_v42 = vld [vmem:[#allocation5_spill] sm:$0xff] }
 0x46b   :  { %13943 = vmatprep.subr.bf16.mxu0 %v26747_v41  ;;  %v26756_v41 = vld [vmem:[#allocation47_spill] sm:$0xff] }
 0x46d   :  { %9672 = vmatmul.mubr.f32.vlgmr.msra.gmra.mrb[8].mxu0 %v26748_v43  ;;  %13229 = vmatpush1.bf16.msra.mxu1 %v26749_v44  ;;  %v26757_v43 = vand.u32 4294901760, %v26672_v1  ;;  %v26759_v44 = vand.u32 4294901760, %v26674_v54  ;;  %v26764_v1 = vmov 5.6028366e-06   ;;  %v26766_v54 = vld [vmem:[#allocation41_spill] sm:$0xff] }
 0x46e   :  { %13945 = vmatpush1.bf16.xpose.msra.mxu0 %v26750_v0  ;;  %9772 = vmatprep.mubr.f32.mxu0 %v21226_v52 }
 0x46f   :  { %13231 = vmatprep.subr.bf16.mxu1 %v26751_v38  ;;  %13947 = vmatprep.subr.bf16.mxu0 %v26752_v32  ;;  %v13238_v0 = vpack.c.bf16 %v26758_v61, %v26757_v43  ;;  %v26760_v38 = vand.u32 4294901760, %v26675_v36  ;;  %v26767_v43 = vand.u32 4294901760, %v26766_v54 }
 0x471   :  { %13233 = vmatpush1.bf16.msra.mxu1 %v26753_v37  ;;  %v13240_v32 = vpack.c.bf16 %v26760_v38, %v26759_v44  ;;  %v26761_v37 = vand.u32 4294901760, %v21352_v11  ;;  %v13244_v36 = vpack.c.bf16 %v26767_v43, %v26765_v10  ;;  %v26768_v44 = vld [vmem:[#allocation80_spill] sm:$0xff] }
 0x472   :  { %13235 = vmatprep.subr.bf16.mxu1 %v26754_v28  ;;  %v26762_v28 = vand.u32 4294901760, %v26677_v48  ;;  %v26769_v11 = vld [vmem:[#allocation44_spill] sm:$0xff]  ;;  %v26771_v48 = vld [vmem:[#allocation50_spill] sm:$0xff] }
 0x473   :  { %v26770_v38 = vand.u32 4294901760, %v26769_v11  ;;  %v26778_v10 = vld [vmem:[#allocation12_spill] sm:$0xff] }
 0x474   :  { %v26779_v54 = vand.u32 4294901760, %v26778_v10 }
 0x475   :  { %13237 = vmatpush1.bf16.msra.mxu1 %v26755_v42  ;;  %v26763_v42 = vand.u32 4294901760, %v26678_v23 }
 0x476   :  { %13949 = vmatpush1.bf16.xpose.msra.mxu0 %v26756_v41  ;;  %6631 = vmatprep.subr.mxu1 %v20809_v40 }
 0x477   :  { %9712 = vmatprep.subr.mxu0 %v26761_v37  ;;  %v13242_v41 = vpack.c.bf16 %v26763_v42, %v26762_v28  ;;  %v26772_v37 = vand.u32 4294901760, %v26771_v48  ;;  %v26773_v28 = vand.u32 4294901760, %v21369_v14  ;;  %v26774_v42 = vld [vmem:[#allocation49_spill] sm:$0xff]  ;;  %v26782_v14 = vld [vmem:[#allocation110_spill] sm:$0xff] }
 0x478   :  { %v26775_v61 = vand.u32 4294901760, %v26774_v42 }
 0x479   :  { %6633 = vmatpush1.msra.mxu1 %v20852_v46  ;;  %v13246_v23 = vpack.c.bf16 %v26772_v37, %v26770_v38  ;;  %v26786_v37 = vld [vmem:[#allocation127_spill] sm:$0xff] }
 0x47a   :  { %13239 = vmatprep.subr.bf16.mxu1 %v13238_v0  ;;  %6652 = vmatmul.mubr.f32.vlgmr.msra.gmra.mrb[6].mxu1 %v26764_v1  ;;  %v26777_v0 = vand.u32 4294901760, %v26776_v45  ;;  %v21498_v45 = vpop.f32.mrb[4].mxu1 }
 0x47b   :  { %13241 = vmatpush1.bf16.msra.mxu1 %v13240_v32  ;;  %6873 = vmatprep.mubr.f32.mxu1 %v26768_v44  ;;  %26790 = vst [vmem:[#allocation103_spill] sm:$0xff] %v21498_v45 }
 0x47c   :  { %13243 = vmatprep.subr.bf16.mxu1 %v13242_v41  ;;  %v13248_v32 = vpack.c.bf16 %v26777_v0, %v26775_v61  ;;  %v26780_v41 = vld [vmem:[#allocation108_spill] sm:$0xff]  ;;  %v21500_v0 = vpop.f32.mrb[5].mxu1 }
 0x47d   :  { %v26781_v43 = vand.u32 4294901760, %v26780_v41  ;;  %26791 = vst [vmem:[#allocation133_spill] sm:$0xff] %v21500_v0  ;;  %v26796_v41 = vld [vmem:[#allocation65_spill] sm:$0xff]  ;;  %v21953_v0 = vld [vmem:[%s23438_s0 + $0xa70] sm:$0xff] }
 0x47e   :  { %9716 = vmatpush1.xpose.msra.mxu0 %v26773_v28  ;;  %v26788_v28 = vld [vmem:[#allocation72_spill] sm:$0xff] }
 0x47f   :  { %13245 = vmatpush1.bf16.msra.mxu1 %v13244_v36  ;;  %13951 = vmatprep.subr.bf16.mxu0 %v21261_v60  ;;  %v13250_v11 = vpack.c.bf16 %v26781_v43, %v26779_v54  ;;  %v26783_v60 = vand.u32 4294901760, %v26782_v14  ;;  %v26784_v36 = vld [vmem:[#allocation126_spill] sm:$0xff]  ;;  %v26789_v42 = vand.u32 4294901760, %v26788_v28  ;;  %v26797_v43 = vand.u32 4294901760, %v26796_v41  ;;  %v26812_v41 = vld [vmem:[#allocation95_spill] sm:$0xff] }
 0x480   :  { %13247 = vmatprep.subr.bf16.mxu1 %v13246_v23  ;;  %v26785_v38 = vand.u32 4294901760, %v26784_v36  ;;  %v26787_v23 = vand.u32 4294901760, %v26786_v37  ;;  %v26805_v28 = vand.u32 4294901760, %v26712_v35 }
 0x481   :  { %9774 = vmatmul.mubr.f32.vlgmr.msra.gmra.mrb[8].mxu0 %v21290_v15 }
 0x482   :  { %13953 = vmatpush1.bf16.xpose.msra.mxu0 %v21275_v18  ;;  %9854 = vmatprep.mubr.f32.mxu0 %v21226_v52  ;;  %v13252_v48 = vpack.c.bf16 %v26785_v38, %v26783_v60  ;;  %v13254_v61 = vpack.c.bf16 %v26789_v42, %v26787_v23  ;;  %v26792_v52 = vld [vmem:[#allocation78_spill] sm:$0xff]  ;;  %v26802_v38 = vld [vmem:[#allocation13_spill] sm:$0xff] }
 0x483   :  { %13249 = vmatpush1.bf16.msra.mxu1 %v13248_v32  ;;  %13955 = vmatprep.subr.bf16.mxu0 %v21284_v58  ;;  %v26793_v18 = vand.u32 4294901760, %v26792_v52  ;;  %v26794_v32 = vld [vmem:[#allocation63_spill] sm:$0xff]  ;;  %v26800_v60 = vld [vmem:[#allocation10_spill] sm:$0xff]  ;;  %v26803_v37 = vand.u32 4294901760, %v26802_v38  ;;  %v26819_v38 = vand.u32 4294901760, %v26722_v53  ;;  %v26826_v53 = vand.u32 4294901760, %v26653_v22 }
 0x484   :  { %13251 = vmatprep.subr.bf16.mxu1 %v13250_v11  ;;  %v26795_v10 = vand.u32 4294901760, %v26794_v32  ;;  %v26798_v58 = vld [vmem:[#allocation67_spill] sm:$0xff]  ;;  %v26801_v36 = vand.u32 4294901760, %v26800_v60  ;;  %v26818_v60 = vand.u32 4294901760, %v26721_v49  ;;  %v26824_v49 = vand.u32 4294901760, %v26651_v3 }
 0x485   :  { %v26799_v11 = vand.u32 4294901760, %v26798_v58  ;;  %v26831_v3 = vand.u32 4294901760, %v21167_v26  ;;  %v26833_v22 = vand.u32 4294901760, %v21210_v16  ;;  %v26836_v26 = vld [vmem:[#allocation45_spill] sm:$0xff] }
 0x486   :  { %v13256_v54 = vpack.c.bf16 %v26795_v10, %v26793_v18  ;;  %v13260_v23 = vpack.c.bf16 %v26803_v37, %v26801_v36  ;;  %v26808_v18 = vld [vmem:[#allocation35_spill] sm:$0xff]  ;;  %v26810_v10 = vld [vmem:[#allocation46_spill] sm:$0xff]  ;;  %v26820_v37 = vand.u32 4294901760, %v26723_v17  ;;  %v26827_v17 = vand.u32 4294901760, %v21111_v33  ;;  %v26840_v16 = vld [vmem:[#allocation125_spill] sm:$0xff] }
 0x487   :  { %13253 = vmatpush1.bf16.msra.mxu1 %v13252_v48  ;;  %v13258_v14 = vpack.c.bf16 %v26799_v11, %v26797_v43  ;;  %v26804_v48 = vand.u32 4294901760, %v26711_v5  ;;  %v26809_v32 = vand.u32 4294901760, %v26808_v18  ;;  %v26813_v43 = vand.u32 4294901760, %v26812_v41  ;;  %v21645_v41 = vld [vmem:[%s23438_s0 + $0x778] sm:$0xff] }
 0x488   :  { %13255 = vmatprep.subr.bf16.mxu1 %v13254_v61  ;;  %v26806_v61 = vld [vmem:[#allocation33_spill] sm:$0xff]  ;;  %v26814_v5 = vand.u32 4294901760, %v26718_v19  ;;  %v26821_v19 = vand.u32 4294901760, %v26724_v25  ;;  %v26828_v25 = vand.u32 4294901760, %v21116_v6  ;;  %v26834_v6 = vand.u32 4294901760, %v21215_v63  ;;  %v26841_v63 = vld [vmem:[#allocation66_spill] sm:$0xff] }
 0x489   :  { %v13262_v42 = vpack.c.bf16 %v26805_v28, %v26804_v48  ;;  %v26807_v52 = vand.u32 4294901760, %v26806_v61  ;;  %v26835_v33 = vmov 0.0050964355  }
 0x48a   :  { %13957 = vmatpush1.bf16.xpose.msra.mxu0 %v21304_v57  ;;  %v13280_v61 = vpack.c.bf16 %v26828_v25, %v26827_v17 }
 0x48b   :  { %13257 = vmatpush1.bf16.msra.mxu1 %v13256_v54  ;;  %9796 = vmatprep.subr.mxu0 %v21318_v7  ;;  %v13264_v57 = vpack.c.bf16 %v26809_v32, %v26807_v52  ;;  %v26811_v54 = vand.u32 4294901760, %v26810_v10  ;;  %v26815_v7 = vld [vmem:[#allocation132_spill] sm:$0xff]  ;;  %v21639_v10 = vld [vmem:[%s23438_s0 + $0x730] sm:$0xff] }
 0x48c   :  { %13259 = vmatprep.subr.bf16.mxu1 %v13258_v14  ;;  %v26816_v35 = vand.u32 4294901760, %v26815_v7  ;;  %v26817_v14 = vand.u32 4294901760, %v26720_v2  ;;  %v26823_v2 = vand.u32 4294901760, %v26645_v12  ;;  %v26830_v12 = vand.u32 4294901760, %v21152_v34  ;;  %v26838_v34 = vld [vmem:[#allocation111_spill] sm:$0xff] }
 0x48d   :  { %v13266_v58 = vpack.c.bf16 %v26813_v43, %v26811_v54  ;;  %v26845_v54 = vld [vmem:[#allocation5_spill] sm:$0xff]  ;;  %v21650_v43 = vld [vmem:[%s23438_s0 + $0x7b8] sm:$0xff] }
 0x48e   :  { %v13268_v11 = vpack.c.bf16 %v26816_v35, %v26814_v5  ;;  %v13270_v36 = vpack.c.bf16 %v26818_v60, %v26817_v14  ;;  %v13276_v28 = vpack.c.bf16 %v26824_v49, %v26823_v2  ;;  %v24477_v35 = vand.u32 4294901760, %v21639_v10  ;;  %v21678_v60 = vld [vmem:[%s23438_s0 + $0x770] sm:$0xff] }
 0x48f   :  { %13261 = vmatpush1.bf16.msra.mxu1 %v13260_v23  ;;  %v26822_v23 = vand.u32 4294901760, %v26635_v55  ;;  %v26829_v55 = vand.u32 4294901760, %v21139_v39  ;;  %v26837_v39 = vld [vmem:[#allocation97_spill] sm:$0xff]  ;;  %v24475_v14 = vand.u32 4294901760, %v21650_v43 }
 0x490   :  { %13263 = vmatprep.subr.bf16.mxu1 %v13262_v42 }
 0x491   :  { %v13274_v48 = vpack.c.bf16 %v26822_v23, %v26821_v19  ;;  %v13282_v52 = vpack.c.bf16 %v26830_v12, %v26829_v55  ;;  %v26850_v23 = vld [vmem:[#allocation90_spill] sm:$0xff] }
 0x492   :  { %9798 = vmatpush1.xpose.msra.mxu0 %v21344_v62  ;;  %v13272_v62 = vpack.c.bf16 %v26820_v37, %v26819_v38  ;;  %v21689_v38 = vld [vmem:[%s23438_s0 + $0x7f8] sm:$0xff] }
 0x493   :  { %13265 = vmatpush1.bf16.msra.mxu1 %v13264_v57  ;;  %v21634_v57 = vld [vmem:[%s23438_s0 + $0x6f0] sm:$0xff]  ;;  %v21694_v37 = vld [vmem:[%s23438_s0 + $0x838] sm:$0xff]  ;;  %v24468_v2 = vand.u32 4294901760, %v21689_v38 }
 0x494   :  { %13267 = vmatprep.subr.bf16.mxu1 %v13266_v58  ;;  %v24478_v7 = vand.u32 4294901760, %v21634_v57  ;;  %v24467_v49 = vand.u32 4294901760, %v21694_v37 }
 0x495   :  { %9856 = vmatmul.mubr.f32.vlgmr.msra.gmra.mrb[8].mxu0 %v21290_v15  ;;  %v26825_v15 = vand.u32 4294901760, %v26652_v9  ;;  %v26832_v9 = vand.u32 4294901760, %v21181_v4  ;;  %v26839_v4 = vld [vmem:[#allocation117_spill] sm:$0xff] }
 0x496   :  { %v21751_v55 = vpack.c.bf16 %v24467_v49, %v24468_v2 }
 0x497   :  { %13269 = vmatpush1.bf16.msra.mxu1 %v13268_v11  ;;  %v13278_v42 = vpack.c.bf16 %v26826_v53, %v26825_v15  ;;  %v13284_v18 = vpack.c.bf16 %v26832_v9, %v26831_v3  ;;  %v24476_v11 = vand.u32 4294901760, %v21645_v41  ;;  %v21725_v15 = vld [vmem:[%s23438_s0 + $0x830] sm:$0xff]  ;;  %v21730_v53 = vld [vmem:[%s23438_s0 + $0x878] sm:$0xff] }
 0x498   :  { %13271 = vmatprep.subr.bf16.mxu1 %v13270_v36  ;;  %v21683_v36 = vld [vmem:[%s23438_s0 + $0x7b0] sm:$0xff]  ;;  %26853 = vst [vmem:[#allocation55_spill] sm:$0xff] %v21751_v55  ;;  %v24464_v12 = vand.u32 4294901760, %v21730_v53 }
 0x499   :  { %v24469_v19 = vand.u32 4294901760, %v21683_v36  ;;  %v21758_v3 = vld [vmem:[%s23438_s0 + $0x870] sm:$0xff] }
 0x49a   :  { %v21763_v9 = vld [vmem:[%s23438_s0 + $0x8b0] sm:$0xff] }
 0x49b   :  { %13273 = vmatpush1.bf16.msra.mxu1 %v13272_v62  ;;  %v24474_v62 = vand.u32 4294901760, %v21678_v60 }
 0x49c   :  { %13275 = vmatprep.subr.bf16.mxu1 %v13274_v48  ;;  %v21713_v48 = vpack.c.bf16 %v24475_v14, %v24476_v11  ;;  %v26860_v11 = vld [vmem:[#allocation93_spill] sm:$0xff] }
 0x49d   :  { %v21742_v17 = vpack.c.bf16 %v24469_v19, %v24474_v62  ;;  %v26858_v62 = vld [vmem:[#allocation85_spill] sm:$0xff] }
 0x49e   :  { %26851 = vst [vmem:[#allocation52_spill] sm:$0xff] %v21713_v48 }
 0x49f   :  { %13277 = vmatpush1.bf16.msra.mxu1 %v13276_v28  ;;  %v21720_v28 = vld [vmem:[%s23438_s0 + $0x7f0] sm:$0xff]  ;;  %26852 = vst [vmem:[#allocation54_spill] sm:$0xff] %v21742_v17 }
 0x4a0   :  { %13279 = vmatprep.subr.bf16.mxu1 %v13278_v42  ;;  %v21735_v42 = vld [vmem:[%s23438_s0 + $0x8b8] sm:$0xff]  ;;  %v24466_v25 = vand.u32 4294901760, %v21720_v28  ;;  %v26888_v1 = vand.u32 4294901760, %v21720_v28 }
 0x4a3   :  { %13281 = vmatpush1.bf16.msra.mxu1 %v13280_v61  ;;  %v24465_v61 = vand.u32 4294901760, %v21725_v15 }
 0x4a4   :  { %13283 = vmatprep.subr.bf16.mxu1 %v13282_v52  ;;  %v24463_v52 = vand.u32 4294901760, %v21735_v42 }
 0x4a7   :  { %13285 = vmatpush1.bf16.msra.mxu1 %v13284_v18  ;;  %v21768_v18 = vld [vmem:[%s23438_s0 + $0x8f8] sm:$0xff] }
 0x4a8   :  { %6853 = vmatprep.subr.mxu1 %v26833_v22  ;;  %v21773_v22 = vld [vmem:[%s23438_s0 + $0x938] sm:$0xff] }
 0x4ab   :  { %6857 = vmatpush1.msra.mxu1 %v26834_v6  ;;  %v21780_v6 = vpack.c.bf16 %v24465_v61, %v24466_v25 }
 0x4ac   :  { %13287 = vmatprep.subr.bf16.mxu1 %v26725_v13  ;;  %6874 = vmatmul.mubr.f32.vlgmr.msra.gmra.mrb[6].mxu1 %v26835_v33  ;;  %v26842_v13 = vld [vmem:[#allocation79_spill] sm:$0xff] }
 0x4ad   :  { %13289 = vmatpush1.bf16.msra.mxu1 %v26727_v50  ;;  %6995 = vmatprep.mubr.f32.mxu1 %v26768_v44  ;;  %v21596_v50 = vld [vmem:[%s23438_s0 + $0x678] sm:$0xff]  ;;  %26854 = vst [vmem:[#allocation56_spill] sm:$0xff] %v21780_v6 }
 0x4ae   :  { %13291 = vmatprep.subr.bf16.mxu1 %v26729_v24  ;;  %v21601_v24 = vld [vmem:[%s23438_s0 + $0x6b8] sm:$0xff] }
 0x4b1   :  { %13293 = vmatpush1.bf16.msra.mxu1 %v26730_v20  ;;  %v21606_v20 = vld [vmem:[%s23438_s0 + $0x670] sm:$0xff] }
 0x4b2   :  { %13295 = vmatprep.subr.bf16.mxu1 %v26731_v31  ;;  %v21611_v31 = vld [vmem:[%s23438_s0 + $0x6b0] sm:$0xff] }
 0x4b5   :  { %13297 = vmatpush1.bf16.msra.mxu1 %v26732_v59  ;;  %v26843_v59 = vld [vmem:[#allocation87_spill] sm:$0xff] }
 0x4b6   :  { %13299 = vmatprep.subr.bf16.mxu1 %v26733_v56  ;;  %v21617_v56 = vld [vmem:[%s23438_s0 + $0x6f8] sm:$0xff] }
 0x4b9   :  { %13301 = vmatpush1.bf16.msra.mxu1 %v26734_v8  ;;  %v21622_v8 = vld [vmem:[%s23438_s0 + $0x738] sm:$0xff] }
 0x4ba   :  { %13303 = vmatprep.subr.bf16.mxu1 %v26735_v51  ;;  %v26844_v51 = vld [vmem:[#allocation89_spill] sm:$0xff]  ;;  %v24479_v32 = vand.u32 4294901760, %v21622_v8 }
 0x4bd   :  { %13305 = vmatpush1.bf16.msra.mxu1 %v26736_v30  ;;  %v8091_v30 = vand.u32 4294901760, %v21596_v50 }
 0x4be   :  { %13307 = vmatprep.subr.bf16.mxu1 %v26738_v29  ;;  %v8095_v29 = vand.u32 4294901760, %v21601_v24 }
 0x4c0   :  { %v21657_v58 = vpack.c.bf16 %v8095_v29, %v8091_v30 }
 0x4c1   :  { %13309 = vmatpush1.bf16.msra.mxu1 %v26739_v47  ;;  %v8093_v47 = vand.u32 4294901760, %v21606_v20 }
 0x4c2   :  { %13311 = vmatprep.subr.bf16.mxu1 %v26740_v21  ;;  %v8097_v21 = vand.u32 4294901760, %v21611_v31  ;;  %26846 = vst [vmem:[#allocation137_spill] sm:$0xff] %v21657_v58 }
 0x4c4   :  { %v21663_v5 = vpack.c.bf16 %v8097_v21, %v8093_v47 }
 0x4c5   :  { %13313 = vmatpush1.bf16.msra.mxu1 %v26741_v27  ;;  %v8099_v27 = vand.u32 4294901760, %v21617_v56 }
 0x4c6   :  { %13315 = vmatprep.subr.bf16.mxu1 %v26836_v26  ;;  %26847 = vst [vmem:[#allocation138_spill] sm:$0xff] %v21663_v5  ;;  %v24471_v26 = vand.u32 4294901760, %v21758_v3 }
 0x4c9   :  { %13317 = vmatpush1.bf16.msra.mxu1 %v26837_v39  ;;  %v24470_v39 = vand.u32 4294901760, %v21763_v9 }
 0x4ca   :  { %13319 = vmatprep.subr.bf16.mxu1 %v26838_v34  ;;  %v21789_v34 = vpack.c.bf16 %v24463_v52, %v24464_v12 }
 0x4cc   :  { %26855 = vst [vmem:[#allocation58_spill] sm:$0xff] %v21789_v34 }
 0x4cd   :  { %13321 = vmatpush1.bf16.msra.mxu1 %v26839_v4  ;;  %v24473_v4 = vand.u32 4294901760, %v21768_v18 }
 0x4ce   :  { %13323 = vmatprep.subr.bf16.mxu1 %v26840_v16  ;;  %v24472_v16 = vand.u32 4294901760, %v21773_v22 }
 0x4d0   :  { %v21827_v49 = vpack.c.bf16 %v24472_v16, %v24473_v4  ;;  %v21844_v16 = vld [vmem:[%s23438_s0 + $0x9f8] sm:$0xff] }
 0x4d1   :  { %13325 = vmatpush1.bf16.msra.mxu1 %v26841_v63  ;;  %v21796_v63 = vld [vmem:[%s23438_s0 + $0x8f0] sm:$0xff]  ;;  %v21849_v4 = vld [vmem:[%s23438_s0 + $0xa38] sm:$0xff] }
 0x4d2   :  { %13327 = vmatprep.subr.bf16.mxu1 %v26842_v13  ;;  %v21801_v13 = vld [vmem:[%s23438_s0 + $0x930] sm:$0xff]  ;;  %v24481_v52 = vand.u32 4294901760, %v21796_v63  ;;  %26857 = vst [vmem:[#allocation26_spill] sm:$0xff] %v21827_v49 }
 0x4d3   :  { %v24480_v12 = vand.u32 4294901760, %v21801_v13 }
 0x4d5   :  { %13329 = vmatpush1.bf16.msra.mxu1 %v26843_v59  ;;  %v21806_v59 = vld [vmem:[%s23438_s0 + $0x978] sm:$0xff] }
 0x4d6   :  { %13331 = vmatprep.subr.bf16.mxu1 %v26844_v51  ;;  %v21811_v51 = vld [vmem:[%s23438_s0 + $0x9b8] sm:$0xff]  ;;  %v24483_v2 = vand.u32 4294901760, %v21806_v59 }
 0x4d7   :  { %v24482_v19 = vand.u32 4294901760, %v21811_v51 }
 0x4d9   :  { %13333 = vmatpush1.bf16.msra.mxu1 %v26845_v54 }
 0x4da   :  { %6977 = vmatprep.subr.mxu1 %v20809_v40  ;;  %v21671_v40 = vpack.c.bf16 %v24479_v32, %v8099_v27  ;;  %v26869_v32 = vand.u32 4294901760, %v21622_v8 }
 0x4dc   :  { %26848 = vst [vmem:[#allocation139_spill] sm:$0xff] %v21671_v40 }
 0x4dd   :  { %6979 = vmatpush1.msra.mxu1 %v20852_v46  ;;  %v21703_v46 = vpack.c.bf16 %v24477_v35, %v24478_v7 }
 0x4de   :  { %6996 = vmatmul.mubr.f32.vlgmr.msra.gmra.mrb[6].mxu1 %v26835_v33  ;;  %13623 = vmatprep.subr.bf16.mxu1 %v21657_v58 }
 0x4df   :  { %13625 = vmatpush1.bf16.msra.mxu1 %v21663_v5  ;;  %26849 = vst [vmem:[#allocation140_spill] sm:$0xff] %v21703_v46  ;;  %8210 = vmatprep.mubr.f32.mxu1 %v26850_v23  ;;  %v21818_v23 = vpack.c.bf16 %v24470_v39, %v24471_v26  ;;  %v21834_v39 = vld [vmem:[%s23438_s0 + $0x970] sm:$0xff] }
 0x4e0   :  { %13627 = vmatprep.subr.bf16.mxu1 %v21671_v40  ;;  %v24484_v7 = vand.u32 4294901760, %v21834_v39 }
 0x4e1   :  { %26856 = vst [vmem:[#allocation60_spill] sm:$0xff] %v21818_v23 }
 0x4e3   :  { %13629 = vmatpush1.bf16.msra.mxu1 %v21703_v46 }
 0x4e4   :  { %13631 = vmatprep.subr.bf16.mxu1 %v21713_v48 }
 0x4e7   :  { %13633 = vmatpush1.bf16.msra.mxu1 %v21742_v17 }
 0x4e8   :  { %13635 = vmatprep.subr.bf16.mxu1 %v21751_v55  ;;  %v26899_v55 = vand.u32 4294901760, %v21773_v22 }
 0x4eb   :  { %v8086_v54 = vpop.f32.mrb[6].mxu0  ;;  %13637 = vmatpush1.bf16.msra.mxu1 %v21780_v6 }
 0x4ec   :  { %v9252_v61 = vrot.slane %v8086_v54, 7  ;;  %v8088_v25 = vpop.f32.mrb[7].mxu0  ;;  %13639 = vmatprep.subr.bf16.mxu1 %v21789_v34  ;;  %v21839_v54 = vld [vmem:[%s23438_s0 + $0x9b0] sm:$0xff]  ;;  %v26898_v34 = vand.u32 4294901760, %v21768_v18 }
 0x4ed   :  { %v9254_v26 = vrot.slane %v8088_v25, 7  ;;  %v21864_v25 = vpack.c.bf16 %v24480_v12, %v24481_v52  ;;  %v21885_v12 = vld [vmem:[%s23438_s0 + $0xa30] sm:$0xff]  ;;  %v21890_v52 = vsub.f32 %v21596_v50, %v8091_v30  ;;  %v21910_v50 = vsub.f32 %v21606_v20, %v8093_v47 }
 0x4ee   :  { %v21853_v14 = vsel %vm9244_vm2, %v9252_v61, %v26858_v62  ;;  %v21905_v61 = vsub.f32 %v21601_v24, %v8095_v29  ;;  %v21915_v30 = vsub.f32 %v21611_v31, %v8097_v21  ;;  %v21920_v62 = vsub.f32 %v21617_v56, %v8099_v27 }
 0x4ef   :  { %26859 = vst [vmem:[#allocation120_spill] sm:$0xff] %v21853_v14  ;;  %v21857_v35 = vsel %vm9244_vm2, %v9254_v26, %v26860_v11  ;;  %13641 = vmatpush1.bf16.msra.mxu1 %v21818_v23  ;;  %26862 = vst [vmem:[#allocation134_spill] sm:$0xff] %v21864_v25  ;;  %v21873_v11 = vpack.c.bf16 %v24482_v19, %v24483_v2  ;;  %v21880_v26 = vld [vmem:[%s23438_s0 + $0x9f0] sm:$0xff]  ;;  %v21895_v19 = vld [vmem:[%s23438_s0 + $0xa78] sm:$0xff]  ;;  %v21925_v24 = vsub.f32 %v21622_v8, %v26869_v32 }
 0x4f0   :  { %26861 = vst [vmem:[#allocation129_spill] sm:$0xff] %v21857_v35  ;;  %13643 = vmatprep.subr.bf16.mxu1 %v21827_v49  ;;  %26864 = vst [vmem:[#allocation105_spill] sm:$0xff] %v21890_v52  ;;  %v21900_v2 = vld [vmem:[%s23438_s0 + $0xab8] sm:$0xff]  ;;  %v26871_v20 = vand.u32 4294901760, %v21839_v54  ;;  %v8149_v31 = vand.u32 4294901760, %v21880_v26  ;;  %v8153_v47 = vand.u32 4294901760, %v21885_v12  ;;  %v22072_v6 = vsub.f32 %v21768_v18, %v26898_v34 }
 0x4f1   :  { %26863 = vst [vmem:[#allocation73_spill] sm:$0xff] %v21873_v11  ;;  %26865 = vst [vmem:[#allocation70_spill] sm:$0xff] %v21905_v61  ;;  %v26873_v56 = vand.u32 4294901760, %v21634_v57  ;;  %v26875_v8 = vand.u32 4294901760, %v21844_v16  ;;  %v26876_v27 = vand.u32 4294901760, %v21849_v4  ;;  %v26883_v14 = vand.u32 4294901760, %v21678_v60 }
 0x4f2   :  { %26866 = vst [vmem:[#allocation141_spill] sm:$0xff] %v21910_v50  ;;  %26867 = vst [vmem:[#allocation142_spill] sm:$0xff] %v21915_v30  ;;  %v21932_v29 = vpack.c.bf16 %v26871_v20, %v24484_v7  ;;  %v26881_v7 = vand.u32 4294901760, %v21650_v43  ;;  %v22047_v23 = vld [vmem:[%s23438_s0 + $0xb78] sm:$0xff]  ;;  %v26897_v49 = vand.u32 4294901760, %v21763_v9  ;;  %v26907_v34 = vand.u32 4294901760, %v21834_v39 }
 0x4f3   :  { %26868 = vst [vmem:[#allocation143_spill] sm:$0xff] %v21920_v62  ;;  %26870 = vst [vmem:[#allocation38_spill] sm:$0xff] %v21925_v24  ;;  %13645 = vmatpush1.bf16.msra.mxu1 %v21864_v25  ;;  %v21939_v21 = vsub.f32 %v21634_v57, %v26873_v56  ;;  %v21946_v32 = vpack.c.bf16 %v26876_v27, %v26875_v8  ;;  %v21958_v57 = vld [vmem:[%s23438_s0 + $0xab0] sm:$0xff]  ;;  %v26878_v56 = vand.u32 4294901760, %v21639_v10  ;;  %v26880_v8 = vand.u32 4294901760, %v21645_v41 }
 0x4f4   :  { %26872 = vst [vmem:[#allocation144_spill] sm:$0xff] %v21932_v29  ;;  %13647 = vmatprep.subr.bf16.mxu1 %v21873_v11  ;;  %v21973_v20 = vsub.f32 %v21650_v43, %v26881_v7  ;;  %v21978_v35 = vsub.f32 %v21678_v60, %v26883_v14  ;;  %v26886_v7 = vand.u32 4294901760, %v21689_v38  ;;  %v26887_v60 = vand.u32 4294901760, %v21694_v37 }
 0x4f5   :  { %26874 = vst [vmem:[#allocation53_spill] sm:$0xff] %v21939_v21  ;;  %26877 = vst [vmem:[#allocation59_spill] sm:$0xff] %v21946_v32  ;;  %v21963_v45 = vsub.f32 %v21639_v10, %v26878_v56  ;;  %v21968_v27 = vsub.f32 %v21645_v41, %v26880_v8  ;;  %v21983_v10 = vld [vmem:[%s23438_s0 + $0xaf8] sm:$0xff]  ;;  %v26885_v56 = vand.u32 4294901760, %v21683_v36  ;;  %v22008_v11 = vsub.f32 %v21720_v28, %v26888_v1  ;;  %v22028_v1 = vld [vmem:[%s23438_s0 + $0xb30] sm:$0xff] }
 0x4f6   :  { %26882 = vst [vmem:[#allocation19_spill] sm:$0xff] %v21973_v20  ;;  %26884 = vst [vmem:[#allocation69_spill] sm:$0xff] %v21978_v35  ;;  %v21988_v41 = vld [vmem:[%s23438_s0 + $0xb38] sm:$0xff]  ;;  %v21998_v14 = vsub.f32 %v21689_v38, %v26886_v7  ;;  %v22003_v8 = vsub.f32 %v21694_v37, %v26887_v60  ;;  %v26889_v25 = vand.u32 4294901760, %v21725_v15  ;;  %v8157_v38 = vand.u32 4294901760, %v21953_v0  ;;  %v22023_v37 = vld [vmem:[%s23438_s0 + $0xaf0] sm:$0xff] }
 0x4f7   :  { %26879 = vst [vmem:[#allocation68_spill] sm:$0xff] %v21963_v45  ;;  %v21993_v43 = vsub.f32 %v21683_v36, %v26885_v56  ;;  %13649 = vmatpush1.bf16.msra.mxu1 %v21932_v29  ;;  %v22016_v56 = vpack.c.bf16 %v8153_v47, %v8149_v31  ;;  %v26891_v28 = vand.u32 4294901760, %v21730_v53  ;;  %v26893_v60 = vand.u32 4294901760, %v21900_v2 }
 0x4f8   :  { %v22013_v36 = vsub.f32 %v21725_v15, %v26889_v25  ;;  %13651 = vmatprep.subr.bf16.mxu1 %v21946_v32  ;;  %v26892_v25 = vand.u32 4294901760, %v21895_v19  ;;  %v22067_v29 = vsub.f32 %v21763_v9, %v26897_v49  ;;  %v26901_v9 = vand.u32 4294901760, %v21801_v13 }
 0x4f9   :  { %26890 = vst [vmem:[#allocation25_spill] sm:$0xff] %v22016_v56  ;;  %v22033_v15 = vsub.f32 %v21730_v53, %v26891_v28  ;;  %v22052_v53 = vld [vmem:[%s23438_s0 + $0xbb8] sm:$0xff]  ;;  %v26895_v28 = vand.u32 4294901760, %v21735_v42  ;;  %v26903_v18 = vand.u32 4294901760, %v21958_v57  ;;  %v22121_v49 = vsub.f32 %v21834_v39, %v26907_v34 }
 0x4fa   :  { %v22040_v7 = vpack.c.bf16 %v26893_v60, %v26892_v25  ;;  %v26896_v25 = vand.u32 4294901760, %v21758_v3  ;;  %v22089_v17 = vsub.f32 %v21801_v13, %v26901_v9  ;;  %v22106_v13 = vld [vmem:[%s23438_s0 + $0xbb0] sm:$0xff]  ;;  %v26911_v39 = vand.u32 4294901760, %v21839_v54 }
 0x4fb   :  { %v22057_v32 = vsub.f32 %v21735_v42, %v26895_v28  ;;  %v22077_v42 = vsub.f32 %v21773_v22, %v26899_v55  ;;  %v26900_v28 = vand.u32 4294901760, %v21796_v63  ;;  %13653 = vmatpush1.bf16.msra.mxu1 %v22016_v56  ;;  %v22094_v55 = vpack.c.bf16 %v26903_v18, %v8157_v38 }
 0x4fc   :  { %26894 = vst [vmem:[#allocation71_spill] sm:$0xff] %v22040_v7  ;;  %v22062_v60 = vsub.f32 %v21758_v3, %v26896_v25  ;;  %26902 = vst [vmem:[#allocation81_spill] sm:$0xff] %v22089_v17  ;;  %v26906_v18 = vand.u32 4294901760, %v21811_v51  ;;  %13655 = vmatprep.subr.bf16.mxu1 %v22040_v7  ;;  %v26908_v25 = vand.u32 4294901760, %v21983_v10  ;;  %v26909_v56 = vand.u32 4294901760, %v21988_v41 }
 0x4fd   :  { %v22082_v3 = vsub.f32 %v21796_v63, %v26900_v28  ;;  %26904 = vst [vmem:[#allocation84_spill] sm:$0xff] %v22094_v55  ;;  %v22101_v63 = vld [vmem:[%s23438_s0 + $0xb70] sm:$0xff]  ;;  %v26905_v28 = vand.u32 4294901760, %v21806_v59  ;;  %v22143_v34 = vsub.f32 %v21839_v54, %v26911_v39  ;;  %v22156_v7 = vsub.f32 %v21880_v26, %v8149_v31 }
 0x4fe   :  { %v22116_v22 = vsub.f32 %v21811_v51, %v26906_v18  ;;  %v22128_v48 = vpack.c.bf16 %v26909_v56, %v26908_v25  ;;  %v22138_v51 = vld [vmem:[%s23438_s0 + $0xc38] sm:$0xff]  ;;  %v26913_v25 = vand.u32 4294901760, %v21849_v4  ;;  %v22159_v46 = vsub.f32 %v21885_v12, %v8153_v47 }
 0x4ff   :  { %v22111_v9 = vsub.f32 %v21806_v59, %v26905_v28  ;;  %v22133_v59 = vld [vmem:[%s23438_s0 + $0xbf8] sm:$0xff]  ;;  %v26912_v28 = vand.u32 4294901760, %v21844_v16  ;;  %v26914_v40 = vand.u32 4294901760, %v22023_v37  ;;  %v26915_v54 = vand.u32 4294901760, %v22028_v1  ;;  %13657 = vmatpush1.bf16.msra.mxu1 %v22094_v55 }
 0x500   :  { %26910 = vst [vmem:[#allocation88_spill] sm:$0xff] %v22128_v48  ;;  %v22153_v18 = vsub.f32 %v21849_v4, %v26913_v25  ;;  %v26917_v4 = vand.u32 4294901760, %v22047_v23  ;;  %v26918_v26 = vand.u32 4294901760, %v22052_v53  ;;  %v22186_v25 = vld [vmem:[%s23438_s0 + $0xc30] sm:$0xff]  ;;  %13659 = vmatprep.subr.bf16.mxu1 %v22128_v48  ;;  %v26923_v58 = vand.u32 4294901760, %v21900_v2 }
 0x501   :  { %v22148_v56 = vsub.f32 %v21844_v16, %v26912_v28  ;;  %v22165_v39 = vpack.c.bf16 %v26915_v54, %v26914_v40  ;;  %v22181_v40 = vld [vmem:[%s23438_s0 + $0xbf0] sm:$0xff]  ;;  %26921 = vst [vmem:[#allocation121_spill] sm:$0xff] %v22186_v25  ;;  %v26922_v16 = vand.u32 4294901760, %v21895_v19  ;;  %v22211_v12 = vsub.f32 %v21953_v0, %v8157_v38 }
 0x502   :  { %v22174_v31 = vpack.c.bf16 %v26918_v26, %v26917_v4  ;;  %26920 = vst [vmem:[#allocation15_spill] sm:$0xff] %v22181_v40  ;;  %v414_v4 = vld [vmem:[%s23438_s0 + $0xc78] sm:$0xf]  ;;  %v22208_v26 = vsub.f32 %v21900_v2, %v26923_v58  ;;  %v26928_v5 = vand.u32 4294901760, %v22133_v59  ;;  %v26929_v58 = vand.u32 4294901760, %v22138_v51 }
 0x503   :  { %26916 = vst [vmem:[#allocation91_spill] sm:$0xff] %v22165_v39  ;;  %v22200_v55 = vsub.f32 %v21895_v19, %v26922_v16  ;;  %26924 = vst [vmem:[#allocation96_spill] sm:$0xff] %v22211_v12  ;;  %13661 = vmatpush1.bf16.msra.mxu1 %v22165_v39  ;;  %v26925_v19 = vand.u32 4294901760, %v22101_v63  ;;  %v26926_v16 = vand.u32 4294901760, %v22106_v13  ;;  %v22229_v0 = vsel %vm419_vm0, %v414_v4, 0 }
 0x504   :  { %26919 = vst [vmem:[#allocation92_spill] sm:$0xff] %v22174_v31  ;;  %v22226_v2 = vpack.c.bf16 %v26929_v58, %v26928_v5  ;;  %26931 = vst [vmem:[#allocation99_spill] sm:$0xff] %v22229_v0  ;;  %v26932_v38 = vand.u32 4294901760, %v21890_v52  ;;  %13663 = vmatprep.subr.bf16.mxu1 %v22174_v31  ;;  %v26934_v5 = vand.u32 4294901760, %v21910_v50  ;;  %v26935_v4 = vand.u32 4294901760, %v21915_v30 }
 0x505   :  { %v22220_v48 = vpack.c.bf16 %v26926_v16, %v26925_v19  ;;  %v413_v19 = vld [vmem:[%s23438_s0 + $0xc70] sm:$0xf]  ;;  %v26933_v16 = vand.u32 4294901760, %v21905_v61  ;;  %v26937_v39 = vand.u32 4294901760, %v21958_v57 }
 0x506   :  { %26930 = vst [vmem:[#allocation123_spill] sm:$0xff] %v22226_v2  ;;  %v8220_v47 = vsub.f32 %v21890_v52, %v26932_v38  ;;  %v8226_v58 = vsub.f32 %v21910_v50, %v26934_v5  ;;  %v8238_v54 = vsub.f32 %v21915_v30, %v26935_v4  ;;  %v26936_v38 = vand.u32 4294901760, %v21920_v62 }
 0x507   :  { %26927 = vst [vmem:[#allocation6_spill] sm:$0xff] %v22220_v48  ;;  %v8232_v28 = vsub.f32 %v21905_v61, %v26933_v16  ;;  %v22253_v33 = vsub.f32 %v21958_v57, %v26937_v39  ;;  %v26939_v52 = vand.u32 4294901760, %v21925_v24  ;;  %v26940_v61 = vand.u32 4294901760, %v21939_v21  ;;  %13665 = vmatpush1.bf16.msra.mxu1 %v22220_v48 }
 0x508   :  { %v8244_v31 = vsub.f32 %v21920_v62, %v26936_v38  ;;  %v26941_v50 = vand.u32 4294901760, %v21963_v45  ;;  %v26942_v30 = vand.u32 4294901760, %v21983_v10  ;;  %v26943_v57 = vand.u32 4294901760, %v22181_v40  ;;  %13667 = vmatprep.subr.bf16.mxu1 %v22226_v2 }
 0x509   :  { %26938 = vst [vmem:[#allocation7_spill] sm:$0xff] %v22253_v33  ;;  %v8256_v16 = vsub.f32 %v21925_v24, %v26939_v52  ;;  %v8250_v5 = vsub.f32 %v21939_v21, %v26940_v61  ;;  %v26944_v39 = vand.u32 4294901760, %v22186_v25  ;;  %v22279_v61 = vand.u32 4294901760, %v22229_v0 }
 0x50a   :  { %v8262_v4 = vsub.f32 %v21963_v45, %v26941_v50  ;;  %v22267_v38 = vsub.f32 %v21983_v10, %v26942_v30  ;;  %v22282_v50 = vsel %vm419_vm0, %v413_v19, 0  ;;  %v8221_v30 = vand.u32 4294901760, %v8220_v47 }
 0x50b   :  { %v22273_v62 = vpack.c.bf16 %v26944_v39, %v26943_v57  ;;  %26946 = vst [vmem:[#allocation75_spill] sm:$0xff] %v22279_v61  ;;  %v8233_v45 = vand.u32 4294901760, %v8232_v28  ;;  %v8227_v57 = vand.u32 4294901760, %v8226_v58  ;;  %v8239_v39 = vand.u32 4294901760, %v8238_v54 }
 0x50c   :  { %v8245_v21 = vand.u32 4294901760, %v8244_v31  ;;  %v8257_v52 = vand.u32 4294901760, %v8256_v16  ;;  %v8251_v25 = vand.u32 4294901760, %v8250_v5  ;;  %v8263_v24 = vand.u32 4294901760, %v8262_v4 }
 0x50d   :  { %26945 = vst [vmem:[#allocation130_spill] sm:$0xff] %v22273_v62  ;;  %v26947_v0 = vand.u32 4294901760, %v21968_v27  ;;  %v26948_v19 = vand.u32 4294901760, %v21973_v20  ;;  %13669 = vmatpush1.bf16.msra.mxu1 %v22273_v62  ;;  %v22297_v31 = vand.u32 4294901760, %v22282_v50  ;;  %v26950_v54 = vand.u32 4294901760, %v21978_v35 }
 0x50e   :  { %v26951_v5 = vand.u32 4294901760, %v21988_v41  ;;  %8188 = vmatprep.subr.mxu1 %v22279_v61  ;;  %v24562_v28 = vand.u32 4294901760, %v22033_v15  ;;  %v24561_v10 = vand.u32 4294901760, %v22057_v32  ;;  %v13672_v48 = vpack.c.bf16 %v8239_v39, %v8227_v57 }
 0x50f   :  { %v8268_v40 = vsub.f32 %v21968_v27, %v26947_v0  ;;  %v8280_v47 = vsub.f32 %v21973_v20, %v26948_v19  ;;  %26949 = vst [vmem:[#allocation18_spill] sm:$0xff] %v22297_v31  ;;  %v8274_v58 = vsub.f32 %v21978_v35, %v26950_v54  ;;  %v13670_v19 = vpack.c.bf16 %v8233_v45, %v8221_v30 }
 0x510   :  { %v22307_v4 = vsub.f32 %v21988_v41, %v26951_v5  ;;  %v13674_v62 = vpack.c.bf16 %v8257_v52, %v8245_v21  ;;  %v13676_v2 = vpack.c.bf16 %v8263_v24, %v8251_v25  ;;  %v26953_v54 = vand.u32 4294901760, %v21993_v43 }
 0x511   :  { %v8269_v0 = vand.u32 4294901760, %v8268_v40  ;;  %v8281_v35 = vand.u32 4294901760, %v8280_v47  ;;  %v26954_v20 = vand.u32 4294901760, %v21998_v14  ;;  %v26955_v5 = vand.u32 4294901760, %v22003_v8  ;;  %8190 = vmatpush1.msra.mxu1 %v22297_v31 }
 0x512   :  { %26952 = vst [vmem:[#allocation102_spill] sm:$0xff] %v22307_v4  ;;  %v8286_v16 = vsub.f32 %v21993_v43, %v26953_v54  ;;  %v8275_v30 = vand.u32 4294901760, %v8274_v58  ;;  %v26956_v21 = vand.u32 4294901760, %v22008_v11  ;;  %v26957_v25 = vand.u32 4294901760, %v22013_v36  ;;  %13671 = vmatprep.subr.bf16.mxu1 %v13670_v19 }
 0x513   :  { %v8292_v41 = vsub.f32 %v21998_v14, %v26954_v20  ;;  %v8304_v45 = vsub.f32 %v22003_v8, %v26955_v5  ;;  %v24564_v52 = vand.u32 4294901760, %v22062_v60  ;;  %v26958_v57 = vmov 2.3283064e-09  }
 0x514   :  { %v8298_v24 = vsub.f32 %v22008_v11, %v26956_v21  ;;  %v8310_v40 = vsub.f32 %v22013_v36, %v26957_v25  ;;  %8211 = vmatmul.mubr.f32.vlgmr.msra.gmra.mrb[8].mxu1 %v26958_v57  ;;  %v8316_v20 = vsub.f32 %v22033_v15, %v24562_v28  ;;  %v8328_v39 = vsub.f32 %v22057_v32, %v24561_v10 }
 0x515   :  { %13673 = vmatpush1.bf16.msra.mxu1 %v13672_v48  ;;  %v8287_v54 = vand.u32 4294901760, %v8286_v16  ;;  %8532 = vmatprep.mubr.f32.mxu1 %v26768_v44  ;;  %v26959_v25 = vand.u32 4294901760, %v22023_v37  ;;  %v13678_v10 = vpack.c.bf16 %v8281_v35, %v8269_v0  ;;  %v8293_v28 = vand.u32 4294901760, %v8292_v41 }
 0x516   :  { %13675 = vmatprep.subr.bf16.mxu1 %v13674_v62  ;;  %v8305_v47 = vand.u32 4294901760, %v8304_v45  ;;  %v26960_v48 = vand.u32 4294901760, %v22028_v1  ;;  %v8299_v5 = vand.u32 4294901760, %v8298_v24  ;;  %v8311_v19 = vand.u32 4294901760, %v8310_v40 }
 0x517   :  { %v22345_v57 = vsub.f32 %v22023_v37, %v26959_v25  ;;  %v8322_v21 = vsub.f32 %v22062_v60, %v24564_v52  ;;  %v8317_v58 = vand.u32 4294901760, %v8316_v20  ;;  %v8329_v44 = vand.u32 4294901760, %v8328_v39 }
 0x518   :  { %v22350_v16 = vsub.f32 %v22028_v1, %v26960_v48  ;;  %v26961_v37 = vand.u32 4294901760, %v22067_v29  ;;  %v26962_v35 = vand.u32 4294901760, %v22072_v6  ;;  %v13680_v41 = vpack.c.bf16 %v8287_v54, %v8275_v30 }
 0x519   :  { %13677 = vmatpush1.bf16.msra.mxu1 %v13676_v2  ;;  %v26963_v1 = vand.u32 4294901760, %v22077_v42  ;;  %v26964_v24 = vand.u32 4294901760, %v22082_v3  ;;  %v26965_v20 = vand.u32 4294901760, %v22089_v17  ;;  %v26966_v25 = vand.u32 4294901760, %v22047_v23 }
 0x51a   :  { %v8334_v62 = vsub.f32 %v22067_v29, %v26961_v37  ;;  %v8340_v0 = vsub.f32 %v22072_v6, %v26962_v35  ;;  %13679 = vmatprep.subr.bf16.mxu1 %v13678_v10  ;;  %v13682_v2 = vpack.c.bf16 %v8305_v47, %v8293_v28  ;;  %v26968_v37 = vand.u32 4294901760, %v22052_v53 }
 0x51b   :  { %v8352_v45 = vsub.f32 %v22077_v42, %v26963_v1  ;;  %v8346_v40 = vsub.f32 %v22082_v3, %v26964_v24  ;;  %v8358_v39 = vsub.f32 %v22089_v17, %v26965_v20  ;;  %v22373_v48 = vsub.f32 %v22047_v23, %v26966_v25 }
 0x51c   :  { %v22380_v35 = vsub.f32 %v22052_v53, %v26968_v37  ;;  %v26970_v1 = vand.u32 4294901760, %v22101_v63  ;;  %v13684_v20 = vpack.c.bf16 %v8311_v19, %v8299_v5  ;;  %v24567_v23 = vand.u32 4294901760, %v22121_v49 }
 0x51d   :  { %26967 = vst [vmem:[#allocation104_spill] sm:$0xff] %v22373_v48  ;;  %v13686_v25 = vpack.c.bf16 %v8329_v44, %v8317_v58  ;;  %v8323_v10 = vand.u32 4294901760, %v8322_v21  ;;  %v8335_v28 = vand.u32 4294901760, %v8334_v62  ;;  %v8341_v47 = vand.u32 4294901760, %v8340_v0  ;;  %13681 = vmatpush1.bf16.msra.mxu1 %v13680_v41 }
 0x51e   :  { %26969 = vst [vmem:[#allocation128_spill] sm:$0xff] %v22380_v35  ;;  %v22385_v24 = vsub.f32 %v22101_v63, %v26970_v1  ;;  %v8353_v52 = vand.u32 4294901760, %v8352_v45  ;;  %v8347_v54 = vand.u32 4294901760, %v8346_v40  ;;  %v8359_v30 = vand.u32 4294901760, %v8358_v39  ;;  %13683 = vmatprep.subr.bf16.mxu1 %v13682_v2 }
 0x51f   :  { %v24573_v17 = vand.u32 4294901760, %v22143_v34  ;;  %v26972_v53 = vand.u32 4294901760, %v22111_v9  ;;  %v26973_v63 = vand.u32 4294901760, %v22116_v22  ;;  %v24572_v44 = vand.u32 4294901760, %v22148_v56 }
 0x520   :  { %26971 = vst [vmem:[#allocation83_spill] sm:$0xff] %v22385_v24  ;;  %v24570_v58 = vand.u32 4294901760, %v22153_v18  ;;  %v8370_v19 = vsub.f32 %v22121_v49, %v24567_v23  ;;  %v24568_v21 = vand.u32 4294901760, %v22156_v7  ;;  %v26974_v41 = vand.u32 4294901760, %v22106_v13 }
 0x521   :  { %v8364_v37 = vsub.f32 %v22111_v9, %v26972_v53  ;;  %v8376_v5 = vsub.f32 %v22116_v22, %v26973_v63  ;;  %v24569_v40 = vand.u32 4294901760, %v22208_v26  ;;  %v24571_v39 = vand.u32 4294901760, %v22211_v12  ;;  %13685 = vmatpush1.bf16.msra.mxu1 %v13684_v20 }
 0x522   :  { %v22406_v45 = vsub.f32 %v22106_v13, %v26974_v41  ;;  %v13688_v1 = vpack.c.bf16 %v8335_v28, %v8323_v10  ;;  %v13690_v53 = vpack.c.bf16 %v8353_v52, %v8341_v47  ;;  %v13692_v63 = vpack.c.bf16 %v8359_v30, %v8347_v54  ;;  %13687 = vmatprep.subr.bf16.mxu1 %v13686_v25 }
 0x523   :  { %v8382_v23 = vsub.f32 %v22143_v34, %v24573_v17  ;;  %v8365_v0 = vand.u32 4294901760, %v8364_v37  ;;  %v8377_v62 = vand.u32 4294901760, %v8376_v5  ;;  %v8388_v13 = vsub.f32 %v22148_v56, %v24572_v44 }
 0x524   :  { %26975 = vst [vmem:[#allocation61_spill] sm:$0xff] %v22406_v45  ;;  %v8400_v41 = vsub.f32 %v22153_v18, %v24570_v58  ;;  %v8371_v2 = vand.u32 4294901760, %v8370_v19  ;;  %v8394_v52 = vsub.f32 %v22156_v7, %v24568_v21  ;;  %v26976_v30 = vand.u32 4294901760, %v22159_v46 }
 0x525   :  { %v26977_v20 = vand.u32 4294901760, %v22200_v55  ;;  %v8424_v10 = vsub.f32 %v22208_v26, %v24569_v40  ;;  %v8418_v28 = vsub.f32 %v22211_v12, %v24571_v39  ;;  %v26978_v47 = vand.u32 4294901760, %v22253_v33  ;;  %13689 = vmatpush1.bf16.msra.mxu1 %v13688_v1 }
 0x526   :  { %v8406_v54 = vsub.f32 %v22159_v46, %v26976_v30  ;;  %v8383_v19 = vand.u32 4294901760, %v8382_v23  ;;  %v26979_v40 = vand.u32 4294901760, %v22133_v59  ;;  %13691 = vmatprep.subr.bf16.mxu1 %v13690_v53  ;;  %v13694_v39 = vpack.c.bf16 %v8377_v62, %v8365_v0 }
 0x527   :  { %v8412_v25 = vsub.f32 %v22200_v55, %v26977_v20  ;;  %v8430_v37 = vsub.f32 %v22253_v33, %v26978_v47  ;;  %v8389_v44 = vand.u32 4294901760, %v8388_v13  ;;  %v8401_v17 = vand.u32 4294901760, %v8400_v41 }
 0x528   :  { %v22445_v58 = vsub.f32 %v22133_v59, %v26979_v40  ;;  %v26981_v47 = vand.u32 4294901760, %v22138_v51  ;;  %v8395_v23 = vand.u32 4294901760, %v8394_v52  ;;  %v8407_v30 = vand.u32 4294901760, %v8406_v54  ;;  %v26987_v52 = vld [vmem:[#allocation15_spill] sm:$0xff] }
 0x529   :  { %v8413_v5 = vand.u32 4294901760, %v8412_v25  ;;  %v8425_v20 = vand.u32 4294901760, %v8424_v10  ;;  %v8419_v33 = vand.u32 4294901760, %v8418_v28  ;;  %v8431_v21 = vand.u32 4294901760, %v8430_v37  ;;  %13693 = vmatpush1.bf16.msra.mxu1 %v13692_v63  ;;  %v26989_v10 = vld [vmem:[#allocation121_spill] sm:$0xff] }
 0x52a   :  { %26980 = vst [vmem:[#allocation64_spill] sm:$0xff] %v22445_v58  ;;  %v22450_v1 = vsub.f32 %v22138_v51, %v26981_v47  ;;  %v26983_v12 = vand.u32 4294901760, %v22267_v38  ;;  %v13696_v40 = vpack.c.bf16 %v8383_v19, %v8371_v2  ;;  %v26984_v62 = vand.u32 4294901760, %v22307_v4  ;;  %13695 = vmatprep.subr.bf16.mxu1 %v13694_v39 }
 0x52b   :  { %v26985_v53 = vand.u32 4294901760, %v22345_v57  ;;  %v26986_v13 = vand.u32 4294901760, %v22350_v16  ;;  %v26988_v54 = vand.u32 4294901760, %v26987_v52  ;;  %v24578_v2 = vand.u32 4294901760, %v22373_v48 }
 0x52c   :  { %26982 = vst [vmem:[#allocation21_spill] sm:$0xff] %v22450_v1  ;;  %v8436_v59 = vsub.f32 %v22267_v38, %v26983_v12  ;;  %v8448_v0 = vsub.f32 %v22307_v4, %v26984_v62  ;;  %v13698_v12 = vpack.c.bf16 %v8401_v17, %v8389_v44  ;;  %v26990_v28 = vand.u32 4294901760, %v26989_v10 }
 0x52d   :  { %v8442_v51 = vsub.f32 %v22345_v57, %v26985_v53  ;;  %v8454_v41 = vsub.f32 %v22350_v16, %v26986_v13  ;;  %v22467_v25 = vsub.f32 %v26987_v52, %v26988_v54  ;;  %v13700_v19 = vpack.c.bf16 %v8407_v30, %v8395_v23  ;;  %13697 = vmatpush1.bf16.msra.mxu1 %v13696_v40  ;;  %v9191_v30 = vld [vmem:[%s23439_s1 + $0x58] sm:$0xff]  ;;  %v9190_v40 = vld [vmem:[%s23439_s1 + $0x50] sm:$0xff] }
 0x52e   :  { %v22474_v37 = vsub.f32 %v26989_v10, %v26990_v28  ;;  %v24581_v47 = vand.u32 4294901760, %v22385_v24  ;;  %v24584_v62 = vand.u32 4294901760, %v22406_v45  ;;  %v13702_v53 = vpack.c.bf16 %v8425_v20, %v8413_v5  ;;  %v9183_v10 = vld [vmem:[%s23439_s1 + $0x18] sm:$0xff]  ;;  %13699 = vmatprep.subr.bf16.mxu1 %v13698_v12 }
 0x52f   :  { %v13704_v13 = vpack.c.bf16 %v8431_v21, %v8419_v33  ;;  %v8437_v52 = vand.u32 4294901760, %v8436_v59  ;;  %v24589_v39 = vand.u32 4294901760, %v22445_v58  ;;  %v8449_v17 = vand.u32 4294901760, %v8448_v0  ;;  %v9182_v59 = vld [vmem:[%s23439_s1 + $0x10] sm:$0xff] }
 0x530   :  { %26991 = vst [vmem:[#allocation30_spill] sm:$0xff] %v22474_v37  ;;  %v8443_v44 = vand.u32 4294901760, %v8442_v51  ;;  %v8455_v54 = vand.u32 4294901760, %v8454_v41  ;;  %v8460_v33 = vsub.f32 %v22373_v48, %v24578_v2  ;;  %v26992_v21 = vand.u32 4294901760, %v22380_v35 }
 0x531   :  { %v9861_v20 = vand.u32 4294901760, %v9183_v10  ;;  %v9865_v23 = vand.u32 4294901760, %v9191_v30  ;;  %v8466_v0 = vsub.f32 %v22385_v24, %v24581_v47  ;;  %v8478_v51 = vsub.f32 %v22406_v45, %v24584_v62  ;;  %13701 = vmatpush1.bf16.msra.mxu1 %v13700_v19 }
 0x532   :  { %v8472_v5 = vsub.f32 %v22380_v35, %v26992_v21  ;;  %v9863_v41 = vand.u32 4294901760, %v9182_v59  ;;  %v9867_v12 = vand.u32 4294901760, %v9190_v40  ;;  %v8484_v28 = vsub.f32 %v22445_v58, %v24589_v39  ;;  %13703 = vmatprep.subr.bf16.mxu1 %v13702_v53  ;;  %v26996_v21 = vld [vmem:[#allocation99_spill] sm:$0xff] }
 0x533   :  { %v22509_v63 = vpack.c.bf16 %v9865_v23, %v9861_v20  ;;  %v26994_v35 = vand.u32 4294901760, %v22450_v1  ;;  %v13706_v48 = vpack.c.bf16 %v8449_v17, %v8437_v52  ;;  %v8461_v39 = vand.u32 4294901760, %v8460_v33 }
 0x534   :  { %v22514_v24 = vpack.c.bf16 %v9867_v12, %v9863_v41  ;;  %v22516_v62 = vsub.f32 %v9182_v59, %v9863_v41  ;;  %v22518_v45 = vsub.f32 %v9190_v40, %v9867_v12  ;;  %v8473_v58 = vand.u32 4294901760, %v8472_v5  ;;  %v9199_v12 = vld [vmem:[%s23439_s1 + $0x98] sm:$0xff] }
 0x535   :  { %26993 = vst [vmem:[#allocation98_spill] sm:$0xff] %v22509_v63  ;;  %v8496_v47 = vsub.f32 %v22450_v1, %v26994_v35  ;;  %v22522_v2 = vsub.f32 %v26996_v21, %v22279_v61  ;;  %13959 = vmatprep.subr.bf16.mxu0 %v22509_v63  ;;  %v22528_v35 = vsub.f32 %v22282_v50, %v22297_v31  ;;  %v8467_v19 = vand.u32 4294901760, %v8466_v0  ;;  %v9207_v50 = vld [vmem:[%s23439_s1 + $0xd8] sm:$0xff] }
 0x536   :  { %26995 = vst [vmem:[#allocation107_spill] sm:$0xff] %v22514_v24  ;;  %13961 = vmatpush1.bf16.xpose.msra.mxu0 %v22514_v24  ;;  %v8479_v59 = vand.u32 4294901760, %v8478_v51  ;;  %v26999_v40 = vand.u32 4294901760, %v22467_v25  ;;  %13705 = vmatpush1.bf16.msra.mxu1 %v13704_v13  ;;  %v13708_v52 = vpack.c.bf16 %v8455_v54, %v8443_v44  ;;  %v8485_v17 = vand.u32 4294901760, %v8484_v28  ;;  %v9206_v54 = vld [vmem:[%s23439_s1 + $0xd0] sm:$0xff] }
 0x537   :  { %26997 = vst [vmem:[#allocation112_spill] sm:$0xff] %v22522_v2  ;;  %26998 = vst [vmem:[#allocation116_spill] sm:$0xff] %v22528_v35  ;;  %v8497_v33 = vand.u32 4294901760, %v8496_v47  ;;  %v27000_v5 = vand.u32 4294901760, %v22474_v37  ;;  %13707 = vmatprep.subr.bf16.mxu1 %v13706_v48  ;;  %v13710_v0 = vpack.c.bf16 %v8473_v58, %v8461_v39  ;;  %v9869_v13 = vand.u32 4294901760, %v9199_v12  ;;  %v9198_v47 = vld [vmem:[%s23439_s1 + $0x90] sm:$0xff] }
 0x538   :  { %v8490_v53 = vsub.f32 %v22467_v25, %v26999_v40  ;;  %v9873_v44 = vand.u32 4294901760, %v9207_v50  ;;  %v9871_v28 = vand.u32 4294901760, %v9198_v47  ;;  %v9875_v21 = vand.u32 4294901760, %v9206_v54 }
 0x539   :  { %v8502_v41 = vsub.f32 %v22474_v37, %v27000_v5  ;;  %v13712_v40 = vpack.c.bf16 %v8479_v59, %v8467_v19  ;;  %v13714_v48 = vpack.c.bf16 %v8497_v33, %v8485_v17  ;;  %v24602_v39 = vand.u32 4294901760, %v22528_v35  ;;  %v22584_v33 = vld [vmem:[%s23439_s1 + $0x110] sm:$0xff] }
 0x53a   :  { %v8491_v5 = vand.u32 4294901760, %v8490_v53  ;;  %v22549_v24 = vpack.c.bf16 %v9873_v44, %v9869_v13  ;;  %13709 = vmatpush1.bf16.msra.mxu1 %v13708_v52  ;;  %v22552_v51 = vpack.c.bf16 %v9875_v21, %v9871_v28  ;;  %v27003_v63 = vand.u32 4294901760, %v22522_v2  ;;  %27006 = vst [vmem:[#allocation17_spill] sm:$0xff] %v22584_v33 }
 0x53b   :  { %v8503_v58 = vand.u32 4294901760, %v8502_v41  ;;  %13711 = vmatprep.subr.bf16.mxu1 %v13710_v0  ;;  %v22557_v61 = vsub.f32 %v9183_v10, %v9861_v20  ;;  %v22559_v37 = vsub.f32 %v9191_v30, %v9865_v23  ;;  %v22563_v19 = vsub.f32 %v9199_v12, %v9869_v13  ;;  %v22579_v23 = vld [vmem:[%s23439_s1 + $0x118] sm:$0xff] }
 0x53c   :  { %27001 = vst [vmem:[#allocation122_spill] sm:$0xff] %v22549_v24  ;;  %27002 = vst [vmem:[#allocation37_spill] sm:$0xff] %v22552_v51  ;;  %v8508_v31 = vsub.f32 %v22522_v2, %v27003_v63  ;;  %13963 = vmatprep.subr.bf16.mxu0 %v22549_v24  ;;  %v22565_v59 = vsub.f32 %v9207_v50, %v9873_v44  ;;  %v22567_v53 = vsub.f32 %v9198_v47, %v9871_v28  ;;  %v27009_v28 = vld [vmem:[#allocation105_spill] sm:$0xff]  ;;  %v27016_v24 = vmov 0.0050964355  }
 0x53d   :  { %27004 = vst [vmem:[#allocation124_spill] sm:$0xff] %v22557_v61  ;;  %v22569_v52 = vsub.f32 %v9206_v54, %v9875_v21  ;;  %v13716_v17 = vpack.c.bf16 %v8503_v58, %v8491_v5  ;;  %v8514_v63 = vsub.f32 %v22528_v35, %v24602_v39  ;;  %v24605_v30 = vand.u32 4294901760, %v22557_v61  ;;  %27005 = vst [vmem:[#allocation14_spill] sm:$0xff] %v22579_v23  ;;  %v27010_v21 = vld [vmem:[#allocation70_spill] sm:$0xff] }
 0x53e   :  { %13965 = vmatpush1.bf16.xpose.msra.mxu0 %v22552_v51  ;;  %13713 = vmatpush1.bf16.msra.mxu1 %v13712_v40  ;;  %v8509_v10 = vand.u32 4294901760, %v8508_v31  ;;  %v24603_v20 = vand.u32 4294901760, %v22559_v37  ;;  %v24604_v41 = vand.u32 4294901760, %v22516_v62  ;;  %v24608_v12 = vand.u32 4294901760, %v22518_v45  ;;  %v27012_v58 = vld [vmem:[#allocation142_spill] sm:$0xff] }
 0x53f   :  { %13715 = vmatprep.subr.bf16.mxu1 %v13714_v48  ;;  %v22589_v31 = vand.u32 4294901760, %v22579_v23  ;;  %v22592_v50 = vand.u32 4294901760, %v22584_v33  ;;  %v9954_v0 = vsub.f32 %v22557_v61, %v24605_v30  ;;  %v8515_v13 = vand.u32 4294901760, %v8514_v63  ;;  %v27011_v48 = vld [vmem:[#allocation141_spill] sm:$0xff]  ;;  %v27014_v30 = vld [vmem:[#allocation38_spill] sm:$0xff] }
 0x540   :  { %v9966_v44 = vsub.f32 %v22559_v37, %v24603_v20  ;;  %v9960_v47 = vsub.f32 %v22516_v62, %v24604_v41  ;;  %v9972_v54 = vsub.f32 %v22518_v45, %v24608_v12  ;;  %v13718_v40 = vpack.c.bf16 %v27010_v21, %v27009_v28  ;;  %v27013_v41 = vld [vmem:[#allocation143_spill] sm:$0xff]  ;;  %v27017_v23 = vld [vmem:[#allocation53_spill] sm:$0xff] }
 0x541   :  { %27007 = vst [vmem:[#allocation74_spill] sm:$0xff] %v22589_v31  ;;  %27008 = vst [vmem:[#allocation23_spill] sm:$0xff] %v22592_v50  ;;  %9878 = vmatprep.subr.mxu0 %v22589_v31  ;;  %v9955_v5 = vand.u32 4294901760, %v9954_v0  ;;  %v13722_v51 = vpack.c.bf16 %v27014_v30, %v27013_v41  ;;  %v24615_v0 = vand.u32 4294901760, %v22563_v19  ;;  %v24616_v33 = vand.u32 4294901760, %v22565_v59 }
 0x542   :  { %13717 = vmatpush1.bf16.msra.mxu1 %v13716_v17  ;;  %v13720_v17 = vpack.c.bf16 %v27012_v58, %v27011_v48  ;;  %v9967_v63 = vand.u32 4294901760, %v9966_v44  ;;  %v9961_v39 = vand.u32 4294901760, %v9960_v47  ;;  %v9973_v20 = vand.u32 4294901760, %v9972_v54  ;;  %v27019_v47 = vld [vmem:[#allocation82_spill] sm:$0xff] }
 0x543   :  { %8510 = vmatprep.subr.mxu1 %v8509_v10  ;;  %v24620_v54 = vand.u32 4294901760, %v22567_v53 }
 0x544   :  { %v13966_v12 = vpack.c.bf16 %v9967_v63, %v9955_v5  ;;  %v22614_v10 = vpack.c.bf16 %v9973_v20, %v9961_v39  ;;  %v27020_v39 = vld [vmem:[#allocation19_spill] sm:$0xff]  ;;  %v9990_v5 = vsub.f32 %v22565_v59, %v24616_v33  ;;  %v13730_v33 = vpack.c.bf16 %v22003_v8, %v21998_v14 }
 0x545   :  { %v13726_v20 = vpack.c.bf16 %v27020_v39, %v21968_v27 }
 0x546   :  { %9880 = vmatpush1.xpose.msra.mxu0 %v22592_v50  ;;  %8516 = vmatpush1.msra.mxu1 %v8515_v13  ;;  %27015 = vst [vmem:[#allocation100_spill] sm:$0xff] %v22614_v10  ;;  %v27018_v50 = vld [vmem:[#allocation68_spill] sm:$0xff]  ;;  %v24619_v13 = vand.u32 4294901760, %v22569_v52 }
 0x547   :  { %13719 = vmatprep.subr.bf16.mxu1 %v13718_v40  ;;  %8533 = vmatmul.mubr.f32.vlgmr.msra.gmra.mrb[8].mxu1 %v27016_v24  ;;  %v13724_v44 = vpack.c.bf16 %v27018_v50, %v27017_v23  ;;  %v9978_v40 = vsub.f32 %v22563_v19, %v24615_v0 }
 0x548   :  { %13721 = vmatpush1.bf16.msra.mxu1 %v13720_v17  ;;  %8705 = vmatprep.mubr.f32.mxu1 %v27019_v47  ;;  %v9984_v17 = vsub.f32 %v22567_v53, %v24620_v54  ;;  %v9991_v47 = vand.u32 4294901760, %v9990_v5  ;;  %v13744_v5 = vpack.c.bf16 %v22143_v34, %v22121_v49  ;;  %v27029_v54 = vld [vmem:[#allocation61_spill] sm:$0xff] }
 0x549   :  { %13723 = vmatprep.subr.bf16.mxu1 %v13722_v51  ;;  %13967 = vmatprep.subr.bf16.mxu0 %v13966_v12  ;;  %v9996_v51 = vsub.f32 %v22569_v52, %v24619_v13  ;;  %v9979_v63 = vand.u32 4294901760, %v9978_v40  ;;  %v27021_v12 = vld [vmem:[#allocation69_spill] sm:$0xff]  ;;  %v13732_v13 = vpack.c.bf16 %v22013_v36, %v22008_v11  ;;  %v13736_v40 = vpack.c.bf16 %v22067_v29, %v22062_v60 }
 0x54a   :  { %v13728_v24 = vpack.c.bf16 %v21993_v43, %v27021_v12  ;;  %v9985_v10 = vand.u32 4294901760, %v9984_v17  ;;  %v13746_v17 = vpack.c.bf16 %v22153_v18, %v22148_v56 }
 0x54b   :  { %v9997_v0 = vand.u32 4294901760, %v9996_v51  ;;  %v22642_v31 = vpack.c.bf16 %v9991_v47, %v9979_v63  ;;  %v13748_v63 = vpack.c.bf16 %v22159_v46, %v22156_v7  ;;  %v13750_v47 = vpack.c.bf16 %v22208_v26, %v22200_v55  ;;  %v27027_v51 = vld [vmem:[#allocation128_spill] sm:$0xff] }
 0x54c   :  { %13725 = vmatpush1.bf16.msra.mxu1 %v13724_v44  ;;  %v13734_v44 = vpack.c.bf16 %v22057_v32, %v22033_v15 }
 0x54d   :  { %13727 = vmatprep.subr.bf16.mxu1 %v13726_v20  ;;  %v22644_v39 = vpack.c.bf16 %v9997_v0, %v9985_v10  ;;  %v13738_v20 = vpack.c.bf16 %v22077_v42, %v22072_v6  ;;  %v27023_v10 = vld [vmem:[#allocation81_spill] sm:$0xff] }
 0x54e   :  { %v13740_v0 = vpack.c.bf16 %v27023_v10, %v22082_v3 }
 0x54f   :  { %27022 = vst [vmem:[#allocation131_spill] sm:$0xff] %v22644_v39 }
 0x550   :  { %13729 = vmatpush1.bf16.msra.mxu1 %v13728_v24  ;;  %v13742_v24 = vpack.c.bf16 %v22116_v22, %v22111_v9 }
 0x551   :  { %13731 = vmatprep.subr.bf16.mxu1 %v13730_v33  ;;  %v27028_v33 = vld [vmem:[#allocation83_spill] sm:$0xff] }
 0x554   :  { %13733 = vmatpush1.bf16.msra.mxu1 %v13732_v13 }
 0x555   :  { %13735 = vmatprep.subr.bf16.mxu1 %v13734_v44  ;;  %v13760_v44 = vpack.c.bf16 %v27029_v54, %v27028_v33  ;;  %v27036_v54 = vld [vmem:[#allocation139_spill] sm:$0xff] }
 0x558   :  { %13737 = vmatpush1.bf16.msra.mxu1 %v13736_v40  ;;  %v27024_v40 = vld [vmem:[#allocation96_spill] sm:$0xff] }
 0x559   :  { %13739 = vmatprep.subr.bf16.mxu1 %v13738_v20  ;;  %v27025_v20 = vld [vmem:[#allocation7_spill] sm:$0xff] }
 0x55c   :  { %13741 = vmatpush1.bf16.msra.mxu1 %v13740_v0  ;;  %v13752_v0 = vpack.c.bf16 %v27025_v20, %v27024_v40 }
 0x55d   :  { %13743 = vmatprep.subr.bf16.mxu1 %v13742_v24  ;;  %v13754_v24 = vpack.c.bf16 %v22307_v4, %v22267_v38 }
 0x560   :  { %13745 = vmatpush1.bf16.msra.mxu1 %v13744_v5  ;;  %v13756_v5 = vpack.c.bf16 %v22350_v16, %v22345_v57 }
 0x561   :  { %13747 = vmatprep.subr.bf16.mxu1 %v13746_v17  ;;  %v27026_v17 = vld [vmem:[#allocation104_spill] sm:$0xff] }
 0x562   :  { %v13758_v13 = vpack.c.bf16 %v27027_v51, %v27026_v17 }
 0x564   :  { %13749 = vmatpush1.bf16.msra.mxu1 %v13748_v63  ;;  %v27030_v63 = vld [vmem:[#allocation64_spill] sm:$0xff] }
 0x565   :  { %13751 = vmatprep.subr.bf16.mxu1 %v13750_v47  ;;  %v13762_v39 = vpack.c.bf16 %v22450_v1, %v27030_v63  ;;  %v27031_v47 = vld [vmem:[#allocation30_spill] sm:$0xff]  ;;  %v27038_v1 = vld [vmem:[#allocation52_spill] sm:$0xff] }
 0x566   :  { %v13764_v4 = vpack.c.bf16 %v27031_v47, %v22467_v25 }
 0x568   :  { %13753 = vmatpush1.bf16.msra.mxu1 %v13752_v0  ;;  %v27032_v0 = vld [vmem:[#allocation137_spill] sm:$0xff] }
 0x569   :  { %13755 = vmatprep.subr.bf16.mxu1 %v13754_v24  ;;  %v27033_v24 = vmov 5.605165e-06  }
 0x56c   :  { %13757 = vmatpush1.bf16.msra.mxu1 %v13756_v5  ;;  %v27034_v5 = vld [vmem:[#allocation138_spill] sm:$0xff] }
 0x56d   :  { %13759 = vmatprep.subr.bf16.mxu1 %v13758_v13  ;;  %v27035_v13 = vld [vmem:[#allocation86_spill] sm:$0xff] }
 0x570   :  { %13761 = vmatpush1.bf16.msra.mxu1 %v13760_v44  ;;  %v27037_v44 = vld [vmem:[#allocation140_spill] sm:$0xff] }
 0x571   :  { %13763 = vmatprep.subr.bf16.mxu1 %v13762_v39  ;;  %v27040_v39 = vand.u32 4294901760, %v22559_v37 }
 0x574   :  { %13765 = vmatpush1.bf16.msra.mxu1 %v13764_v4  ;;  %v27039_v4 = vand.u32 4294901760, %v22557_v61  ;;  %v27050_v61 = vand.u32 4294901760, %v22565_v59 }
 0x575   :  { %8685 = vmatprep.subr.mxu1 %v22522_v2 }
 0x576   :  { %v22701_v2 = vpack.c.bf16 %v27040_v39, %v27039_v4  ;;  %v27052_v39 = vld [vmem:[#allocation60_spill] sm:$0xff] }
 0x578   :  { %8688 = vmatpush1.msra.mxu1 %v22528_v35  ;;  %27041 = vst [vmem:[#allocation136_spill] sm:$0xff] %v22701_v2  ;;  %v27042_v35 = vld [vmem:[#allocation54_spill] sm:$0xff]  ;;  %v27053_v2 = vand.u32 4294901760, %v22567_v53 }
 0x579   :  { %13767 = vmatprep.subr.bf16.mxu1 %v27032_v0  ;;  %8706 = vmatmul.mubr.f32.vlgmr.msra.gmra.mrb[8].mxu1 %v27033_v24  ;;  %v27043_v24 = vand.u32 4294901760, %v22516_v62 }
 0x57a   :  { %13769 = vmatpush1.bf16.msra.mxu1 %v27034_v5  ;;  %8829 = vmatprep.mubr.f32.mxu1 %v27035_v13  ;;  %v27044_v5 = vand.u32 4294901760, %v22518_v45  ;;  %v27046_v13 = vld [vmem:[#allocation55_spill] sm:$0xff] }
 0x57b   :  { %13771 = vmatprep.subr.bf16.mxu1 %v27036_v54  ;;  %v27047_v54 = vld [vmem:[#allocation56_spill] sm:$0xff] }
 0x57c   :  { %v22708_v0 = vpack.c.bf16 %v27044_v5, %v27043_v24  ;;  %v27056_v24 = vld [vmem:[#allocation26_spill] sm:$0xff] }
 0x57e   :  { %13773 = vmatpush1.bf16.msra.mxu1 %v27037_v44  ;;  %27045 = vst [vmem:[#allocation16_spill] sm:$0xff] %v22708_v0  ;;  %v27048_v44 = vld [vmem:[#allocation58_spill] sm:$0xff] }
 0x57f   :  { %13775 = vmatprep.subr.bf16.mxu1 %v27038_v1  ;;  %v27049_v1 = vand.u32 4294901760, %v22563_v19  ;;  %v27057_v0 = vld [vmem:[#allocation134_spill] sm:$0xff] }
 0x581   :  { %v22717_v4 = vpack.c.bf16 %v27050_v61, %v27049_v1  ;;  %v27061_v61 = vld [vmem:[#allocation25_spill] sm:$0xff]  ;;  %v27062_v1 = vld [vmem:[#allocation71_spill] sm:$0xff] }
 0x582   :  { %13777 = vmatpush1.bf16.msra.mxu1 %v27042_v35  ;;  %v27054_v35 = vand.u32 4294901760, %v22569_v52 }
 0x583   :  { %13779 = vmatprep.subr.bf16.mxu1 %v27046_v13  ;;  %27051 = vst [vmem:[#allocation9_spill] sm:$0xff] %v22717_v4  ;;  %v27060_v13 = vld [vmem:[#allocation59_spill] sm:$0xff]  ;;  %v27063_v4 = vld [vmem:[#allocation84_spill] sm:$0xff] }
 0x584   :  { %v22724_v5 = vpack.c.bf16 %v27054_v35, %v27053_v2  ;;  %v27065_v2 = vld [vmem:[#allocation91_spill] sm:$0xff]  ;;  %v27066_v35 = vld [vmem:[#allocation92_spill] sm:$0xff] }
 0x586   :  { %13781 = vmatpush1.bf16.msra.mxu1 %v27047_v54  ;;  %27055 = vst [vmem:[#allocation11_spill] sm:$0xff] %v22724_v5  ;;  %v27058_v54 = vld [vmem:[#allocation73_spill] sm:$0xff]  ;;  %v27067_v5 = vld [vmem:[#allocation6_spill] sm:$0xff] }
 0x587   :  { %13783 = vmatprep.subr.bf16.mxu1 %v27048_v44  ;;  %v27059_v44 = vld [vmem:[#allocation144_spill] sm:$0xff] }
 0x58a   :  { %13785 = vmatpush1.bf16.msra.mxu1 %v27052_v39  ;;  %v27064_v39 = vld [vmem:[#allocation88_spill] sm:$0xff] }
 0x58b   :  { %13787 = vmatprep.subr.bf16.mxu1 %v27056_v24 }
 0x58e   :  { %13789 = vmatpush1.bf16.msra.mxu1 %v27057_v0  ;;  %v27068_v0 = vld [vmem:[#allocation123_spill] sm:$0xff] }
 0x58f   :  { %13791 = vmatprep.subr.bf16.mxu1 %v27058_v54  ;;  %v27069_v54 = vld [vmem:[#allocation130_spill] sm:$0xff] }
 0x592   :  { %13793 = vmatpush1.bf16.msra.mxu1 %v27059_v44  ;;  %v27070_v44 = vld [vmem:[#allocation75_spill] sm:$0xff] }
 0x593   :  { %13795 = vmatprep.subr.bf16.mxu1 %v27060_v13 }
 0x596   :  { %13797 = vmatpush1.bf16.msra.mxu1 %v27061_v61  ;;  %v27071_v61 = vand.u32 4294901760, %v27009_v28  ;;  %v27079_v28 = vand.u32 4294901760, %v27017_v23  ;;  %v27087_v23 = vand.u32 4294901760, %v21998_v14  ;;  %v27093_v14 = vand.u32 4294901760, %v22062_v60 }
 0x597   :  { %13799 = vmatprep.subr.bf16.mxu1 %v27062_v1  ;;  %v27072_v1 = vand.u32 4294901760, %v27010_v21  ;;  %v27080_v21 = vand.u32 4294901760, %v27018_v50  ;;  %v27088_v50 = vand.u32 4294901760, %v22003_v8  ;;  %v27094_v8 = vand.u32 4294901760, %v22067_v29 }
 0x598   :  { %v27099_v29 = vand.u32 4294901760, %v22082_v3  ;;  %v27104_v3 = vand.u32 4294901760, %v22143_v34 }
 0x599   :  { %v13814_v13 = vpack.c.bf16 %v27072_v1, %v27071_v61  ;;  %v13820_v61 = vpack.c.bf16 %v27080_v21, %v27079_v28 }
 0x59a   :  { %13801 = vmatpush1.bf16.msra.mxu1 %v27063_v4  ;;  %v27073_v4 = vand.u32 4294901760, %v27011_v48  ;;  %v27081_v48 = vld [vmem:[#allocation80_spill] sm:$0xff] }
 0x59b   :  { %13803 = vmatprep.subr.bf16.mxu1 %v27064_v39  ;;  %v27074_v39 = vand.u32 4294901760, %v27012_v58  ;;  %v27082_v58 = vand.u32 4294901760, %v21968_v27  ;;  %v27090_v27 = vand.u32 4294901760, %v22013_v36 }
 0x59e   :  { %13805 = vmatpush1.bf16.msra.mxu1 %v27065_v2  ;;  %v13816_v2 = vpack.c.bf16 %v27074_v39, %v27073_v4  ;;  %v27085_v39 = vand.u32 4294901760, %v27021_v12  ;;  %v27092_v12 = vand.u32 4294901760, %v22057_v32 }
 0x59f   :  { %13807 = vmatprep.subr.bf16.mxu1 %v27066_v35  ;;  %v27075_v35 = vand.u32 4294901760, %v27013_v41  ;;  %v27083_v41 = vld [vmem:[#allocation19_spill] sm:$0xff] }
 0x5a0   :  { %v27084_v4 = vand.u32 4294901760, %v27083_v41  ;;  %v27096_v41 = vand.u32 4294901760, %v22072_v6 }
 0x5a2   :  { %13809 = vmatpush1.bf16.msra.mxu1 %v27067_v5  ;;  %v27076_v5 = vand.u32 4294901760, %v27014_v30  ;;  %v13822_v30 = vpack.c.bf16 %v27084_v4, %v27082_v58  ;;  %v13832_v58 = vpack.c.bf16 %v27094_v8, %v27093_v14  ;;  %v27110_v14 = vand.u32 4294901760, %v22159_v46 }
 0x5a3   :  { %13811 = vmatprep.subr.bf16.mxu1 %v27068_v0  ;;  %v27077_v0 = vld [vmem:[#allocation18_spill] sm:$0xff]  ;;  %v27116_v46 = vand.u32 4294901760, %v27024_v40  ;;  %v27121_v40 = vand.u32 4294901760, %v22345_v57  ;;  %v27127_v57 = vld [vmem:[#allocation61_spill] sm:$0xff] }
 0x5a4   :  { %v13818_v24 = vpack.c.bf16 %v27076_v5, %v27075_v35  ;;  %v13826_v5 = vpack.c.bf16 %v27088_v50, %v27087_v23  ;;  %v27102_v50 = vand.u32 4294901760, %v22116_v22 }
 0x5a6   :  { %13813 = vmatpush1.bf16.msra.mxu1 %v27069_v54  ;;  %v27078_v54 = vmov 5.6028366e-06  }
 0x5a7   :  { %8809 = vmatprep.subr.mxu1 %v27070_v44 }
 0x5aa   :  { %8811 = vmatpush1.msra.mxu1 %v27077_v0 }
 0x5ab   :  { %13815 = vmatprep.subr.bf16.mxu1 %v13814_v13  ;;  %8830 = vmatmul.mubr.f32.vlgmr.msra.gmra.mrb[8].mxu1 %v27078_v54  ;;  %v27086_v13 = vand.u32 4294901760, %v21993_v43 }
 0x5ac   :  { %13817 = vmatpush1.bf16.msra.mxu1 %v13816_v2  ;;  %9051 = vmatprep.mubr.f32.mxu1 %v27081_v48  ;;  %v27091_v2 = vand.u32 4294901760, %v22033_v15  ;;  %v27097_v15 = vand.u32 4294901760, %v22077_v42  ;;  %v27101_v42 = vand.u32 4294901760, %v22111_v9 }
 0x5ad   :  { %13819 = vmatprep.subr.bf16.mxu1 %v13818_v24  ;;  %v13824_v54 = vpack.c.bf16 %v27086_v13, %v27085_v39  ;;  %v27089_v24 = vand.u32 4294901760, %v22008_v11  ;;  %v27095_v11 = vld [vmem:[#allocation76_spill] sm:$0xff] }
 0x5ae   :  { %v13830_v35 = vpack.c.bf16 %v27092_v12, %v27091_v2  ;;  %v13834_v32 = vpack.c.bf16 %v27097_v15, %v27096_v41  ;;  %v27105_v12 = vld [vmem:[#allocation74_spill] sm:$0xff]  ;;  %v27114_v41 = vld [vmem:[#allocation17_spill] sm:$0xff] }
 0x5af   :  { %v13828_v1 = vpack.c.bf16 %v27090_v27, %v27089_v24 }
 0x5b0   :  { %13821 = vmatpush1.bf16.msra.mxu1 %v13820_v61 }
 0x5b1   :  { %13823 = vmatprep.subr.bf16.mxu1 %v13822_v30  ;;  %v6997_v43 = vpop.f32.mrb[6].mxu1  ;;  %v27098_v30 = vld [vmem:[#allocation24_spill] sm:$0xff] }
 0x5b2   :  { %v9248_v28 = vrot.slane %v6997_v43, 7  ;;  %v6999_v21 = vpop.f32.mrb[7].mxu1  ;;  %v27107_v43 = vand.u32 4294901760, %v22148_v56 }
 0x5b3   :  { %v9250_v61 = vrot.slane %v6999_v21, 7 }
 0x5b4   :  { %13825 = vmatpush1.bf16.msra.mxu1 %v13824_v54  ;;  %v9249_v36 = vsel %vm9244_vm2, %v9248_v28, %v27095_v11  ;;  %v27100_v54 = vand.u32 4294901760, %v27023_v10  ;;  %v27111_v11 = vand.u32 4294901760, %v22200_v55 }
 0x5b5   :  { %13827 = vmatprep.subr.bf16.mxu1 %v13826_v5  ;;  %v22790_v4 = vand.u32 4294901760, %v9249_v36  ;;  %v9251_v39 = vsel %vm9244_vm2, %v9250_v61, %v27098_v30  ;;  %v13838_v5 = vpack.c.bf16 %v27102_v50, %v27101_v42  ;;  %v27109_v61 = vand.u32 4294901760, %v22156_v7 }
 0x5b6   :  { %v22794_v13 = vand.u32 4294901760, %v9251_v39  ;;  %v13836_v23 = vpack.c.bf16 %v27100_v54, %v27099_v29  ;;  %v27117_v7 = vand.u32 4294901760, %v27025_v20  ;;  %v27122_v20 = vand.u32 4294901760, %v22350_v16 }
 0x5b7   :  { %v22797_v60 = vsub.f32 %v9249_v36, %v22790_v4  ;;  %v13844_v8 = vpack.c.bf16 %v27110_v14, %v27109_v61  ;;  %v27112_v36 = vand.u32 4294901760, %v22208_v26  ;;  %v27118_v26 = vand.u32 4294901760, %v22267_v38  ;;  %v27136_v61 = vld [vmem:[#allocation112_spill] sm:$0xff] }
 0x5b8   :  { %13829 = vmatpush1.bf16.msra.mxu1 %v13828_v1  ;;  %v22804_v6 = vsub.f32 %v9251_v39, %v22794_v13  ;;  %v27103_v1 = vand.u32 4294901760, %v22121_v49  ;;  %v27108_v49 = vand.u32 4294901760, %v22153_v18  ;;  %v27113_v18 = vld [vmem:[#allocation23_spill] sm:$0xff]  ;;  %v13848_v30 = vpack.c.bf16 %v27117_v7, %v27116_v46  ;;  %v27119_v39 = vld [vmem:[#allocation102_spill] sm:$0xff] }
 0x5b9   :  { %13831 = vmatprep.subr.bf16.mxu1 %v13830_v35  ;;  %v9943_v24 = vand.u32 4294901760, %v22797_v60  ;;  %v27106_v35 = vld [vmem:[#allocation14_spill] sm:$0xff]  ;;  %v13846_v56 = vpack.c.bf16 %v27112_v36, %v27111_v11  ;;  %v22841_v15 = vsub.f32 %v27114_v41, %v27113_v18  ;;  %v27120_v29 = vand.u32 4294901760, %v27119_v39  ;;  %v27148_v41 = vld [vmem:[#allocation52_spill] sm:$0xff] }
 0x5ba   :  { %v9937_v27 = vand.u32 4294901760, %v22804_v6  ;;  %v13840_v10 = vpack.c.bf16 %v27104_v3, %v27103_v1  ;;  %v22821_v9 = vsub.f32 %v27106_v35, %v27105_v12  ;;  %v13842_v28 = vpack.c.bf16 %v27108_v49, %v27107_v43  ;;  %v27125_v3 = vld [vmem:[#allocation131_spill] sm:$0xff]  ;;  %v27144_v36 = vld [vmem:[#allocation138_spill] sm:$0xff] }
 0x5bb   :  { %v9944_v2 = vsub.f32 %v22797_v60, %v9943_v24  ;;  %v13850_v54 = vpack.c.bf16 %v27120_v29, %v27118_v26  ;;  %v13852_v42 = vpack.c.bf16 %v27122_v20, %v27121_v40  ;;  %v27129_v35 = vand.u32 4294901760, %v27030_v63  ;;  %v27153_v46 = vld [vmem:[#allocation98_spill] sm:$0xff]  ;;  %v22937_v26 = vld [vmem:[%s23439_s1 + $0x60] sm:$0xff] }
 0x5bc   :  { %13833 = vmatpush1.bf16.msra.mxu1 %v13832_v58  ;;  %v9938_v22 = vsub.f32 %v22804_v6, %v9937_v27  ;;  %v10001_v58 = vand.u32 4294901760, %v22821_v9  ;;  %v27132_v49 = vand.u32 4294901760, %v22467_v25  ;;  %v27137_v14 = vand.u32 4294901760, %v27136_v61  ;;  %v27139_v25 = vld [vmem:[#allocation116_spill] sm:$0xff]  ;;  %v22924_v7 = vld [vmem:[%s23439_s1 + $0x68] sm:$0xff] }
 0x5bd   :  { %13835 = vmatprep.subr.bf16.mxu1 %v13834_v32  ;;  %v9945_v21 = vand.u32 4294901760, %v9944_v2  ;;  %v27115_v32 = vld [vmem:[#allocation100_spill] sm:$0xff]  ;;  %v27128_v2 = vand.u32 4294901760, %v27127_v57  ;;  %v27138_v63 = vpack.c.bf16 %v22518_v45, %v22516_v62  ;;  %v27143_v11 = vmov 0.0050964355   ;;  %v27156_v39 = vld [vmem:[#allocation26_spill] sm:$0xff] }
 0x5be   :  { %v9939_v34 = vand.u32 4294901760, %v9938_v22  ;;  %v10002_v55 = vsub.f32 %v22821_v9, %v10001_v58  ;;  %v27146_v45 = vld [vmem:[#allocation140_spill] sm:$0xff]  ;;  %v27147_v62 = vpack.c.bf16 %v22569_v52, %v22567_v53  ;;  %v22919_v52 = vld [vmem:[%s23439_s1 + $0x28] sm:$0xff]  ;;  %v10441_v40 = vand.u32 4294901760, %v22924_v7 }
 0x5bf   :  { %v27154_v53 = vld [vmem:[#allocation60_spill] sm:$0xff]  ;;  %v27157_v29 = vld [vmem:[#allocation122_spill] sm:$0xff] }
 0x5c0   :  { %13837 = vmatpush1.bf16.msra.mxu1 %v13836_v23  ;;  %9940 = vmatprep.mubr.f32.mxu0 %v9939_v34  ;;  %v10007_v23 = vand.u32 4294901760, %v22841_v15  ;;  %v10003_v50 = vand.u32 4294901760, %v10002_v55  ;;  %v22932_v55 = vld [vmem:[%s23439_s1 + $0x20] sm:$0xff] }
 0x5c1   :  { %13839 = vmatprep.subr.bf16.mxu1 %v13838_v5  ;;  %9946 = vmatmul.mubr.f32.vlgmr.msra.gmra.mrb[8].mxu0 %v9945_v21  ;;  %v27124_v5 = vand.u32 4294901760, %v27027_v51  ;;  %v22956_v20 = vld [vmem:[%s23439_s1 + $0xa0] sm:$0xff] }
 0x5c2   :  { %13969 = vmatpush1.bf16.xpose.msra.mxu0 %v27115_v32  ;;  %10066 = vmatprep.mubr.f32.mxu0 %v22794_v13  ;;  %v10008_v38 = vsub.f32 %v22841_v15, %v10007_v23  ;;  %v27151_v32 = vld [vmem:[#allocation56_spill] sm:$0xff] }
 0x5c3   :  { %13971 = vmatprep.subr.bf16.mxu0 %v22642_v31  ;;  %v27123_v31 = vand.u32 4294901760, %v27026_v17  ;;  %v27130_v17 = vld [vmem:[#allocation21_spill] sm:$0xff] }
 0x5c4   :  { %13841 = vmatpush1.bf16.msra.mxu1 %v13840_v10  ;;  %v27126_v10 = vand.u32 4294901760, %v27028_v33  ;;  %v27131_v22 = vand.u32 4294901760, %v27130_v17  ;;  %v10009_v43 = vand.u32 4294901760, %v10008_v38  ;;  %v27134_v33 = vld [vmem:[#allocation124_spill] sm:$0xff]  ;;  %v22975_v38 = vsub.f32 %v22924_v7, %v10441_v40 }
 0x5c5   :  { %13843 = vmatprep.subr.bf16.mxu1 %v13842_v28  ;;  %v13854_v1 = vpack.c.bf16 %v27124_v5, %v27123_v31  ;;  %v27133_v28 = vand.u32 4294901760, %v27031_v47  ;;  %v27135_v21 = vpack.c.bf16 %v22559_v37, %v27134_v33  ;;  %v27140_v47 = vand.u32 4294901760, %v27139_v25  ;;  %v27142_v37 = vld [vmem:[#allocation137_spill] sm:$0xff]  ;;  %v27162_v33 = vld [vmem:[#allocation59_spill] sm:$0xff] }
 0x5c6   :  { %v13856_v16 = vpack.c.bf16 %v27128_v2, %v27126_v10  ;;  %v13858_v51 = vpack.c.bf16 %v27131_v22, %v27129_v35  ;;  %v10439_v31 = vand.u32 4294901760, %v22932_v55  ;;  %v10443_v5 = vand.u32 4294901760, %v22937_v26 }
 0x5c7   :  { %v13860_v34 = vpack.c.bf16 %v27133_v28, %v27132_v49  ;;  %v10447_v35 = vand.u32 4294901760, %v22956_v20  ;;  %v10541_v61 = vand.u32 4294901760, %v22975_v38 }
 0x5c8   :  { %13845 = vmatpush1.bf16.msra.mxu1 %v13844_v8  ;;  %v27141_v8 = vpack.c.bf16 %v22565_v59, %v22563_v19  ;;  %v27149_v19 = vld [vmem:[#allocation54_spill] sm:$0xff]  ;;  %v27150_v59 = vld [vmem:[#allocation55_spill] sm:$0xff]  ;;  %v22982_v2 = vsub.f32 %v22932_v55, %v10439_v31 }
 0x5c9   :  { %13847 = vmatprep.subr.bf16.mxu1 %v13846_v56  ;;  %v27145_v56 = vld [vmem:[#allocation139_spill] sm:$0xff]  ;;  %v23005_v49 = vsub.f32 %v22956_v20, %v10447_v35 }
 0x5ca   :  { %13973 = vmatpush1.bf16.xpose.msra.mxu0 %v27125_v3 }
 0x5cb   :  { %10004 = vmatprep.subr.mxu0 %v10003_v50  ;;  %v27158_v50 = vld [vmem:[#allocation134_spill] sm:$0xff] }
 0x5cc   :  { %13849 = vmatpush1.bf16.msra.mxu1 %v13848_v30  ;;  %v27155_v30 = vld [vmem:[#allocation107_spill] sm:$0xff] }
 0x5cd   :  { %13851 = vmatprep.subr.bf16.mxu1 %v13850_v54  ;;  %v22944_v54 = vld [vmem:[%s23439_s1 + $0xa8] sm:$0xff] }
 0x5ce   :  { %v10445_v10 = vand.u32 4294901760, %v22944_v54 }
 0x5d0   :  { %13853 = vmatpush1.bf16.msra.mxu1 %v13852_v42  ;;  %v22961_v42 = vld [vmem:[%s23439_s1 + $0xe0] sm:$0xff]  ;;  %v22994_v22 = vsub.f32 %v22944_v54, %v10445_v10 }
 0x5d1   :  { %13855 = vmatprep.subr.bf16.mxu1 %v13854_v1  ;;  %v27159_v1 = vld [vmem:[#allocation73_spill] sm:$0xff]  ;;  %v10451_v17 = vand.u32 4294901760, %v22961_v42 }
 0x5d2   :  { %10010 = vmatpush1.xpose.msra.mxu0 %v10009_v43  ;;  %v27160_v43 = vld [vmem:[#allocation144_spill] sm:$0xff]  ;;  %v10553_v25 = vand.u32 4294901760, %v22994_v22 }
 0x5d3   :  { %13975 = vmatprep.subr.bf16.mxu0 %v27135_v21  ;;  %v23010_v28 = vsub.f32 %v22961_v42, %v10451_v17 }
 0x5d4   :  { %13857 = vmatpush1.bf16.msra.mxu1 %v13856_v16  ;;  %v22987_v16 = vsub.f32 %v22937_v26, %v10443_v5  ;;  %v9217_v26 = vld [vmem:[%s23439_s1 + $0x128] sm:$0xff] }
 0x5d5   :  { %13859 = vmatprep.subr.bf16.mxu1 %v13858_v51  ;;  %10068 = vmatmul.mubr.f32.vlgmr.msra.gmra.mrb[8].mxu0 %v22790_v4  ;;  %v23150_v54 = vand.u32 4294901760, %v9217_v26 }
 0x5d6   :  { %13977 = vmatpush1.bf16.xpose.msra.mxu0 %v27138_v63  ;;  %10159 = vmatprep.mubr.f32.mxu0 %v22804_v6  ;;  %v22949_v6 = vld [vmem:[%s23439_s1 + $0xe8] sm:$0xff]  ;;  %v10547_v63 = vand.u32 4294901760, %v22987_v16 }
 0x5d7   :  { %13979 = vmatprep.subr.bf16.mxu0 %v27141_v8  ;;  %v10449_v57 = vand.u32 4294901760, %v22949_v6 }
 0x5d8   :  { %13861 = vmatpush1.bf16.msra.mxu1 %v13860_v34  ;;  %v27161_v34 = vld [vmem:[#allocation37_spill] sm:$0xff]  ;;  %v10548_v42 = vsub.f32 %v22987_v16, %v10547_v63 }
 0x5d9   :  { %9031 = vmatprep.subr.mxu1 %v27137_v14  ;;  %v22999_v51 = vsub.f32 %v22949_v6, %v10449_v57  ;;  %v10535_v14 = vand.u32 4294901760, %v22982_v2  ;;  %v23129_v7 = vpack.c.bf16 %v10449_v57, %v10445_v10  ;;  %v10554_v57 = vsub.f32 %v22994_v22, %v10553_v25 }
 0x5db   :  { %v10536_v20 = vsub.f32 %v22982_v2, %v10535_v14 }
 0x5dc   :  { %9035 = vmatpush1.msra.mxu1 %v27140_v47  ;;  %v10565_v47 = vand.u32 4294901760, %v22999_v51 }
 0x5dd   :  { %13863 = vmatprep.subr.bf16.mxu1 %v27142_v37  ;;  %9052 = vmatmul.mubr.f32.vlgmr.msra.gmra.mrb[8].mxu1 %v27143_v11  ;;  %v27163_v37 = vld [vmem:[#allocation25_spill] sm:$0xff] }
 0x5de   :  { %13865 = vmatpush1.bf16.msra.mxu1 %v27144_v36  ;;  %9173 = vmatprep.mubr.f32.mxu1 %v27081_v48  ;;  %v27152_v48 = vld [vmem:[#allocation58_spill] sm:$0xff]  ;;  %v10559_v36 = vand.u32 4294901760, %v23005_v49 }
 0x5df   :  { %13867 = vmatprep.subr.bf16.mxu1 %v27145_v56  ;;  %13981 = vmatpush1.bf16.xpose.msra.mxu0 %v27147_v62  ;;  %v10571_v56 = vand.u32 4294901760, %v23010_v28  ;;  %v27164_v62 = vld [vmem:[#allocation71_spill] sm:$0xff] }
 0x5e0   :  { %10099 = vmatprep.subr.mxu0 %v22821_v9  ;;  %v23089_v9 = vld [vmem:[%s23439_s1 + $0x30] sm:$0xff] }
 0x5e2   :  { %13869 = vmatpush1.bf16.msra.mxu1 %v27146_v45  ;;  %v23034_v45 = vpack.c.bf16 %v10547_v63, %v10535_v14  ;;  %v10555_v63 = vand.u32 4294901760, %v10554_v57 }
 0x5e3   :  { %13871 = vmatprep.subr.bf16.mxu1 %v27148_v41  ;;  %v23041_v41 = vpack.c.bf16 %v10565_v47, %v10553_v25 }
 0x5e6   :  { %13873 = vmatpush1.bf16.msra.mxu1 %v27149_v19  ;;  %v23047_v19 = vpack.c.bf16 %v10571_v56, %v10559_v36 }
 0x5e7   :  { %13875 = vmatprep.subr.bf16.mxu1 %v27150_v59  ;;  %10102 = vmatpush1.xpose.msra.mxu0 %v22841_v15  ;;  %v27165_v59 = vld [vmem:[#allocation84_spill] sm:$0xff] }
 0x5e8   :  { %13983 = vmatprep.subr.bf16.mxu0 %v27153_v46 }
 0x5ea   :  { %13877 = vmatpush1.bf16.msra.mxu1 %v27151_v32  ;;  %10162 = vmatmul.mubr.f32.vlgmr.msra.gmra.mrb[8].mxu0 %v22797_v60  ;;  %v27166_v32 = vld [vmem:[#allocation88_spill] sm:$0xff] }
 0x5eb   :  { %13879 = vmatprep.subr.bf16.mxu1 %v27152_v48  ;;  %13985 = vmatpush1.bf16.xpose.msra.mxu0 %v27155_v30  ;;  %v27167_v48 = vld [vmem:[#allocation136_spill] sm:$0xff] }
 0x5ec   :  { %10244 = vmatprep.mubr.f32.mxu0 %v9937_v27  ;;  %13987 = vmatprep.subr.bf16.mxu0 %v27157_v29  ;;  %v10437_v27 = vand.u32 4294901760, %v22919_v52 }
 0x5ee   :  { %13881 = vmatpush1.bf16.msra.mxu1 %v27154_v53  ;;  %v22970_v3 = vsub.f32 %v22919_v52, %v10437_v27  ;;  %v27168_v53 = vld [vmem:[#allocation91_spill] sm:$0xff]  ;;  %v23101_v15 = vpack.c.bf16 %v10441_v40, %v10437_v27  ;;  %v10542_v27 = vsub.f32 %v22975_v38, %v10541_v61 }
 0x5ef   :  { %13883 = vmatprep.subr.bf16.mxu1 %v27156_v39  ;;  %v27169_v39 = vld [vmem:[#allocation16_spill] sm:$0xff] }
 0x5f0   :  { %v10529_v21 = vand.u32 4294901760, %v22970_v3  ;;  %v10543_v10 = vand.u32 4294901760, %v10542_v27 }
 0x5f2   :  { %13885 = vmatpush1.bf16.msra.mxu1 %v27158_v50  ;;  %v23025_v8 = vpack.c.bf16 %v10541_v61, %v10529_v21  ;;  %v27170_v50 = vld [vmem:[#allocation92_spill] sm:$0xff]  ;;  %v10530_v6 = vsub.f32 %v22970_v3, %v10529_v21  ;;  %v10537_v21 = vand.u32 4294901760, %v10536_v20  ;;  %v10549_v61 = vand.u32 4294901760, %v10548_v42 }
 0x5f3   :  { %13887 = vmatprep.subr.bf16.mxu1 %v27159_v1  ;;  %13989 = vmatpush1.bf16.xpose.msra.mxu0 %v27161_v34  ;;  %v27171_v1 = vld [vmem:[#allocation9_spill] sm:$0xff] }
 0x5f4   :  { %10184 = vmatprep.subr.mxu0 %v27105_v12  ;;  %v14016_v25 = vpack.c.bf16 %v10549_v61, %v10537_v21 }
 0x5f6   :  { %13889 = vmatpush1.bf16.msra.mxu1 %v27160_v43  ;;  %v27172_v43 = vld [vmem:[#allocation6_spill] sm:$0xff] }
 0x5f7   :  { %13891 = vmatprep.subr.bf16.mxu1 %v27162_v33  ;;  %v27173_v33 = vld [vmem:[#allocation123_spill] sm:$0xff] }
 0x5fa   :  { %13893 = vmatpush1.bf16.msra.mxu1 %v27163_v37  ;;  %v27174_v37 = vld [vmem:[#allocation130_spill] sm:$0xff] }
 0x5fb   :  { %13895 = vmatprep.subr.bf16.mxu1 %v27164_v62  ;;  %10186 = vmatpush1.xpose.msra.mxu0 %v27113_v18  ;;  %v27175_v62 = vld [vmem:[#allocation11_spill] sm:$0xff] }
 0x5fc   :  { %13991 = vmatprep.subr.bf16.mxu0 %v27167_v48  ;;  %v10572_v48 = vsub.f32 %v23010_v28, %v10571_v56 }
 0x5fe   :  { %13897 = vmatpush1.bf16.msra.mxu1 %v27165_v59  ;;  %10248 = vmatmul.mubr.f32.vlgmr.msra.gmra.mrb[8].mxu0 %v9943_v24 }
 0x5ff   :  { %13899 = vmatprep.subr.bf16.mxu1 %v27166_v32  ;;  %13993 = vmatpush1.bf16.xpose.msra.mxu0 %v27169_v39  ;;  %v23182_v32 = vsub.f32 %v9217_v26, %v23150_v54  ;;  %v14026_v26 = vpack.c.bf16 %v22999_v51, %v22994_v22  ;;  %v23231_v22 = vld [vmem:[%s23439_s1 + $0xb0] sm:$0xff] }
 0x600   :  { %10348 = vmatprep.mubr.f32.mxu0 %v22794_v13  ;;  %13995 = vmatprep.subr.bf16.mxu0 %v27171_v1  ;;  %v11023_v27 = vand.u32 4294901760, %v23231_v22 }
 0x602   :  { %13901 = vmatpush1.bf16.msra.mxu1 %v27168_v53 }
 0x603   :  { %13903 = vmatprep.subr.bf16.mxu1 %v27170_v50  ;;  %v10577_v50 = vand.u32 4294901760, %v23182_v32 }
 0x606   :  { %13905 = vmatpush1.bf16.msra.mxu1 %v27172_v43 }
 0x607   :  { %13907 = vmatprep.subr.bf16.mxu1 %v27173_v33  ;;  %13997 = vmatpush1.bf16.xpose.msra.mxu0 %v27175_v62  ;;  %v10573_v33 = vand.u32 4294901760, %v10572_v48 }
 0x608   :  { %10288 = vmatprep.subr.mxu0 %v10001_v58  ;;  %v11015_v58 = vand.u32 4294901760, %v23089_v9 }
 0x60a   :  { %13909 = vmatpush1.bf16.msra.mxu1 %v27174_v37 }
 0x60b   :  { %9155 = vmatprep.subr.mxu1 %v27070_v44  ;;  %v27176_v44 = vld [vmem:[#allocation129_spill] sm:$0xff] }
 0x60c   :  { %v23077_v60 = vand.u32 4294901760, %v27176_v44 }
 0x60e   :  { %9157 = vmatpush1.msra.mxu1 %v27077_v0  ;;  %v23081_v0 = vsub.f32 %v27176_v44, %v23077_v60 }
 0x60f   :  { %9174 = vmatmul.mubr.f32.vlgmr.msra.gmra.mrb[8].mxu1 %v27143_v11  ;;  %10292 = vmatpush1.xpose.msra.mxu0 %v10007_v23  ;;  %v23110_v11 = vsub.f32 %v23089_v9, %v11015_v58 }
 0x610   :  { %13999 = vmatprep.subr.bf16.mxu0 %v27153_v46  ;;  %v10513_v24 = vand.u32 4294901760, %v23081_v0  ;;  %v23117_v46 = vpack.c.bf16 %v10443_v5, %v10439_v31  ;;  %v9216_v31 = vld [vmem:[%s23439_s1 + $0x120] sm:$0xff]  ;;  %v10531_v5 = vand.u32 4294901760, %v10530_v6  ;;  %v14028_v6 = vpack.c.bf16 %v23010_v28, %v23005_v49 }
 0x612   :  { %10350 = vmatmul.mubr.f32.vlgmr.msra.gmra.mrb[8].mxu0 %v22790_v4  ;;  %v14014_v14 = vpack.c.bf16 %v10543_v10, %v10531_v5  ;;  %v11111_v5 = vand.u32 4294901760, %v23110_v11 }
 0x613   :  { %14001 = vmatpush1.bf16.xpose.msra.mxu0 %v27155_v30  ;;  %10430 = vmatprep.mubr.f32.mxu0 %v22794_v13  ;;  %v23094_v13 = vld [vmem:[%s23439_s1 + $0x70] sm:$0xff]  ;;  %v27177_v30 = vld [vmem:[#allocation120_spill] sm:$0xff] }
 0x614   :  { %14003 = vmatprep.subr.bf16.mxu0 %v27157_v29  ;;  %v11019_v23 = vand.u32 4294901760, %v23094_v13  ;;  %v23133_v55 = vand.u32 4294901760, %v27177_v30  ;;  %v11112_v57 = vsub.f32 %v23110_v11, %v11111_v5 }
 0x616   :  { %v23122_v52 = vsub.f32 %v23094_v13, %v11019_v23  ;;  %v23142_v29 = vsub.f32 %v27177_v30, %v23133_v55  ;;  %v14024_v30 = vpack.c.bf16 %v22987_v16, %v22982_v2 }
 0x618   :  { %v10519_v40 = vand.u32 4294901760, %v23142_v29  ;;  %v11123_v10 = vand.u32 4294901760, %v23122_v52 }
 0x61b   :  { %14005 = vmatpush1.bf16.xpose.msra.mxu0 %v27161_v34  ;;  %v10520_v34 = vsub.f32 %v23142_v29, %v10519_v40 }
 0x61c   :  { %10372 = vmatprep.subr.mxu0 %v27105_v12  ;;  %v10514_v12 = vsub.f32 %v23081_v0, %v10513_v24 }
 0x61d   :  { %v10521_v53 = vand.u32 4294901760, %v10520_v34  ;;  %v11113_v34 = vand.u32 4294901760, %v11112_v57  ;;  %v27179_v57 = vld [vmem:[#allocation133_spill] sm:$0xff] }
 0x623   :  { %10374 = vmatpush1.xpose.msra.mxu0 %v27113_v18  ;;  %v10515_v18 = vand.u32 4294901760, %v10514_v12 }
 0x624   :  { %14007 = vmatprep.subr.bf16.mxu0 %v23101_v15 }
 0x626   :  { %10432 = vmatmul.mubr.f32.vlgmr.msra.gmra.mrb[8].mxu0 %v22790_v4  ;;  %v23148_v4 = vpack.c.bf16 %v10451_v17, %v10447_v35  ;;  %v10566_v35 = vsub.f32 %v22999_v51, %v10565_v47  ;;  %v23176_v17 = vand.u32 4294901760, %v9216_v31  ;;  %v10560_v47 = vsub.f32 %v23005_v49, %v10559_v36  ;;  %v23236_v51 = vld [vmem:[%s23439_s1 + $0xf0] sm:$0xff] }
 0x627   :  { %14009 = vmatpush1.bf16.xpose.msra.mxu0 %v23117_v46  ;;  %10516 = vmatprep.mubr.f32.mxu0 %v10515_v18  ;;  %v10578_v36 = vsub.f32 %v23182_v32, %v10577_v50  ;;  %v14022_v18 = vpack.c.bf16 %v22975_v38, %v22970_v3  ;;  %v9203_v3 = vld [vmem:[%s23439_s1 + $0xb8] sm:$0xff]  ;;  %v11027_v20 = vand.u32 4294901760, %v23236_v51 }
 0x628   :  { %14011 = vmatprep.subr.bf16.mxu0 %v23129_v7  ;;  %v10567_v59 = vand.u32 4294901760, %v10566_v35  ;;  %v23193_v1 = vsub.f32 %v9216_v31, %v23176_v17  ;;  %v10561_v43 = vand.u32 4294901760, %v10560_v47  ;;  %v9211_v38 = vld [vmem:[%s23439_s1 + $0xf8] sm:$0xff]  ;;  %v23223_v2 = vsel %vm9267_vm3, %v9203_v3, 0 }
 0x629   :  { %v10579_v62 = vand.u32 4294901760, %v10578_v36  ;;  %v23226_v16 = vsel %vm9267_vm3, %v9211_v38, 0  ;;  %v11021_v49 = vand.u32 4294901760, %v23223_v2  ;;  %v11124_v35 = vsub.f32 %v23122_v52, %v11123_v10 }
 0x62a   :  { %v14018_v39 = vpack.c.bf16 %v10567_v59, %v10555_v63  ;;  %v14020_v56 = vpack.c.bf16 %v10573_v33, %v10561_v43  ;;  %v10583_v37 = vand.u32 4294901760, %v23193_v1  ;;  %v11025_v28 = vand.u32 4294901760, %v23226_v16 }
 0x62b   :  { %v23250_v42 = vsub.f32 %v23223_v2, %v11021_v49  ;;  %v11125_v21 = vand.u32 4294901760, %v11124_v35 }
 0x62c   :  { %v10584_v44 = vsub.f32 %v23193_v1, %v10583_v37  ;;  %v23253_v31 = vsub.f32 %v23226_v16, %v11025_v28 }
 0x62d   :  { %v23275_v61 = vpack.c.bf16 %v11125_v21, %v11113_v34 }
 0x62e   :  { %v10585_v12 = vand.u32 4294901760, %v10584_v44  ;;  %v11141_v63 = vand.u32 4294901760, %v23253_v31  ;;  %v14074_v3 = vpack.c.bf16 %v23253_v31, %v23250_v42 }
 0x62f   :  { %14013 = vmatpush1.bf16.xpose.msra.mxu0 %v23148_v4 }
 0x630   :  { %10454 = vmatprep.subr.mxu0 %v23150_v54  ;;  %v11142_v48 = vsub.f32 %v23253_v31, %v11141_v63 }
 0x632   :  { %v11143_v33 = vand.u32 4294901760, %v11142_v48 }
 0x637   :  { %10456 = vmatpush1.xpose.msra.mxu0 %v23176_v17 }
 0x638   :  { %14015 = vmatprep.subr.bf16.mxu0 %v14014_v14  ;;  %v11129_v14 = vand.u32 4294901760, %v23250_v42 }
 0x63a   :  { %10522 = vmatmul.mubr.f32.vlgmr.msra.gmra.mrb[8].mxu0 %v10521_v53  ;;  %v11130_v47 = vsub.f32 %v23250_v42, %v11129_v14  ;;  %v14090_v16 = vpack.c.bf16 %v11141_v63, %v11129_v14 }
 0x63b   :  { %14017 = vmatpush1.bf16.xpose.msra.mxu0 %v14016_v25  ;;  %10642 = vmatprep.mubr.f32.mxu0 %v23077_v60 }
 0x63c   :  { %14019 = vmatprep.subr.bf16.mxu0 %v14018_v39  ;;  %v11131_v43 = vand.u32 4294901760, %v11130_v47 }
 0x643   :  { %14021 = vmatpush1.bf16.xpose.msra.mxu0 %v14020_v56 }
 0x644   :  { %10580 = vmatprep.subr.mxu0 %v10579_v62  ;;  %v23297_v62 = vpack.c.bf16 %v11143_v33, %v11131_v43 }
 0x64b   :  { %10586 = vmatpush1.xpose.msra.mxu0 %v10585_v12  ;;  %v9195_v12 = vld [vmem:[%s23439_s1 + $0x78] sm:$0xff] }
 0x64c   :  { %14023 = vmatprep.subr.bf16.mxu0 %v14022_v18 }
 0x64e   :  { %10644 = vmatmul.mubr.f32.vlgmr.msra.gmra.mrb[8].mxu0 %v23133_v55 }
 0x64f   :  { %14025 = vmatpush1.bf16.xpose.msra.mxu0 %v14024_v30  ;;  %10735 = vmatprep.mubr.f32.mxu0 %v23081_v0  ;;  %v23258_v0 = vsub.f32 %v23231_v22, %v11023_v27 }
 0x650   :  { %14027 = vmatprep.subr.bf16.mxu0 %v14026_v26 }
 0x651   :  { %v11135_v59 = vand.u32 4294901760, %v23258_v0 }
 0x653   :  { %v11136_v53 = vsub.f32 %v23258_v0, %v11135_v59 }
 0x655   :  { %v11137_v36 = vand.u32 4294901760, %v11136_v53 }
 0x657   :  { %14029 = vmatpush1.bf16.xpose.msra.mxu0 %v14028_v6  ;;  %v14072_v6 = vpack.c.bf16 %v23122_v52, %v23110_v11  ;;  %v11605_v11 = vld [vmem:[%s23440_s2] ss:$0 sm:$0xff] }
 0x658   :  { %10675 = vmatprep.subr.mxu0 %v23182_v32 }
 0x65f   :  { %10678 = vmatpush1.xpose.msra.mxu0 %v23193_v1 }
 0x660   :  { %14031 = vmatprep.subr.bf16.mxu0 %v23101_v15 }
 0x662   :  { %10738 = vmatmul.mubr.f32.vlgmr.msra.gmra.mrb[8].mxu0 %v23142_v29 }
 0x663   :  { %14033 = vmatpush1.bf16.xpose.msra.mxu0 %v23117_v46  ;;  %10820 = vmatprep.mubr.f32.mxu0 %v10513_v24  ;;  %v23263_v24 = vsub.f32 %v23236_v51, %v11027_v20 }
 0x664   :  { %14035 = vmatprep.subr.bf16.mxu0 %v23129_v7 }
 0x665   :  { %v11147_v25 = vand.u32 4294901760, %v23263_v24  ;;  %v14076_v38 = vpack.c.bf16 %v23263_v24, %v23258_v0 }
 0x667   :  { %v11148_v39 = vsub.f32 %v23263_v24, %v11147_v25  ;;  %v14092_v22 = vpack.c.bf16 %v11147_v25, %v11135_v59 }
 0x669   :  { %v11149_v56 = vand.u32 4294901760, %v11148_v39 }
 0x66b   :  { %14037 = vmatpush1.bf16.xpose.msra.mxu0 %v23148_v4  ;;  %v23301_v44 = vpack.c.bf16 %v11149_v56, %v11137_v36 }
 0x66c   :  { %10760 = vmatprep.subr.mxu0 %v23150_v54 }
 0x673   :  { %10762 = vmatpush1.xpose.msra.mxu0 %v23176_v17 }
 0x674   :  { %14039 = vmatprep.subr.bf16.mxu0 %v23025_v8  ;;  %v9187_v8 = vld [vmem:[%s23439_s1 + $0x38] sm:$0xff] }
 0x675   :  { %v9271_v29 = vsel %vm9267_vm3, %v9187_v8, 0 }
 0x676   :  { %10824 = vmatmul.mubr.f32.vlgmr.msra.gmra.mrb[8].mxu0 %v10519_v40  ;;  %v9274_v40 = vsel %vm9267_vm3, %v9195_v12, 0  ;;  %v11013_v18 = vand.u32 4294901760, %v9271_v29 }
 0x677   :  { %14041 = vmatpush1.bf16.xpose.msra.mxu0 %v23034_v45  ;;  %10924 = vmatprep.mubr.f32.mxu0 %v23077_v60  ;;  %v11017_v45 = vand.u32 4294901760, %v9274_v40 }
 0x678   :  { %14043 = vmatprep.subr.bf16.mxu0 %v23041_v41  ;;  %v23315_v41 = vsub.f32 %v9271_v29, %v11013_v18 }
 0x679   :  { %v23317_v30 = vsub.f32 %v9274_v40, %v11017_v45 }
 0x67a   :  { %v11105_v9 = vand.u32 4294901760, %v23315_v41 }
 0x67b   :  { %v14070_v26 = vpack.c.bf16 %v23317_v30, %v23315_v41  ;;  %v11117_v13 = vand.u32 4294901760, %v23317_v30 }
 0x67f   :  { %14045 = vmatpush1.bf16.xpose.msra.mxu0 %v23047_v19  ;;  %v23336_v19 = vpack.c.bf16 %v11017_v45, %v11013_v18 }
 0x680   :  { %10864 = vmatprep.subr.mxu0 %v10577_v50  ;;  %v14086_v50 = vpack.c.bf16 %v11117_v13, %v11105_v9 }
 0x687   :  { %10868 = vmatpush1.xpose.msra.mxu0 %v10583_v37  ;;  %v14088_v37 = vpack.c.bf16 %v11123_v10, %v11111_v5 }
 0x688   :  { %14047 = vmatprep.subr.bf16.mxu0 %v23101_v15  ;;  %v23343_v15 = vpack.c.bf16 %v11019_v23, %v11015_v58  ;;  %v23363_v23 = vpack.c.bf16 %v11027_v20, %v11023_v27  ;;  %v27178_v20 = vld [vmem:[#allocation103_spill] sm:$0xff] }
 0x68a   :  { %10926 = vmatmul.mubr.f32.vlgmr.msra.gmra.mrb[8].mxu0 %v23133_v55 }
 0x68b   :  { %14049 = vmatpush1.bf16.xpose.msra.mxu0 %v23117_v46  ;;  %11006 = vmatprep.mubr.f32.mxu0 %v23077_v60  ;;  %v23348_v60 = vpack.c.bf16 %v11025_v28, %v11021_v49  ;;  %v9219_v46 = vld [vmem:[%s23439_s1 + $0x138] sm:$0xff] }
 0x68c   :  { %14051 = vmatprep.subr.bf16.mxu0 %v23129_v7  ;;  %v9283_v58 = vsel %vm9267_vm3, %v9219_v46, 0 }
 0x68d   :  { %v23365_v7 = vand.u32 4294901760, %v9283_v58 }
 0x68f   :  { %v11152_v48 = vsub.f32 %v9283_v58, %v23365_v7 }
 0x691   :  { %v11153_v33 = vand.u32 4294901760, %v11152_v48 }
 0x693   :  { %14053 = vmatpush1.bf16.xpose.msra.mxu0 %v23148_v4  ;;  %v11118_v4 = vsub.f32 %v23317_v30, %v11117_v13  ;;  %v11154_v56 = vsub.f32 %v11152_v48, %v11153_v33 }
 0x694   :  { %10948 = vmatprep.subr.mxu0 %v23150_v54  ;;  %v9218_v54 = vld [vmem:[%s23439_s1 + $0x130] sm:$0xff] }
 0x695   :  { %v11119_v32 = vand.u32 4294901760, %v11118_v4  ;;  %v23374_v1 = vand.u32 4294901760, %v9218_v54  ;;  %v11155_v12 = vand.u32 4294901760, %v11154_v56 }
 0x697   :  { %v11158_v36 = vsub.f32 %v9218_v54, %v23374_v1 }
 0x699   :  { %v11159_v8 = vand.u32 4294901760, %v11158_v36 }
 0x69b   :  { %10950 = vmatpush1.xpose.msra.mxu0 %v23176_v17  ;;  %v11160_v29 = vsub.f32 %v11158_v36, %v11159_v8 }
 0x69c   :  { %14055 = vmatprep.subr.bf16.mxu0 %v23336_v19 }
 0x69d   :  { %v11161_v40 = vand.u32 4294901760, %v11160_v29 }
 0x69e   :  { %11008 = vmatmul.mubr.f32.vlgmr.msra.gmra.mrb[8].mxu0 %v23133_v55  ;;  %v11106_v55 = vsub.f32 %v23315_v41, %v11105_v9 }
 0x69f   :  { %14057 = vmatpush1.bf16.xpose.msra.mxu0 %v23343_v15 }
 0x6a0   :  { %14059 = vmatprep.subr.bf16.mxu0 %v23348_v60  ;;  %v11107_v17 = vand.u32 4294901760, %v11106_v55 }
 0x6a2   :  { %v14062_v2 = vpack.c.bf16 %v11119_v32, %v11107_v17 }
 0x6a7   :  { %14061 = vmatpush1.bf16.xpose.msra.mxu0 %v23363_v23 }
 0x6a8   :  { %11030 = vmatprep.subr.mxu0 %v23365_v7 }
 0x6af   :  { %11032 = vmatpush1.xpose.msra.mxu0 %v23374_v1 }
 0x6b0   :  { %14063 = vmatprep.subr.bf16.mxu0 %v14062_v2 }
 0x6e2   :  { %v9175_v51 = vpop.f32.mrb[8].mxu1 }
 0x6e3   :  { %v9256_v49 = vrot.slane %v9175_v51, 7  ;;  %v9177_v28 = vpop.f32.mrb[9].mxu1 }
 0x6e4   :  { %v9258_v27 = vrot.slane %v9177_v28, 7 }
 0x6e5   :  { %v9257_v5 = vsel %vm9244_vm2, %v9256_v49, %v27178_v20 }
 0x6e6   :  { %v11093_v10 = vand.u32 4294901760, %v9257_v5  ;;  %v9259_v35 = vsel %vm9244_vm2, %v9258_v27, %v27179_v57 }
 0x6e7   :  { %v9268_v34 = vsel %vm9267_vm3, %v9259_v35, 0 }
 0x6e8   :  { %v11094_v21 = vsub.f32 %v9257_v5, %v11093_v10  ;;  %v11087_v14 = vand.u32 4294901760, %v9268_v34 }
 0x6ea   :  { %v11088_v63 = vsub.f32 %v9268_v34, %v11087_v14  ;;  %v11095_v59 = vand.u32 4294901760, %v11094_v21 }
 0x6ec   :  { %v11089_v25 = vand.u32 4294901760, %v11088_v63  ;;  %v11096_v47 = vsub.f32 %v11094_v21, %v11095_v59 }
 0x6ee   :  { %v11090_v53 = vsub.f32 %v11088_v63, %v11089_v25  ;;  %v11097_v43 = vand.u32 4294901760, %v11096_v47 }
 0x6f0   :  { %v11091_v39 = vand.u32 4294901760, %v11090_v53 }
 0x6f2   :  { %11092 = vmatprep.mubr.f32.mxu0 %v11091_v39 }
 0x6f3   :  { %11098 = vmatmul.mubr.f32.vlgmr.msra.gmra.mrb[8].mxu0 %v11097_v43 }
 0x6f4   :  { %14065 = vmatpush1.bf16.xpose.msra.mxu0 %v23275_v61  ;;  %11218 = vmatprep.mubr.f32.mxu0 %v11087_v14 }
 0x6f5   :  { %14067 = vmatprep.subr.bf16.mxu0 %v23297_v62 }
 0x6fc   :  { %14069 = vmatpush1.bf16.xpose.msra.mxu0 %v23301_v44 }
 0x6fd   :  { %11156 = vmatprep.subr.mxu0 %v11155_v12 }
 0x704   :  { %11162 = vmatpush1.xpose.msra.mxu0 %v11161_v40 }
 0x705   :  { %14071 = vmatprep.subr.bf16.mxu0 %v14070_v26 }
 0x707   :  { %11220 = vmatmul.mubr.f32.vlgmr.msra.gmra.mrb[8].mxu0 %v11093_v10 }
 0x708   :  { %14073 = vmatpush1.bf16.xpose.msra.mxu0 %v14072_v6  ;;  %11311 = vmatprep.mubr.f32.mxu0 %v11088_v63 }
 0x709   :  { %14075 = vmatprep.subr.bf16.mxu0 %v14074_v3 }
 0x710   :  { %14077 = vmatpush1.bf16.xpose.msra.mxu0 %v14076_v38 }
 0x711   :  { %11251 = vmatprep.subr.mxu0 %v11152_v48 }
 0x718   :  { %11254 = vmatpush1.xpose.msra.mxu0 %v11158_v36 }
 0x719   :  { %14079 = vmatprep.subr.bf16.mxu0 %v23336_v19 }
 0x71b   :  { %11314 = vmatmul.mubr.f32.vlgmr.msra.gmra.mrb[8].mxu0 %v11094_v21 }
 0x71c   :  { %14081 = vmatpush1.bf16.xpose.msra.mxu0 %v23343_v15  ;;  %11396 = vmatprep.mubr.f32.mxu0 %v11089_v25 }
 0x71d   :  { %14083 = vmatprep.subr.bf16.mxu0 %v23348_v60 }
 0x724   :  { %14085 = vmatpush1.bf16.xpose.msra.mxu0 %v23363_v23 }
 0x725   :  { %11336 = vmatprep.subr.mxu0 %v23365_v7 }
 0x72c   :  { %11338 = vmatpush1.xpose.msra.mxu0 %v23374_v1 }
 0x72d   :  { %14087 = vmatprep.subr.bf16.mxu0 %v14086_v50 }
 0x72f   :  { %11400 = vmatmul.mubr.f32.vlgmr.msra.gmra.mrb[8].mxu0 %v11095_v59 }
 0x730   :  { %14089 = vmatpush1.bf16.xpose.msra.mxu0 %v14088_v37  ;;  %11500 = vmatprep.mubr.f32.mxu0 %v11087_v14 }
 0x731   :  { %14091 = vmatprep.subr.bf16.mxu0 %v14090_v16 }
 0x738   :  { %14093 = vmatpush1.bf16.xpose.msra.mxu0 %v14092_v22 }
 0x739   :  { %11440 = vmatprep.subr.mxu0 %v11153_v33 }
 0x740   :  { %11444 = vmatpush1.xpose.msra.mxu0 %v11159_v8 }
 0x741   :  { %14095 = vmatprep.subr.bf16.mxu0 %v23336_v19 }
 0x743   :  { %11502 = vmatmul.mubr.f32.vlgmr.msra.gmra.mrb[8].mxu0 %v11093_v10 }
 0x744   :  { %14097 = vmatpush1.bf16.xpose.msra.mxu0 %v23343_v15  ;;  %11582 = vmatprep.mubr.f32.mxu0 %v11087_v14 }
 0x745   :  { %14099 = vmatprep.subr.bf16.mxu0 %v23348_v60 }
 0x74c   :  { %14101 = vmatpush1.bf16.xpose.msra.mxu0 %v23363_v23 }
 0x74d   :  { %11524 = vmatprep.subr.mxu0 %v23365_v7 }
 0x754   :  { %11526 = vmatpush1.xpose.msra.mxu0 %v23374_v1 }
 0x757   :  { %11584 = vmatmul.mubr.f32.vlgmr.msra.gmra.mrb[8].mxu0 %v11093_v10 }
 0x82a   :  { %v11585_v52 = vpop.f32.mrb[8].mxu0 }
 0x82b   :  { %v14104_v42 = vadd.f32 %v11605_v11, %v11585_v52  ;;  %v11587_v31 = vpop.f32.mrb[9].mxu0 }
 0x82d   :  { %11590 = vst.msk [vmem:[#allocation2] sm:$0x3] %vm11589_vm4, %v14104_v42 }
 0x82e   :  { %14246 = shalt.err (!%p14243_p4)
}
 0x82f   :  { %s14247_s4 = scalar_lea.hbm %s23441_s3, 32 }
 0x830   :  { %p14248_p5 = scmp.ne.s32.totalorder %s23441_s3, %s14247_s4  ;;  %p14251_p6 = scmp.lt.u32.totalorder %s14247_s4, %s23441_s3 }
 0x832   :  { %p14253_p7 = pnand %p14251_p6, %p14248_p5 }
 0x834   :  { %14256 = shalt.err (!%p14253_p7)
}
 0x835   :  { %11600 = dma.vmem_to_hbm [thread:$0]  %s11598_s27, 32, %s23441_s3, [#allocation3]  }
 0x836   :  { %14257 = dma.done.wait [#allocation3], 32  }
 0x837   :  { %14258 = vsyncadd [#allocation3], 4294967264 }
 0x838   :  { %11604 = vsyncpa [#allocation3], 1 }

</bundles_post_ra>
